<compile_context>
chip_gen: v7x
topology: tpu7x:2x2x1
jax: 0.10.0
libtpu: 0.0.40
codegen_flags: <defaults>
</compile_context>

<pallas_src>
import functools
import math

import jax
import jax.numpy as jnp
from jax.experimental import pallas as pl
from jax.experimental.pallas import tpu as pltpu

TM_MAX = 512   # row tile (output pixels)
TN_MAX = 256   # output-channel tile (fills the 256-wide MXU on v6e/v7x)


def _round_up(x, m):
    return ((x + m - 1) // m) * m


# ----------------------------------------------------------------------------
# Pallas kernels
# ----------------------------------------------------------------------------
def _conv_mm_kernel(x_ref, w_ref, b_ref, o_ref, *, relu):
    y = jnp.dot(x_ref[...], w_ref[...], preferred_element_type=jnp.float32)
    y = y + b_ref[...]
    if relu:
        y = jnp.maximum(y, 0.0)
    o_ref[...] = y.astype(o_ref.dtype)


def _conv_mm_res_kernel(x_ref, w_ref, b_ref, r_ref, o_ref, *, relu):
    # conv + folded-BN shift + residual add + (optional) ReLU, all in one pass.
    y = jnp.dot(x_ref[...], w_ref[...], preferred_element_type=jnp.float32)
    y = y + b_ref[...] + r_ref[...].astype(jnp.float32)
    if relu:
        y = jnp.maximum(y, 0.0)
    o_ref[...] = y.astype(o_ref.dtype)


def _maxpool_kernel(x_ref, o_ref):
    # x_ref: [k*k, tm, C] -> max over taps (channel stays in the lane dim).
    o_ref[...] = jnp.max(x_ref[...], axis=0).astype(o_ref.dtype)


def _avgpool_kernel(x_ref, inv_ref, o_ref):
    # x_ref: [k*k, tm, C], inv_ref: [tm, 1] per-position 1/count.
    acc = jnp.sum(x_ref[...].astype(jnp.float32), axis=0)
    o_ref[...] = (acc * inv_ref[...]).astype(o_ref.dtype)


# ----------------------------------------------------------------------------
# Conv (im2col matmul) wrapper
# ----------------------------------------------------------------------------
def _matmul_bn_act(patches, wmat, shift, residual, *, relu):
    """[M,K]@[K,Coutp] + shift [+ residual] [+ ReLU], tiled (rows x out-chans)."""
    M, K = patches.shape
    Coutp = wmat.shape[1]
    tm = min(TM_MAX, M)
    tn = min(TN_MAX, Coutp)
    grid = (pl.cdiv(M, tm), pl.cdiv(Coutp, tn))

    in_specs = [
        pl.BlockSpec((tm, K), lambda i, j: (i, 0)),
        pl.BlockSpec((K, tn), lambda i, j: (0, j)),
        pl.BlockSpec((1, tn), lambda i, j: (0, j)),
    ]
    args = [patches, wmat, shift]
    if residual is None:
        kernel = functools.partial(_conv_mm_kernel, relu=relu)
    else:
        in_specs.append(pl.BlockSpec((tm, tn), lambda i, j: (i, j)))
        args.append(residual)
        kernel = functools.partial(_conv_mm_res_kernel, relu=relu)

    return pl.pallas_call(
        kernel,
        out_shape=jax.ShapeDtypeStruct((M, Coutp), jnp.bfloat16),
        grid=grid,
        in_specs=in_specs,
        out_specs=pl.BlockSpec((tm, tn), lambda i, j: (i, j)),
        compiler_params=pltpu.CompilerParams(
            dimension_semantics=("parallel", "parallel")),
    )(*args)


def _im2col_nhwc(x, kh, kw, stride, padding):
    N, H, W, C = x.shape
    Ho = (H + 2 * padding - kh) // stride + 1
    Wo = (W + 2 * padding - kw) // stride + 1
    if padding:
        x = jnp.pad(x, ((0, 0), (padding, padding), (padding, padding), (0, 0)))
    cols = []
    for di in range(kh):
        for dj in range(kw):
            cols.append(x[:, di:di + stride * (Ho - 1) + 1:stride,
                            dj:dj + stride * (Wo - 1) + 1:stride, :])
    cols = jnp.stack(cols, axis=3)                   # [N, Ho, Wo, kh*kw, C]
    return cols.reshape(N * Ho * Wo, kh * kw * C), Ho, Wo


def conv_bn(x, w, bn, *, stride, padding, relu, residual=None, eps=1e-5):
    """Conv2d(bias=False) + folded BatchNorm(eval) [+ residual] [+ ReLU]. NHWC."""
    N, H, W, Cin = x.shape
    Cout, _, kh, kw = w.shape
    scale = bn["gamma"] * jax.lax.rsqrt(bn["var"] + eps)
    shift = (bn["beta"] - bn["mean"] * scale).astype(jnp.float32)
    # BN scale folded into the weight columns; MXU operands in bf16.
    wmat = (w.transpose(2, 3, 1, 0).reshape(kh * kw * Cin, Cout)
            * scale[None, :]).astype(jnp.bfloat16)

    if kh == 1 and kw == 1 and stride == 1 and padding == 0:
        patches, Ho, Wo = x.reshape(N * H * W, Cin), H, W
    else:
        patches, Ho, Wo = _im2col_nhwc(x, kh, kw, stride, padding)
    patches = patches.astype(jnp.bfloat16)
    M = N * Ho * Wo

    Coutp = _round_up(Cout, 128)          # lane-dense output tiles
    if Coutp != Cout:
        wmat = jnp.pad(wmat, ((0, 0), (0, Coutp - Cout)))
        shift = jnp.pad(shift, (0, Coutp - Cout))
    r2 = None
    if residual is not None:
        r2 = residual.reshape(M, Cout).astype(jnp.bfloat16)
        if Coutp != Cout:
            r2 = jnp.pad(r2, ((0, 0), (0, Coutp - Cout)))

    out = _matmul_bn_act(patches, wmat, shift.reshape(1, Coutp), r2, relu=relu)
    if Coutp != Cout:
        out = out[:, :Cout]
    return out.reshape(N, Ho, Wo, Cout)


# ----------------------------------------------------------------------------
# Pooling (channel-last, lane-dense)
# ----------------------------------------------------------------------------
def _stack_windows(x, k, stride, padding, Ho, Wo, pad_value):
    """NHWC -> [k*k, N, Ho, Wo, C] stack of shifted windows."""
    N, H, W, C = x.shape
    need_h = (Ho - 1) * stride + k
    need_w = (Wo - 1) * stride + k
    pad_b = max(need_h - H - padding, padding)
    pad_r = max(need_w - W - padding, padding)
    xp = jnp.pad(x, ((0, 0), (padding, pad_b), (padding, pad_r), (0, 0)),
                 constant_values=pad_value)
    wins = [xp[:, di:di + stride * (Ho - 1) + 1:stride,
                 dj:dj + stride * (Wo - 1) + 1:stride, :]
            for di in range(k) for dj in range(k)]
    return jnp.stack(wins, axis=0)


def max_pool2d(x, k, stride, padding):
    N, H, W, C = x.shape
    Ho = (H + 2 * padding - k) // stride + 1
    Wo = (W + 2 * padding - k) // stride + 1
    M = N * Ho * Wo
    wins = _stack_windows(x, k, stride, padding, Ho, Wo, -jnp.inf)
    wins = wins.reshape(k * k, M, C)
    tm = min(TM_MAX, M)
    out = pl.pallas_call(
        _maxpool_kernel,
        out_shape=jax.ShapeDtypeStruct((M, C), x.dtype),
        grid=(pl.cdiv(M, tm),),
        in_specs=[pl.BlockSpec((k * k, tm, C), lambda i: (0, i, 0))],
        out_specs=pl.BlockSpec((tm, C), lambda i: (i, 0)),
        compiler_params=pltpu.CompilerParams(dimension_semantics=("parallel",)),
    )(wins)
    return out.reshape(N, Ho, Wo, C)


def avg_pool2d(x, k, stride, padding, *, ceil_mode, count_include_pad):
    N, H, W, C = x.shape
    if k == 1 and stride == 1 and padding == 0:
        return x                      # identity pool (layer1 downsample)
    if ceil_mode:
        Ho = -(-(H + 2 * padding - k) // stride) + 1
        Wo = -(-(W + 2 * padding - k) // stride) + 1
        if (Ho - 1) * stride >= H + padding:
            Ho -= 1
        if (Wo - 1) * stride >= W + padding:
            Wo -= 1
    else:
        Ho = (H + 2 * padding - k) // stride + 1
        Wo = (W + 2 * padding - k) // stride + 1
    M = N * Ho * Wo
    wins = _stack_windows(x, k, stride, padding, Ho, Wo, 0.0).reshape(k * k, M, C)
    if count_include_pad:
        inv = jnp.full((M, 1), 1.0 / (k * k), jnp.float32)
    else:
        ones = jnp.ones((1, H, W, 1), jnp.float32)
        counts = _stack_windows(ones, k, stride, padding, Ho, Wo, 0.0).sum(axis=0)
        counts = jnp.maximum(counts, 1.0)   # guard windows that are all padding
        inv = jnp.broadcast_to(1.0 / counts, (N, Ho, Wo, 1)).reshape(M, 1)
    tm = min(TM_MAX, M)
    out = pl.pallas_call(
        _avgpool_kernel,
        out_shape=jax.ShapeDtypeStruct((M, C), x.dtype),
        grid=(pl.cdiv(M, tm),),
        in_specs=[pl.BlockSpec((k * k, tm, C), lambda i: (0, i, 0)),
                  pl.BlockSpec((tm, 1), lambda i: (i, 0))],
        out_specs=pl.BlockSpec((tm, C), lambda i: (i, 0)),
        compiler_params=pltpu.CompilerParams(dimension_semantics=("parallel",)),
    )(wins, inv)
    return out.reshape(N, Ho, Wo, C)


# ----------------------------------------------------------------------------
# Parameters (arrays) + static config (python), mirroring the module
# ----------------------------------------------------------------------------
class _ParamGen:
    def __init__(self, key):
        self.key = key

    def conv(self, cout, cin, kh, kw):
        self.key, k = jax.random.split(self.key)
        std = math.sqrt(2.0 / (cout * kh * kw))   # kaiming_normal_, fan_out, relu
        return jax.random.normal(k, (cout, cin, kh, kw), jnp.float32) * std

    def bn(self, c):
        return dict(gamma=jnp.ones((c,), jnp.float32),
                    beta=jnp.zeros((c,), jnp.float32),
                    mean=jnp.zeros((c,), jnp.float32),
                    var=jnp.ones((c,), jnp.float32))


def make_res2net(key, layers, base_width=26, scale=4):
    pg = _ParamGen(key)
    expansion = 4
    params = {"stem": [
        dict(w=pg.conv(32, 3, 3, 3), bn=pg.bn(32)),
        dict(w=pg.conv(32, 32, 3, 3), bn=pg.bn(32)),
        dict(w=pg.conv(64, 32, 3, 3), bn=pg.bn(64)),   # bn here == model.bn1
    ]}
    inplanes = 64
    layer_params, config = [], []
    for planes, nblocks, stride in zip((64, 128, 256), layers, (1, 2, 2)):
        blocks_p, blocks_c = [], []
        for bi in range(nblocks):
            s = stride if bi == 0 else 1
            stype = "stage" if bi == 0 else "normal"
            width = int(math.floor(planes * base_width / 64.0))
            nums = 1 if scale == 1 else scale - 1
            bp = dict(
                conv1_w=pg.conv(width * scale, inplanes, 1, 1),
                bn1=pg.bn(width * scale),
                convs_w=[pg.conv(width, width, 3, 3) for _ in range(nums)],
                bns=[pg.bn(width) for _ in range(nums)],
                conv3_w=pg.conv(planes * expansion, width * scale, 1, 1),
                bn3=pg.bn(planes * expansion),
            )
            has_down = bi == 0 and (s != 1 or inplanes != planes * expansion)
            if has_down:
                bp["down_conv_w"] = pg.conv(planes * expansion, inplanes, 1, 1)
                bp["down_bn"] = pg.bn(planes * expansion)
            blocks_p.append(bp)
            blocks_c.append(dict(stride=s, stype=stype, has_down=has_down))
            inplanes = planes * expansion
        layer_params.append(blocks_p)
        config.append(blocks_c)
    params["layers"] = layer_params
    return params, config


# ----------------------------------------------------------------------------
# Forward pass (Bottle2neck + Res2Net.forward), NHWC internally
# ----------------------------------------------------------------------------
def bottle2neck_forward(x, p, cfg, scale):
    stride, stype = cfg["stride"], cfg["stype"]
    out = conv_bn(x, p["conv1_w"], p["bn1"], stride=1, padding=0, relu=True)
    spx = jnp.split(out, scale, axis=-1)
    nums = 1 if scale == 1 else scale - 1
    outs, sp = [], None
    for i in range(nums):
        if i == 0 or stype == "stage":
            sp = spx[i]
        else:
            sp = sp + spx[i]          # folded by XLA into the next im2col pass
        sp = conv_bn(sp, p["convs_w"][i], p["bns"][i],
                     stride=stride, padding=1, relu=True)
        outs.append(sp)
    if scale != 1:
        if stype == "normal":
            outs.append(spx[nums])
        else:  # stage
            outs.append(avg_pool2d(spx[nums], 3, stride, 1,
                                   ceil_mode=False, count_include_pad=True))
    cat = jnp.concatenate(outs, axis=-1)
    if cfg["has_down"]:
        r = avg_pool2d(x, stride, stride, 0,
                       ceil_mode=True, count_include_pad=False)
        residual = conv_bn(r, p["down_conv_w"], p["down_bn"],
                           stride=1, padding=0, relu=False)
    else:
        residual = x
    # conv3 + bn3 with residual add + final ReLU fused into the matmul epilogue
    return conv_bn(cat, p["conv3_w"], p["bn3"], stride=1, padding=0,
                   relu=True, residual=residual)


def make_forward(config, scale=4):
    def fwd(x, params):
        x = jnp.transpose(x, (0, 2, 3, 1)).astype(jnp.bfloat16)   # NCHW -> NHWC
        s = params["stem"]
        x = conv_bn(x, s[0]["w"], s[0]["bn"], stride=2, padding=1, relu=True)
        x = conv_bn(x, s[1]["w"], s[1]["bn"], stride=1, padding=1, relu=True)
        x = conv_bn(x, s[2]["w"], s[2]["bn"], stride=1, padding=1, relu=True)  # +bn1+relu
        x = max_pool2d(x, 3, 2, 1)
        feats = []
        for blocks_c, blocks_p in zip(config, params["layers"]):
            for cfg, bp in zip(blocks_c, blocks_p):
                x = bottle2neck_forward(x, bp, cfg, scale)
            feats.append(x)
        x1, x2, x3 = feats
        to_nchw = lambda t: jnp.transpose(t, (0, 3, 1, 2)).astype(jnp.float32)
        return to_nchw(x3), to_nchw(x1), to_nchw(x2)
    return jax.jit(fwd)


# ----------------------------------------------------------------------------
if __name__ == "__main__":
    key = jax.random.PRNGKey(0)
    pkey, xkey = jax.random.split(key)

    layers = [2, 1, 1]           # small layer config (Bottle2neck block)
    base_width, scale = 26, 4
    params, config = make_res2net(pkey, layers, base_width, scale)
    forward = make_forward(config, scale)

    # NCHW input, 3 channels as required by conv1
    x = jax.random.normal(xkey, (2, 3, 32, 32), jnp.float32)

    out, x_layer1, x_layer2 = forward(x, params)
    jax.block_until_ready((out, x_layer1, x_layer2))

    assert out.shape == (2, 1024, 2, 2), out.shape
    assert x_layer1.shape == (2, 256, 8, 8), x_layer1.shape
    assert x_layer2.shape == (2, 512, 4, 4), x_layer2.shape
    assert bool(jnp.all(jnp.isfinite(out)))

    print("KERNEL_OK")
</pallas_src>

<mosaic_0001>
module attributes {stable_mosaic.version = 11 : i64} {
  func.func @_conv_mm_kernel(%arg0: i32, %arg1: i32, %arg2: memref<512x27xbf16, #tpu.memory_space<vmem>>, %arg3: memref<27x128xbf16, #tpu.memory_space<vmem>>, %arg4: memref<1x128xf32, #tpu.memory_space<vmem>>, %arg5: memref<512x128xbf16, #tpu.memory_space<vmem>>) attributes {dimension_semantics = [#tpu.dimension_semantics<parallel>, #tpu.dimension_semantics<parallel>], iteration_bounds = array<i64: 1, 1>, scalar_prefetch = 0 : i64, scratch_operands = 0 : i64, tpu.core_type = #tpu.core_type<tc>, window_params = [{transform_indices = @transform_0, window_bounds = array<i64: 512, 27>}, {transform_indices = @transform_1, window_bounds = array<i64: 27, 128>}, {transform_indices = @transform_2, window_bounds = array<i64: 1, 128>}, {transform_indices = @transform_3, window_bounds = array<i64: 512, 128>}]} {
    %c0 = arith.constant 0 : index
    %c0_0 = arith.constant 0 : index
    %0 = vector.load %arg2[%c0, %c0_0] : memref<512x27xbf16, #tpu.memory_space<vmem>>, vector<512x27xbf16>
    %c0_1 = arith.constant 0 : index
    %c0_2 = arith.constant 0 : index
    %1 = vector.load %arg3[%c0_1, %c0_2] : memref<27x128xbf16, #tpu.memory_space<vmem>>, vector<27x128xbf16>
    %cst = arith.constant dense<0.000000e+00> : vector<512x128xf32>
    %2 = tpu.matmul %0, %1, %cst {dimension_numbers = #tpu.dot_dimension_numbers<[1], [0], [0], [1], [0, 0, 1, 1], [], []>} : vector<512x27xbf16>, vector<27x128xbf16>, vector<512x128xf32> -> vector<512x128xf32>
    %c0_3 = arith.constant 0 : index
    %c0_4 = arith.constant 0 : index
    %3 = vector.load %arg4[%c0_3, %c0_4] : memref<1x128xf32, #tpu.memory_space<vmem>>, vector<1x128xf32>
    %4 = vector.broadcast %3 : vector<1x128xf32> to vector<512x128xf32>
    %5 = arith.addf %2, %4 : vector<512x128xf32>
    %cst_5 = arith.constant 0.000000e+00 : f32
    %6 = vector.broadcast %cst_5 : f32 to vector<512x128xf32>
    %7 = arith.maximumf %5, %6 : vector<512x128xf32>
    %8 = arith.truncf %7 : vector<512x128xf32> to vector<512x128xbf16>
    %c0_6 = arith.constant 0 : index
    %c0_7 = arith.constant 0 : index
    %9 = vector.load %arg5[%c0_6, %c0_7] : memref<512x128xbf16, #tpu.memory_space<vmem>>, vector<512x128xbf16>
    tpu.vector_store %arg5[%c0_6, %c0_7], %8 {strides = array<i32>} : memref<512x128xbf16, #tpu.memory_space<vmem>>, vector<512x128xbf16>,
    return
  }
  func.func @transform_0(%arg0: i32, %arg1: i32) -> (i32, i32) {
    %c0_i32 = arith.constant 0 : i32
    %c0_i32_0 = arith.constant 0 : i32
    return %arg0, %c0_i32 : i32, i32
  }
  func.func @transform_1(%arg0: i32, %arg1: i32) -> (i32, i32) {
    %c0_i32 = arith.constant 0 : i32
    %c0_i32_0 = arith.constant 0 : i32
    return %c0_i32, %arg1 : i32, i32
  }
  func.func @transform_2(%arg0: i32, %arg1: i32) -> (i32, i32) {
    %c0_i32 = arith.constant 0 : i32
    %c0_i32_0 = arith.constant 0 : i32
    return %c0_i32, %arg1 : i32, i32
  }
  func.func @transform_3(%arg0: i32, %arg1: i32) -> (i32, i32) {
    %c0_i32 = arith.constant 0 : i32
    return %arg0, %arg1 : i32, i32
  }
}

module attributes {stable_mosaic.version = 11 : i64} {
  func.func @_conv_mm_kernel(%arg0: i32, %arg1: i32, %arg2: memref<512x288xbf16, #tpu.memory_space<vmem>>, %arg3: memref<288x128xbf16, #tpu.memory_space<vmem>>, %arg4: memref<1x128xf32, #tpu.memory_space<vmem>>, %arg5: memref<512x128xbf16, #tpu.memory_space<vmem>>) attributes {dimension_semantics = [#tpu.dimension_semantics<parallel>, #tpu.dimension_semantics<parallel>], iteration_bounds = array<i64: 1, 1>, scalar_prefetch = 0 : i64, scratch_operands = 0 : i64, tpu.core_type = #tpu.core_type<tc>, window_params = [{transform_indices = @transform_0, window_bounds = array<i64: 512, 288>}, {transform_indices = @transform_1, window_bounds = array<i64: 288, 128>}, {transform_indices = @transform_2, window_bounds = array<i64: 1, 128>}, {transform_indices = @transform_3, window_bounds = array<i64: 512, 128>}]} {
    %c0 = arith.constant 0 : index
    %c0_0 = arith.constant 0 : index
    %0 = vector.load %arg2[%c0, %c0_0] : memref<512x288xbf16, #tpu.memory_space<vmem>>, vector<512x288xbf16>
    %c0_1 = arith.constant 0 : index
    %c0_2 = arith.constant 0 : index
    %1 = vector.load %arg3[%c0_1, %c0_2] : memref<288x128xbf16, #tpu.memory_space<vmem>>, vector<288x128xbf16>
    %cst = arith.constant dense<0.000000e+00> : vector<512x128xf32>
    %2 = tpu.matmul %0, %1, %cst {dimension_numbers = #tpu.dot_dimension_numbers<[1], [0], [0], [1], [0, 0, 1, 1], [], []>} : vector<512x288xbf16>, vector<288x128xbf16>, vector<512x128xf32> -> vector<512x128xf32>
    %c0_3 = arith.constant 0 : index
    %c0_4 = arith.constant 0 : index
    %3 = vector.load %arg4[%c0_3, %c0_4] : memref<1x128xf32, #tpu.memory_space<vmem>>, vector<1x128xf32>
    %4 = vector.broadcast %3 : vector<1x128xf32> to vector<512x128xf32>
    %5 = arith.addf %2, %4 : vector<512x128xf32>
    %cst_5 = arith.constant 0.000000e+00 : f32
    %6 = vector.broadcast %cst_5 : f32 to vector<512x128xf32>
    %7 = arith.maximumf %5, %6 : vector<512x128xf32>
    %8 = arith.truncf %7 : vector<512x128xf32> to vector<512x128xbf16>
    %c0_6 = arith.constant 0 : index
    %c0_7 = arith.constant 0 : index
    %9 = vector.load %arg5[%c0_6, %c0_7] : memref<512x128xbf16, #tpu.memory_space<vmem>>, vector<512x128xbf16>
    tpu.vector_store %arg5[%c0_6, %c0_7], %8 {strides = array<i32>} : memref<512x128xbf16, #tpu.memory_space<vmem>>, vector<512x128xbf16>,
    return
  }
  func.func @transform_0(%arg0: i32, %arg1: i32) -> (i32, i32) {
    %c0_i32 = arith.constant 0 : i32
    %c0_i32_0 = arith.constant 0 : i32
    return %arg0, %c0_i32 : i32, i32
  }
  func.func @transform_1(%arg0: i32, %arg1: i32) -> (i32, i32) {
    %c0_i32 = arith.constant 0 : i32
    %c0_i32_0 = arith.constant 0 : i32
    return %c0_i32, %arg1 : i32, i32
  }
  func.func @transform_2(%arg0: i32, %arg1: i32) -> (i32, i32) {
    %c0_i32 = arith.constant 0 : i32
    %c0_i32_0 = arith.constant 0 : i32
    return %c0_i32, %arg1 : i32, i32
  }
  func.func @transform_3(%arg0: i32, %arg1: i32) -> (i32, i32) {
    %c0_i32 = arith.constant 0 : i32
    return %arg0, %arg1 : i32, i32
  }
}

module attributes {stable_mosaic.version = 11 : i64} {
  func.func @_maxpool_kernel(%arg0: i32, %arg1: memref<9x128x64xbf16, #tpu.memory_space<vmem>>, %arg2: memref<128x64xbf16, #tpu.memory_space<vmem>>) attributes {dimension_semantics = [#tpu.dimension_semantics<parallel>], iteration_bounds = array<i64: 1>, scalar_prefetch = 0 : i64, scratch_operands = 0 : i64, tpu.core_type = #tpu.core_type<tc>, window_params = [{transform_indices = @transform_0, window_bounds = array<i64: 9, 128, 64>}, {transform_indices = @transform_1, window_bounds = array<i64: 128, 64>}]} {
    %c0 = arith.constant 0 : index
    %c0_0 = arith.constant 0 : index
    %c0_1 = arith.constant 0 : index
    %0 = vector.load %arg1[%c0, %c0_0, %c0_1] : memref<9x128x64xbf16, #tpu.memory_space<vmem>>, vector<9x128x64xbf16>
    %cst = arith.constant dense<0xFF80> : vector<128x64xbf16>
    %1 = vector.multi_reduction <maximumf>, %0, %cst [0] : vector<9x128x64xbf16> to vector<128x64xbf16>
    %c0_2 = arith.constant 0 : index
    %c0_3 = arith.constant 0 : index
    %2 = vector.load %arg2[%c0_2, %c0_3] : memref<128x64xbf16, #tpu.memory_space<vmem>>, vector<128x64xbf16>
    tpu.vector_store %arg2[%c0_2, %c0_3], %1 {strides = array<i32>} : memref<128x64xbf16, #tpu.memory_space<vmem>>, vector<128x64xbf16>,
    return
  }
  func.func @transform_0(%arg0: i32) -> (i32, i32, i32) {
    %c0_i32 = arith.constant 0 : i32
    %c0_i32_0 = arith.constant 0 : i32
    %c0_i32_1 = arith.constant 0 : i32
    return %c0_i32, %arg0, %c0_i32_0 : i32, i32, i32
  }
  func.func @transform_1(%arg0: i32) -> (i32, i32) {
    %c0_i32 = arith.constant 0 : i32
    %c0_i32_0 = arith.constant 0 : i32
    return %arg0, %c0_i32 : i32, i32
  }
}

module attributes {stable_mosaic.version = 11 : i64} {
  func.func @_conv_mm_kernel(%arg0: i32, %arg1: i32, %arg2: memref<128x64xbf16, #tpu.memory_space<vmem>>, %arg3: memref<64x128xbf16, #tpu.memory_space<vmem>>, %arg4: memref<1x128xf32, #tpu.memory_space<vmem>>, %arg5: memref<128x128xbf16, #tpu.memory_space<vmem>>) attributes {dimension_semantics = [#tpu.dimension_semantics<parallel>, #tpu.dimension_semantics<parallel>], iteration_bounds = array<i64: 1, 1>, scalar_prefetch = 0 : i64, scratch_operands = 0 : i64, tpu.core_type = #tpu.core_type<tc>, window_params = [{transform_indices = @transform_0, window_bounds = array<i64: 128, 64>}, {transform_indices = @transform_1, window_bounds = array<i64: 64, 128>}, {transform_indices = @transform_2, window_bounds = array<i64: 1, 128>}, {transform_indices = @transform_3, window_bounds = array<i64: 128, 128>}]} {
    %c0 = arith.constant 0 : index
    %c0_0 = arith.constant 0 : index
    %0 = vector.load %arg2[%c0, %c0_0] : memref<128x64xbf16, #tpu.memory_space<vmem>>, vector<128x64xbf16>
    %c0_1 = arith.constant 0 : index
    %c0_2 = arith.constant 0 : index
    %1 = vector.load %arg3[%c0_1, %c0_2] : memref<64x128xbf16, #tpu.memory_space<vmem>>, vector<64x128xbf16>
    %cst = arith.constant dense<0.000000e+00> : vector<128x128xf32>
    %2 = tpu.matmul %0, %1, %cst {dimension_numbers = #tpu.dot_dimension_numbers<[1], [0], [0], [1], [0, 0, 1, 1], [], []>} : vector<128x64xbf16>, vector<64x128xbf16>, vector<128x128xf32> -> vector<128x128xf32>
    %c0_3 = arith.constant 0 : index
    %c0_4 = arith.constant 0 : index
    %3 = vector.load %arg4[%c0_3, %c0_4] : memref<1x128xf32, #tpu.memory_space<vmem>>, vector<1x128xf32>
    %4 = vector.broadcast %3 : vector<1x128xf32> to vector<128x128xf32>
    %5 = arith.addf %2, %4 : vector<128x128xf32>
    %cst_5 = arith.constant 0.000000e+00 : f32
    %6 = vector.broadcast %cst_5 : f32 to vector<128x128xf32>
    %7 = arith.maximumf %5, %6 : vector<128x128xf32>
    %8 = arith.truncf %7 : vector<128x128xf32> to vector<128x128xbf16>
    %c0_6 = arith.constant 0 : index
    %c0_7 = arith.constant 0 : index
    %9 = vector.load %arg5[%c0_6, %c0_7] : memref<128x128xbf16, #tpu.memory_space<vmem>>, vector<128x128xbf16>
    tpu.vector_store %arg5[%c0_6, %c0_7], %8 {strides = array<i32>} : memref<128x128xbf16, #tpu.memory_space<vmem>>, vector<128x128xbf16>,
    return
  }
  func.func @transform_0(%arg0: i32, %arg1: i32) -> (i32, i32) {
    %c0_i32 = arith.constant 0 : i32
    %c0_i32_0 = arith.constant 0 : i32
    return %arg0, %c0_i32 : i32, i32
  }
  func.func @transform_1(%arg0: i32, %arg1: i32) -> (i32, i32) {
    %c0_i32 = arith.constant 0 : i32
    %c0_i32_0 = arith.constant 0 : i32
    return %c0_i32, %arg1 : i32, i32
  }
  func.func @transform_2(%arg0: i32, %arg1: i32) -> (i32, i32) {
    %c0_i32 = arith.constant 0 : i32
    %c0_i32_0 = arith.constant 0 : i32
    return %c0_i32, %arg1 : i32, i32
  }
  func.func @transform_3(%arg0: i32, %arg1: i32) -> (i32, i32) {
    %c0_i32 = arith.constant 0 : i32
    return %arg0, %arg1 : i32, i32
  }
}

module attributes {stable_mosaic.version = 11 : i64} {
  func.func @_conv_mm_kernel(%arg0: i32, %arg1: i32, %arg2: memref<128x234xbf16, #tpu.memory_space<vmem>>, %arg3: memref<234x128xbf16, #tpu.memory_space<vmem>>, %arg4: memref<1x128xf32, #tpu.memory_space<vmem>>, %arg5: memref<128x128xbf16, #tpu.memory_space<vmem>>) attributes {dimension_semantics = [#tpu.dimension_semantics<parallel>, #tpu.dimension_semantics<parallel>], iteration_bounds = array<i64: 1, 1>, scalar_prefetch = 0 : i64, scratch_operands = 0 : i64, tpu.core_type = #tpu.core_type<tc>, window_params = [{transform_indices = @transform_0, window_bounds = array<i64: 128, 234>}, {transform_indices = @transform_1, window_bounds = array<i64: 234, 128>}, {transform_indices = @transform_2, window_bounds = array<i64: 1, 128>}, {transform_indices = @transform_3, window_bounds = array<i64: 128, 128>}]} {
    %c0 = arith.constant 0 : index
    %c0_0 = arith.constant 0 : index
    %0 = vector.load %arg2[%c0, %c0_0] : memref<128x234xbf16, #tpu.memory_space<vmem>>, vector<128x234xbf16>
    %c0_1 = arith.constant 0 : index
    %c0_2 = arith.constant 0 : index
    %1 = vector.load %arg3[%c0_1, %c0_2] : memref<234x128xbf16, #tpu.memory_space<vmem>>, vector<234x128xbf16>
    %cst = arith.constant dense<0.000000e+00> : vector<128x128xf32>
    %2 = tpu.matmul %0, %1, %cst {dimension_numbers = #tpu.dot_dimension_numbers<[1], [0], [0], [1], [0, 0, 1, 1], [], []>} : vector<128x234xbf16>, vector<234x128xbf16>, vector<128x128xf32> -> vector<128x128xf32>
    %c0_3 = arith.constant 0 : index
    %c0_4 = arith.constant 0 : index
    %3 = vector.load %arg4[%c0_3, %c0_4] : memref<1x128xf32, #tpu.memory_space<vmem>>, vector<1x128xf32>
    %4 = vector.broadcast %3 : vector<1x128xf32> to vector<128x128xf32>
    %5 = arith.addf %2, %4 : vector<128x128xf32>
    %cst_5 = arith.constant 0.000000e+00 : f32
    %6 = vector.broadcast %cst_5 : f32 to vector<128x128xf32>
    %7 = arith.maximumf %5, %6 : vector<128x128xf32>
    %8 = arith.truncf %7 : vector<128x128xf32> to vector<128x128xbf16>
    %c0_6 = arith.constant 0 : index
    %c0_7 = arith.constant 0 : index
    %9 = vector.load %arg5[%c0_6, %c0_7] : memref<128x128xbf16, #tpu.memory_space<vmem>>, vector<128x128xbf16>
    tpu.vector_store %arg5[%c0_6, %c0_7], %8 {strides = array<i32>} : memref<128x128xbf16, #tpu.memory_space<vmem>>, vector<128x128xbf16>,
    return
  }
  func.func @transform_0(%arg0: i32, %arg1: i32) -> (i32, i32) {
    %c0_i32 = arith.constant 0 : i32
    %c0_i32_0 = arith.constant 0 : i32
    return %arg0, %c0_i32 : i32, i32
  }
  func.func @transform_1(%arg0: i32, %arg1: i32) -> (i32, i32) {
    %c0_i32 = arith.constant 0 : i32
    %c0_i32_0 = arith.constant 0 : i32
    return %c0_i32, %arg1 : i32, i32
  }
  func.func @transform_2(%arg0: i32, %arg1: i32) -> (i32, i32) {
    %c0_i32 = arith.constant 0 : i32
    %c0_i32_0 = arith.constant 0 : i32
    return %c0_i32, %arg1 : i32, i32
  }
  func.func @transform_3(%arg0: i32, %arg1: i32) -> (i32, i32) {
    %c0_i32 = arith.constant 0 : i32
    return %arg0, %arg1 : i32, i32
  }
}

module attributes {stable_mosaic.version = 11 : i64} {
  func.func @_avgpool_kernel(%arg0: i32, %arg1: memref<9x128x26xbf16, #tpu.memory_space<vmem>>, %arg2: memref<128x1xf32, #tpu.memory_space<vmem>>, %arg3: memref<128x26xbf16, #tpu.memory_space<vmem>>) attributes {dimension_semantics = [#tpu.dimension_semantics<parallel>], iteration_bounds = array<i64: 1>, scalar_prefetch = 0 : i64, scratch_operands = 0 : i64, tpu.core_type = #tpu.core_type<tc>, window_params = [{transform_indices = @transform_0, window_bounds = array<i64: 9, 128, 26>}, {transform_indices = @transform_1, window_bounds = array<i64: 128, 1>}, {transform_indices = @transform_2, window_bounds = array<i64: 128, 26>}]} {
    %c0 = arith.constant 0 : index
    %c0_0 = arith.constant 0 : index
    %c0_1 = arith.constant 0 : index
    %0 = vector.load %arg1[%c0, %c0_0, %c0_1] : memref<9x128x26xbf16, #tpu.memory_space<vmem>>, vector<9x128x26xbf16>
    %1 = arith.extf %0 : vector<9x128x26xbf16> to vector<9x128x26xf32>
    %cst = arith.constant dense<0.000000e+00> : vector<128x26xf32>
    %2 = vector.multi_reduction <add>, %1, %cst [0] : vector<9x128x26xf32> to vector<128x26xf32>
    %c0_2 = arith.constant 0 : index
    %c0_3 = arith.constant 0 : index
    %3 = vector.load %arg2[%c0_2, %c0_3] : memref<128x1xf32, #tpu.memory_space<vmem>>, vector<128x1xf32>
    %4 = vector.broadcast %3 : vector<128x1xf32> to vector<128x26xf32>
    %5 = arith.mulf %2, %4 : vector<128x26xf32>
    %6 = arith.truncf %5 : vector<128x26xf32> to vector<128x26xbf16>
    %c0_4 = arith.constant 0 : index
    %c0_5 = arith.constant 0 : index
    %7 = vector.load %arg3[%c0_4, %c0_5] : memref<128x26xbf16, #tpu.memory_space<vmem>>, vector<128x26xbf16>
    tpu.vector_store %arg3[%c0_4, %c0_5], %6 {strides = array<i32>} : memref<128x26xbf16, #tpu.memory_space<vmem>>, vector<128x26xbf16>,
    return
  }
  func.func @transform_0(%arg0: i32) -> (i32, i32, i32) {
    %c0_i32 = arith.constant 0 : i32
    %c0_i32_0 = arith.constant 0 : i32
    %c0_i32_1 = arith.constant 0 : i32
    return %c0_i32, %arg0, %c0_i32_0 : i32, i32, i32
  }
  func.func @transform_1(%arg0: i32) -> (i32, i32) {
    %c0_i32 = arith.constant 0 : i32
    %c0_i32_0 = arith.constant 0 : i32
    return %arg0, %c0_i32 : i32, i32
  }
  func.func @transform_2(%arg0: i32) -> (i32, i32) {
    %c0_i32 = arith.constant 0 : i32
    %c0_i32_0 = arith.constant 0 : i32
    return %arg0, %c0_i32 : i32, i32
  }
}

module attributes {stable_mosaic.version = 11 : i64} {
  func.func @_conv_mm_kernel(%arg0: i32, %arg1: i32, %arg2: memref<128x64xbf16, #tpu.memory_space<vmem>>, %arg3: memref<64x256xbf16, #tpu.memory_space<vmem>>, %arg4: memref<1x256xf32, #tpu.memory_space<vmem>>, %arg5: memref<128x256xbf16, #tpu.memory_space<vmem>>) attributes {dimension_semantics = [#tpu.dimension_semantics<parallel>, #tpu.dimension_semantics<parallel>], iteration_bounds = array<i64: 1, 1>, scalar_prefetch = 0 : i64, scratch_operands = 0 : i64, tpu.core_type = #tpu.core_type<tc>, window_params = [{transform_indices = @transform_0, window_bounds = array<i64: 128, 64>}, {transform_indices = @transform_1, window_bounds = array<i64: 64, 256>}, {transform_indices = @transform_2, window_bounds = array<i64: 1, 256>}, {transform_indices = @transform_3, window_bounds = array<i64: 128, 256>}]} {
    %c0 = arith.constant 0 : index
    %c0_0 = arith.constant 0 : index
    %0 = vector.load %arg2[%c0, %c0_0] : memref<128x64xbf16, #tpu.memory_space<vmem>>, vector<128x64xbf16>
    %c0_1 = arith.constant 0 : index
    %c0_2 = arith.constant 0 : index
    %1 = vector.load %arg3[%c0_1, %c0_2] : memref<64x256xbf16, #tpu.memory_space<vmem>>, vector<64x256xbf16>
    %cst = arith.constant dense<0.000000e+00> : vector<128x256xf32>
    %2 = tpu.matmul %0, %1, %cst {dimension_numbers = #tpu.dot_dimension_numbers<[1], [0], [0], [1], [0, 0, 1, 1], [], []>} : vector<128x64xbf16>, vector<64x256xbf16>, vector<128x256xf32> -> vector<128x256xf32>
    %c0_3 = arith.constant 0 : index
    %c0_4 = arith.constant 0 : index
    %3 = vector.load %arg4[%c0_3, %c0_4] : memref<1x256xf32, #tpu.memory_space<vmem>>, vector<1x256xf32>
    %4 = vector.broadcast %3 : vector<1x256xf32> to vector<128x256xf32>
    %5 = arith.addf %2, %4 : vector<128x256xf32>
    %6 = arith.truncf %5 : vector<128x256xf32> to vector<128x256xbf16>
    %c0_5 = arith.constant 0 : index
    %c0_6 = arith.constant 0 : index
    %7 = vector.load %arg5[%c0_5, %c0_6] : memref<128x256xbf16, #tpu.memory_space<vmem>>, vector<128x256xbf16>
    tpu.vector_store %arg5[%c0_5, %c0_6], %6 {strides = array<i32>} : memref<128x256xbf16, #tpu.memory_space<vmem>>, vector<128x256xbf16>,
    return
  }
  func.func @transform_0(%arg0: i32, %arg1: i32) -> (i32, i32) {
    %c0_i32 = arith.constant 0 : i32
    %c0_i32_0 = arith.constant 0 : i32
    return %arg0, %c0_i32 : i32, i32
  }
  func.func @transform_1(%arg0: i32, %arg1: i32) -> (i32, i32) {
    %c0_i32 = arith.constant 0 : i32
    %c0_i32_0 = arith.constant 0 : i32
    return %c0_i32, %arg1 : i32, i32
  }
  func.func @transform_2(%arg0: i32, %arg1: i32) -> (i32, i32) {
    %c0_i32 = arith.constant 0 : i32
    %c0_i32_0 = arith.constant 0 : i32
    return %c0_i32, %arg1 : i32, i32
  }
  func.func @transform_3(%arg0: i32, %arg1: i32) -> (i32, i32) {
    %c0_i32 = arith.constant 0 : i32
    return %arg0, %arg1 : i32, i32
  }
}

module attributes {stable_mosaic.version = 11 : i64} {
  func.func @_conv_mm_res_kernel(%arg0: i32, %arg1: i32, %arg2: memref<128x104xbf16, #tpu.memory_space<vmem>>, %arg3: memref<104x256xbf16, #tpu.memory_space<vmem>>, %arg4: memref<1x256xf32, #tpu.memory_space<vmem>>, %arg5: memref<128x256xbf16, #tpu.memory_space<vmem>>, %arg6: memref<128x256xbf16, #tpu.memory_space<vmem>>) attributes {dimension_semantics = [#tpu.dimension_semantics<parallel>, #tpu.dimension_semantics<parallel>], iteration_bounds = array<i64: 1, 1>, scalar_prefetch = 0 : i64, scratch_operands = 0 : i64, tpu.core_type = #tpu.core_type<tc>, window_params = [{transform_indices = @transform_0, window_bounds = array<i64: 128, 104>}, {transform_indices = @transform_1, window_bounds = array<i64: 104, 256>}, {transform_indices = @transform_2, window_bounds = array<i64: 1, 256>}, {transform_indices = @transform_3, window_bounds = array<i64: 128, 256>}, {transform_indices = @transform_4, window_bounds = array<i64: 128, 256>}]} {
    %c0 = arith.constant 0 : index
    %c0_0 = arith.constant 0 : index
    %0 = vector.load %arg2[%c0, %c0_0] : memref<128x104xbf16, #tpu.memory_space<vmem>>, vector<128x104xbf16>
    %c0_1 = arith.constant 0 : index
    %c0_2 = arith.constant 0 : index
    %1 = vector.load %arg3[%c0_1, %c0_2] : memref<104x256xbf16, #tpu.memory_space<vmem>>, vector<104x256xbf16>
    %cst = arith.constant dense<0.000000e+00> : vector<128x256xf32>
    %2 = tpu.matmul %0, %1, %cst {dimension_numbers = #tpu.dot_dimension_numbers<[1], [0], [0], [1], [0, 0, 1, 1], [], []>} : vector<128x104xbf16>, vector<104x256xbf16>, vector<128x256xf32> -> vector<128x256xf32>
    %c0_3 = arith.constant 0 : index
    %c0_4 = arith.constant 0 : index
    %3 = vector.load %arg4[%c0_3, %c0_4] : memref<1x256xf32, #tpu.memory_space<vmem>>, vector<1x256xf32>
    %4 = vector.broadcast %3 : vector<1x256xf32> to vector<128x256xf32>
    %5 = arith.addf %2, %4 : vector<128x256xf32>
    %c0_5 = arith.constant 0 : index
    %c0_6 = arith.constant 0 : index
    %6 = vector.load %arg5[%c0_5, %c0_6] : memref<128x256xbf16, #tpu.memory_space<vmem>>, vector<128x256xbf16>
    %7 = arith.extf %6 : vector<128x256xbf16> to vector<128x256xf32>
    %8 = arith.addf %5, %7 : vector<128x256xf32>
    %cst_7 = arith.constant 0.000000e+00 : f32
    %9 = vector.broadcast %cst_7 : f32 to vector<128x256xf32>
    %10 = arith.maximumf %8, %9 : vector<128x256xf32>
    %11 = arith.truncf %10 : vector<128x256xf32> to vector<128x256xbf16>
    %c0_8 = arith.constant 0 : index
    %c0_9 = arith.constant 0 : index
    %12 = vector.load %arg6[%c0_8, %c0_9] : memref<128x256xbf16, #tpu.memory_space<vmem>>, vector<128x256xbf16>
    tpu.vector_store %arg6[%c0_8, %c0_9], %11 {strides = array<i32>} : memref<128x256xbf16, #tpu.memory_space<vmem>>, vector<128x256xbf16>,
    return
  }
  func.func @transform_0(%arg0: i32, %arg1: i32) -> (i32, i32) {
    %c0_i32 = arith.constant 0 : i32
    %c0_i32_0 = arith.constant 0 : i32
    return %arg0, %c0_i32 : i32, i32
  }
  func.func @transform_1(%arg0: i32, %arg1: i32) -> (i32, i32) {
    %c0_i32 = arith.constant 0 : i32
    %c0_i32_0 = arith.constant 0 : i32
    return %c0_i32, %arg1 : i32, i32
  }
  func.func @transform_2(%arg0: i32, %arg1: i32) -> (i32, i32) {
    %c0_i32 = arith.constant 0 : i32
    %c0_i32_0 = arith.constant 0 : i32
    return %c0_i32, %arg1 : i32, i32
  }
  func.func @transform_3(%arg0: i32, %arg1: i32) -> (i32, i32) {
    %c0_i32 = arith.constant 0 : i32
    return %arg0, %arg1 : i32, i32
  }
  func.func @transform_4(%arg0: i32, %arg1: i32) -> (i32, i32) {
    %c0_i32 = arith.constant 0 : i32
    return %arg0, %arg1 : i32, i32
  }
}

module attributes {stable_mosaic.version = 11 : i64} {
  func.func @_conv_mm_kernel(%arg0: i32, %arg1: i32, %arg2: memref<128x256xbf16, #tpu.memory_space<vmem>>, %arg3: memref<256x128xbf16, #tpu.memory_space<vmem>>, %arg4: memref<1x128xf32, #tpu.memory_space<vmem>>, %arg5: memref<128x128xbf16, #tpu.memory_space<vmem>>) attributes {dimension_semantics = [#tpu.dimension_semantics<parallel>, #tpu.dimension_semantics<parallel>], iteration_bounds = array<i64: 1, 1>, scalar_prefetch = 0 : i64, scratch_operands = 0 : i64, tpu.core_type = #tpu.core_type<tc>, window_params = [{transform_indices = @transform_0, window_bounds = array<i64: 128, 256>}, {transform_indices = @transform_1, window_bounds = array<i64: 256, 128>}, {transform_indices = @transform_2, window_bounds = array<i64: 1, 128>}, {transform_indices = @transform_3, window_bounds = array<i64: 128, 128>}]} {
    %c0 = arith.constant 0 : index
    %c0_0 = arith.constant 0 : index
    %0 = vector.load %arg2[%c0, %c0_0] : memref<128x256xbf16, #tpu.memory_space<vmem>>, vector<128x256xbf16>
    %c0_1 = arith.constant 0 : index
    %c0_2 = arith.constant 0 : index
    %1 = vector.load %arg3[%c0_1, %c0_2] : memref<256x128xbf16, #tpu.memory_space<vmem>>, vector<256x128xbf16>
    %cst = arith.constant dense<0.000000e+00> : vector<128x128xf32>
    %2 = tpu.matmul %0, %1, %cst {dimension_numbers = #tpu.dot_dimension_numbers<[1], [0], [0], [1], [0, 0, 1, 1], [], []>} : vector<128x256xbf16>, vector<256x128xbf16>, vector<128x128xf32> -> vector<128x128xf32>
    %c0_3 = arith.constant 0 : index
    %c0_4 = arith.constant 0 : index
    %3 = vector.load %arg4[%c0_3, %c0_4] : memref<1x128xf32, #tpu.memory_space<vmem>>, vector<1x128xf32>
    %4 = vector.broadcast %3 : vector<1x128xf32> to vector<128x128xf32>
    %5 = arith.addf %2, %4 : vector<128x128xf32>
    %cst_5 = arith.constant 0.000000e+00 : f32
    %6 = vector.broadcast %cst_5 : f32 to vector<128x128xf32>
    %7 = arith.maximumf %5, %6 : vector<128x128xf32>
    %8 = arith.truncf %7 : vector<128x128xf32> to vector<128x128xbf16>
    %c0_6 = arith.constant 0 : index
    %c0_7 = arith.constant 0 : index
    %9 = vector.load %arg5[%c0_6, %c0_7] : memref<128x128xbf16, #tpu.memory_space<vmem>>, vector<128x128xbf16>
    tpu.vector_store %arg5[%c0_6, %c0_7], %8 {strides = array<i32>} : memref<128x128xbf16, #tpu.memory_space<vmem>>, vector<128x128xbf16>,
    return
  }
  func.func @transform_0(%arg0: i32, %arg1: i32) -> (i32, i32) {
    %c0_i32 = arith.constant 0 : i32
    %c0_i32_0 = arith.constant 0 : i32
    return %arg0, %c0_i32 : i32, i32
  }
  func.func @transform_1(%arg0: i32, %arg1: i32) -> (i32, i32) {
    %c0_i32 = arith.constant 0 : i32
    %c0_i32_0 = arith.constant 0 : i32
    return %c0_i32, %arg1 : i32, i32
  }
  func.func @transform_2(%arg0: i32, %arg1: i32) -> (i32, i32) {
    %c0_i32 = arith.constant 0 : i32
    %c0_i32_0 = arith.constant 0 : i32
    return %c0_i32, %arg1 : i32, i32
  }
  func.func @transform_3(%arg0: i32, %arg1: i32) -> (i32, i32) {
    %c0_i32 = arith.constant 0 : i32
    return %arg0, %arg1 : i32, i32
  }
}

module attributes {stable_mosaic.version = 11 : i64} {
  func.func @_avgpool_kernel(%arg0: i32, %arg1: memref<4x32x256xbf16, #tpu.memory_space<vmem>>, %arg2: memref<32x1xf32, #tpu.memory_space<vmem>>, %arg3: memref<32x256xbf16, #tpu.memory_space<vmem>>) attributes {dimension_semantics = [#tpu.dimension_semantics<parallel>], iteration_bounds = array<i64: 1>, scalar_prefetch = 0 : i64, scratch_operands = 0 : i64, tpu.core_type = #tpu.core_type<tc>, window_params = [{transform_indices = @transform_0, window_bounds = array<i64: 4, 32, 256>}, {transform_indices = @transform_1, window_bounds = array<i64: 32, 1>}, {transform_indices = @transform_2, window_bounds = array<i64: 32, 256>}]} {
    %c0 = arith.constant 0 : index
    %c0_0 = arith.constant 0 : index
    %c0_1 = arith.constant 0 : index
    %0 = vector.load %arg1[%c0, %c0_0, %c0_1] : memref<4x32x256xbf16, #tpu.memory_space<vmem>>, vector<4x32x256xbf16>
    %1 = arith.extf %0 : vector<4x32x256xbf16> to vector<4x32x256xf32>
    %cst = arith.constant dense<0.000000e+00> : vector<32x256xf32>
    %2 = vector.multi_reduction <add>, %1, %cst [0] : vector<4x32x256xf32> to vector<32x256xf32>
    %c0_2 = arith.constant 0 : index
    %c0_3 = arith.constant 0 : index
    %3 = vector.load %arg2[%c0_2, %c0_3] : memref<32x1xf32, #tpu.memory_space<vmem>>, vector<32x1xf32>
    %4 = vector.broadcast %3 : vector<32x1xf32> to vector<32x256xf32>
    %5 = arith.mulf %2, %4 : vector<32x256xf32>
    %6 = arith.truncf %5 : vector<32x256xf32> to vector<32x256xbf16>
    %c0_4 = arith.constant 0 : index
    %c0_5 = arith.constant 0 : index
    %7 = vector.load %arg3[%c0_4, %c0_5] : memref<32x256xbf16, #tpu.memory_space<vmem>>, vector<32x256xbf16>
    tpu.vector_store %arg3[%c0_4, %c0_5], %6 {strides = array<i32>} : memref<32x256xbf16, #tpu.memory_space<vmem>>, vector<32x256xbf16>,
    return
  }
  func.func @transform_0(%arg0: i32) -> (i32, i32, i32) {
    %c0_i32 = arith.constant 0 : i32
    %c0_i32_0 = arith.constant 0 : i32
    %c0_i32_1 = arith.constant 0 : i32
    return %c0_i32, %arg0, %c0_i32_0 : i32, i32, i32
  }
  func.func @transform_1(%arg0: i32) -> (i32, i32) {
    %c0_i32 = arith.constant 0 : i32
    %c0_i32_0 = arith.constant 0 : i32
    return %arg0, %c0_i32 : i32, i32
  }
  func.func @transform_2(%arg0: i32) -> (i32, i32) {
    %c0_i32 = arith.constant 0 : i32
    %c0_i32_0 = arith.constant 0 : i32
    return %arg0, %c0_i32 : i32, i32
  }
}

module attributes {stable_mosaic.version = 11 : i64} {
  func.func @_conv_mm_kernel(%arg0: i32, %arg1: i32, %arg2: memref<32x256xbf16, #tpu.memory_space<vmem>>, %arg3: memref<256x256xbf16, #tpu.memory_space<vmem>>, %arg4: memref<1x256xf32, #tpu.memory_space<vmem>>, %arg5: memref<32x256xbf16, #tpu.memory_space<vmem>>) attributes {dimension_semantics = [#tpu.dimension_semantics<parallel>, #tpu.dimension_semantics<parallel>], iteration_bounds = array<i64: 1, 2>, scalar_prefetch = 0 : i64, scratch_operands = 0 : i64, tpu.core_type = #tpu.core_type<tc>, window_params = [{transform_indices = @transform_0, window_bounds = array<i64: 32, 256>}, {transform_indices = @transform_1, window_bounds = array<i64: 256, 256>}, {transform_indices = @transform_2, window_bounds = array<i64: 1, 256>}, {transform_indices = @transform_3, window_bounds = array<i64: 32, 256>}]} {
    %c0 = arith.constant 0 : index
    %c0_0 = arith.constant 0 : index
    %0 = vector.load %arg2[%c0, %c0_0] : memref<32x256xbf16, #tpu.memory_space<vmem>>, vector<32x256xbf16>
    %c0_1 = arith.constant 0 : index
    %c0_2 = arith.constant 0 : index
    %1 = vector.load %arg3[%c0_1, %c0_2] : memref<256x256xbf16, #tpu.memory_space<vmem>>, vector<256x256xbf16>
    %cst = arith.constant dense<0.000000e+00> : vector<32x256xf32>
    %2 = tpu.matmul %0, %1, %cst {dimension_numbers = #tpu.dot_dimension_numbers<[1], [0], [0], [1], [0, 0, 1, 1], [], []>} : vector<32x256xbf16>, vector<256x256xbf16>, vector<32x256xf32> -> vector<32x256xf32>
    %c0_3 = arith.constant 0 : index
    %c0_4 = arith.constant 0 : index
    %3 = vector.load %arg4[%c0_3, %c0_4] : memref<1x256xf32, #tpu.memory_space<vmem>>, vector<1x256xf32>
    %4 = vector.broadcast %3 : vector<1x256xf32> to vector<32x256xf32>
    %5 = arith.addf %2, %4 : vector<32x256xf32>
    %6 = arith.truncf %5 : vector<32x256xf32> to vector<32x256xbf16>
    %c0_5 = arith.constant 0 : index
    %c0_6 = arith.constant 0 : index
    %7 = vector.load %arg5[%c0_5, %c0_6] : memref<32x256xbf16, #tpu.memory_space<vmem>>, vector<32x256xbf16>
    tpu.vector_store %arg5[%c0_5, %c0_6], %6 {strides = array<i32>} : memref<32x256xbf16, #tpu.memory_space<vmem>>, vector<32x256xbf16>,
    return
  }
  func.func @transform_0(%arg0: i32, %arg1: i32) -> (i32, i32) {
    %c0_i32 = arith.constant 0 : i32
    %c0_i32_0 = arith.constant 0 : i32
    return %arg0, %c0_i32 : i32, i32
  }
  func.func @transform_1(%arg0: i32, %arg1: i32) -> (i32, i32) {
    %c0_i32 = arith.constant 0 : i32
    %c0_i32_0 = arith.constant 0 : i32
    return %c0_i32, %arg1 : i32, i32
  }
  func.func @transform_2(%arg0: i32, %arg1: i32) -> (i32, i32) {
    %c0_i32 = arith.constant 0 : i32
    %c0_i32_0 = arith.constant 0 : i32
    return %c0_i32, %arg1 : i32, i32
  }
  func.func @transform_3(%arg0: i32, %arg1: i32) -> (i32, i32) {
    %c0_i32 = arith.constant 0 : i32
    return %arg0, %arg1 : i32, i32
  }
}

module attributes {stable_mosaic.version = 11 : i64} {
  func.func @_conv_mm_kernel(%arg0: i32, %arg1: i32, %arg2: memref<128x256xbf16, #tpu.memory_space<vmem>>, %arg3: memref<256x256xbf16, #tpu.memory_space<vmem>>, %arg4: memref<1x256xf32, #tpu.memory_space<vmem>>, %arg5: memref<128x256xbf16, #tpu.memory_space<vmem>>) attributes {dimension_semantics = [#tpu.dimension_semantics<parallel>, #tpu.dimension_semantics<parallel>], iteration_bounds = array<i64: 1, 1>, scalar_prefetch = 0 : i64, scratch_operands = 0 : i64, tpu.core_type = #tpu.core_type<tc>, window_params = [{transform_indices = @transform_0, window_bounds = array<i64: 128, 256>}, {transform_indices = @transform_1, window_bounds = array<i64: 256, 256>}, {transform_indices = @transform_2, window_bounds = array<i64: 1, 256>}, {transform_indices = @transform_3, window_bounds = array<i64: 128, 256>}]} {
    %c0 = arith.constant 0 : index
    %c0_0 = arith.constant 0 : index
    %0 = vector.load %arg2[%c0, %c0_0] : memref<128x256xbf16, #tpu.memory_space<vmem>>, vector<128x256xbf16>
    %c0_1 = arith.constant 0 : index
    %c0_2 = arith.constant 0 : index
    %1 = vector.load %arg3[%c0_1, %c0_2] : memref<256x256xbf16, #tpu.memory_space<vmem>>, vector<256x256xbf16>
    %cst = arith.constant dense<0.000000e+00> : vector<128x256xf32>
    %2 = tpu.matmul %0, %1, %cst {dimension_numbers = #tpu.dot_dimension_numbers<[1], [0], [0], [1], [0, 0, 1, 1], [], []>} : vector<128x256xbf16>, vector<256x256xbf16>, vector<128x256xf32> -> vector<128x256xf32>
    %c0_3 = arith.constant 0 : index
    %c0_4 = arith.constant 0 : index
    %3 = vector.load %arg4[%c0_3, %c0_4] : memref<1x256xf32, #tpu.memory_space<vmem>>, vector<1x256xf32>
    %4 = vector.broadcast %3 : vector<1x256xf32> to vector<128x256xf32>
    %5 = arith.addf %2, %4 : vector<128x256xf32>
    %cst_5 = arith.constant 0.000000e+00 : f32
    %6 = vector.broadcast %cst_5 : f32 to vector<128x256xf32>
    %7 = arith.maximumf %5, %6 : vector<128x256xf32>
    %8 = arith.truncf %7 : vector<128x256xf32> to vector<128x256xbf16>
    %c0_6 = arith.constant 0 : index
    %c0_7 = arith.constant 0 : index
    %9 = vector.load %arg5[%c0_6, %c0_7] : memref<128x256xbf16, #tpu.memory_space<vmem>>, vector<128x256xbf16>
    tpu.vector_store %arg5[%c0_6, %c0_7], %8 {strides = array<i32>} : memref<128x256xbf16, #tpu.memory_space<vmem>>, vector<128x256xbf16>,
    return
  }
  func.func @transform_0(%arg0: i32, %arg1: i32) -> (i32, i32) {
    %c0_i32 = arith.constant 0 : i32
    %c0_i32_0 = arith.constant 0 : i32
    return %arg0, %c0_i32 : i32, i32
  }
  func.func @transform_1(%arg0: i32, %arg1: i32) -> (i32, i32) {
    %c0_i32 = arith.constant 0 : i32
    %c0_i32_0 = arith.constant 0 : i32
    return %c0_i32, %arg1 : i32, i32
  }
  func.func @transform_2(%arg0: i32, %arg1: i32) -> (i32, i32) {
    %c0_i32 = arith.constant 0 : i32
    %c0_i32_0 = arith.constant 0 : i32
    return %c0_i32, %arg1 : i32, i32
  }
  func.func @transform_3(%arg0: i32, %arg1: i32) -> (i32, i32) {
    %c0_i32 = arith.constant 0 : i32
    return %arg0, %arg1 : i32, i32
  }
}

module attributes {stable_mosaic.version = 11 : i64} {
  func.func @_conv_mm_kernel(%arg0: i32, %arg1: i32, %arg2: memref<32x468xbf16, #tpu.memory_space<vmem>>, %arg3: memref<468x128xbf16, #tpu.memory_space<vmem>>, %arg4: memref<1x128xf32, #tpu.memory_space<vmem>>, %arg5: memref<32x128xbf16, #tpu.memory_space<vmem>>) attributes {dimension_semantics = [#tpu.dimension_semantics<parallel>, #tpu.dimension_semantics<parallel>], iteration_bounds = array<i64: 1, 1>, scalar_prefetch = 0 : i64, scratch_operands = 0 : i64, tpu.core_type = #tpu.core_type<tc>, window_params = [{transform_indices = @transform_0, window_bounds = array<i64: 32, 468>}, {transform_indices = @transform_1, window_bounds = array<i64: 468, 128>}, {transform_indices = @transform_2, window_bounds = array<i64: 1, 128>}, {transform_indices = @transform_3, window_bounds = array<i64: 32, 128>}]} {
    %c0 = arith.constant 0 : index
    %c0_0 = arith.constant 0 : index
    %0 = vector.load %arg2[%c0, %c0_0] : memref<32x468xbf16, #tpu.memory_space<vmem>>, vector<32x468xbf16>
    %c0_1 = arith.constant 0 : index
    %c0_2 = arith.constant 0 : index
    %1 = vector.load %arg3[%c0_1, %c0_2] : memref<468x128xbf16, #tpu.memory_space<vmem>>, vector<468x128xbf16>
    %cst = arith.constant dense<0.000000e+00> : vector<32x128xf32>
    %2 = tpu.matmul %0, %1, %cst {dimension_numbers = #tpu.dot_dimension_numbers<[1], [0], [0], [1], [0, 0, 1, 1], [], []>} : vector<32x468xbf16>, vector<468x128xbf16>, vector<32x128xf32> -> vector<32x128xf32>
    %c0_3 = arith.constant 0 : index
    %c0_4 = arith.constant 0 : index
    %3 = vector.load %arg4[%c0_3, %c0_4] : memref<1x128xf32, #tpu.memory_space<vmem>>, vector<1x128xf32>
    %4 = vector.broadcast %3 : vector<1x128xf32> to vector<32x128xf32>
    %5 = arith.addf %2, %4 : vector<32x128xf32>
    %cst_5 = arith.constant 0.000000e+00 : f32
    %6 = vector.broadcast %cst_5 : f32 to vector<32x128xf32>
    %7 = arith.maximumf %5, %6 : vector<32x128xf32>
    %8 = arith.truncf %7 : vector<32x128xf32> to vector<32x128xbf16>
    %c0_6 = arith.constant 0 : index
    %c0_7 = arith.constant 0 : index
    %9 = vector.load %arg5[%c0_6, %c0_7] : memref<32x128xbf16, #tpu.memory_space<vmem>>, vector<32x128xbf16>
    tpu.vector_store %arg5[%c0_6, %c0_7], %8 {strides = array<i32>} : memref<32x128xbf16, #tpu.memory_space<vmem>>, vector<32x128xbf16>,
    return
  }
  func.func @transform_0(%arg0: i32, %arg1: i32) -> (i32, i32) {
    %c0_i32 = arith.constant 0 : i32
    %c0_i32_0 = arith.constant 0 : i32
    return %arg0, %c0_i32 : i32, i32
  }
  func.func @transform_1(%arg0: i32, %arg1: i32) -> (i32, i32) {
    %c0_i32 = arith.constant 0 : i32
    %c0_i32_0 = arith.constant 0 : i32
    return %c0_i32, %arg1 : i32, i32
  }
  func.func @transform_2(%arg0: i32, %arg1: i32) -> (i32, i32) {
    %c0_i32 = arith.constant 0 : i32
    %c0_i32_0 = arith.constant 0 : i32
    return %c0_i32, %arg1 : i32, i32
  }
  func.func @transform_3(%arg0: i32, %arg1: i32) -> (i32, i32) {
    %c0_i32 = arith.constant 0 : i32
    return %arg0, %arg1 : i32, i32
  }
}

module attributes {stable_mosaic.version = 11 : i64} {
  func.func @_avgpool_kernel(%arg0: i32, %arg1: memref<9x32x52xbf16, #tpu.memory_space<vmem>>, %arg2: memref<32x1xf32, #tpu.memory_space<vmem>>, %arg3: memref<32x52xbf16, #tpu.memory_space<vmem>>) attributes {dimension_semantics = [#tpu.dimension_semantics<parallel>], iteration_bounds = array<i64: 1>, scalar_prefetch = 0 : i64, scratch_operands = 0 : i64, tpu.core_type = #tpu.core_type<tc>, window_params = [{transform_indices = @transform_0, window_bounds = array<i64: 9, 32, 52>}, {transform_indices = @transform_1, window_bounds = array<i64: 32, 1>}, {transform_indices = @transform_2, window_bounds = array<i64: 32, 52>}]} {
    %c0 = arith.constant 0 : index
    %c0_0 = arith.constant 0 : index
    %c0_1 = arith.constant 0 : index
    %0 = vector.load %arg1[%c0, %c0_0, %c0_1] : memref<9x32x52xbf16, #tpu.memory_space<vmem>>, vector<9x32x52xbf16>
    %1 = arith.extf %0 : vector<9x32x52xbf16> to vector<9x32x52xf32>
    %cst = arith.constant dense<0.000000e+00> : vector<32x52xf32>
    %2 = vector.multi_reduction <add>, %1, %cst [0] : vector<9x32x52xf32> to vector<32x52xf32>
    %c0_2 = arith.constant 0 : index
    %c0_3 = arith.constant 0 : index
    %3 = vector.load %arg2[%c0_2, %c0_3] : memref<32x1xf32, #tpu.memory_space<vmem>>, vector<32x1xf32>
    %4 = vector.broadcast %3 : vector<32x1xf32> to vector<32x52xf32>
    %5 = arith.mulf %2, %4 : vector<32x52xf32>
    %6 = arith.truncf %5 : vector<32x52xf32> to vector<32x52xbf16>
    %c0_4 = arith.constant 0 : index
    %c0_5 = arith.constant 0 : index
    %7 = vector.load %arg3[%c0_4, %c0_5] : memref<32x52xbf16, #tpu.memory_space<vmem>>, vector<32x52xbf16>
    tpu.vector_store %arg3[%c0_4, %c0_5], %6 {strides = array<i32>} : memref<32x52xbf16, #tpu.memory_space<vmem>>, vector<32x52xbf16>,
    return
  }
  func.func @transform_0(%arg0: i32) -> (i32, i32, i32) {
    %c0_i32 = arith.constant 0 : i32
    %c0_i32_0 = arith.constant 0 : i32
    %c0_i32_1 = arith.constant 0 : i32
    return %c0_i32, %arg0, %c0_i32_0 : i32, i32, i32
  }
  func.func @transform_1(%arg0: i32) -> (i32, i32) {
    %c0_i32 = arith.constant 0 : i32
    %c0_i32_0 = arith.constant 0 : i32
    return %arg0, %c0_i32 : i32, i32
  }
  func.func @transform_2(%arg0: i32) -> (i32, i32) {
    %c0_i32 = arith.constant 0 : i32
    %c0_i32_0 = arith.constant 0 : i32
    return %arg0, %c0_i32 : i32, i32
  }
}

module attributes {stable_mosaic.version = 11 : i64} {
  func.func @_conv_mm_res_kernel(%arg0: i32, %arg1: i32, %arg2: memref<32x208xbf16, #tpu.memory_space<vmem>>, %arg3: memref<208x256xbf16, #tpu.memory_space<vmem>>, %arg4: memref<1x256xf32, #tpu.memory_space<vmem>>, %arg5: memref<32x256xbf16, #tpu.memory_space<vmem>>, %arg6: memref<32x256xbf16, #tpu.memory_space<vmem>>) attributes {dimension_semantics = [#tpu.dimension_semantics<parallel>, #tpu.dimension_semantics<parallel>], iteration_bounds = array<i64: 1, 2>, scalar_prefetch = 0 : i64, scratch_operands = 0 : i64, tpu.core_type = #tpu.core_type<tc>, window_params = [{transform_indices = @transform_0, window_bounds = array<i64: 32, 208>}, {transform_indices = @transform_1, window_bounds = array<i64: 208, 256>}, {transform_indices = @transform_2, window_bounds = array<i64: 1, 256>}, {transform_indices = @transform_3, window_bounds = array<i64: 32, 256>}, {transform_indices = @transform_4, window_bounds = array<i64: 32, 256>}]} {
    %c0 = arith.constant 0 : index
    %c0_0 = arith.constant 0 : index
    %0 = vector.load %arg2[%c0, %c0_0] : memref<32x208xbf16, #tpu.memory_space<vmem>>, vector<32x208xbf16>
    %c0_1 = arith.constant 0 : index
    %c0_2 = arith.constant 0 : index
    %1 = vector.load %arg3[%c0_1, %c0_2] : memref<208x256xbf16, #tpu.memory_space<vmem>>, vector<208x256xbf16>
    %cst = arith.constant dense<0.000000e+00> : vector<32x256xf32>
    %2 = tpu.matmul %0, %1, %cst {dimension_numbers = #tpu.dot_dimension_numbers<[1], [0], [0], [1], [0, 0, 1, 1], [], []>} : vector<32x208xbf16>, vector<208x256xbf16>, vector<32x256xf32> -> vector<32x256xf32>
    %c0_3 = arith.constant 0 : index
    %c0_4 = arith.constant 0 : index
    %3 = vector.load %arg4[%c0_3, %c0_4] : memref<1x256xf32, #tpu.memory_space<vmem>>, vector<1x256xf32>
    %4 = vector.broadcast %3 : vector<1x256xf32> to vector<32x256xf32>
    %5 = arith.addf %2, %4 : vector<32x256xf32>
    %c0_5 = arith.constant 0 : index
    %c0_6 = arith.constant 0 : index
    %6 = vector.load %arg5[%c0_5, %c0_6] : memref<32x256xbf16, #tpu.memory_space<vmem>>, vector<32x256xbf16>
    %7 = arith.extf %6 : vector<32x256xbf16> to vector<32x256xf32>
    %8 = arith.addf %5, %7 : vector<32x256xf32>
    %cst_7 = arith.constant 0.000000e+00 : f32
    %9 = vector.broadcast %cst_7 : f32 to vector<32x256xf32>
    %10 = arith.maximumf %8, %9 : vector<32x256xf32>
    %11 = arith.truncf %10 : vector<32x256xf32> to vector<32x256xbf16>
    %c0_8 = arith.constant 0 : index
    %c0_9 = arith.constant 0 : index
    %12 = vector.load %arg6[%c0_8, %c0_9] : memref<32x256xbf16, #tpu.memory_space<vmem>>, vector<32x256xbf16>
    tpu.vector_store %arg6[%c0_8, %c0_9], %11 {strides = array<i32>} : memref<32x256xbf16, #tpu.memory_space<vmem>>, vector<32x256xbf16>,
    return
  }
  func.func @transform_0(%arg0: i32, %arg1: i32) -> (i32, i32) {
    %c0_i32 = arith.constant 0 : i32
    %c0_i32_0 = arith.constant 0 : i32
    return %arg0, %c0_i32 : i32, i32
  }
  func.func @transform_1(%arg0: i32, %arg1: i32) -> (i32, i32) {
    %c0_i32 = arith.constant 0 : i32
    %c0_i32_0 = arith.constant 0 : i32
    return %c0_i32, %arg1 : i32, i32
  }
  func.func @transform_2(%arg0: i32, %arg1: i32) -> (i32, i32) {
    %c0_i32 = arith.constant 0 : i32
    %c0_i32_0 = arith.constant 0 : i32
    return %c0_i32, %arg1 : i32, i32
  }
  func.func @transform_3(%arg0: i32, %arg1: i32) -> (i32, i32) {
    %c0_i32 = arith.constant 0 : i32
    return %arg0, %arg1 : i32, i32
  }
  func.func @transform_4(%arg0: i32, %arg1: i32) -> (i32, i32) {
    %c0_i32 = arith.constant 0 : i32
    return %arg0, %arg1 : i32, i32
  }
}

module attributes {stable_mosaic.version = 11 : i64} {
  func.func @_avgpool_kernel(%arg0: i32, %arg1: memref<4x8x512xbf16, #tpu.memory_space<vmem>>, %arg2: memref<8x1xf32, #tpu.memory_space<vmem>>, %arg3: memref<8x512xbf16, #tpu.memory_space<vmem>>) attributes {dimension_semantics = [#tpu.dimension_semantics<parallel>], iteration_bounds = array<i64: 1>, scalar_prefetch = 0 : i64, scratch_operands = 0 : i64, tpu.core_type = #tpu.core_type<tc>, window_params = [{transform_indices = @transform_0, window_bounds = array<i64: 4, 8, 512>}, {transform_indices = @transform_1, window_bounds = array<i64: 8, 1>}, {transform_indices = @transform_2, window_bounds = array<i64: 8, 512>}]} {
    %c0 = arith.constant 0 : index
    %c0_0 = arith.constant 0 : index
    %c0_1 = arith.constant 0 : index
    %0 = vector.load %arg1[%c0, %c0_0, %c0_1] : memref<4x8x512xbf16, #tpu.memory_space<vmem>>, vector<4x8x512xbf16>
    %1 = arith.extf %0 : vector<4x8x512xbf16> to vector<4x8x512xf32>
    %cst = arith.constant dense<0.000000e+00> : vector<8x512xf32>
    %2 = vector.multi_reduction <add>, %1, %cst [0] : vector<4x8x512xf32> to vector<8x512xf32>
    %c0_2 = arith.constant 0 : index
    %c0_3 = arith.constant 0 : index
    %3 = vector.load %arg2[%c0_2, %c0_3] : memref<8x1xf32, #tpu.memory_space<vmem>>, vector<8x1xf32>
    %4 = vector.broadcast %3 : vector<8x1xf32> to vector<8x512xf32>
    %5 = arith.mulf %2, %4 : vector<8x512xf32>
    %6 = arith.truncf %5 : vector<8x512xf32> to vector<8x512xbf16>
    %c0_4 = arith.constant 0 : index
    %c0_5 = arith.constant 0 : index
    %7 = vector.load %arg3[%c0_4, %c0_5] : memref<8x512xbf16, #tpu.memory_space<vmem>>, vector<8x512xbf16>
    tpu.vector_store %arg3[%c0_4, %c0_5], %6 {strides = array<i32>} : memref<8x512xbf16, #tpu.memory_space<vmem>>, vector<8x512xbf16>,
    return
  }
  func.func @transform_0(%arg0: i32) -> (i32, i32, i32) {
    %c0_i32 = arith.constant 0 : i32
    %c0_i32_0 = arith.constant 0 : i32
    %c0_i32_1 = arith.constant 0 : i32
    return %c0_i32, %arg0, %c0_i32_0 : i32, i32, i32
  }
  func.func @transform_1(%arg0: i32) -> (i32, i32) {
    %c0_i32 = arith.constant 0 : i32
    %c0_i32_0 = arith.constant 0 : i32
    return %arg0, %c0_i32 : i32, i32
  }
  func.func @transform_2(%arg0: i32) -> (i32, i32) {
    %c0_i32 = arith.constant 0 : i32
    %c0_i32_0 = arith.constant 0 : i32
    return %arg0, %c0_i32 : i32, i32
  }
}

module attributes {stable_mosaic.version = 11 : i64} {
  func.func @_conv_mm_kernel(%arg0: i32, %arg1: i32, %arg2: memref<8x512xbf16, #tpu.memory_space<vmem>>, %arg3: memref<512x256xbf16, #tpu.memory_space<vmem>>, %arg4: memref<1x256xf32, #tpu.memory_space<vmem>>, %arg5: memref<8x256xbf16, #tpu.memory_space<vmem>>) attributes {dimension_semantics = [#tpu.dimension_semantics<parallel>, #tpu.dimension_semantics<parallel>], iteration_bounds = array<i64: 1, 4>, scalar_prefetch = 0 : i64, scratch_operands = 0 : i64, tpu.core_type = #tpu.core_type<tc>, window_params = [{transform_indices = @transform_0, window_bounds = array<i64: 8, 512>}, {transform_indices = @transform_1, window_bounds = array<i64: 512, 256>}, {transform_indices = @transform_2, window_bounds = array<i64: 1, 256>}, {transform_indices = @transform_3, window_bounds = array<i64: 8, 256>}]} {
    %c0 = arith.constant 0 : index
    %c0_0 = arith.constant 0 : index
    %0 = vector.load %arg2[%c0, %c0_0] : memref<8x512xbf16, #tpu.memory_space<vmem>>, vector<8x512xbf16>
    %c0_1 = arith.constant 0 : index
    %c0_2 = arith.constant 0 : index
    %1 = vector.load %arg3[%c0_1, %c0_2] : memref<512x256xbf16, #tpu.memory_space<vmem>>, vector<512x256xbf16>
    %cst = arith.constant dense<0.000000e+00> : vector<8x256xf32>
    %2 = tpu.matmul %0, %1, %cst {dimension_numbers = #tpu.dot_dimension_numbers<[1], [0], [0], [1], [0, 0, 1, 1], [], []>} : vector<8x512xbf16>, vector<512x256xbf16>, vector<8x256xf32> -> vector<8x256xf32>
    %c0_3 = arith.constant 0 : index
    %c0_4 = arith.constant 0 : index
    %3 = vector.load %arg4[%c0_3, %c0_4] : memref<1x256xf32, #tpu.memory_space<vmem>>, vector<1x256xf32>
    %4 = vector.broadcast %3 : vector<1x256xf32> to vector<8x256xf32>
    %5 = arith.addf %2, %4 : vector<8x256xf32>
    %6 = arith.truncf %5 : vector<8x256xf32> to vector<8x256xbf16>
    %c0_5 = arith.constant 0 : index
    %c0_6 = arith.constant 0 : index
    %7 = vector.load %arg5[%c0_5, %c0_6] : memref<8x256xbf16, #tpu.memory_space<vmem>>, vector<8x256xbf16>
    tpu.vector_store %arg5[%c0_5, %c0_6], %6 {strides = array<i32>} : memref<8x256xbf16, #tpu.memory_space<vmem>>, vector<8x256xbf16>,
    return
  }
  func.func @transform_0(%arg0: i32, %arg1: i32) -> (i32, i32) {
    %c0_i32 = arith.constant 0 : i32
    %c0_i32_0 = arith.constant 0 : i32
    return %arg0, %c0_i32 : i32, i32
  }
  func.func @transform_1(%arg0: i32, %arg1: i32) -> (i32, i32) {
    %c0_i32 = arith.constant 0 : i32
    %c0_i32_0 = arith.constant 0 : i32
    return %c0_i32, %arg1 : i32, i32
  }
  func.func @transform_2(%arg0: i32, %arg1: i32) -> (i32, i32) {
    %c0_i32 = arith.constant 0 : i32
    %c0_i32_0 = arith.constant 0 : i32
    return %c0_i32, %arg1 : i32, i32
  }
  func.func @transform_3(%arg0: i32, %arg1: i32) -> (i32, i32) {
    %c0_i32 = arith.constant 0 : i32
    return %arg0, %arg1 : i32, i32
  }
}

module attributes {stable_mosaic.version = 11 : i64} {
  func.func @_conv_mm_kernel(%arg0: i32, %arg1: i32, %arg2: memref<32x512xbf16, #tpu.memory_space<vmem>>, %arg3: memref<512x256xbf16, #tpu.memory_space<vmem>>, %arg4: memref<1x256xf32, #tpu.memory_space<vmem>>, %arg5: memref<32x256xbf16, #tpu.memory_space<vmem>>) attributes {dimension_semantics = [#tpu.dimension_semantics<parallel>, #tpu.dimension_semantics<parallel>], iteration_bounds = array<i64: 1, 2>, scalar_prefetch = 0 : i64, scratch_operands = 0 : i64, tpu.core_type = #tpu.core_type<tc>, window_params = [{transform_indices = @transform_0, window_bounds = array<i64: 32, 512>}, {transform_indices = @transform_1, window_bounds = array<i64: 512, 256>}, {transform_indices = @transform_2, window_bounds = array<i64: 1, 256>}, {transform_indices = @transform_3, window_bounds = array<i64: 32, 256>}]} {
    %c0 = arith.constant 0 : index
    %c0_0 = arith.constant 0 : index
    %0 = vector.load %arg2[%c0, %c0_0] : memref<32x512xbf16, #tpu.memory_space<vmem>>, vector<32x512xbf16>
    %c0_1 = arith.constant 0 : index
    %c0_2 = arith.constant 0 : index
    %1 = vector.load %arg3[%c0_1, %c0_2] : memref<512x256xbf16, #tpu.memory_space<vmem>>, vector<512x256xbf16>
    %cst = arith.constant dense<0.000000e+00> : vector<32x256xf32>
    %2 = tpu.matmul %0, %1, %cst {dimension_numbers = #tpu.dot_dimension_numbers<[1], [0], [0], [1], [0, 0, 1, 1], [], []>} : vector<32x512xbf16>, vector<512x256xbf16>, vector<32x256xf32> -> vector<32x256xf32>
    %c0_3 = arith.constant 0 : index
    %c0_4 = arith.constant 0 : index
    %3 = vector.load %arg4[%c0_3, %c0_4] : memref<1x256xf32, #tpu.memory_space<vmem>>, vector<1x256xf32>
    %4 = vector.broadcast %3 : vector<1x256xf32> to vector<32x256xf32>
    %5 = arith.addf %2, %4 : vector<32x256xf32>
    %cst_5 = arith.constant 0.000000e+00 : f32
    %6 = vector.broadcast %cst_5 : f32 to vector<32x256xf32>
    %7 = arith.maximumf %5, %6 : vector<32x256xf32>
    %8 = arith.truncf %7 : vector<32x256xf32> to vector<32x256xbf16>
    %c0_6 = arith.constant 0 : index
    %c0_7 = arith.constant 0 : index
    %9 = vector.load %arg5[%c0_6, %c0_7] : memref<32x256xbf16, #tpu.memory_space<vmem>>, vector<32x256xbf16>
    tpu.vector_store %arg5[%c0_6, %c0_7], %8 {strides = array<i32>} : memref<32x256xbf16, #tpu.memory_space<vmem>>, vector<32x256xbf16>,
    return
  }
  func.func @transform_0(%arg0: i32, %arg1: i32) -> (i32, i32) {
    %c0_i32 = arith.constant 0 : i32
    %c0_i32_0 = arith.constant 0 : i32
    return %arg0, %c0_i32 : i32, i32
  }
  func.func @transform_1(%arg0: i32, %arg1: i32) -> (i32, i32) {
    %c0_i32 = arith.constant 0 : i32
    %c0_i32_0 = arith.constant 0 : i32
    return %c0_i32, %arg1 : i32, i32
  }
  func.func @transform_2(%arg0: i32, %arg1: i32) -> (i32, i32) {
    %c0_i32 = arith.constant 0 : i32
    %c0_i32_0 = arith.constant 0 : i32
    return %c0_i32, %arg1 : i32, i32
  }
  func.func @transform_3(%arg0: i32, %arg1: i32) -> (i32, i32) {
    %c0_i32 = arith.constant 0 : i32
    return %arg0, %arg1 : i32, i32
  }
}

module attributes {stable_mosaic.version = 11 : i64} {
  func.func @_conv_mm_kernel(%arg0: i32, %arg1: i32, %arg2: memref<8x936xbf16, #tpu.memory_space<vmem>>, %arg3: memref<936x128xbf16, #tpu.memory_space<vmem>>, %arg4: memref<1x128xf32, #tpu.memory_space<vmem>>, %arg5: memref<8x128xbf16, #tpu.memory_space<vmem>>) attributes {dimension_semantics = [#tpu.dimension_semantics<parallel>, #tpu.dimension_semantics<parallel>], iteration_bounds = array<i64: 1, 1>, scalar_prefetch = 0 : i64, scratch_operands = 0 : i64, tpu.core_type = #tpu.core_type<tc>, window_params = [{transform_indices = @transform_0, window_bounds = array<i64: 8, 936>}, {transform_indices = @transform_1, window_bounds = array<i64: 936, 128>}, {transform_indices = @transform_2, window_bounds = array<i64: 1, 128>}, {transform_indices = @transform_3, window_bounds = array<i64: 8, 128>}]} {
    %c0 = arith.constant 0 : index
    %c0_0 = arith.constant 0 : index
    %0 = vector.load %arg2[%c0, %c0_0] : memref<8x936xbf16, #tpu.memory_space<vmem>>, vector<8x936xbf16>
    %c0_1 = arith.constant 0 : index
    %c0_2 = arith.constant 0 : index
    %1 = vector.load %arg3[%c0_1, %c0_2] : memref<936x128xbf16, #tpu.memory_space<vmem>>, vector<936x128xbf16>
    %cst = arith.constant dense<0.000000e+00> : vector<8x128xf32>
    %2 = tpu.matmul %0, %1, %cst {dimension_numbers = #tpu.dot_dimension_numbers<[1], [0], [0], [1], [0, 0, 1, 1], [], []>} : vector<8x936xbf16>, vector<936x128xbf16>, vector<8x128xf32> -> vector<8x128xf32>
    %c0_3 = arith.constant 0 : index
    %c0_4 = arith.constant 0 : index
    %3 = vector.load %arg4[%c0_3, %c0_4] : memref<1x128xf32, #tpu.memory_space<vmem>>, vector<1x128xf32>
    %4 = vector.broadcast %3 : vector<1x128xf32> to vector<8x128xf32>
    %5 = arith.addf %2, %4 : vector<8x128xf32>
    %cst_5 = arith.constant 0.000000e+00 : f32
    %6 = vector.broadcast %cst_5 : f32 to vector<8x128xf32>
    %7 = arith.maximumf %5, %6 : vector<8x128xf32>
    %8 = arith.truncf %7 : vector<8x128xf32> to vector<8x128xbf16>
    %c0_6 = arith.constant 0 : index
    %c0_7 = arith.constant 0 : index
    %9 = vector.load %arg5[%c0_6, %c0_7] : memref<8x128xbf16, #tpu.memory_space<vmem>>, vector<8x128xbf16>
    tpu.vector_store %arg5[%c0_6, %c0_7], %8 {strides = array<i32>} : memref<8x128xbf16, #tpu.memory_space<vmem>>, vector<8x128xbf16>,
    return
  }
  func.func @transform_0(%arg0: i32, %arg1: i32) -> (i32, i32) {
    %c0_i32 = arith.constant 0 : i32
    %c0_i32_0 = arith.constant 0 : i32
    return %arg0, %c0_i32 : i32, i32
  }
  func.func @transform_1(%arg0: i32, %arg1: i32) -> (i32, i32) {
    %c0_i32 = arith.constant 0 : i32
    %c0_i32_0 = arith.constant 0 : i32
    return %c0_i32, %arg1 : i32, i32
  }
  func.func @transform_2(%arg0: i32, %arg1: i32) -> (i32, i32) {
    %c0_i32 = arith.constant 0 : i32
    %c0_i32_0 = arith.constant 0 : i32
    return %c0_i32, %arg1 : i32, i32
  }
  func.func @transform_3(%arg0: i32, %arg1: i32) -> (i32, i32) {
    %c0_i32 = arith.constant 0 : i32
    return %arg0, %arg1 : i32, i32
  }
}

module attributes {stable_mosaic.version = 11 : i64} {
  func.func @_avgpool_kernel(%arg0: i32, %arg1: memref<9x8x104xbf16, #tpu.memory_space<vmem>>, %arg2: memref<8x1xf32, #tpu.memory_space<vmem>>, %arg3: memref<8x104xbf16, #tpu.memory_space<vmem>>) attributes {dimension_semantics = [#tpu.dimension_semantics<parallel>], iteration_bounds = array<i64: 1>, scalar_prefetch = 0 : i64, scratch_operands = 0 : i64, tpu.core_type = #tpu.core_type<tc>, window_params = [{transform_indices = @transform_0, window_bounds = array<i64: 9, 8, 104>}, {transform_indices = @transform_1, window_bounds = array<i64: 8, 1>}, {transform_indices = @transform_2, window_bounds = array<i64: 8, 104>}]} {
    %c0 = arith.constant 0 : index
    %c0_0 = arith.constant 0 : index
    %c0_1 = arith.constant 0 : index
    %0 = vector.load %arg1[%c0, %c0_0, %c0_1] : memref<9x8x104xbf16, #tpu.memory_space<vmem>>, vector<9x8x104xbf16>
    %1 = arith.extf %0 : vector<9x8x104xbf16> to vector<9x8x104xf32>
    %cst = arith.constant dense<0.000000e+00> : vector<8x104xf32>
    %2 = vector.multi_reduction <add>, %1, %cst [0] : vector<9x8x104xf32> to vector<8x104xf32>
    %c0_2 = arith.constant 0 : index
    %c0_3 = arith.constant 0 : index
    %3 = vector.load %arg2[%c0_2, %c0_3] : memref<8x1xf32, #tpu.memory_space<vmem>>, vector<8x1xf32>
    %4 = vector.broadcast %3 : vector<8x1xf32> to vector<8x104xf32>
    %5 = arith.mulf %2, %4 : vector<8x104xf32>
    %6 = arith.truncf %5 : vector<8x104xf32> to vector<8x104xbf16>
    %c0_4 = arith.constant 0 : index
    %c0_5 = arith.constant 0 : index
    %7 = vector.load %arg3[%c0_4, %c0_5] : memref<8x104xbf16, #tpu.memory_space<vmem>>, vector<8x104xbf16>
    tpu.vector_store %arg3[%c0_4, %c0_5], %6 {strides = array<i32>} : memref<8x104xbf16, #tpu.memory_space<vmem>>, vector<8x104xbf16>,
    return
  }
  func.func @transform_0(%arg0: i32) -> (i32, i32, i32) {
    %c0_i32 = arith.constant 0 : i32
    %c0_i32_0 = arith.constant 0 : i32
    %c0_i32_1 = arith.constant 0 : i32
    return %c0_i32, %arg0, %c0_i32_0 : i32, i32, i32
  }
  func.func @transform_1(%arg0: i32) -> (i32, i32) {
    %c0_i32 = arith.constant 0 : i32
    %c0_i32_0 = arith.constant 0 : i32
    return %arg0, %c0_i32 : i32, i32
  }
  func.func @transform_2(%arg0: i32) -> (i32, i32) {
    %c0_i32 = arith.constant 0 : i32
    %c0_i32_0 = arith.constant 0 : i32
    return %arg0, %c0_i32 : i32, i32
  }
}

module attributes {stable_mosaic.version = 11 : i64} {
  func.func @_conv_mm_res_kernel(%arg0: i32, %arg1: i32, %arg2: memref<8x416xbf16, #tpu.memory_space<vmem>>, %arg3: memref<416x256xbf16, #tpu.memory_space<vmem>>, %arg4: memref<1x256xf32, #tpu.memory_space<vmem>>, %arg5: memref<8x256xbf16, #tpu.memory_space<vmem>>, %arg6: memref<8x256xbf16, #tpu.memory_space<vmem>>) attributes {dimension_semantics = [#tpu.dimension_semantics<parallel>, #tpu.dimension_semantics<parallel>], iteration_bounds = array<i64: 1, 4>, scalar_prefetch = 0 : i64, scratch_operands = 0 : i64, tpu.core_type = #tpu.core_type<tc>, window_params = [{transform_indices = @transform_0, window_bounds = array<i64: 8, 416>}, {transform_indices = @transform_1, window_bounds = array<i64: 416, 256>}, {transform_indices = @transform_2, window_bounds = array<i64: 1, 256>}, {transform_indices = @transform_3, window_bounds = array<i64: 8, 256>}, {transform_indices = @transform_4, window_bounds = array<i64: 8, 256>}]} {
    %c0 = arith.constant 0 : index
    %c0_0 = arith.constant 0 : index
    %0 = vector.load %arg2[%c0, %c0_0] : memref<8x416xbf16, #tpu.memory_space<vmem>>, vector<8x416xbf16>
    %c0_1 = arith.constant 0 : index
    %c0_2 = arith.constant 0 : index
    %1 = vector.load %arg3[%c0_1, %c0_2] : memref<416x256xbf16, #tpu.memory_space<vmem>>, vector<416x256xbf16>
    %cst = arith.constant dense<0.000000e+00> : vector<8x256xf32>
    %2 = tpu.matmul %0, %1, %cst {dimension_numbers = #tpu.dot_dimension_numbers<[1], [0], [0], [1], [0, 0, 1, 1], [], []>} : vector<8x416xbf16>, vector<416x256xbf16>, vector<8x256xf32> -> vector<8x256xf32>
    %c0_3 = arith.constant 0 : index
    %c0_4 = arith.constant 0 : index
    %3 = vector.load %arg4[%c0_3, %c0_4] : memref<1x256xf32, #tpu.memory_space<vmem>>, vector<1x256xf32>
    %4 = vector.broadcast %3 : vector<1x256xf32> to vector<8x256xf32>
    %5 = arith.addf %2, %4 : vector<8x256xf32>
    %c0_5 = arith.constant 0 : index
    %c0_6 = arith.constant 0 : index
    %6 = vector.load %arg5[%c0_5, %c0_6] : memref<8x256xbf16, #tpu.memory_space<vmem>>, vector<8x256xbf16>
    %7 = arith.extf %6 : vector<8x256xbf16> to vector<8x256xf32>
    %8 = arith.addf %5, %7 : vector<8x256xf32>
    %cst_7 = arith.constant 0.000000e+00 : f32
    %9 = vector.broadcast %cst_7 : f32 to vector<8x256xf32>
    %10 = arith.maximumf %8, %9 : vector<8x256xf32>
    %11 = arith.truncf %10 : vector<8x256xf32> to vector<8x256xbf16>
    %c0_8 = arith.constant 0 : index
    %c0_9 = arith.constant 0 : index
    %12 = vector.load %arg6[%c0_8, %c0_9] : memref<8x256xbf16, #tpu.memory_space<vmem>>, vector<8x256xbf16>
    tpu.vector_store %arg6[%c0_8, %c0_9], %11 {strides = array<i32>} : memref<8x256xbf16, #tpu.memory_space<vmem>>, vector<8x256xbf16>,
    return
  }
  func.func @transform_0(%arg0: i32, %arg1: i32) -> (i32, i32) {
    %c0_i32 = arith.constant 0 : i32
    %c0_i32_0 = arith.constant 0 : i32
    return %arg0, %c0_i32 : i32, i32
  }
  func.func @transform_1(%arg0: i32, %arg1: i32) -> (i32, i32) {
    %c0_i32 = arith.constant 0 : i32
    %c0_i32_0 = arith.constant 0 : i32
    return %c0_i32, %arg1 : i32, i32
  }
  func.func @transform_2(%arg0: i32, %arg1: i32) -> (i32, i32) {
    %c0_i32 = arith.constant 0 : i32
    %c0_i32_0 = arith.constant 0 : i32
    return %c0_i32, %arg1 : i32, i32
  }
  func.func @transform_3(%arg0: i32, %arg1: i32) -> (i32, i32) {
    %c0_i32 = arith.constant 0 : i32
    return %arg0, %arg1 : i32, i32
  }
  func.func @transform_4(%arg0: i32, %arg1: i32) -> (i32, i32) {
    %c0_i32 = arith.constant 0 : i32
    return %arg0, %arg1 : i32, i32
  }
}

</mosaic_0001>

<bundles_post_ra>
// kernel: fwd.32
= control target key start
LH: loop header
LB: loop body
LE: loop exit
PB: predicated region body
PF: predicated region fallthrough
CT: control target
= control target key end

     0   :  { %vm358_vm0 = vcmask 1044480   ;;  %vm359_vm1 = vcmask 1045504   ;;  %vm261_vm2 = vcmask 220160   ;;  %v1569_v1 = vmov 65535   ;;  %s1889_s1 = inlined_call_operand.vmem [shape: bf16[27,128], index: 1, kind: input, shape index: {}]   ;;  %s1890_s0 = inlined_call_operand.vmem [shape: bf16[512,27], index: 0, kind: input, shape index: {}]   ;;  %s1891_s2 = inlined_call_operand.vmem [shape: f32[1,128], index: 2, kind: input, shape index: {}]   ;;  %s1892_s3 = inlined_call_operand.vmem [shape: bf16[512,128], index: 3, kind: output, shape index: {}]  }
   0x1   :  { %v1535_v0 = vld [vmem:[%s1889_s1] sm:$0xff]   ;;  %v360_v2 = vsel %vm358_vm0, 4294967295, %v1569_v1  ;;  %v1536_v3 = vld [vmem:[%s1889_s1 + $0x8] sm:$0x3f]   ;;  %v1541_v10 = vld [vmem:[%s1890_s0 + $0x10] sm:$0xff]  }
   0x2   :  { %1462 = vmatprep.subr.bf16.mxu0 %v1535_v0  ;;  %1530 = vmatprep.subr.bf16.mxu1 %v1535_v0  ;;  %v361_v4 = vsel %vm359_vm1, %v360_v2, 0  ;;  %v1537_v5 = vld [vmem:[%s1890_s0] sm:$0xff]   ;;  %v1539_v8 = vld [vmem:[%s1890_s0 + $0x8] sm:$0xff]   ;;  %v1542_v11 = vld [vmem:[%s1890_s0 + $0x90] sm:$0xff]  }
   0x3   :  { %1463 = vmatpush3.bf16.msra.mxu0 %v1535_v0  ;;  %1532 = vmatpush3.bf16.msra.mxu1 %v1535_v0  ;;  %v363_v6 = vand.u32 %v1536_v3, %v361_v4  ;;  %v1538_v7 = vld [vmem:[%s1890_s0 + $0x80] sm:$0xff]   ;;  %v1540_v9 = vld [vmem:[%s1890_s0 + $0x88] sm:$0xff]   ;;  %v1543_v12 = vld [vmem:[%s1890_s0 + $0x18] sm:$0xff]  }
   0x4   :  { %1466 = vmatprep.mubr.msk.bf16.mxu0 %vm261_vm2, %v1537_v5  ;;  %1498 = vmatprep.mubr.msk.bf16.mxu1 %vm261_vm2, %v1538_v7  ;;  %v1544_v13 = vld [vmem:[%s1890_s0 + $0x98] sm:$0xff]   ;;  %v1545_v14 = vld [vmem:[%s1890_s0 + $0x20] sm:$0xff]   ;;  %v1547_v16 = vld [vmem:[%s1890_s0 + $0x28] sm:$0xff]  }
   0x5   :  { %1464 = vmatprep.subr.bf16.mxu0 %v363_v6  ;;  %1531 = vmatprep.subr.bf16.mxu1 %v363_v6  ;;  %v1546_v15 = vld [vmem:[%s1890_s0 + $0xa0] sm:$0xff]   ;;  %v1548_v17 = vld [vmem:[%s1890_s0 + $0xa8] sm:$0xff]   ;;  %v1549_v18 = vld [vmem:[%s1890_s0 + $0x30] sm:$0xff]  }
   0x6   :  { %v1550_v19 = vld [vmem:[%s1890_s0 + $0xb0] sm:$0xff]   ;;  %v1551_v20 = vld [vmem:[%s1890_s0 + $0x38] sm:$0xff]   ;;  %v1553_v22 = vld [vmem:[%s1890_s0 + $0x40] sm:$0xff]  }
   0x7   :  { %1465 = vmatpush3.bf16.msra.mxu0 %v363_v6  ;;  %1533 = vmatpush3.bf16.msra.mxu1 %v363_v6  ;;  %v1552_v21 = vld [vmem:[%s1890_s0 + $0xb8] sm:$0xff]   ;;  %v1554_v23 = vld [vmem:[%s1890_s0 + $0xc0] sm:$0xff]   ;;  %v1555_v24 = vld [vmem:[%s1890_s0 + $0x48] sm:$0xff]  }
   0x8   :  { %v1556_v25 = vld [vmem:[%s1890_s0 + $0xc8] sm:$0xff]   ;;  %v1557_v26 = vld [vmem:[%s1890_s0 + $0x50] sm:$0xff]   ;;  %v1559_v28 = vld [vmem:[%s1890_s0 + $0x58] sm:$0xff]  }
   0x9   :  { %v1558_v27 = vld [vmem:[%s1890_s0 + $0xd0] sm:$0xff]   ;;  %v1560_v29 = vld [vmem:[%s1890_s0 + $0xd8] sm:$0xff]   ;;  %v1561_v30 = vld [vmem:[%s1890_s0 + $0x60] sm:$0xff]  }
   0xa   :  { %1467 = vmatmul.mubr.msk.bf16.vlgmr.msra.gmra.mrb[0].mxu0 %vm261_vm2, %v1539_v8  ;;  %1499 = vmatmul.mubr.msk.bf16.vlgmr.msra.gmra.mrb[0].mxu1 %vm261_vm2, %v1540_v9  ;;  %v1562_v31 = vld [vmem:[%s1890_s0 + $0xe0] sm:$0xff]   ;;  %v1563_v32 = vld [vmem:[%s1890_s0 + $0x68] sm:$0xff]   ;;  %v1565_v34 = vld [vmem:[%s1890_s0 + $0x70] sm:$0xff]  }
   0xb   :  { %1470 = vmatprep.mubr.msk.bf16.mxu0 %vm261_vm2, %v1541_v10  ;;  %1502 = vmatprep.mubr.msk.bf16.mxu1 %vm261_vm2, %v1542_v11  ;;  %v1564_v33 = vld [vmem:[%s1890_s0 + $0xe8] sm:$0xff]   ;;  %v1566_v35 = vld [vmem:[%s1890_s0 + $0xf0] sm:$0xff]   ;;  %v1567_v36 = vld [vmem:[%s1890_s0 + $0x78] sm:$0xff]  }
   0xc   :  { %v1568_v37 = vld [vmem:[%s1890_s0 + $0xf8] sm:$0xff]   ;;  %v1727_v38 = vld [vmem:[%s1891_s2] ss:$0 sm:$0xff] }
  0x12   :  { %1471 = vmatmul.mubr.msk.bf16.gmra.mrb[4].mxu0 %vm261_vm2, %v1543_v12  ;;  %1503 = vmatmul.mubr.msk.bf16.gmra.mrb[4].mxu1 %vm261_vm2, %v1544_v13 }
  0x13   :  { %1474 = vmatprep.mubr.msk.bf16.mxu0 %vm261_vm2, %v1545_v14  ;;  %1506 = vmatprep.mubr.msk.bf16.mxu1 %vm261_vm2, %v1546_v15 }
  0x1a   :  { %1475 = vmatmul.mubr.msk.bf16.gmra.mrb[8].mxu0 %vm261_vm2, %v1547_v16  ;;  %1507 = vmatmul.mubr.msk.bf16.gmra.mrb[8].mxu1 %vm261_vm2, %v1548_v17 }
  0x1b   :  { %1478 = vmatprep.mubr.msk.bf16.mxu0 %vm261_vm2, %v1549_v18  ;;  %1510 = vmatprep.mubr.msk.bf16.mxu1 %vm261_vm2, %v1550_v19 }
  0x22   :  { %1479 = vmatmul.mubr.msk.bf16.gmra.mrb[12].mxu0 %vm261_vm2, %v1551_v20  ;;  %1511 = vmatmul.mubr.msk.bf16.gmra.mrb[12].mxu1 %vm261_vm2, %v1552_v21 }
  0x23   :  { %1482 = vmatprep.mubr.msk.bf16.mxu0 %vm261_vm2, %v1553_v22  ;;  %1514 = vmatprep.mubr.msk.bf16.mxu1 %vm261_vm2, %v1554_v23 }
  0x2a   :  { %1483 = vmatmul.mubr.msk.bf16.gmra.mrb[16].mxu0 %vm261_vm2, %v1555_v24  ;;  %1515 = vmatmul.mubr.msk.bf16.gmra.mrb[16].mxu1 %vm261_vm2, %v1556_v25 }
  0x2b   :  { %1486 = vmatprep.mubr.msk.bf16.mxu0 %vm261_vm2, %v1557_v26  ;;  %1518 = vmatprep.mubr.msk.bf16.mxu1 %vm261_vm2, %v1558_v27 }
  0x32   :  { %1487 = vmatmul.mubr.msk.bf16.gmra.mrb[20].mxu0 %vm261_vm2, %v1559_v28  ;;  %1519 = vmatmul.mubr.msk.bf16.gmra.mrb[20].mxu1 %vm261_vm2, %v1560_v29 }
  0x33   :  { %1490 = vmatprep.mubr.msk.bf16.mxu0 %vm261_vm2, %v1561_v30  ;;  %1522 = vmatprep.mubr.msk.bf16.mxu1 %vm261_vm2, %v1562_v31 }
  0x3a   :  { %1491 = vmatmul.mubr.msk.bf16.gmra.mrb[24].mxu0 %vm261_vm2, %v1563_v32  ;;  %1523 = vmatmul.mubr.msk.bf16.gmra.mrb[24].mxu1 %vm261_vm2, %v1564_v33 }
  0x3b   :  { %1494 = vmatprep.mubr.msk.bf16.mxu0 %vm261_vm2, %v1565_v34  ;;  %1526 = vmatprep.mubr.msk.bf16.mxu1 %vm261_vm2, %v1566_v35 }
  0x42   :  { %1495 = vmatmul.mubr.msk.bf16.gmra.mrb[28].mxu0 %vm261_vm2, %v1567_v36  ;;  %1527 = vmatmul.mubr.msk.bf16.gmra.mrb[28].mxu1 %vm261_vm2, %v1568_v37 }
  0xdd   :  { %v1468_v39 = vpop.f32.mrb[0].mxu0  ;;  %v1500_v40 = vpop.f32.mrb[0].mxu1 }
  0xde   :  { %v408_v41 = vadd.f32 %v1468_v39, %v1727_v38  ;;  %v536_v42 = vadd.f32 %v1500_v40, %v1727_v38  ;;  %v399_v43 = vpop.f32.mrb[1].mxu0  ;;  %v527_v44 = vpop.f32.mrb[1].mxu1 }
  0xdf   :  { %v400_v45 = vadd.f32 %v1727_v38, %v399_v43  ;;  %v528_v46 = vadd.f32 %v1727_v38, %v527_v44  ;;  %v1469_v47 = vpop.f32.mrb[2].mxu0  ;;  %v1501_v48 = vpop.f32.mrb[2].mxu1 }
  0xe0   :  { %v411_v49 = vadd.f32 %v1469_v47, %v1727_v38  ;;  %v539_v50 = vadd.f32 %v1501_v48, %v1727_v38  ;;  %v402_v51 = vpop.f32.mrb[3].mxu0  ;;  %v530_v52 = vpop.f32.mrb[3].mxu1  ;;  %v656_v55 = vmax.f32 %v408_v41, 0.0  ;;  %v688_v56 = vmax.f32 %v536_v42, 0.0 }
  0xe1   :  { %v403_v53 = vadd.f32 %v1727_v38, %v402_v51  ;;  %v531_v54 = vadd.f32 %v1727_v38, %v530_v52  ;;  %v654_v59 = vmax.f32 %v400_v45, 0.0  ;;  %v686_v60 = vmax.f32 %v528_v46, 0.0 }
  0xe2   :  { %v657_v57 = vmax.f32 %v411_v49, 0.0  ;;  %v689_v58 = vmax.f32 %v539_v50, 0.0 }
  0xe3   :  { %v655_v61 = vmax.f32 %v403_v53, 0.0  ;;  %v687_v62 = vmax.f32 %v531_v54, 0.0 }
  0xe4   :  { %v1245_v63 = vpack.c.bf16 %v657_v57, %v656_v55  ;;  %v1325_v0 = vpack.c.bf16 %v689_v58, %v688_v56 }
  0xe5   :  { %v1240_v1 = vpack.c.bf16 %v655_v61, %v654_v59  ;;  %v1320_v2 = vpack.c.bf16 %v687_v62, %v686_v60  ;;  %v1472_v3 = vpop.f32.mrb[4].mxu0  ;;  %v1504_v4 = vpop.f32.mrb[4].mxu1 }
  0xe6   :  { %1397 = vst [vmem:[%s1892_s3 + $0x8] sm:$0xff] %v1245_v63   ;;  %1413 = vst [vmem:[%s1892_s3 + $0x88] sm:$0xff] %v1325_v0   ;;  %v424_v5 = vadd.f32 %v1472_v3, %v1727_v38  ;;  %v552_v6 = vadd.f32 %v1504_v4, %v1727_v38  ;;  %v415_v7 = vpop.f32.mrb[5].mxu0  ;;  %v543_v8 = vpop.f32.mrb[5].mxu1 }
  0xe7   :  { %1241 = vst [vmem:[%s1892_s3] sm:$0xff] %v1240_v1   ;;  %1412 = vst [vmem:[%s1892_s3 + $0x80] sm:$0xff] %v1320_v2   ;;  %v416_v9 = vadd.f32 %v1727_v38, %v415_v7  ;;  %v544_v10 = vadd.f32 %v1727_v38, %v543_v8  ;;  %v1473_v11 = vpop.f32.mrb[6].mxu0  ;;  %v1505_v12 = vpop.f32.mrb[6].mxu1 }
  0xe8   :  { %v427_v13 = vadd.f32 %v1473_v11, %v1727_v38  ;;  %v555_v14 = vadd.f32 %v1505_v12, %v1727_v38  ;;  %v418_v15 = vpop.f32.mrb[7].mxu0  ;;  %v546_v16 = vpop.f32.mrb[7].mxu1  ;;  %v660_v19 = vmax.f32 %v424_v5, 0.0  ;;  %v692_v20 = vmax.f32 %v552_v6, 0.0 }
  0xe9   :  { %v419_v17 = vadd.f32 %v1727_v38, %v418_v15  ;;  %v547_v18 = vadd.f32 %v1727_v38, %v546_v16  ;;  %v658_v23 = vmax.f32 %v416_v9, 0.0  ;;  %v690_v24 = vmax.f32 %v544_v10, 0.0 }
  0xea   :  { %v661_v21 = vmax.f32 %v427_v13, 0.0  ;;  %v693_v22 = vmax.f32 %v555_v14, 0.0 }
  0xeb   :  { %v659_v25 = vmax.f32 %v419_v17, 0.0  ;;  %v691_v26 = vmax.f32 %v547_v18, 0.0 }
  0xec   :  { %v1255_v27 = vpack.c.bf16 %v661_v21, %v660_v19  ;;  %v1335_v28 = vpack.c.bf16 %v693_v22, %v692_v20 }
  0xed   :  { %v1250_v29 = vpack.c.bf16 %v659_v25, %v658_v23  ;;  %v1330_v30 = vpack.c.bf16 %v691_v26, %v690_v24  ;;  %v1476_v31 = vpop.f32.mrb[8].mxu0  ;;  %v1508_v32 = vpop.f32.mrb[8].mxu1 }
  0xee   :  { %1399 = vst [vmem:[%s1892_s3 + $0x18] sm:$0xff] %v1255_v27   ;;  %1415 = vst [vmem:[%s1892_s3 + $0x98] sm:$0xff] %v1335_v28   ;;  %v440_v33 = vadd.f32 %v1476_v31, %v1727_v38  ;;  %v568_v34 = vadd.f32 %v1508_v32, %v1727_v38  ;;  %v431_v35 = vpop.f32.mrb[9].mxu0  ;;  %v559_v36 = vpop.f32.mrb[9].mxu1 }
  0xef   :  { %1398 = vst [vmem:[%s1892_s3 + $0x10] sm:$0xff] %v1250_v29   ;;  %1414 = vst [vmem:[%s1892_s3 + $0x90] sm:$0xff] %v1330_v30   ;;  %v432_v37 = vadd.f32 %v1727_v38, %v431_v35  ;;  %v560_v39 = vadd.f32 %v1727_v38, %v559_v36  ;;  %v1477_v40 = vpop.f32.mrb[10].mxu0  ;;  %v1509_v41 = vpop.f32.mrb[10].mxu1 }
  0xf0   :  { %v443_v42 = vadd.f32 %v1477_v40, %v1727_v38  ;;  %v571_v43 = vadd.f32 %v1509_v41, %v1727_v38  ;;  %v434_v44 = vpop.f32.mrb[11].mxu0  ;;  %v562_v45 = vpop.f32.mrb[11].mxu1  ;;  %v664_v48 = vmax.f32 %v440_v33, 0.0  ;;  %v696_v49 = vmax.f32 %v568_v34, 0.0 }
  0xf1   :  { %v435_v46 = vadd.f32 %v1727_v38, %v434_v44  ;;  %v563_v47 = vadd.f32 %v1727_v38, %v562_v45  ;;  %v662_v52 = vmax.f32 %v432_v37, 0.0  ;;  %v694_v53 = vmax.f32 %v560_v39, 0.0 }
  0xf2   :  { %v665_v50 = vmax.f32 %v443_v42, 0.0  ;;  %v697_v51 = vmax.f32 %v571_v43, 0.0 }
  0xf3   :  { %v663_v54 = vmax.f32 %v435_v46, 0.0  ;;  %v695_v55 = vmax.f32 %v563_v47, 0.0 }
  0xf4   :  { %v1265_v56 = vpack.c.bf16 %v665_v50, %v664_v48  ;;  %v1345_v57 = vpack.c.bf16 %v697_v51, %v696_v49 }
  0xf5   :  { %v1260_v58 = vpack.c.bf16 %v663_v54, %v662_v52  ;;  %v1340_v59 = vpack.c.bf16 %v695_v55, %v694_v53  ;;  %v1480_v60 = vpop.f32.mrb[12].mxu0  ;;  %v1512_v61 = vpop.f32.mrb[12].mxu1 }
  0xf6   :  { %1401 = vst [vmem:[%s1892_s3 + $0x28] sm:$0xff] %v1265_v56   ;;  %1417 = vst [vmem:[%s1892_s3 + $0xa8] sm:$0xff] %v1345_v57   ;;  %v456_v62 = vadd.f32 %v1480_v60, %v1727_v38  ;;  %v584_v63 = vadd.f32 %v1512_v61, %v1727_v38  ;;  %v447_v0 = vpop.f32.mrb[13].mxu0  ;;  %v575_v1 = vpop.f32.mrb[13].mxu1 }
  0xf7   :  { %1400 = vst [vmem:[%s1892_s3 + $0x20] sm:$0xff] %v1260_v58   ;;  %1416 = vst [vmem:[%s1892_s3 + $0xa0] sm:$0xff] %v1340_v59   ;;  %v448_v2 = vadd.f32 %v1727_v38, %v447_v0  ;;  %v576_v3 = vadd.f32 %v1727_v38, %v575_v1  ;;  %v1481_v4 = vpop.f32.mrb[14].mxu0  ;;  %v1513_v5 = vpop.f32.mrb[14].mxu1 }
  0xf8   :  { %v459_v6 = vadd.f32 %v1481_v4, %v1727_v38  ;;  %v587_v7 = vadd.f32 %v1513_v5, %v1727_v38  ;;  %v450_v8 = vpop.f32.mrb[15].mxu0  ;;  %v578_v9 = vpop.f32.mrb[15].mxu1  ;;  %v668_v12 = vmax.f32 %v456_v62, 0.0  ;;  %v700_v13 = vmax.f32 %v584_v63, 0.0 }
  0xf9   :  { %v451_v10 = vadd.f32 %v1727_v38, %v450_v8  ;;  %v579_v11 = vadd.f32 %v1727_v38, %v578_v9  ;;  %v666_v16 = vmax.f32 %v448_v2, 0.0  ;;  %v698_v17 = vmax.f32 %v576_v3, 0.0 }
  0xfa   :  { %v669_v14 = vmax.f32 %v459_v6, 0.0  ;;  %v701_v15 = vmax.f32 %v587_v7, 0.0 }
  0xfb   :  { %v667_v18 = vmax.f32 %v451_v10, 0.0  ;;  %v699_v19 = vmax.f32 %v579_v11, 0.0 }
  0xfc   :  { %v1275_v20 = vpack.c.bf16 %v669_v14, %v668_v12  ;;  %v1355_v21 = vpack.c.bf16 %v701_v15, %v700_v13 }
  0xfd   :  { %v1270_v22 = vpack.c.bf16 %v667_v18, %v666_v16  ;;  %v1350_v23 = vpack.c.bf16 %v699_v19, %v698_v17  ;;  %v1484_v24 = vpop.f32.mrb[16].mxu0  ;;  %v1516_v25 = vpop.f32.mrb[16].mxu1 }
  0xfe   :  { %1403 = vst [vmem:[%s1892_s3 + $0x38] sm:$0xff] %v1275_v20   ;;  %1419 = vst [vmem:[%s1892_s3 + $0xb8] sm:$0xff] %v1355_v21   ;;  %v472_v26 = vadd.f32 %v1484_v24, %v1727_v38  ;;  %v600_v27 = vadd.f32 %v1516_v25, %v1727_v38  ;;  %v463_v28 = vpop.f32.mrb[17].mxu0  ;;  %v591_v29 = vpop.f32.mrb[17].mxu1 }
  0xff   :  { %1402 = vst [vmem:[%s1892_s3 + $0x30] sm:$0xff] %v1270_v22   ;;  %1418 = vst [vmem:[%s1892_s3 + $0xb0] sm:$0xff] %v1350_v23   ;;  %v464_v30 = vadd.f32 %v1727_v38, %v463_v28  ;;  %v592_v31 = vadd.f32 %v1727_v38, %v591_v29  ;;  %v1485_v32 = vpop.f32.mrb[18].mxu0  ;;  %v1517_v33 = vpop.f32.mrb[18].mxu1 }
 0x100   :  { %v475_v34 = vadd.f32 %v1485_v32, %v1727_v38  ;;  %v603_v35 = vadd.f32 %v1517_v33, %v1727_v38  ;;  %v466_v36 = vpop.f32.mrb[19].mxu0  ;;  %v594_v37 = vpop.f32.mrb[19].mxu1  ;;  %v672_v41 = vmax.f32 %v472_v26, 0.0  ;;  %v704_v42 = vmax.f32 %v600_v27, 0.0 }
 0x101   :  { %v467_v39 = vadd.f32 %v1727_v38, %v466_v36  ;;  %v595_v40 = vadd.f32 %v1727_v38, %v594_v37  ;;  %v670_v45 = vmax.f32 %v464_v30, 0.0  ;;  %v702_v46 = vmax.f32 %v592_v31, 0.0 }
 0x102   :  { %v673_v43 = vmax.f32 %v475_v34, 0.0  ;;  %v705_v44 = vmax.f32 %v603_v35, 0.0 }
 0x103   :  { %v671_v47 = vmax.f32 %v467_v39, 0.0  ;;  %v703_v48 = vmax.f32 %v595_v40, 0.0 }
 0x104   :  { %v1285_v49 = vpack.c.bf16 %v673_v43, %v672_v41  ;;  %v1365_v50 = vpack.c.bf16 %v705_v44, %v704_v42 }
 0x105   :  { %v1280_v51 = vpack.c.bf16 %v671_v47, %v670_v45  ;;  %v1360_v52 = vpack.c.bf16 %v703_v48, %v702_v46  ;;  %v1488_v53 = vpop.f32.mrb[20].mxu0  ;;  %v1520_v54 = vpop.f32.mrb[20].mxu1 }
 0x106   :  { %1405 = vst [vmem:[%s1892_s3 + $0x48] sm:$0xff] %v1285_v49   ;;  %1421 = vst [vmem:[%s1892_s3 + $0xc8] sm:$0xff] %v1365_v50   ;;  %v488_v55 = vadd.f32 %v1488_v53, %v1727_v38  ;;  %v616_v56 = vadd.f32 %v1520_v54, %v1727_v38  ;;  %v479_v57 = vpop.f32.mrb[21].mxu0  ;;  %v607_v58 = vpop.f32.mrb[21].mxu1 }
 0x107   :  { %1404 = vst [vmem:[%s1892_s3 + $0x40] sm:$0xff] %v1280_v51   ;;  %1420 = vst [vmem:[%s1892_s3 + $0xc0] sm:$0xff] %v1360_v52   ;;  %v480_v59 = vadd.f32 %v1727_v38, %v479_v57  ;;  %v608_v60 = vadd.f32 %v1727_v38, %v607_v58  ;;  %v1489_v61 = vpop.f32.mrb[22].mxu0  ;;  %v1521_v62 = vpop.f32.mrb[22].mxu1 }
 0x108   :  { %v491_v63 = vadd.f32 %v1489_v61, %v1727_v38  ;;  %v619_v0 = vadd.f32 %v1521_v62, %v1727_v38  ;;  %v482_v1 = vpop.f32.mrb[23].mxu0  ;;  %v610_v2 = vpop.f32.mrb[23].mxu1  ;;  %v676_v5 = vmax.f32 %v488_v55, 0.0  ;;  %v708_v6 = vmax.f32 %v616_v56, 0.0 }
 0x109   :  { %v483_v3 = vadd.f32 %v1727_v38, %v482_v1  ;;  %v611_v4 = vadd.f32 %v1727_v38, %v610_v2  ;;  %v674_v9 = vmax.f32 %v480_v59, 0.0  ;;  %v706_v10 = vmax.f32 %v608_v60, 0.0 }
 0x10a   :  { %v677_v7 = vmax.f32 %v491_v63, 0.0  ;;  %v709_v8 = vmax.f32 %v619_v0, 0.0 }
 0x10b   :  { %v675_v11 = vmax.f32 %v483_v3, 0.0  ;;  %v707_v12 = vmax.f32 %v611_v4, 0.0 }
 0x10c   :  { %v1295_v13 = vpack.c.bf16 %v677_v7, %v676_v5  ;;  %v1375_v14 = vpack.c.bf16 %v709_v8, %v708_v6 }
 0x10d   :  { %v1290_v15 = vpack.c.bf16 %v675_v11, %v674_v9  ;;  %v1370_v16 = vpack.c.bf16 %v707_v12, %v706_v10  ;;  %v1492_v17 = vpop.f32.mrb[24].mxu0  ;;  %v1524_v18 = vpop.f32.mrb[24].mxu1 }
 0x10e   :  { %1407 = vst [vmem:[%s1892_s3 + $0x58] sm:$0xff] %v1295_v13   ;;  %1423 = vst [vmem:[%s1892_s3 + $0xd8] sm:$0xff] %v1375_v14   ;;  %v504_v19 = vadd.f32 %v1492_v17, %v1727_v38  ;;  %v632_v20 = vadd.f32 %v1524_v18, %v1727_v38  ;;  %v495_v21 = vpop.f32.mrb[25].mxu0  ;;  %v623_v22 = vpop.f32.mrb[25].mxu1 }
 0x10f   :  { %1406 = vst [vmem:[%s1892_s3 + $0x50] sm:$0xff] %v1290_v15   ;;  %1422 = vst [vmem:[%s1892_s3 + $0xd0] sm:$0xff] %v1370_v16   ;;  %v496_v23 = vadd.f32 %v1727_v38, %v495_v21  ;;  %v624_v24 = vadd.f32 %v1727_v38, %v623_v22  ;;  %v1493_v25 = vpop.f32.mrb[26].mxu0  ;;  %v1525_v26 = vpop.f32.mrb[26].mxu1 }
 0x110   :  { %v507_v27 = vadd.f32 %v1493_v25, %v1727_v38  ;;  %v635_v28 = vadd.f32 %v1525_v26, %v1727_v38  ;;  %v498_v29 = vpop.f32.mrb[27].mxu0  ;;  %v626_v30 = vpop.f32.mrb[27].mxu1  ;;  %v680_v33 = vmax.f32 %v504_v19, 0.0  ;;  %v712_v34 = vmax.f32 %v632_v20, 0.0 }
 0x111   :  { %v499_v31 = vadd.f32 %v1727_v38, %v498_v29  ;;  %v627_v32 = vadd.f32 %v1727_v38, %v626_v30  ;;  %v678_v37 = vmax.f32 %v496_v23, 0.0  ;;  %v710_v39 = vmax.f32 %v624_v24, 0.0 }
 0x112   :  { %v681_v35 = vmax.f32 %v507_v27, 0.0  ;;  %v713_v36 = vmax.f32 %v635_v28, 0.0 }
 0x113   :  { %v679_v40 = vmax.f32 %v499_v31, 0.0  ;;  %v711_v41 = vmax.f32 %v627_v32, 0.0 }
 0x114   :  { %v1305_v42 = vpack.c.bf16 %v681_v35, %v680_v33  ;;  %v1385_v43 = vpack.c.bf16 %v713_v36, %v712_v34 }
 0x115   :  { %v1300_v44 = vpack.c.bf16 %v679_v40, %v678_v37  ;;  %v1380_v45 = vpack.c.bf16 %v711_v41, %v710_v39  ;;  %v1496_v46 = vpop.f32.mrb[28].mxu0  ;;  %v1528_v47 = vpop.f32.mrb[28].mxu1 }
 0x116   :  { %1409 = vst [vmem:[%s1892_s3 + $0x68] sm:$0xff] %v1305_v42   ;;  %1425 = vst [vmem:[%s1892_s3 + $0xe8] sm:$0xff] %v1385_v43   ;;  %v520_v48 = vadd.f32 %v1496_v46, %v1727_v38  ;;  %v648_v49 = vadd.f32 %v1528_v47, %v1727_v38  ;;  %v511_v50 = vpop.f32.mrb[29].mxu0  ;;  %v639_v51 = vpop.f32.mrb[29].mxu1 }
 0x117   :  { %1408 = vst [vmem:[%s1892_s3 + $0x60] sm:$0xff] %v1300_v44   ;;  %1424 = vst [vmem:[%s1892_s3 + $0xe0] sm:$0xff] %v1380_v45   ;;  %v512_v52 = vadd.f32 %v1727_v38, %v511_v50  ;;  %v640_v53 = vadd.f32 %v1727_v38, %v639_v51  ;;  %v1497_v54 = vpop.f32.mrb[30].mxu0  ;;  %v1529_v55 = vpop.f32.mrb[30].mxu1 }
 0x118   :  { %v523_v56 = vadd.f32 %v1497_v54, %v1727_v38  ;;  %v651_v57 = vadd.f32 %v1529_v55, %v1727_v38  ;;  %v514_v58 = vpop.f32.mrb[31].mxu0  ;;  %v642_v59 = vpop.f32.mrb[31].mxu1  ;;  %v684_v62 = vmax.f32 %v520_v48, 0.0  ;;  %v716_v63 = vmax.f32 %v648_v49, 0.0 }
 0x119   :  { %v515_v60 = vadd.f32 %v1727_v38, %v514_v58  ;;  %v643_v61 = vadd.f32 %v1727_v38, %v642_v59  ;;  %v682_v2 = vmax.f32 %v512_v52, 0.0  ;;  %v714_v3 = vmax.f32 %v640_v53, 0.0 }
 0x11a   :  { %v685_v0 = vmax.f32 %v523_v56, 0.0  ;;  %v717_v1 = vmax.f32 %v651_v57, 0.0 }
 0x11b   :  { %v683_v4 = vmax.f32 %v515_v60, 0.0  ;;  %v715_v5 = vmax.f32 %v643_v61, 0.0 }
 0x11c   :  { %v1315_v6 = vpack.c.bf16 %v685_v0, %v684_v62  ;;  %v1395_v7 = vpack.c.bf16 %v717_v1, %v716_v63 }
 0x11d   :  { %v1310_v8 = vpack.c.bf16 %v683_v4, %v682_v2  ;;  %v1390_v9 = vpack.c.bf16 %v715_v5, %v714_v3 }
 0x11e   :  { %1411 = vst [vmem:[%s1892_s3 + $0x78] sm:$0xff] %v1315_v6   ;;  %1427 = vst [vmem:[%s1892_s3 + $0xf8] sm:$0xff] %v1395_v7  }
 0x11f   :  { %1410 = vst [vmem:[%s1892_s3 + $0x70] sm:$0xff] %v1310_v8   ;;  %1426 = vst [vmem:[%s1892_s3 + $0xf0] sm:$0xff] %v1390_v9  }

// kernel: fwd.33
= control target key start
LH: loop header
LB: loop body
LE: loop exit
PB: predicated region body
PF: predicated region fallthrough
CT: control target
= control target key end

     0   :  { %v2584_v0 = vmov 0   ;;  %vm774_vm0 = vcmask 261120   ;;  %s3302_s1 = inlined_call_operand.vmem [shape: bf16[288,128], index: 1, kind: input, shape index: {}]   ;;  %s3303_s0 = inlined_call_operand.vmem [shape: bf16[512,288], index: 0, kind: input, shape index: {}]   ;;  %s3304_s2 = inlined_call_operand.vmem [shape: f32[1,128], index: 2, kind: input, shape index: {}]   ;;  %s3305_s3 = inlined_call_operand.vmem [shape: bf16[512,128], index: 3, kind: output, shape index: {}]  }
   0x1   :  { %871 = vmatprep.subr.bf16.mxu0 %v2584_v0  ;;  %2405 = vmatprep.subr.bf16.mxu1 %v2584_v0  ;;  %v2438_v1 = vld [vmem:[%s3302_s1] sm:$0xff]   ;;  %v2439_v2 = vld [vmem:[%s3302_s1 + $0x8] sm:$0xff]   ;;  %v2440_v3 = vld [vmem:[%s3302_s1 + $0x10] sm:$0xff]  }
   0x2   :  { %872 = vmatpush1.bf16.msra.mxu0 %v2438_v1  ;;  %2421 = vmatpush1.bf16.msra.mxu1 %v2438_v1  ;;  %v2441_v4 = vld [vmem:[%s3302_s1 + $0x18] sm:$0xff]   ;;  %v2442_v5 = vld [vmem:[%s3302_s1 + $0x20] sm:$0xff]   ;;  %v2443_v7 = vld [vmem:[%s3302_s1 + $0x28] sm:$0xff]  }
   0x3   :  { %873 = vmatprep.subr.bf16.mxu0 %v2584_v0  ;;  %2406 = vmatprep.subr.bf16.mxu1 %v2584_v0  ;;  %v2456_v6 = vld [vmem:[%s3303_s0 + $0x4] ss:$12 sps:$4 sm:$0xff]   ;;  %v2445_v10 = vld [vmem:[%s3302_s1 + $0x38] sm:$0xff]   ;;  %v2447_v12 = vld [vmem:[%s3302_s1 + $0x48] sm:$0xff]  }
   0x4   :  { %v2459_v8 = vld [vmem:[%s3303_s0 + $0x244] ss:$12 sps:$4 sm:$0xff]   ;;  %903 = vmatprep.mubr.bf16.mxu0 %v2456_v6  ;;  %v2449_v14 = vld [vmem:[%s3302_s1 + $0x58] sm:$0xff]   ;;  %v2451_v16 = vld [vmem:[%s3302_s1 + $0x68] sm:$0xff]  }
   0x5   :  { %1095 = vmatprep.mubr.bf16.mxu1 %v2459_v8  ;;  %v2444_v9 = vld [vmem:[%s3302_s1 + $0x30] sm:$0xff]   ;;  %v2446_v11 = vld [vmem:[%s3302_s1 + $0x40] sm:$0xff]   ;;  %v2453_v18 = vld [vmem:[%s3302_s1 + $0x78] sm:$0xff]  }
   0x6   :  { %874 = vmatpush1.bf16.msra.mxu0 %v2439_v2  ;;  %2422 = vmatpush1.bf16.msra.mxu1 %v2439_v2  ;;  %v2448_v13 = vld [vmem:[%s3302_s1 + $0x50] sm:$0xff]   ;;  %v2450_v15 = vld [vmem:[%s3302_s1 + $0x60] sm:$0xff]   ;;  %v2461_v22 = vld [vmem:[%s3303_s0 + $0x1c] ss:$12 sps:$4 sm:$0xff]  }
   0x7   :  { %875 = vmatprep.subr.bf16.mxu0 %v2584_v0  ;;  %2407 = vmatprep.subr.bf16.mxu1 %v2584_v0  ;;  %v2452_v17 = vld [vmem:[%s3302_s1 + $0x70] sm:$0xff]   ;;  %v2460_v19 = vld [vmem:[%s3302_s1 + $0x80] sm:$0xff]   ;;  %v2463_v23 = vld [vmem:[%s3303_s0 + $0x25c] ss:$12 sps:$4 sm:$0xff]  }
   0x8   :  { %v2454_v20 = vld [vmem:[%s3303_s0] ss:$12 sps:$4 sm:$0xff]   ;;  %v2465_v25 = vld [vmem:[%s3303_s0 + $0x18] ss:$12 sps:$4 sm:$0xff]   ;;  %v2471_v29 = vld [vmem:[%s3303_s0 + $0x30] ss:$12 sps:$4 sm:$0xff]  }
   0x9   :  { %v2457_v21 = vld [vmem:[%s3303_s0 + $0x240] ss:$12 sps:$4 sm:$0xff]   ;;  %v2466_v26 = vld [vmem:[%s3303_s0 + $0x258] ss:$12 sps:$4 sm:$0xff]   ;;  %v2472_v30 = vld [vmem:[%s3303_s0 + $0x270] ss:$12 sps:$4 sm:$0xff]  }
   0xa   :  { %876 = vmatpush1.bf16.msra.mxu0 %v2440_v3  ;;  %2423 = vmatpush1.bf16.msra.mxu1 %v2440_v3  ;;  %v2485_v24 = vld [vmem:[%s3302_s1 + $0x88] sm:$0xff]   ;;  %v2467_v27 = vld [vmem:[%s3303_s0 + $0x34] ss:$12 sps:$4 sm:$0xff]   ;;  %v2479_v35 = vld [vmem:[%s3303_s0 + $0x64] ss:$12 sps:$4 sm:$0xff]  }
   0xb   :  { %877 = vmatprep.subr.bf16.mxu0 %v2584_v0  ;;  %2408 = vmatprep.subr.bf16.mxu1 %v2584_v0  ;;  %v2469_v28 = vld [vmem:[%s3303_s0 + $0x274] ss:$12 sps:$4 sm:$0xff]   ;;  %v2473_v31 = vld [vmem:[%s3303_s0 + $0x4c] ss:$12 sps:$4 sm:$0xff]   ;;  %v2481_v36 = vld [vmem:[%s3303_s0 + $0x2a4] ss:$12 sps:$4 sm:$0xff]  }
   0xc   :  { %v2475_v32 = vld [vmem:[%s3303_s0 + $0x28c] ss:$12 sps:$4 sm:$0xff]   ;;  %v2477_v33 = vld [vmem:[%s3303_s0 + $0x48] ss:$12 sps:$4 sm:$0xff]   ;;  %v2496_v45 = vld [vmem:[%s3303_s0 + $0x90] ss:$12 sps:$4 sm:$0xff]  }
   0xd   :  { %v2478_v34 = vld [vmem:[%s3303_s0 + $0x288] ss:$12 sps:$4 sm:$0xff]   ;;  %v2483_v37 = vld [vmem:[%s3303_s0 + $0x60] ss:$12 sps:$4 sm:$0xff]   ;;  %v2490_v41 = vld [vmem:[%s3303_s0 + $0x78] ss:$12 sps:$4 sm:$0xff]  }
   0xe   :  { %878 = vmatpush1.bf16.msra.mxu0 %v2441_v4  ;;  %2424 = vmatpush1.bf16.msra.mxu1 %v2441_v4  ;;  %v2484_v38 = vld [vmem:[%s3303_s0 + $0x2a0] ss:$12 sps:$4 sm:$0xff]   ;;  %v2486_v39 = vld [vmem:[%s3303_s0 + $0x7c] ss:$12 sps:$4 sm:$0xff]   ;;  %v2491_v42 = vld [vmem:[%s3303_s0 + $0x2b8] ss:$12 sps:$4 sm:$0xff]  }
   0xf   :  { %879 = vmatprep.subr.bf16.mxu0 %v2584_v0  ;;  %2409 = vmatprep.subr.bf16.mxu1 %v2584_v0  ;;  %v2488_v40 = vld [vmem:[%s3303_s0 + $0x2bc] ss:$12 sps:$4 sm:$0xff]   ;;  %v2492_v43 = vld [vmem:[%s3303_s0 + $0x94] ss:$12 sps:$4 sm:$0xff]   ;;  %v2498_v47 = vld [vmem:[%s3303_s0 + $0xac] ss:$12 sps:$4 sm:$0xff]  }
  0x10   :  { %v2494_v44 = vld [vmem:[%s3303_s0 + $0x2d4] ss:$12 sps:$4 sm:$0xff]   ;;  %v2497_v46 = vld [vmem:[%s3303_s0 + $0x2d0] ss:$12 sps:$4 sm:$0xff]   ;;  %v2500_v48 = vld [vmem:[%s3303_s0 + $0x2ec] ss:$12 sps:$4 sm:$0xff]  }
  0x11   :  { %v2502_v49 = vld [vmem:[%s3303_s0 + $0xa8] ss:$12 sps:$4 sm:$0xff]   ;;  %v2504_v51 = vld [vmem:[%s3303_s0 + $0xc4] ss:$12 sps:$4 sm:$0xff]   ;;  %v2507_v53 = vld [vmem:[%s3303_s0 + $0xc0] ss:$12 sps:$4 sm:$0xff]  }
  0x12   :  { %880 = vmatpush1.bf16.msra.mxu0 %v2442_v5  ;;  %2425 = vmatpush1.bf16.msra.mxu1 %v2442_v5  ;;  %v2503_v50 = vld [vmem:[%s3303_s0 + $0x2e8] ss:$12 sps:$4 sm:$0xff]   ;;  %v2508_v54 = vld [vmem:[%s3303_s0 + $0x20] ss:$12 sps:$4 sm:$0xff]   ;;  %v2511_v56 = vld [vmem:[%s3303_s0 + $0x38] ss:$12 sps:$4 sm:$0xff]  }
  0x13   :  { %881 = vmatprep.subr.bf16.mxu0 %v2584_v0  ;;  %2410 = vmatprep.subr.bf16.mxu1 %v2584_v0  ;;  %v2506_v52 = vld [vmem:[%s3303_s0 + $0x8] ss:$12 sps:$4 sm:$0xff]   ;;  %v2512_v57 = vld [vmem:[%s3303_s0 + $0xd8] ss:$12 sps:$4 sm:$0xff]   ;;  %v2513_v58 = vld [vmem:[%s3303_s0 + $0x50] ss:$12 sps:$4 sm:$0xff]  }
  0x14   :  { %v2509_v55 = vld [vmem:[%s3303_s0 + $0xdc] ss:$12 sps:$4 sm:$0xff]   ;;  %v2514_v59 = vld [vmem:[%s3303_s0 + $0xf4] ss:$12 sps:$4 sm:$0xff]   ;;  %v2519_v63 = vld [vmem:[%s3303_s0 + $0x10c] ss:$12 sps:$4 sm:$0xff]  }
  0x15   :  { %v2516_v60 = vld [vmem:[%s3303_s0 + $0x68] ss:$12 sps:$4 sm:$0xff]   ;;  %v2517_v61 = vld [vmem:[%s3303_s0 + $0xf0] ss:$12 sps:$4 sm:$0xff]   ;;  %v2518_v62 = vld [vmem:[%s3303_s0 + $0x80] ss:$12 sps:$4 sm:$0xff]  }
  0x16   :  { %882 = vmatpush1.bf16.msra.mxu0 %v2443_v7  ;;  %2426 = vmatpush1.bf16.msra.mxu1 %v2443_v7  ;;  %v2522_v1 = vld [vmem:[%s3303_s0 + $0x108] ss:$12 sps:$4 sm:$0xff]   ;;  %v2523_v2 = vld [vmem:[%s3303_s0 + $0xb0] ss:$12 sps:$4 sm:$0xff]   ;;  %v2527_v5 = vld [vmem:[%s3303_s0 + $0x120] ss:$12 sps:$4 sm:$0xff]  }
  0x17   :  { %883 = vmatprep.subr.bf16.mxu0 %v2584_v0  ;;  %2411 = vmatprep.subr.bf16.mxu1 %v2584_v0  ;;  %v2524_v3 = vld [vmem:[%s3303_s0 + $0x124] ss:$12 sps:$4 sm:$0xff]   ;;  %v2526_v4 = vld [vmem:[%s3303_s0 + $0xc8] ss:$12 sps:$4 sm:$0xff]   ;;  %v2528_v6 = vld [vmem:[%s3303_s0 + $0xe0] ss:$12 sps:$4 sm:$0xff]  }
  0x18   :  { %v2529_v7 = vld [vmem:[%s3303_s0 + $0x13c] ss:$12 sps:$4 sm:$0xff]   ;;  %v2531_v8 = vld [vmem:[%s3303_s0 + $0xf8] ss:$12 sps:$4 sm:$0xff]  }
  0x1a   :  { %884 = vmatpush1.bf16.msra.mxu0 %v2444_v9  ;;  %2427 = vmatpush1.bf16.msra.mxu1 %v2444_v9  ;;  %v2532_v9 = vld [vmem:[%s3303_s0 + $0x138] ss:$12 sps:$4 sm:$0xff]  }
  0x1b   :  { %885 = vmatprep.subr.bf16.mxu0 %v2584_v0  ;;  %2412 = vmatprep.subr.bf16.mxu1 %v2584_v0 }
  0x1e   :  { %886 = vmatpush1.bf16.msra.mxu0 %v2445_v10  ;;  %2428 = vmatpush1.bf16.msra.mxu1 %v2445_v10  ;;  %v2533_v10 = vld [vmem:[%s3303_s0 + $0x110] ss:$12 sps:$4 sm:$0xff]  }
  0x1f   :  { %887 = vmatprep.subr.bf16.mxu0 %v2584_v0  ;;  %2413 = vmatprep.subr.bf16.mxu1 %v2584_v0 }
  0x22   :  { %888 = vmatpush1.bf16.msra.mxu0 %v2446_v11  ;;  %2429 = vmatpush1.bf16.msra.mxu1 %v2446_v11  ;;  %v2534_v11 = vld [vmem:[%s3303_s0 + $0x154] ss:$12 sps:$4 sm:$0xff]  }
  0x23   :  { %889 = vmatprep.subr.bf16.mxu0 %v2584_v0  ;;  %2414 = vmatprep.subr.bf16.mxu1 %v2584_v0 }
  0x26   :  { %890 = vmatpush1.bf16.msra.mxu0 %v2447_v12  ;;  %2430 = vmatpush1.bf16.msra.mxu1 %v2447_v12  ;;  %v2536_v12 = vld [vmem:[%s3303_s0 + $0x128] ss:$12 sps:$4 sm:$0xff]  }
  0x27   :  { %891 = vmatprep.subr.bf16.mxu0 %v2584_v0  ;;  %2415 = vmatprep.subr.bf16.mxu1 %v2584_v0 }
  0x2a   :  { %892 = vmatpush1.bf16.msra.mxu0 %v2448_v13  ;;  %2431 = vmatpush1.bf16.msra.mxu1 %v2448_v13  ;;  %v2537_v13 = vld [vmem:[%s3303_s0 + $0x150] ss:$12 sps:$4 sm:$0xff]  }
  0x2b   :  { %893 = vmatprep.subr.bf16.mxu0 %v2584_v0  ;;  %2416 = vmatprep.subr.bf16.mxu1 %v2584_v0 }
  0x2e   :  { %894 = vmatpush1.bf16.msra.mxu0 %v2449_v14  ;;  %2432 = vmatpush1.bf16.msra.mxu1 %v2449_v14  ;;  %v2538_v14 = vld [vmem:[%s3303_s0 + $0x140] ss:$12 sps:$4 sm:$0xff]  }
  0x2f   :  { %895 = vmatprep.subr.bf16.mxu0 %v2584_v0  ;;  %2417 = vmatprep.subr.bf16.mxu1 %v2584_v0 }
  0x32   :  { %896 = vmatpush1.bf16.msra.mxu0 %v2450_v15  ;;  %2433 = vmatpush1.bf16.msra.mxu1 %v2450_v15  ;;  %v2539_v15 = vld [vmem:[%s3303_s0 + $0x16c] ss:$12 sps:$4 sm:$0xff]  }
  0x33   :  { %897 = vmatprep.subr.bf16.mxu0 %v2584_v0  ;;  %2418 = vmatprep.subr.bf16.mxu1 %v2584_v0 }
  0x36   :  { %898 = vmatpush1.bf16.msra.mxu0 %v2451_v16  ;;  %2434 = vmatpush1.bf16.msra.mxu1 %v2451_v16  ;;  %v2541_v16 = vld [vmem:[%s3303_s0 + $0x158] ss:$12 sps:$4 sm:$0xff]  }
  0x37   :  { %899 = vmatprep.subr.bf16.mxu0 %v2584_v0  ;;  %2419 = vmatprep.subr.bf16.mxu1 %v2584_v0 }
  0x3a   :  { %900 = vmatpush1.bf16.msra.mxu0 %v2452_v17  ;;  %2435 = vmatpush1.bf16.msra.mxu1 %v2452_v17  ;;  %v2542_v17 = vld [vmem:[%s3303_s0 + $0x168] ss:$12 sps:$4 sm:$0xff]  }
  0x3b   :  { %901 = vmatprep.subr.bf16.mxu0 %v2584_v0  ;;  %2420 = vmatprep.subr.bf16.mxu1 %v2584_v0  ;;  %v2521_v0 = vld [vmem:[%s3303_s0 + $0x98] ss:$12 sps:$4 sm:$0xff]  }
  0x3e   :  { %902 = vmatpush1.bf16.msra.mxu0 %v2453_v18  ;;  %2436 = vmatpush1.bf16.msra.mxu1 %v2453_v18  ;;  %v2543_v18 = vld [vmem:[%s3303_s0 + $0x170] ss:$12 sps:$4 sm:$0xff]  }
  0x3f   :  { %2337 = vmatprep.subr.bf16.mxu1 %v2460_v19 }
  0x41   :  { %904 = vmatmul.mubr.bf16.vlgmr.msra.gmra.mrb[0].mxu0 %v2454_v20  ;;  %1096 = vmatmul.mubr.bf16.vlgmr.msra.gmra.mrb[0].mxu1 %v2457_v21  ;;  %v2546_v20 = vld [vmem:[%s3303_s0 + $0x188] ss:$12 sps:$4 sm:$0xff]   ;;  %v2547_v21 = vld [vmem:[%s3303_s0 + $0x180] ss:$12 sps:$4 sm:$0xff]  }
  0x42   :  { %2338 = vmatpush3.bf16.msra.mxu1 %v2460_v19  ;;  %911 = vmatprep.mubr.bf16.mxu0 %v2461_v22  ;;  %v2544_v19 = vld [vmem:[%s3303_s0 + $0x184] ss:$12 sps:$4 sm:$0xff]   ;;  %v2548_v22 = vld [vmem:[%s3303_s0 + $0x1a0] ss:$12 sps:$4 sm:$0xff]  }
  0x43   :  { %1103 = vmatprep.mubr.bf16.mxu1 %v2463_v23  ;;  %2339 = vmatprep.subr.bf16.mxu1 %v2485_v24  ;;  %v2549_v23 = vld [vmem:[%s3303_s0 + $0x19c] ss:$12 sps:$4 sm:$0xff]  }
  0x46   :  { %2340 = vmatpush3.bf16.msra.mxu1 %v2485_v24  ;;  %v2551_v24 = vld [vmem:[%s3303_s0 + $0x1b8] ss:$12 sps:$4 sm:$0xff]  }
  0x49   :  { %912 = vmatmul.mubr.bf16.gmra.mrb[4].mxu0 %v2465_v25  ;;  %1104 = vmatmul.mubr.bf16.gmra.mrb[4].mxu1 %v2466_v26  ;;  %v2552_v25 = vld [vmem:[%s3303_s0 + $0x198] ss:$12 sps:$4 sm:$0xff]   ;;  %v2553_v26 = vld [vmem:[%s3303_s0 + $0x1d0] ss:$12 sps:$4 sm:$0xff]  }
  0x4a   :  { %919 = vmatprep.mubr.bf16.mxu0 %v2467_v27  ;;  %1111 = vmatprep.mubr.bf16.mxu1 %v2469_v28  ;;  %v2554_v27 = vld [vmem:[%s3303_s0 + $0x1b4] ss:$12 sps:$4 sm:$0xff]  }
  0x4b   :  { %v2556_v28 = vld [vmem:[%s3303_s0 + $0x1e8] ss:$12 sps:$4 sm:$0xff]  }
  0x51   :  { %920 = vmatmul.mubr.bf16.gmra.mrb[8].mxu0 %v2471_v29  ;;  %1112 = vmatmul.mubr.bf16.gmra.mrb[8].mxu1 %v2472_v30  ;;  %v2557_v29 = vld [vmem:[%s3303_s0 + $0x1b0] ss:$12 sps:$4 sm:$0xff]   ;;  %v2558_v30 = vld [vmem:[%s3303_s0 + $0x200] ss:$12 sps:$4 sm:$0xff]  }
  0x52   :  { %927 = vmatprep.mubr.bf16.mxu0 %v2473_v31  ;;  %1119 = vmatprep.mubr.bf16.mxu1 %v2475_v32  ;;  %v2559_v31 = vld [vmem:[%s3303_s0 + $0x1cc] ss:$12 sps:$4 sm:$0xff]  }
  0x53   :  { %v2561_v32 = vld [vmem:[%s3303_s0 + $0x218] ss:$12 sps:$4 sm:$0xff]  }
  0x59   :  { %928 = vmatmul.mubr.bf16.gmra.mrb[12].mxu0 %v2477_v33  ;;  %1120 = vmatmul.mubr.bf16.gmra.mrb[12].mxu1 %v2478_v34  ;;  %v2562_v33 = vld [vmem:[%s3303_s0 + $0x1c8] ss:$12 sps:$4 sm:$0xff]   ;;  %v2563_v34 = vld [vmem:[%s3303_s0 + $0x230] ss:$12 sps:$4 sm:$0xff]  }
  0x5a   :  { %935 = vmatprep.mubr.bf16.mxu0 %v2479_v35  ;;  %1127 = vmatprep.mubr.bf16.mxu1 %v2481_v36  ;;  %v2564_v35 = vld [vmem:[%s3303_s0 + $0x1e4] ss:$12 sps:$4 sm:$0xff]   ;;  %v2566_v36 = vld [vmem:[%s3303_s0 + $0x248] ss:$12 sps:$4 sm:$0xff]  }
  0x61   :  { %936 = vmatmul.mubr.bf16.gmra.mrb[16].mxu0 %v2483_v37  ;;  %1128 = vmatmul.mubr.bf16.gmra.mrb[16].mxu1 %v2484_v38  ;;  %v2567_v37 = vld [vmem:[%s3303_s0 + $0x1e0] ss:$12 sps:$4 sm:$0xff]  }
  0x62   :  { %943 = vmatprep.mubr.bf16.mxu0 %v2486_v39  ;;  %1135 = vmatprep.mubr.bf16.mxu1 %v2488_v40  ;;  %v2568_v38 = vld [vmem:[%s3303_s0 + $0x260] ss:$12 sps:$4 sm:$0xff]   ;;  %v2569_v39 = vld [vmem:[%s3303_s0 + $0x1fc] ss:$12 sps:$4 sm:$0xff]   ;;  %v2571_v40 = vld [vmem:[%s3303_s0 + $0x278] ss:$12 sps:$4 sm:$0xff]  }
  0x69   :  { %944 = vmatmul.mubr.bf16.gmra.mrb[20].mxu0 %v2490_v41  ;;  %1136 = vmatmul.mubr.bf16.gmra.mrb[20].mxu1 %v2491_v42  ;;  %v2572_v41 = vld [vmem:[%s3303_s0 + $0x1f8] ss:$12 sps:$4 sm:$0xff]   ;;  %v2573_v42 = vld [vmem:[%s3303_s0 + $0x290] ss:$12 sps:$4 sm:$0xff]  }
  0x6a   :  { %951 = vmatprep.mubr.bf16.mxu0 %v2492_v43  ;;  %1143 = vmatprep.mubr.bf16.mxu1 %v2494_v44  ;;  %v2574_v43 = vld [vmem:[%s3303_s0 + $0x214] ss:$12 sps:$4 sm:$0xff]  }
  0x6b   :  { %v2576_v44 = vld [vmem:[%s3303_s0 + $0x2a8] ss:$12 sps:$4 sm:$0xff]  }
  0x71   :  { %952 = vmatmul.mubr.bf16.gmra.mrb[24].mxu0 %v2496_v45  ;;  %1144 = vmatmul.mubr.bf16.gmra.mrb[24].mxu1 %v2497_v46  ;;  %v2577_v45 = vld [vmem:[%s3303_s0 + $0x210] ss:$12 sps:$4 sm:$0xff]   ;;  %v2578_v46 = vld [vmem:[%s3303_s0 + $0x2c0] ss:$12 sps:$4 sm:$0xff]  }
  0x72   :  { %959 = vmatprep.mubr.bf16.mxu0 %v2498_v47  ;;  %1151 = vmatprep.mubr.bf16.mxu1 %v2500_v48  ;;  %v2579_v47 = vld [vmem:[%s3303_s0 + $0x22c] ss:$12 sps:$4 sm:$0xff]  }
  0x73   :  { %v2581_v48 = vld [vmem:[%s3303_s0 + $0x2d8] ss:$12 sps:$4 sm:$0xff]  }
  0x79   :  { %960 = vmatmul.mubr.bf16.gmra.mrb[28].mxu0 %v2502_v49  ;;  %1152 = vmatmul.mubr.bf16.gmra.mrb[28].mxu1 %v2503_v50  ;;  %v2582_v49 = vld [vmem:[%s3303_s0 + $0x228] ss:$12 sps:$4 sm:$0xff]   ;;  %v2583_v50 = vld [vmem:[%s3303_s0 + $0x2f0] ss:$12 sps:$4 sm:$0xff]  }
  0x7a   :  { %967 = vmatprep.mubr.bf16.mxu0 %v2504_v51  ;;  %2341 = vmatprep.mubr.msk.bf16.mxu1 %vm774_vm0, %v2506_v52 }
  0x81   :  { %968 = vmatmul.mubr.bf16.gmra.mrb[32].mxu0 %v2507_v53  ;;  %2342 = vmatmul.mubr.msk.bf16.vlgmr.msra.gmra.mrb[32].mxu1 %vm774_vm0, %v2508_v54 }
  0x82   :  { %975 = vmatprep.mubr.bf16.mxu0 %v2509_v55  ;;  %2345 = vmatprep.mubr.msk.bf16.mxu1 %vm774_vm0, %v2511_v56 }
  0x89   :  { %976 = vmatmul.mubr.bf16.gmra.mrb[36].mxu0 %v2512_v57  ;;  %2346 = vmatmul.mubr.msk.bf16.gmra.mrb[36].mxu1 %vm774_vm0, %v2513_v58 }
  0x8a   :  { %983 = vmatprep.mubr.bf16.mxu0 %v2514_v59  ;;  %2349 = vmatprep.mubr.msk.bf16.mxu1 %vm774_vm0, %v2516_v60 }
  0x91   :  { %984 = vmatmul.mubr.bf16.gmra.mrb[40].mxu0 %v2517_v61  ;;  %2350 = vmatmul.mubr.msk.bf16.gmra.mrb[40].mxu1 %vm774_vm0, %v2518_v62 }
  0x92   :  { %991 = vmatprep.mubr.bf16.mxu0 %v2519_v63  ;;  %2353 = vmatprep.mubr.msk.bf16.mxu1 %vm774_vm0, %v2521_v0 }
  0x99   :  { %992 = vmatmul.mubr.bf16.gmra.mrb[44].mxu0 %v2522_v1  ;;  %2354 = vmatmul.mubr.msk.bf16.gmra.mrb[44].mxu1 %vm774_vm0, %v2523_v2 }
  0x9a   :  { %999 = vmatprep.mubr.bf16.mxu0 %v2524_v3  ;;  %2357 = vmatprep.mubr.msk.bf16.mxu1 %vm774_vm0, %v2526_v4 }
  0xa1   :  { %1000 = vmatmul.mubr.bf16.gmra.mrb[48].mxu0 %v2527_v5  ;;  %2358 = vmatmul.mubr.msk.bf16.gmra.mrb[48].mxu1 %vm774_vm0, %v2528_v6 }
  0xa2   :  { %1007 = vmatprep.mubr.bf16.mxu0 %v2529_v7  ;;  %2361 = vmatprep.mubr.msk.bf16.mxu1 %vm774_vm0, %v2531_v8 }
  0xa9   :  { %1008 = vmatmul.mubr.bf16.gmra.mrb[52].mxu0 %v2532_v9  ;;  %2362 = vmatmul.mubr.msk.bf16.gmra.mrb[52].mxu1 %vm774_vm0, %v2533_v10 }
  0xaa   :  { %1015 = vmatprep.mubr.bf16.mxu0 %v2534_v11  ;;  %2365 = vmatprep.mubr.msk.bf16.mxu1 %vm774_vm0, %v2536_v12 }
  0xb1   :  { %1016 = vmatmul.mubr.bf16.gmra.mrb[56].mxu0 %v2537_v13  ;;  %2366 = vmatmul.mubr.msk.bf16.gmra.mrb[56].mxu1 %vm774_vm0, %v2538_v14 }
  0xb2   :  { %1023 = vmatprep.mubr.bf16.mxu0 %v2539_v15  ;;  %2369 = vmatprep.mubr.msk.bf16.mxu1 %vm774_vm0, %v2541_v16 }
  0xb9   :  { %1024 = vmatmul.mubr.bf16.gmra.mrb[60].mxu0 %v2542_v17  ;;  %2370 = vmatmul.mubr.msk.bf16.gmra.mrb[60].mxu1 %vm774_vm0, %v2543_v18 }
  0xba   :  { %1031 = vmatprep.mubr.bf16.mxu0 %v2544_v19  ;;  %2373 = vmatprep.mubr.msk.bf16.mxu1 %vm774_vm0, %v2546_v20 }
  0xc1   :  { %1032 = vmatmul.mubr.bf16.gmra.mrb[64].mxu0 %v2547_v21  ;;  %2374 = vmatmul.mubr.msk.bf16.gmra.mrb[64].mxu1 %vm774_vm0, %v2548_v22 }
  0xc2   :  { %1039 = vmatprep.mubr.bf16.mxu0 %v2549_v23  ;;  %2377 = vmatprep.mubr.msk.bf16.mxu1 %vm774_vm0, %v2551_v24 }
  0xc9   :  { %1040 = vmatmul.mubr.bf16.gmra.mrb[68].mxu0 %v2552_v25  ;;  %2378 = vmatmul.mubr.msk.bf16.gmra.mrb[68].mxu1 %vm774_vm0, %v2553_v26 }
  0xca   :  { %1047 = vmatprep.mubr.bf16.mxu0 %v2554_v27  ;;  %2381 = vmatprep.mubr.msk.bf16.mxu1 %vm774_vm0, %v2556_v28 }
  0xd1   :  { %1048 = vmatmul.mubr.bf16.gmra.mrb[72].mxu0 %v2557_v29  ;;  %2382 = vmatmul.mubr.msk.bf16.gmra.mrb[72].mxu1 %vm774_vm0, %v2558_v30 }
  0xd2   :  { %1055 = vmatprep.mubr.bf16.mxu0 %v2559_v31  ;;  %2385 = vmatprep.mubr.msk.bf16.mxu1 %vm774_vm0, %v2561_v32 }
  0xd9   :  { %1056 = vmatmul.mubr.bf16.gmra.mrb[76].mxu0 %v2562_v33  ;;  %2386 = vmatmul.mubr.msk.bf16.gmra.mrb[76].mxu1 %vm774_vm0, %v2563_v34 }
  0xda   :  { %1063 = vmatprep.mubr.bf16.mxu0 %v2564_v35  ;;  %2389 = vmatprep.mubr.msk.bf16.mxu1 %vm774_vm0, %v2566_v36 }
  0xe1   :  { %1064 = vmatmul.mubr.bf16.gmra.mrb[80].mxu0 %v2567_v37  ;;  %2390 = vmatmul.mubr.msk.bf16.gmra.mrb[80].mxu1 %vm774_vm0, %v2568_v38 }
  0xe2   :  { %1071 = vmatprep.mubr.bf16.mxu0 %v2569_v39  ;;  %2393 = vmatprep.mubr.msk.bf16.mxu1 %vm774_vm0, %v2571_v40 }
  0xe9   :  { %1072 = vmatmul.mubr.bf16.gmra.mrb[84].mxu0 %v2572_v41  ;;  %2394 = vmatmul.mubr.msk.bf16.gmra.mrb[84].mxu1 %vm774_vm0, %v2573_v42 }
  0xea   :  { %1079 = vmatprep.mubr.bf16.mxu0 %v2574_v43  ;;  %2397 = vmatprep.mubr.msk.bf16.mxu1 %vm774_vm0, %v2576_v44 }
  0xf1   :  { %1080 = vmatmul.mubr.bf16.gmra.mrb[88].mxu0 %v2577_v45  ;;  %2398 = vmatmul.mubr.msk.bf16.gmra.mrb[88].mxu1 %vm774_vm0, %v2578_v46 }
  0xf2   :  { %1087 = vmatprep.mubr.bf16.mxu0 %v2579_v47  ;;  %2401 = vmatprep.mubr.msk.bf16.mxu1 %vm774_vm0, %v2581_v48 }
  0xf9   :  { %1088 = vmatmul.mubr.bf16.gmra.mrb[92].mxu0 %v2582_v49  ;;  %2402 = vmatmul.mubr.msk.bf16.gmra.mrb[92].mxu1 %vm774_vm0, %v2583_v50 }
 0x114   :  { %v3011_v51 = vpop.f32.mrb[0].mxu0  ;;  %v3013_v52 = vpop.f32.mrb[0].mxu1 }
 0x115   :  { %v907_v53 = vpop.f32.mrb[1].mxu0  ;;  %v1099_v54 = vpop.f32.mrb[1].mxu1 }
 0x116   :  { %v3015_v55 = vpop.f32.mrb[2].mxu0  ;;  %v3017_v56 = vpop.f32.mrb[2].mxu1  ;;  %v3074_v53 = vld [vmem:[%s3304_s2] ss:$0 sm:$0xff] }
 0x117   :  { %v910_v57 = vpop.f32.mrb[3].mxu0  ;;  %v1102_v58 = vpop.f32.mrb[3].mxu1 }
 0x118   :  { %v906_v57 = vadd.f32 %v3074_v53, %v3011_v51 }
 0x11c   :  { %v913_v59 = vpop.f32.mrb[4].mxu0  ;;  %v3019_v60 = vpop.f32.mrb[4].mxu1 }
 0x11d   :  { %v915_v61 = vpop.f32.mrb[5].mxu0  ;;  %v1107_v62 = vpop.f32.mrb[5].mxu1  ;;  %v914_v54 = vadd.f32 %v3074_v53, %v913_v59 }
 0x11e   :  { %v916_v63 = vpop.f32.mrb[6].mxu0  ;;  %v3021_v0 = vpop.f32.mrb[6].mxu1 }
 0x11f   :  { %v918_v1 = vpop.f32.mrb[7].mxu0  ;;  %v1110_v2 = vpop.f32.mrb[7].mxu1  ;;  %v917_v62 = vadd.f32 %v3074_v53, %v916_v63 }
 0x124   :  { %v3023_v3 = vpop.f32.mrb[8].mxu0  ;;  %v3025_v4 = vpop.f32.mrb[8].mxu1 }
 0x125   :  { %v923_v5 = vpop.f32.mrb[9].mxu0  ;;  %v1115_v6 = vpop.f32.mrb[9].mxu1 }
 0x126   :  { %v3027_v7 = vpop.f32.mrb[10].mxu0  ;;  %v3029_v8 = vpop.f32.mrb[10].mxu1  ;;  %v909_v6 = vadd.f32 %v3074_v53, %v3015_v55 }
 0x127   :  { %v926_v9 = vpop.f32.mrb[11].mxu0  ;;  %v1118_v10 = vpop.f32.mrb[11].mxu1 }
 0x12c   :  { %v3031_v11 = vpop.f32.mrb[12].mxu0  ;;  %v3033_v12 = vpop.f32.mrb[12].mxu1 }
 0x12d   :  { %v931_v13 = vpop.f32.mrb[13].mxu0  ;;  %v1123_v14 = vpop.f32.mrb[13].mxu1  ;;  %v930_v63 = vadd.f32 %v3074_v53, %v3031_v11  ;;  %v925_v11 = vadd.f32 %v3074_v53, %v3027_v7 }
 0x12e   :  { %v3035_v15 = vpop.f32.mrb[14].mxu0  ;;  %v3037_v16 = vpop.f32.mrb[14].mxu1 }
 0x12f   :  { %v934_v17 = vpop.f32.mrb[15].mxu0  ;;  %v1126_v18 = vpop.f32.mrb[15].mxu1 }
 0x134   :  { %v3039_v19 = vpop.f32.mrb[16].mxu0  ;;  %v3041_v20 = vpop.f32.mrb[16].mxu1 }
 0x135   :  { %v939_v21 = vpop.f32.mrb[17].mxu0  ;;  %v1131_v22 = vpop.f32.mrb[17].mxu1 }
 0x136   :  { %v3043_v23 = vpop.f32.mrb[18].mxu0  ;;  %v3045_v24 = vpop.f32.mrb[18].mxu1 }
 0x137   :  { %v942_v25 = vpop.f32.mrb[19].mxu0  ;;  %v1134_v26 = vpop.f32.mrb[19].mxu1 }
 0x13c   :  { %v3047_v27 = vpop.f32.mrb[20].mxu0  ;;  %v3049_v28 = vpop.f32.mrb[20].mxu1 }
 0x13d   :  { %v947_v29 = vpop.f32.mrb[21].mxu0  ;;  %v1139_v30 = vpop.f32.mrb[21].mxu1 }
 0x13e   :  { %v3051_v31 = vpop.f32.mrb[22].mxu0  ;;  %v3053_v32 = vpop.f32.mrb[22].mxu1  ;;  %v922_v29 = vadd.f32 %v3074_v53, %v3023_v3 }
 0x13f   :  { %v950_v33 = vpop.f32.mrb[23].mxu0  ;;  %v1142_v34 = vpop.f32.mrb[23].mxu1 }
 0x140   :  { %v933_v34 = vadd.f32 %v3074_v53, %v3035_v15 }
 0x144   :  { %v3055_v35 = vpop.f32.mrb[24].mxu0  ;;  %v3057_v36 = vpop.f32.mrb[24].mxu1 }
 0x145   :  { %v955_v37 = vpop.f32.mrb[25].mxu0  ;;  %v1147_v38 = vpop.f32.mrb[25].mxu1 }
 0x146   :  { %v3059_v39 = vpop.f32.mrb[26].mxu0  ;;  %v3061_v40 = vpop.f32.mrb[26].mxu1 }
 0x147   :  { %v958_v41 = vpop.f32.mrb[27].mxu0  ;;  %v1150_v42 = vpop.f32.mrb[27].mxu1 }
 0x14c   :  { %v3063_v43 = vpop.f32.mrb[28].mxu0  ;;  %v3065_v44 = vpop.f32.mrb[28].mxu1 }
 0x14d   :  { %v963_v45 = vpop.f32.mrb[29].mxu0  ;;  %v1155_v46 = vpop.f32.mrb[29].mxu1 }
 0x14e   :  { %v3067_v47 = vpop.f32.mrb[30].mxu0  ;;  %v3069_v48 = vpop.f32.mrb[30].mxu1 }
 0x14f   :  { %v966_v49 = vpop.f32.mrb[31].mxu0  ;;  %v1158_v50 = vpop.f32.mrb[31].mxu1 }
 0x154   :  { %v3079_v58 = vpop.f32.mrb[32].mxu0  ;;  %v2343_v61 = vpop.f32.mrb[32].mxu1 }
 0x155   :  { %v1203_v1 = vadd.f32 %v2343_v61, %v914_v54  ;;  %v971_v2 = vpop.f32.mrb[33].mxu0  ;;  %v1194_v5 = vpop.f32.mrb[33].mxu1 }
 0x156   :  { %v1195_v9 = vadd.f32 %v1194_v5, %v906_v57  ;;  %v3084_v10 = vpop.f32.mrb[34].mxu0  ;;  %v2344_v13 = vpop.f32.mrb[34].mxu1  ;;  %v938_v2 = vadd.f32 %v3074_v53, %v3039_v19 }
 0x157   :  { %v1206_v14 = vadd.f32 %v2344_v13, %v917_v62  ;;  %v974_v59 = vpop.f32.mrb[35].mxu0  ;;  %v1197_v17 = vpop.f32.mrb[35].mxu1  ;;  %v1451_v51 = vmax.f32 %v1203_v1, 0.0  ;;  %v946_v1 = vadd.f32 %v3074_v53, %v3047_v27  ;;  %v949_v13 = vadd.f32 %v3074_v53, %v3051_v31 }
 0x158   :  { %v1198_v18 = vadd.f32 %v1197_v17, %v909_v6  ;;  %v1449_v22 = vmax.f32 %v1195_v9, 0.0  ;;  %v941_v27 = vadd.f32 %v3074_v53, %v3043_v23 }
 0x159   :  { %v1452_v21 = vmax.f32 %v1206_v14, 0.0 }
 0x15a   :  { %v1450_v25 = vmax.f32 %v1198_v18, 0.0 }
 0x15b   :  { %v2120_v26 = vpack.c.bf16 %v1452_v21, %v1451_v51 }
 0x15c   :  { %v2115_v55 = vpack.c.bf16 %v1450_v25, %v1449_v22  ;;  %v3090_v30 = vpop.f32.mrb[36].mxu0  ;;  %v2347_v33 = vpop.f32.mrb[36].mxu1 }
 0x15d   :  { %2272 = vst [vmem:[%s3305_s3 + $0x8] sm:$0xff] %v2120_v26   ;;  %v1219_v37 = vadd.f32 %v2347_v33, %v930_v63  ;;  %v979_v38 = vpop.f32.mrb[37].mxu0  ;;  %v1210_v41 = vpop.f32.mrb[37].mxu1  ;;  %v962_v33 = vadd.f32 %v3074_v53, %v3063_v43  ;;  %v957_v43 = vadd.f32 %v3074_v53, %v3059_v39  ;;  %v970_v39 = vadd.f32 %v3074_v53, %v3079_v58 }
 0x15e   :  { %2116 = vst [vmem:[%s3305_s3] sm:$0xff] %v2115_v55   ;;  %v1211_v3 = vadd.f32 %v1210_v41, %v922_v29  ;;  %v3102_v42 = vpop.f32.mrb[38].mxu0  ;;  %v2348_v45 = vpop.f32.mrb[38].mxu1 }
 0x15f   :  { %v1222_v46 = vadd.f32 %v2348_v45, %v933_v34  ;;  %v982_v15 = vpop.f32.mrb[39].mxu0  ;;  %v1213_v49 = vpop.f32.mrb[39].mxu1  ;;  %v1455_v54 = vmax.f32 %v1219_v37, 0.0  ;;  %v954_v34 = vadd.f32 %v3074_v53, %v3055_v35 }
 0x160   :  { %v1214_v50 = vadd.f32 %v1213_v49, %v925_v11  ;;  %v1453_v61 = vmax.f32 %v1211_v3, 0.0  ;;  %v965_v11 = vadd.f32 %v3074_v53, %v3067_v47 }
 0x161   :  { %v1456_v57 = vmax.f32 %v1222_v46, 0.0 }
 0x162   :  { %v1454_v62 = vmax.f32 %v1214_v50, 0.0 }
 0x163   :  { %v2130_v7 = vpack.c.bf16 %v1456_v57, %v1455_v54 }
 0x164   :  { %v2125_v5 = vpack.c.bf16 %v1454_v62, %v1453_v61  ;;  %v3108_v6 = vpop.f32.mrb[40].mxu0  ;;  %v2351_v9 = vpop.f32.mrb[40].mxu1 }
 0x165   :  { %2274 = vst [vmem:[%s3305_s3 + $0x18] sm:$0xff] %v2130_v7   ;;  %v1235_v14 = vadd.f32 %v2351_v9, %v946_v1  ;;  %v987_v59 = vpop.f32.mrb[41].mxu0  ;;  %v1226_v17 = vpop.f32.mrb[41].mxu1 }
 0x166   :  { %2273 = vst [vmem:[%s3305_s3 + $0x10] sm:$0xff] %v2125_v5   ;;  %v1227_v19 = vadd.f32 %v1226_v17, %v938_v2  ;;  %v3120_v18 = vpop.f32.mrb[42].mxu0  ;;  %v2352_v51 = vpop.f32.mrb[42].mxu1  ;;  %v978_v2 = vadd.f32 %v3074_v53, %v3090_v30  ;;  %v981_v59 = vadd.f32 %v3074_v53, %v3102_v42  ;;  %v973_v30 = vadd.f32 %v3074_v53, %v3084_v10 }
 0x167   :  { %v1238_v21 = vadd.f32 %v2352_v51, %v949_v13  ;;  %v990_v31 = vpop.f32.mrb[43].mxu0  ;;  %v1229_v22 = vpop.f32.mrb[43].mxu1  ;;  %v1459_v63 = vmax.f32 %v1235_v14, 0.0  ;;  %v986_v10 = vadd.f32 %v3074_v53, %v3108_v6 }
 0x168   :  { %v1230_v25 = vadd.f32 %v1229_v22, %v941_v27  ;;  %v1457_v29 = vmax.f32 %v1227_v19, 0.0 }
 0x169   :  { %v1460_v26 = vmax.f32 %v1238_v21, 0.0 }
 0x16a   :  { %v1458_v55 = vmax.f32 %v1230_v25, 0.0 }
 0x16b   :  { %v2140_v23 = vpack.c.bf16 %v1460_v26, %v1459_v63 }
 0x16c   :  { %v2135_v37 = vpack.c.bf16 %v1458_v55, %v1457_v29  ;;  %v993_v38 = vpop.f32.mrb[44].mxu0  ;;  %v2355_v41 = vpop.f32.mrb[44].mxu1 }
 0x16d   :  { %2276 = vst [vmem:[%s3305_s3 + $0x28] sm:$0xff] %v2140_v23   ;;  %v1251_v3 = vadd.f32 %v2355_v41, %v962_v33  ;;  %v995_v45 = vpop.f32.mrb[45].mxu0  ;;  %v1242_v46 = vpop.f32.mrb[45].mxu1  ;;  %v994_v33 = vadd.f32 %v3074_v53, %v993_v38 }
 0x16e   :  { %2275 = vst [vmem:[%s3305_s3 + $0x20] sm:$0xff] %v2135_v37   ;;  %v1243_v35 = vadd.f32 %v1242_v46, %v954_v34  ;;  %v996_v15 = vpop.f32.mrb[46].mxu0  ;;  %v2356_v49 = vpop.f32.mrb[46].mxu1 }
 0x16f   :  { %v1254_v50 = vadd.f32 %v2356_v49, %v965_v11  ;;  %v998_v54 = vpop.f32.mrb[47].mxu0  ;;  %v1245_v47 = vpop.f32.mrb[47].mxu1  ;;  %v1463_v61 = vmax.f32 %v1251_v3, 0.0  ;;  %v997_v11 = vadd.f32 %v3074_v53, %v996_v15 }
 0x170   :  { %v1246_v57 = vadd.f32 %v1245_v47, %v957_v43  ;;  %v1461_v1 = vmax.f32 %v1243_v35, 0.0  ;;  %v989_v43 = vadd.f32 %v3074_v53, %v3120_v18 }
 0x171   :  { %v1464_v62 = vmax.f32 %v1254_v50, 0.0 }
 0x172   :  { %v1462_v7 = vmax.f32 %v1246_v57, 0.0 }
 0x173   :  { %v2150_v5 = vpack.c.bf16 %v1464_v62, %v1463_v61 }
 0x174   :  { %v2145_v9 = vpack.c.bf16 %v1462_v7, %v1461_v1  ;;  %v1001_v13 = vpop.f32.mrb[48].mxu0  ;;  %v2359_v14 = vpop.f32.mrb[48].mxu1 }
 0x175   :  { %2278 = vst [vmem:[%s3305_s3 + $0x38] sm:$0xff] %v2150_v5   ;;  %v1267_v17 = vadd.f32 %v2359_v14, %v978_v2  ;;  %v1003_v27 = vpop.f32.mrb[49].mxu0  ;;  %v1258_v19 = vpop.f32.mrb[49].mxu1  ;;  %v1002_v18 = vadd.f32 %v3074_v53, %v1001_v13 }
 0x176   :  { %2277 = vst [vmem:[%s3305_s3 + $0x30] sm:$0xff] %v2145_v9   ;;  %v1259_v58 = vadd.f32 %v1258_v19, %v970_v39  ;;  %v1004_v51 = vpop.f32.mrb[50].mxu0  ;;  %v2360_v21 = vpop.f32.mrb[50].mxu1 }
 0x177   :  { %v1270_v31 = vadd.f32 %v2360_v21, %v981_v59  ;;  %v1006_v22 = vpop.f32.mrb[51].mxu0  ;;  %v1261_v42 = vpop.f32.mrb[51].mxu1  ;;  %v1467_v63 = vmax.f32 %v1267_v17, 0.0  ;;  %v1005_v27 = vadd.f32 %v3074_v53, %v1004_v51 }
 0x178   :  { %v1262_v25 = vadd.f32 %v1261_v42, %v973_v30  ;;  %v1465_v29 = vmax.f32 %v1259_v58, 0.0 }
 0x179   :  { %v1468_v26 = vmax.f32 %v1270_v31, 0.0 }
 0x17a   :  { %v1466_v55 = vmax.f32 %v1262_v25, 0.0 }
 0x17b   :  { %v2160_v23 = vpack.c.bf16 %v1468_v26, %v1467_v63 }
 0x17c   :  { %v2155_v34 = vpack.c.bf16 %v1466_v55, %v1465_v29  ;;  %v1009_v37 = vpop.f32.mrb[52].mxu0  ;;  %v2363_v41 = vpop.f32.mrb[52].mxu1 }
 0x17d   :  { %2280 = vst [vmem:[%s3305_s3 + $0x48] sm:$0xff] %v2160_v23   ;;  %v1283_v3 = vadd.f32 %v2363_v41, %v994_v33  ;;  %v1011_v45 = vpop.f32.mrb[53].mxu0  ;;  %v1274_v46 = vpop.f32.mrb[53].mxu1  ;;  %v1010_v1 = vadd.f32 %v3074_v53, %v1009_v37 }
 0x17e   :  { %2279 = vst [vmem:[%s3305_s3 + $0x40] sm:$0xff] %v2155_v34   ;;  %v1275_v6 = vadd.f32 %v1274_v46, %v986_v10  ;;  %v1012_v38 = vpop.f32.mrb[54].mxu0  ;;  %v2364_v35 = vpop.f32.mrb[54].mxu1 }
 0x17f   :  { %v1286_v49 = vadd.f32 %v2364_v35, %v997_v11  ;;  %v1014_v50 = vpop.f32.mrb[55].mxu0  ;;  %v1277_v15 = vpop.f32.mrb[55].mxu1  ;;  %v1471_v47 = vmax.f32 %v1283_v3, 0.0  ;;  %v1013_v9 = vadd.f32 %v3074_v53, %v1012_v38 }
 0x180   :  { %v1278_v54 = vadd.f32 %v1277_v15, %v989_v43  ;;  %v1469_v61 = vmax.f32 %v1275_v6, 0.0 }
 0x181   :  { %v1472_v57 = vmax.f32 %v1286_v49, 0.0 }
 0x182   :  { %v1470_v62 = vmax.f32 %v1278_v54, 0.0 }
 0x183   :  { %v2170_v7 = vpack.c.bf16 %v1472_v57, %v1471_v47 }
 0x184   :  { %v2165_v2 = vpack.c.bf16 %v1470_v62, %v1469_v61  ;;  %v1017_v5 = vpop.f32.mrb[56].mxu0  ;;  %v2367_v39 = vpop.f32.mrb[56].mxu1 }
 0x185   :  { %2282 = vst [vmem:[%s3305_s3 + $0x58] sm:$0xff] %v2170_v7   ;;  %v1299_v14 = vadd.f32 %v2367_v39, %v1010_v1  ;;  %v1019_v59 = vpop.f32.mrb[57].mxu0  ;;  %v1290_v17 = vpop.f32.mrb[57].mxu1  ;;  %v1018_v55 = vadd.f32 %v3074_v53, %v1017_v5 }
 0x186   :  { %2281 = vst [vmem:[%s3305_s3 + $0x50] sm:$0xff] %v2165_v2   ;;  %v1291_v19 = vadd.f32 %v1290_v17, %v1002_v18  ;;  %v1020_v13 = vpop.f32.mrb[58].mxu0  ;;  %v2368_v30 = vpop.f32.mrb[58].mxu1 }
 0x187   :  { %v1302_v58 = vadd.f32 %v2368_v30, %v1013_v9  ;;  %v1022_v21 = vpop.f32.mrb[59].mxu0  ;;  %v1293_v31 = vpop.f32.mrb[59].mxu1  ;;  %v1475_v42 = vmax.f32 %v1299_v14, 0.0  ;;  %v1021_v41 = vadd.f32 %v3074_v53, %v1020_v13 }
 0x188   :  { %v1294_v22 = vadd.f32 %v1293_v31, %v1005_v27  ;;  %v1473_v63 = vmax.f32 %v1291_v19, 0.0 }
 0x189   :  { %v1476_v25 = vmax.f32 %v1302_v58, 0.0 }
 0x18a   :  { %v1474_v26 = vmax.f32 %v1294_v22, 0.0 }
 0x18b   :  { %v2180_v29 = vpack.c.bf16 %v1476_v25, %v1475_v42 }
 0x18c   :  { %v2175_v33 = vpack.c.bf16 %v1474_v26, %v1473_v63  ;;  %v1025_v51 = vpop.f32.mrb[60].mxu0  ;;  %v2371_v23 = vpop.f32.mrb[60].mxu1 }
 0x18d   :  { %2284 = vst [vmem:[%s3305_s3 + $0x68] sm:$0xff] %v2180_v29   ;;  %v1026_v10 = vadd.f32 %v3074_v53, %v1025_v51  ;;  %v1027_v34 = vpop.f32.mrb[61].mxu0  ;;  %v1306_v37 = vpop.f32.mrb[61].mxu1 }
 0x18e   :  { %2283 = vst [vmem:[%s3305_s3 + $0x60] sm:$0xff] %v2175_v33   ;;  %v1307_v11 = vadd.f32 %v1306_v37, %v1018_v55  ;;  %v1028_v3 = vpop.f32.mrb[62].mxu0  ;;  %v2372_v45 = vpop.f32.mrb[62].mxu1 }
 0x18f   :  { %v1315_v46 = vadd.f32 %v2371_v23, %v1026_v10  ;;  %v1029_v43 = vadd.f32 %v3074_v53, %v1028_v3  ;;  %v1030_v6 = vpop.f32.mrb[63].mxu0  ;;  %v1309_v38 = vpop.f32.mrb[63].mxu1 }
 0x190   :  { %v1310_v35 = vadd.f32 %v1309_v38, %v1021_v41  ;;  %v1477_v50 = vmax.f32 %v1307_v11, 0.0 }
 0x191   :  { %v1318_v49 = vadd.f32 %v2372_v45, %v1029_v43  ;;  %v1479_v54 = vmax.f32 %v1315_v46, 0.0 }
 0x192   :  { %v1478_v15 = vmax.f32 %v1310_v35, 0.0 }
 0x193   :  { %v1480_v47 = vmax.f32 %v1318_v49, 0.0 }
 0x194   :  { %v2185_v57 = vpack.c.bf16 %v1478_v15, %v1477_v50  ;;  %v1033_v61 = vpop.f32.mrb[64].mxu0  ;;  %v2375_v62 = vpop.f32.mrb[64].mxu1 }
 0x195   :  { %v2190_v1 = vpack.c.bf16 %v1480_v47, %v1479_v54  ;;  %v1034_v7 = vadd.f32 %v3074_v53, %v1033_v61  ;;  %v1035_v18 = vpop.f32.mrb[65].mxu0  ;;  %v1322_v2 = vpop.f32.mrb[65].mxu1 }
 0x196   :  { %2285 = vst [vmem:[%s3305_s3 + $0x70] sm:$0xff] %v2185_v57   ;;  %v1036_v5 = vpop.f32.mrb[66].mxu0  ;;  %v2376_v39 = vpop.f32.mrb[66].mxu1 }
 0x197   :  { %2286 = vst [vmem:[%s3305_s3 + $0x78] sm:$0xff] %v2190_v1   ;;  %v1323_v9 = vadd.f32 %v1322_v2, %v1034_v7  ;;  %v1037_v14 = vadd.f32 %v3074_v53, %v1036_v5  ;;  %v1038_v59 = vpop.f32.mrb[67].mxu0  ;;  %v1325_v17 = vpop.f32.mrb[67].mxu1 }
 0x199   :  { %v1326_v27 = vadd.f32 %v1325_v17, %v1037_v14  ;;  %v1481_v19 = vmax.f32 %v1323_v9, 0.0  ;;  %v1106_v17 = vadd.f32 %v3074_v53, %v3019_v60 }
 0x19b   :  { %v1482_v13 = vmax.f32 %v1326_v27, 0.0 }
 0x19c   :  { %v1041_v30 = vpop.f32.mrb[68].mxu0  ;;  %v2379_v58 = vpop.f32.mrb[68].mxu1 }
 0x19d   :  { %v2195_v21 = vpack.c.bf16 %v1482_v13, %v1481_v19  ;;  %v1042_v31 = vadd.f32 %v3074_v53, %v1041_v30  ;;  %v1043_v22 = vpop.f32.mrb[69].mxu0  ;;  %v1338_v42 = vpop.f32.mrb[69].mxu1  ;;  %v1098_v13 = vadd.f32 %v3074_v53, %v3013_v52 }
 0x19e   :  { %v1044_v25 = vpop.f32.mrb[70].mxu0  ;;  %v2380_v63 = vpop.f32.mrb[70].mxu1 }
 0x19f   :  { %2287 = vst [vmem:[%s3305_s3 + $0x80] sm:$0xff] %v2195_v21   ;;  %v1331_v26 = vadd.f32 %v2375_v62, %v1042_v31  ;;  %v1045_v29 = vadd.f32 %v3074_v53, %v1044_v25  ;;  %v1046_v55 = vpop.f32.mrb[71].mxu0  ;;  %v1341_v33 = vpop.f32.mrb[71].mxu1  ;;  %v1109_v31 = vadd.f32 %v3074_v53, %v3021_v0 }
 0x1a1   :  { %v1334_v51 = vadd.f32 %v2376_v39, %v1045_v29  ;;  %v1483_v23 = vmax.f32 %v1331_v26, 0.0 }
 0x1a3   :  { %v1484_v10 = vmax.f32 %v1334_v51, 0.0 }
 0x1a4   :  { %v1049_v34 = vpop.f32.mrb[72].mxu0  ;;  %v3195_v37 = vpop.f32.mrb[72].mxu1 }
 0x1a5   :  { %v2200_v41 = vpack.c.bf16 %v1484_v10, %v1483_v23  ;;  %v1050_v11 = vadd.f32 %v3074_v53, %v1049_v34  ;;  %v1051_v3 = vpop.f32.mrb[73].mxu0  ;;  %v1354_v45 = vpop.f32.mrb[73].mxu1 }
 0x1a6   :  { %v1052_v46 = vpop.f32.mrb[74].mxu0  ;;  %v3198_v43 = vpop.f32.mrb[74].mxu1 }
 0x1a7   :  { %2288 = vst [vmem:[%s3305_s3 + $0x88] sm:$0xff] %v2200_v41   ;;  %v1339_v6 = vadd.f32 %v1338_v42, %v1050_v11  ;;  %v1053_v38 = vadd.f32 %v3074_v53, %v1052_v46  ;;  %v1054_v35 = vpop.f32.mrb[75].mxu0  ;;  %v1357_v49 = vpop.f32.mrb[75].mxu1 }
 0x1a9   :  { %v1342_v50 = vadd.f32 %v1341_v33, %v1053_v38  ;;  %v1485_v15 = vmax.f32 %v1339_v6, 0.0 }
 0x1ab   :  { %v1486_v54 = vmax.f32 %v1342_v50, 0.0 }
 0x1ac   :  { %v1057_v47 = vpop.f32.mrb[76].mxu0  ;;  %v3204_v57 = vpop.f32.mrb[76].mxu1 }
 0x1ad   :  { %v2205_v61 = vpack.c.bf16 %v1486_v54, %v1485_v15  ;;  %v1058_v62 = vadd.f32 %v3074_v53, %v1057_v47  ;;  %v1059_v1 = vpop.f32.mrb[77].mxu0  ;;  %v3207_v7 = vpop.f32.mrb[77].mxu1  ;;  %v1125_v47 = vadd.f32 %v3074_v53, %v3037_v16 }
 0x1ae   :  { %v1060_v18 = vpop.f32.mrb[78].mxu0  ;;  %v3209_v2 = vpop.f32.mrb[78].mxu1 }
 0x1af   :  { %2289 = vst [vmem:[%s3305_s3 + $0x90] sm:$0xff] %v2205_v61   ;;  %v1347_v5 = vadd.f32 %v2379_v58, %v1058_v62  ;;  %v1061_v39 = vadd.f32 %v3074_v53, %v1060_v18  ;;  %v1062_v9 = vpop.f32.mrb[79].mxu0  ;;  %v3215_v14 = vpop.f32.mrb[79].mxu1  ;;  %v1117_v18 = vadd.f32 %v3074_v53, %v3029_v8 }
 0x1b1   :  { %v1350_v59 = vadd.f32 %v2380_v63, %v1061_v39  ;;  %v1487_v27 = vmax.f32 %v1347_v5, 0.0  ;;  %v1101_v63 = vadd.f32 %v3074_v53, %v3017_v56  ;;  %v1122_v56 = vadd.f32 %v3074_v53, %v3033_v12 }
 0x1b3   :  { %v1488_v19 = vmax.f32 %v1350_v59, 0.0 }
 0x1b4   :  { %v1065_v30 = vpop.f32.mrb[80].mxu0  ;;  %v2391_v21 = vpop.f32.mrb[80].mxu1 }
 0x1b5   :  { %v2210_v58 = vpack.c.bf16 %v1488_v19, %v1487_v27  ;;  %v1066_v22 = vadd.f32 %v3074_v53, %v1065_v30  ;;  %v1395_v42 = vadd.f32 %v2391_v21, %v1106_v17  ;;  %v1067_v25 = vpop.f32.mrb[81].mxu0  ;;  %v1386_v26 = vpop.f32.mrb[81].mxu1 }
 0x1b6   :  { %v1387_v60 = vadd.f32 %v1386_v26, %v1098_v13  ;;  %v1068_v29 = vpop.f32.mrb[82].mxu0  ;;  %v2392_v55 = vpop.f32.mrb[82].mxu1 }
 0x1b7   :  { %2290 = vst [vmem:[%s3305_s3 + $0x98] sm:$0xff] %v2210_v58   ;;  %v1355_v52 = vadd.f32 %v1354_v45, %v1066_v22  ;;  %v1069_v33 = vadd.f32 %v3074_v53, %v1068_v29  ;;  %v1398_v0 = vadd.f32 %v2392_v55, %v1109_v31  ;;  %v1070_v51 = vpop.f32.mrb[83].mxu0  ;;  %v1389_v23 = vpop.f32.mrb[83].mxu1  ;;  %v1499_v34 = vmax.f32 %v1395_v42, 0.0 }
 0x1b8   :  { %v1390_v10 = vadd.f32 %v1389_v23, %v1101_v63  ;;  %v1497_v3 = vmax.f32 %v1387_v60, 0.0  ;;  %v1114_v45 = vadd.f32 %v3074_v53, %v3025_v4  ;;  %v1138_v58 = vadd.f32 %v3074_v53, %v3049_v28 }
 0x1b9   :  { %v1358_v41 = vadd.f32 %v1357_v49, %v1069_v33  ;;  %v1500_v11 = vmax.f32 %v1398_v0, 0.0  ;;  %v1489_v6 = vmax.f32 %v1355_v52, 0.0  ;;  %v1141_v29 = vadd.f32 %v3074_v53, %v3053_v32 }
 0x1ba   :  { %v1498_v46 = vmax.f32 %v1390_v10, 0.0  ;;  %v1133_v0 = vadd.f32 %v3074_v53, %v3045_v24 }
 0x1bb   :  { %v1490_v38 = vmax.f32 %v1358_v41, 0.0  ;;  %v2240_v35 = vpack.c.bf16 %v1500_v11, %v1499_v34 }
 0x1bc   :  { %v2235_v50 = vpack.c.bf16 %v1498_v46, %v1497_v3  ;;  %v1073_v15 = vpop.f32.mrb[84].mxu0  ;;  %v2395_v54 = vpop.f32.mrb[84].mxu1 }
 0x1bd   :  { %v2215_v61 = vpack.c.bf16 %v1490_v38, %v1489_v6  ;;  %2296 = vst [vmem:[%s3305_s3 + $0xc8] sm:$0xff] %v2240_v35   ;;  %v1074_v49 = vadd.f32 %v3074_v53, %v1073_v15  ;;  %v1411_v12 = vadd.f32 %v2395_v54, %v1122_v56  ;;  %v1075_v62 = vpop.f32.mrb[85].mxu0  ;;  %v1402_v1 = vpop.f32.mrb[85].mxu1  ;;  %v1154_v35 = vadd.f32 %v3074_v53, %v3065_v44 }
 0x1be   :  { %2295 = vst [vmem:[%s3305_s3 + $0xc0] sm:$0xff] %v2235_v50   ;;  %v1403_v4 = vadd.f32 %v1402_v1, %v1114_v45  ;;  %v1076_v5 = vpop.f32.mrb[86].mxu0  ;;  %v2396_v16 = vpop.f32.mrb[86].mxu1 }
 0x1bf   :  { %2291 = vst [vmem:[%s3305_s3 + $0xa0] sm:$0xff] %v2215_v61   ;;  %v1363_v39 = vadd.f32 %v3195_v37, %v1074_v49  ;;  %v1077_v9 = vadd.f32 %v3074_v53, %v1076_v5  ;;  %v1414_v59 = vadd.f32 %v2396_v16, %v1125_v47  ;;  %v1078_v17 = vpop.f32.mrb[87].mxu0  ;;  %v1405_v27 = vpop.f32.mrb[87].mxu1  ;;  %v1503_v8 = vmax.f32 %v1411_v12, 0.0 }
 0x1c0   :  { %v1406_v19 = vadd.f32 %v1405_v27, %v1117_v18  ;;  %v1501_v21 = vmax.f32 %v1403_v4, 0.0  ;;  %v1130_v37 = vadd.f32 %v3074_v53, %v3041_v20  ;;  %v1157_v49 = vadd.f32 %v3074_v53, %v3069_v48 }
 0x1c1   :  { %v1366_v13 = vadd.f32 %v3198_v43, %v1077_v9  ;;  %v1504_v30 = vmax.f32 %v1414_v59, 0.0  ;;  %v1491_v22 = vmax.f32 %v1363_v39, 0.0  ;;  %v1149_v18 = vadd.f32 %v3074_v53, %v3061_v40 }
 0x1c2   :  { %v1502_v31 = vmax.f32 %v1406_v19, 0.0 }
 0x1c3   :  { %v1492_v42 = vmax.f32 %v1366_v13, 0.0  ;;  %v2250_v25 = vpack.c.bf16 %v1504_v30, %v1503_v8 }
 0x1c4   :  { %v2245_v26 = vpack.c.bf16 %v1502_v31, %v1501_v21  ;;  %v1081_v63 = vpop.f32.mrb[88].mxu0  ;;  %v2399_v60 = vpop.f32.mrb[88].mxu1 }
 0x1c5   :  { %v2220_v55 = vpack.c.bf16 %v1492_v42, %v1491_v22  ;;  %2298 = vst [vmem:[%s3305_s3 + $0xd8] sm:$0xff] %v2250_v25   ;;  %v1082_v43 = vadd.f32 %v3074_v53, %v1081_v63  ;;  %v1427_v28 = vadd.f32 %v2399_v60, %v1138_v58  ;;  %v1083_v52 = vpop.f32.mrb[89].mxu0  ;;  %v1418_v33 = vpop.f32.mrb[89].mxu1 }
 0x1c6   :  { %2297 = vst [vmem:[%s3305_s3 + $0xd0] sm:$0xff] %v2245_v26   ;;  %v1419_v20 = vadd.f32 %v1418_v33, %v1130_v37  ;;  %v1084_v51 = vpop.f32.mrb[90].mxu0  ;;  %v2400_v32 = vpop.f32.mrb[90].mxu1 }
 0x1c7   :  { %2292 = vst [vmem:[%s3305_s3 + $0xa8] sm:$0xff] %v2220_v55   ;;  %v1371_v23 = vadd.f32 %v3207_v7, %v1082_v43  ;;  %v1085_v10 = vadd.f32 %v3074_v53, %v1084_v51  ;;  %v1430_v34 = vadd.f32 %v2400_v32, %v1141_v29  ;;  %v1086_v41 = vpop.f32.mrb[91].mxu0  ;;  %v1421_v11 = vpop.f32.mrb[91].mxu1  ;;  %v1507_v24 = vmax.f32 %v1427_v28, 0.0 }
 0x1c8   :  { %v1422_v3 = vadd.f32 %v1421_v11, %v1133_v0  ;;  %v1505_v6 = vmax.f32 %v1419_v20, 0.0  ;;  %v1146_v7 = vadd.f32 %v3074_v53, %v3057_v36 }
 0x1c9   :  { %v1374_v46 = vadd.f32 %v3215_v14, %v1085_v10  ;;  %v1508_v56 = vmax.f32 %v1430_v34, 0.0  ;;  %v1493_v45 = vmax.f32 %v1371_v23, 0.0 }
 0x1ca   :  { %v1506_v38 = vmax.f32 %v1422_v3, 0.0 }
 0x1cb   :  { %v1494_v50 = vmax.f32 %v1374_v46, 0.0  ;;  %v2260_v15 = vpack.c.bf16 %v1508_v56, %v1507_v24 }
 0x1cc   :  { %v2255_v54 = vpack.c.bf16 %v1506_v38, %v1505_v6  ;;  %v1089_v47 = vpop.f32.mrb[92].mxu0  ;;  %v2403_v61 = vpop.f32.mrb[92].mxu1 }
 0x1cd   :  { %v2225_v12 = vpack.c.bf16 %v1494_v50, %v1493_v45  ;;  %2300 = vst [vmem:[%s3305_s3 + $0xe8] sm:$0xff] %v2260_v15   ;;  %v1090_v14 = vadd.f32 %v3074_v53, %v1089_v47  ;;  %v1443_v44 = vadd.f32 %v2403_v61, %v1154_v35  ;;  %v1091_v62 = vpop.f32.mrb[93].mxu0  ;;  %v1434_v1 = vpop.f32.mrb[93].mxu1 }
 0x1ce   :  { %2299 = vst [vmem:[%s3305_s3 + $0xe0] sm:$0xff] %v2255_v54   ;;  %v1435_v36 = vadd.f32 %v1434_v1, %v1146_v7  ;;  %v1092_v4 = vpop.f32.mrb[94].mxu0  ;;  %v2404_v48 = vpop.f32.mrb[94].mxu1 }
 0x1cf   :  { %2293 = vst [vmem:[%s3305_s3 + $0xb0] sm:$0xff] %v2225_v12   ;;  %v1379_v5 = vadd.f32 %v3204_v57, %v1090_v14  ;;  %v1093_v16 = vadd.f32 %v3074_v53, %v1092_v4  ;;  %v1446_v39 = vadd.f32 %v2404_v48, %v1157_v49  ;;  %v1094_v9 = vpop.f32.mrb[95].mxu0  ;;  %v1437_v59 = vpop.f32.mrb[95].mxu1  ;;  %v1511_v40 = vmax.f32 %v1443_v44, 0.0 }
 0x1d0   :  { %v1438_v17 = vadd.f32 %v1437_v59, %v1149_v18  ;;  %v1509_v8 = vmax.f32 %v1435_v36, 0.0 }
 0x1d1   :  { %v1382_v27 = vadd.f32 %v3209_v2, %v1093_v16  ;;  %v1512_v19 = vmax.f32 %v1446_v39, 0.0  ;;  %v1495_v30 = vmax.f32 %v1379_v5, 0.0 }
 0x1d2   :  { %v1510_v13 = vmax.f32 %v1438_v17, 0.0 }
 0x1d3   :  { %v1496_v21 = vmax.f32 %v1382_v27, 0.0  ;;  %v2270_v31 = vpack.c.bf16 %v1512_v19, %v1511_v40 }
 0x1d4   :  { %v2265_v58 = vpack.c.bf16 %v1510_v13, %v1509_v8 }
 0x1d5   :  { %v2230_v22 = vpack.c.bf16 %v1496_v21, %v1495_v30  ;;  %2302 = vst [vmem:[%s3305_s3 + $0xf8] sm:$0xff] %v2270_v31  }
 0x1d6   :  { %2301 = vst [vmem:[%s3305_s3 + $0xf0] sm:$0xff] %v2265_v58  }
 0x1d7   :  { %2294 = vst [vmem:[%s3305_s3 + $0xb8] sm:$0xff] %v2230_v22  }

// kernel: fwd.35
= control target key start
LH: loop header
LB: loop body
LE: loop exit
PB: predicated region body
PF: predicated region fallthrough
CT: control target
= control target key end

     0   :  { %vm153_vm0 = vcmask 519168   ;;  %s1385_s0 = inlined_call_operand.vmem [shape: bf16[9,128,64], index: 0, kind: input, shape index: {}]   ;;  %s1386_s1 = inlined_call_operand.vmem [shape: bf16[128,64], index: 1, kind: output, shape index: {}]  }
   0x1   :  { %v9_v0 = vld [vmem:[%s1385_s0] sm:$0xf]  ;;  %v10_v12 = vld [vmem:[%s1385_s0 + $0x4] sm:$0xf]  ;;  %v11_v33 = vld [vmem:[%s1385_s0 + $0x8] sm:$0xf] }
   0x2   :  { %v25_v1 = vld [vmem:[%s1385_s0 + $0x40] sm:$0xf]  ;;  %v156_v4 = vsel %vm153_vm0, %v9_v0, 4286644096  ;;  %v26_v13 = vld [vmem:[%s1385_s0 + $0x44] sm:$0xf] }
   0x3   :  { %v41_v2 = vld [vmem:[%s1385_s0 + $0x80] sm:$0xf]  ;;  %v159_v5 = vsel %vm153_vm0, %v25_v1, 4286644096  ;;  %v42_v14 = vld [vmem:[%s1385_s0 + $0x84] sm:$0xf] }
   0x4   :  { %v57_v3 = vld [vmem:[%s1385_s0 + $0xc0] sm:$0xf]  ;;  %v163_v6 = vsel %vm153_vm0, %v41_v2, 4286644096  ;;  %v161_v8 = vmax.bf16 %v159_v5, %v156_v4  ;;  %v58_v19 = vld [vmem:[%s1385_s0 + $0xc4] sm:$0xf] }
   0x5   :  { %v73_v7 = vld [vmem:[%s1385_s0 + $0x100] sm:$0xf]  ;;  %v167_v10 = vsel %vm153_vm0, %v57_v3, 4286644096  ;;  %v191_v20 = vsel %vm153_vm0, %v10_v12, 4286644096 }
   0x6   :  { %v89_v9 = vld [vmem:[%s1385_s0 + $0x140] sm:$0xf]  ;;  %v165_v11 = vmax.bf16 %v163_v6, %v161_v8  ;;  %v171_v15 = vsel %vm153_vm0, %v73_v7, 4286644096  ;;  %v194_v21 = vsel %vm153_vm0, %v26_v13, 4286644096 }
   0x7   :  { %v105_v16 = vld [vmem:[%s1385_s0 + $0x180] sm:$0xf]  ;;  %v175_v18 = vsel %vm153_vm0, %v89_v9, 4286644096  ;;  %v198_v22 = vsel %vm153_vm0, %v42_v14, 4286644096  ;;  %v196_v27 = vmax.bf16 %v194_v21, %v191_v20 }
   0x8   :  { %v169_v17 = vmax.bf16 %v167_v10, %v165_v11  ;;  %v121_v23 = vld [vmem:[%s1385_s0 + $0x1c0] sm:$0xf]  ;;  %v74_v26 = vld [vmem:[%s1385_s0 + $0x104] sm:$0xf]  ;;  %v179_v28 = vsel %vm153_vm0, %v105_v16, 4286644096 }
   0x9   :  { %v137_v24 = vld [vmem:[%s1385_s0 + $0x200] sm:$0xf]  ;;  %v90_v29 = vld [vmem:[%s1385_s0 + $0x144] sm:$0xf]  ;;  %v202_v30 = vsel %vm153_vm0, %v58_v19, 4286644096  ;;  %v200_v32 = vmax.bf16 %v198_v22, %v196_v27 }
   0xa   :  { %v173_v25 = vmax.bf16 %v171_v15, %v169_v17  ;;  %v27_v34 = vld [vmem:[%s1385_s0 + $0x48] sm:$0xf]  ;;  %v183_v36 = vsel %vm153_vm0, %v121_v23, 4286644096  ;;  %v187_v37 = vsel %vm153_vm0, %v137_v24, 4286644096 }
   0xb   :  { %v43_v35 = vld [vmem:[%s1385_s0 + $0x88] sm:$0xf]  ;;  %v206_v38 = vsel %vm153_vm0, %v74_v26, 4286644096  ;;  %v106_v40 = vld [vmem:[%s1385_s0 + $0x184] sm:$0xf]  ;;  %v204_v41 = vmax.bf16 %v202_v30, %v200_v32 }
   0xc   :  { %v177_v31 = vmax.bf16 %v175_v18, %v173_v25  ;;  %v210_v42 = vsel %vm153_vm0, %v90_v29, 4286644096  ;;  %v59_v43 = vld [vmem:[%s1385_s0 + $0xc8] sm:$0xf]  ;;  %v226_v44 = vsel %vm153_vm0, %v11_v33, 4286644096 }
   0xd   :  { %v229_v45 = vsel %vm153_vm0, %v27_v34, 4286644096  ;;  %v233_v46 = vsel %vm153_vm0, %v43_v35, 4286644096  ;;  %v122_v48 = vld [vmem:[%s1385_s0 + $0x1c4] sm:$0xf]  ;;  %v208_v50 = vmax.bf16 %v206_v38, %v204_v41 }
   0xe   :  { %v181_v39 = vmax.bf16 %v179_v28, %v177_v31  ;;  %v138_v49 = vld [vmem:[%s1385_s0 + $0x204] sm:$0xf]  ;;  %v75_v51 = vld [vmem:[%s1385_s0 + $0x108] sm:$0xf]  ;;  %v231_v52 = vmax.bf16 %v229_v45, %v226_v44  ;;  %v214_v53 = vsel %vm153_vm0, %v106_v40, 4286644096 }
   0xf   :  { %v91_v54 = vld [vmem:[%s1385_s0 + $0x148] sm:$0xf]  ;;  %v237_v55 = vsel %vm153_vm0, %v59_v43, 4286644096  ;;  %v212_v57 = vmax.bf16 %v210_v42, %v208_v50  ;;  %v12_v59 = vld [vmem:[%s1385_s0 + $0xc] sm:$0xf] }
  0x10   :  { %v185_v47 = vmax.bf16 %v183_v36, %v181_v39  ;;  %v235_v58 = vmax.bf16 %v233_v46, %v231_v52  ;;  %v28_v60 = vld [vmem:[%s1385_s0 + $0x4c] sm:$0xf]  ;;  %v218_v62 = vsel %vm153_vm0, %v122_v48, 4286644096  ;;  %v222_v63 = vsel %vm153_vm0, %v138_v49, 4286644096 }
  0x11   :  { %v44_v61 = vld [vmem:[%s1385_s0 + $0x8c] sm:$0xf]  ;;  %v241_v0 = vsel %vm153_vm0, %v75_v51, 4286644096  ;;  %v216_v1 = vmax.bf16 %v214_v53, %v212_v57  ;;  %v107_v2 = vld [vmem:[%s1385_s0 + $0x188] sm:$0xf] }
  0x12   :  { %v189_v56 = vmax.bf16 %v187_v37, %v185_v47  ;;  %v239_v3 = vmax.bf16 %v237_v55, %v235_v58  ;;  %v245_v4 = vsel %vm153_vm0, %v91_v54, 4286644096  ;;  %v60_v5 = vld [vmem:[%s1385_s0 + $0xcc] sm:$0xf]  ;;  %v261_v6 = vsel %vm153_vm0, %v12_v59, 4286644096 }
  0x13   :  { %v264_v7 = vsel %vm153_vm0, %v28_v60, 4286644096  ;;  %v268_v8 = vsel %vm153_vm0, %v44_v61, 4286644096  ;;  %v220_v9 = vmax.bf16 %v218_v62, %v216_v1  ;;  %v123_v10 = vld [vmem:[%s1385_s0 + $0x1c8] sm:$0xf] }
  0x14   :  { %715 = vst.msk [vmem:[%s1386_s1] sm:$0xf] %vm153_vm0, %v189_v56  ;;  %v139_v11 = vld [vmem:[%s1385_s0 + $0x208] sm:$0xf]  ;;  %v243_v12 = vmax.bf16 %v241_v0, %v239_v3  ;;  %v76_v13 = vld [vmem:[%s1385_s0 + $0x10c] sm:$0xf]  ;;  %v266_v14 = vmax.bf16 %v264_v7, %v261_v6 }
  0x15   :  { %v249_v15 = vsel %vm153_vm0, %v107_v2, 4286644096  ;;  %v92_v16 = vld [vmem:[%s1385_s0 + $0x14c] sm:$0xf]  ;;  %v272_v17 = vsel %vm153_vm0, %v60_v5, 4286644096  ;;  %v224_v18 = vmax.bf16 %v222_v63, %v220_v9 }
  0x16   :  { %v247_v19 = vmax.bf16 %v245_v4, %v243_v12  ;;  %v270_v20 = vmax.bf16 %v268_v8, %v266_v14  ;;  %v13_v21 = vld [vmem:[%s1385_s0 + $0x10] sm:$0xf]  ;;  %v253_v24 = vsel %vm153_vm0, %v123_v10, 4286644096  ;;  %v257_v25 = vsel %vm153_vm0, %v139_v11, 4286644096 }
  0x17   :  { %v29_v22 = vld [vmem:[%s1385_s0 + $0x50] sm:$0xf]  ;;  %v276_v26 = vsel %vm153_vm0, %v76_v13, 4286644096  ;;  %716 = vst.msk [vmem:[%s1386_s1 + $0x4] sm:$0xf] %vm153_vm0, %v224_v18 }
  0x18   :  { %v45_v23 = vld [vmem:[%s1385_s0 + $0x90] sm:$0xf]  ;;  %v251_v27 = vmax.bf16 %v249_v15, %v247_v19  ;;  %v108_v28 = vld [vmem:[%s1385_s0 + $0x18c] sm:$0xf]  ;;  %v274_v29 = vmax.bf16 %v272_v17, %v270_v20  ;;  %v280_v30 = vsel %vm153_vm0, %v92_v16, 4286644096 }
  0x19   :  { %v61_v31 = vld [vmem:[%s1385_s0 + $0xd0] sm:$0xf]  ;;  %v296_v32 = vsel %vm153_vm0, %v13_v21, 4286644096  ;;  %v299_v33 = vsel %vm153_vm0, %v29_v22, 4286644096 }
  0x1a   :  { %v303_v34 = vsel %vm153_vm0, %v45_v23, 4286644096  ;;  %v255_v35 = vmax.bf16 %v253_v24, %v251_v27  ;;  %v124_v36 = vld [vmem:[%s1385_s0 + $0x1cc] sm:$0xf]  ;;  %v278_v38 = vmax.bf16 %v276_v26, %v274_v29  ;;  %v77_v39 = vld [vmem:[%s1385_s0 + $0x110] sm:$0xf]  ;;  %v301_v40 = vmax.bf16 %v299_v33, %v296_v32 }
  0x1b   :  { %v140_v37 = vld [vmem:[%s1385_s0 + $0x20c] sm:$0xf]  ;;  %v284_v41 = vsel %vm153_vm0, %v108_v28, 4286644096  ;;  %v93_v42 = vld [vmem:[%s1385_s0 + $0x150] sm:$0xf] }
  0x1c   :  { %v307_v43 = vsel %vm153_vm0, %v61_v31, 4286644096  ;;  %v259_v44 = vmax.bf16 %v257_v25, %v255_v35  ;;  %v282_v45 = vmax.bf16 %v280_v30, %v278_v38  ;;  %v305_v46 = vmax.bf16 %v303_v34, %v301_v40  ;;  %v14_v47 = vld [vmem:[%s1385_s0 + $0x14] sm:$0xf]  ;;  %v109_v54 = vld [vmem:[%s1385_s0 + $0x190] sm:$0xf] }
  0x1d   :  { %v30_v48 = vld [vmem:[%s1385_s0 + $0x54] sm:$0xf]  ;;  %v288_v50 = vsel %vm153_vm0, %v124_v36, 4286644096  ;;  %v292_v51 = vsel %vm153_vm0, %v140_v37, 4286644096 }
  0x1e   :  { %v46_v49 = vld [vmem:[%s1385_s0 + $0x94] sm:$0xf]  ;;  %v311_v52 = vsel %vm153_vm0, %v77_v39, 4286644096  ;;  %717 = vst.msk [vmem:[%s1386_s1 + $0x8] sm:$0xf] %vm153_vm0, %v259_v44  ;;  %v286_v53 = vmax.bf16 %v284_v41, %v282_v45  ;;  %v309_v55 = vmax.bf16 %v307_v43, %v305_v46 }
  0x1f   :  { %v315_v56 = vsel %vm153_vm0, %v93_v42, 4286644096  ;;  %v62_v57 = vld [vmem:[%s1385_s0 + $0xd4] sm:$0xf]  ;;  %v331_v58 = vsel %vm153_vm0, %v14_v47, 4286644096 }
  0x20   :  { %v334_v59 = vsel %vm153_vm0, %v30_v48, 4286644096  ;;  %v338_v60 = vsel %vm153_vm0, %v46_v49, 4286644096  ;;  %v290_v61 = vmax.bf16 %v288_v50, %v286_v53  ;;  %v125_v62 = vld [vmem:[%s1385_s0 + $0x1d0] sm:$0xf]  ;;  %v313_v0 = vmax.bf16 %v311_v52, %v309_v55 }
  0x21   :  { %v141_v63 = vld [vmem:[%s1385_s0 + $0x210] sm:$0xf]  ;;  %v78_v1 = vld [vmem:[%s1385_s0 + $0x114] sm:$0xf]  ;;  %v336_v2 = vmax.bf16 %v334_v59, %v331_v58  ;;  %v319_v3 = vsel %vm153_vm0, %v109_v54, 4286644096 }
  0x22   :  { %v94_v4 = vld [vmem:[%s1385_s0 + $0x154] sm:$0xf]  ;;  %v342_v5 = vsel %vm153_vm0, %v62_v57, 4286644096  ;;  %v294_v6 = vmax.bf16 %v292_v51, %v290_v61  ;;  %v317_v7 = vmax.bf16 %v315_v56, %v313_v0  ;;  %v15_v9 = vld [vmem:[%s1385_s0 + $0x18] sm:$0xf] }
  0x23   :  { %v340_v8 = vmax.bf16 %v338_v60, %v336_v2  ;;  %v31_v10 = vld [vmem:[%s1385_s0 + $0x58] sm:$0xf]  ;;  %v323_v12 = vsel %vm153_vm0, %v125_v62, 4286644096  ;;  %v327_v13 = vsel %vm153_vm0, %v141_v63, 4286644096 }
  0x24   :  { %v47_v11 = vld [vmem:[%s1385_s0 + $0x98] sm:$0xf]  ;;  %v346_v14 = vsel %vm153_vm0, %v78_v1, 4286644096  ;;  %718 = vst.msk [vmem:[%s1386_s1 + $0xc] sm:$0xf] %vm153_vm0, %v294_v6  ;;  %v321_v15 = vmax.bf16 %v319_v3, %v317_v7 }
  0x25   :  { %v110_v16 = vld [vmem:[%s1385_s0 + $0x194] sm:$0xf]  ;;  %v344_v17 = vmax.bf16 %v342_v5, %v340_v8  ;;  %v350_v18 = vsel %vm153_vm0, %v94_v4, 4286644096  ;;  %v63_v19 = vld [vmem:[%s1385_s0 + $0xd8] sm:$0xf] }
  0x26   :  { %v366_v20 = vsel %vm153_vm0, %v15_v9, 4286644096  ;;  %v369_v21 = vsel %vm153_vm0, %v31_v10, 4286644096  ;;  %v373_v22 = vsel %vm153_vm0, %v47_v11, 4286644096  ;;  %v325_v23 = vmax.bf16 %v323_v12, %v321_v15 }
  0x27   :  { %v126_v24 = vld [vmem:[%s1385_s0 + $0x1d4] sm:$0xf]  ;;  %v348_v26 = vmax.bf16 %v346_v14, %v344_v17  ;;  %v79_v27 = vld [vmem:[%s1385_s0 + $0x118] sm:$0xf]  ;;  %v371_v28 = vmax.bf16 %v369_v21, %v366_v20  ;;  %v354_v29 = vsel %vm153_vm0, %v110_v16, 4286644096 }
  0x28   :  { %v142_v25 = vld [vmem:[%s1385_s0 + $0x214] sm:$0xf]  ;;  %v95_v30 = vld [vmem:[%s1385_s0 + $0x158] sm:$0xf]  ;;  %v377_v31 = vsel %vm153_vm0, %v63_v19, 4286644096  ;;  %v329_v32 = vmax.bf16 %v327_v13, %v325_v23 }
  0x29   :  { %v352_v33 = vmax.bf16 %v350_v18, %v348_v26  ;;  %v375_v34 = vmax.bf16 %v373_v22, %v371_v28  ;;  %v16_v35 = vld [vmem:[%s1385_s0 + $0x1c] sm:$0xf]  ;;  %v358_v38 = vsel %vm153_vm0, %v126_v24, 4286644096  ;;  %v362_v39 = vsel %vm153_vm0, %v142_v25, 4286644096 }
  0x2a   :  { %v32_v36 = vld [vmem:[%s1385_s0 + $0x5c] sm:$0xf]  ;;  %v381_v40 = vsel %vm153_vm0, %v79_v27, 4286644096  ;;  %719 = vst.msk [vmem:[%s1386_s1 + $0x10] sm:$0xf] %vm153_vm0, %v329_v32 }
  0x2b   :  { %v48_v37 = vld [vmem:[%s1385_s0 + $0x9c] sm:$0xf]  ;;  %v356_v41 = vmax.bf16 %v354_v29, %v352_v33  ;;  %v111_v42 = vld [vmem:[%s1385_s0 + $0x198] sm:$0xf]  ;;  %v379_v43 = vmax.bf16 %v377_v31, %v375_v34  ;;  %v385_v44 = vsel %vm153_vm0, %v95_v30, 4286644096 }
  0x2c   :  { %v64_v45 = vld [vmem:[%s1385_s0 + $0xdc] sm:$0xf]  ;;  %v401_v46 = vsel %vm153_vm0, %v16_v35, 4286644096  ;;  %v404_v47 = vsel %vm153_vm0, %v32_v36, 4286644096 }
  0x2d   :  { %v408_v48 = vsel %vm153_vm0, %v48_v37, 4286644096  ;;  %v360_v49 = vmax.bf16 %v358_v38, %v356_v41  ;;  %v127_v50 = vld [vmem:[%s1385_s0 + $0x1d8] sm:$0xf]  ;;  %v383_v52 = vmax.bf16 %v381_v40, %v379_v43  ;;  %v80_v53 = vld [vmem:[%s1385_s0 + $0x11c] sm:$0xf]  ;;  %v406_v54 = vmax.bf16 %v404_v47, %v401_v46 }
  0x2e   :  { %v143_v51 = vld [vmem:[%s1385_s0 + $0x218] sm:$0xf]  ;;  %v389_v55 = vsel %vm153_vm0, %v111_v42, 4286644096  ;;  %v96_v56 = vld [vmem:[%s1385_s0 + $0x15c] sm:$0xf] }
  0x2f   :  { %v412_v57 = vsel %vm153_vm0, %v64_v45, 4286644096  ;;  %v364_v58 = vmax.bf16 %v362_v39, %v360_v49  ;;  %v387_v59 = vmax.bf16 %v385_v44, %v383_v52  ;;  %v410_v60 = vmax.bf16 %v408_v48, %v406_v54  ;;  %v17_v61 = vld [vmem:[%s1385_s0 + $0x20] sm:$0xf]  ;;  %v112_v4 = vld [vmem:[%s1385_s0 + $0x19c] sm:$0xf] }
  0x30   :  { %v33_v62 = vld [vmem:[%s1385_s0 + $0x60] sm:$0xf]  ;;  %v393_v0 = vsel %vm153_vm0, %v127_v50, 4286644096  ;;  %v397_v1 = vsel %vm153_vm0, %v143_v51, 4286644096 }
  0x31   :  { %v49_v63 = vld [vmem:[%s1385_s0 + $0xa0] sm:$0xf]  ;;  %v416_v2 = vsel %vm153_vm0, %v80_v53, 4286644096  ;;  %720 = vst.msk [vmem:[%s1386_s1 + $0x14] sm:$0xf] %vm153_vm0, %v364_v58  ;;  %v391_v3 = vmax.bf16 %v389_v55, %v387_v59  ;;  %v414_v5 = vmax.bf16 %v412_v57, %v410_v60 }
  0x32   :  { %v420_v6 = vsel %vm153_vm0, %v96_v56, 4286644096  ;;  %v65_v7 = vld [vmem:[%s1385_s0 + $0xe0] sm:$0xf]  ;;  %v436_v8 = vsel %vm153_vm0, %v17_v61, 4286644096 }
  0x33   :  { %v439_v9 = vsel %vm153_vm0, %v33_v62, 4286644096  ;;  %v443_v10 = vsel %vm153_vm0, %v49_v63, 4286644096  ;;  %v395_v11 = vmax.bf16 %v393_v0, %v391_v3  ;;  %v128_v12 = vld [vmem:[%s1385_s0 + $0x1dc] sm:$0xf]  ;;  %v418_v14 = vmax.bf16 %v416_v2, %v414_v5 }
  0x34   :  { %v144_v13 = vld [vmem:[%s1385_s0 + $0x21c] sm:$0xf]  ;;  %v81_v15 = vld [vmem:[%s1385_s0 + $0x120] sm:$0xf]  ;;  %v441_v16 = vmax.bf16 %v439_v9, %v436_v8  ;;  %v424_v17 = vsel %vm153_vm0, %v112_v4, 4286644096 }
  0x35   :  { %v97_v18 = vld [vmem:[%s1385_s0 + $0x160] sm:$0xf]  ;;  %v447_v19 = vsel %vm153_vm0, %v65_v7, 4286644096  ;;  %v399_v20 = vmax.bf16 %v397_v1, %v395_v11  ;;  %v422_v21 = vmax.bf16 %v420_v6, %v418_v14  ;;  %v18_v23 = vld [vmem:[%s1385_s0 + $0x24] sm:$0xf] }
  0x36   :  { %v445_v22 = vmax.bf16 %v443_v10, %v441_v16  ;;  %v34_v24 = vld [vmem:[%s1385_s0 + $0x64] sm:$0xf]  ;;  %v428_v26 = vsel %vm153_vm0, %v128_v12, 4286644096  ;;  %v432_v27 = vsel %vm153_vm0, %v144_v13, 4286644096 }
  0x37   :  { %v50_v25 = vld [vmem:[%s1385_s0 + $0xa4] sm:$0xf]  ;;  %v451_v28 = vsel %vm153_vm0, %v81_v15, 4286644096  ;;  %721 = vst.msk [vmem:[%s1386_s1 + $0x18] sm:$0xf] %vm153_vm0, %v399_v20  ;;  %v426_v29 = vmax.bf16 %v424_v17, %v422_v21 }
  0x38   :  { %v113_v30 = vld [vmem:[%s1385_s0 + $0x1a0] sm:$0xf]  ;;  %v449_v31 = vmax.bf16 %v447_v19, %v445_v22  ;;  %v455_v32 = vsel %vm153_vm0, %v97_v18, 4286644096  ;;  %v66_v33 = vld [vmem:[%s1385_s0 + $0xe4] sm:$0xf] }
  0x39   :  { %v471_v34 = vsel %vm153_vm0, %v18_v23, 4286644096  ;;  %v474_v35 = vsel %vm153_vm0, %v34_v24, 4286644096  ;;  %v478_v36 = vsel %vm153_vm0, %v50_v25, 4286644096  ;;  %v430_v37 = vmax.bf16 %v428_v26, %v426_v29 }
  0x3a   :  { %v129_v38 = vld [vmem:[%s1385_s0 + $0x1e0] sm:$0xf]  ;;  %v453_v40 = vmax.bf16 %v451_v28, %v449_v31  ;;  %v82_v41 = vld [vmem:[%s1385_s0 + $0x124] sm:$0xf]  ;;  %v476_v42 = vmax.bf16 %v474_v35, %v471_v34  ;;  %v459_v43 = vsel %vm153_vm0, %v113_v30, 4286644096 }
  0x3b   :  { %v145_v39 = vld [vmem:[%s1385_s0 + $0x220] sm:$0xf]  ;;  %v98_v44 = vld [vmem:[%s1385_s0 + $0x164] sm:$0xf]  ;;  %v482_v45 = vsel %vm153_vm0, %v66_v33, 4286644096  ;;  %v434_v46 = vmax.bf16 %v432_v27, %v430_v37 }
  0x3c   :  { %v457_v47 = vmax.bf16 %v455_v32, %v453_v40  ;;  %v480_v48 = vmax.bf16 %v478_v36, %v476_v42  ;;  %v19_v49 = vld [vmem:[%s1385_s0 + $0x28] sm:$0xf]  ;;  %v463_v52 = vsel %vm153_vm0, %v129_v38, 4286644096  ;;  %v467_v53 = vsel %vm153_vm0, %v145_v39, 4286644096 }
  0x3d   :  { %v35_v50 = vld [vmem:[%s1385_s0 + $0x68] sm:$0xf]  ;;  %v486_v54 = vsel %vm153_vm0, %v82_v41, 4286644096  ;;  %722 = vst.msk [vmem:[%s1386_s1 + $0x1c] sm:$0xf] %vm153_vm0, %v434_v46 }
  0x3e   :  { %v51_v51 = vld [vmem:[%s1385_s0 + $0xa8] sm:$0xf]  ;;  %v461_v55 = vmax.bf16 %v459_v43, %v457_v47  ;;  %v114_v56 = vld [vmem:[%s1385_s0 + $0x1a4] sm:$0xf]  ;;  %v484_v57 = vmax.bf16 %v482_v45, %v480_v48  ;;  %v490_v58 = vsel %vm153_vm0, %v98_v44, 4286644096 }
  0x3f   :  { %v67_v59 = vld [vmem:[%s1385_s0 + $0xe8] sm:$0xf]  ;;  %v506_v60 = vsel %vm153_vm0, %v19_v49, 4286644096  ;;  %v509_v61 = vsel %vm153_vm0, %v35_v50, 4286644096 }
  0x40   :  { %v513_v62 = vsel %vm153_vm0, %v51_v51, 4286644096  ;;  %v465_v63 = vmax.bf16 %v463_v52, %v461_v55  ;;  %v130_v0 = vld [vmem:[%s1385_s0 + $0x1e4] sm:$0xf]  ;;  %v488_v2 = vmax.bf16 %v486_v54, %v484_v57  ;;  %v83_v3 = vld [vmem:[%s1385_s0 + $0x128] sm:$0xf]  ;;  %v511_v4 = vmax.bf16 %v509_v61, %v506_v60 }
  0x41   :  { %v146_v1 = vld [vmem:[%s1385_s0 + $0x224] sm:$0xf]  ;;  %v494_v5 = vsel %vm153_vm0, %v114_v56, 4286644096  ;;  %v99_v6 = vld [vmem:[%s1385_s0 + $0x168] sm:$0xf] }
  0x42   :  { %v517_v7 = vsel %vm153_vm0, %v67_v59, 4286644096  ;;  %v469_v8 = vmax.bf16 %v467_v53, %v465_v63  ;;  %v492_v9 = vmax.bf16 %v490_v58, %v488_v2  ;;  %v515_v10 = vmax.bf16 %v513_v62, %v511_v4  ;;  %v20_v11 = vld [vmem:[%s1385_s0 + $0x2c] sm:$0xf]  ;;  %v115_v18 = vld [vmem:[%s1385_s0 + $0x1a8] sm:$0xf] }
  0x43   :  { %v36_v12 = vld [vmem:[%s1385_s0 + $0x6c] sm:$0xf]  ;;  %v498_v14 = vsel %vm153_vm0, %v130_v0, 4286644096  ;;  %v502_v15 = vsel %vm153_vm0, %v146_v1, 4286644096 }
  0x44   :  { %v52_v13 = vld [vmem:[%s1385_s0 + $0xac] sm:$0xf]  ;;  %v521_v16 = vsel %vm153_vm0, %v83_v3, 4286644096  ;;  %723 = vst.msk [vmem:[%s1386_s1 + $0x20] sm:$0xf] %vm153_vm0, %v469_v8  ;;  %v496_v17 = vmax.bf16 %v494_v5, %v492_v9  ;;  %v519_v19 = vmax.bf16 %v517_v7, %v515_v10 }
  0x45   :  { %v525_v20 = vsel %vm153_vm0, %v99_v6, 4286644096  ;;  %v68_v21 = vld [vmem:[%s1385_s0 + $0xec] sm:$0xf]  ;;  %v541_v22 = vsel %vm153_vm0, %v20_v11, 4286644096 }
  0x46   :  { %v544_v23 = vsel %vm153_vm0, %v36_v12, 4286644096  ;;  %v548_v24 = vsel %vm153_vm0, %v52_v13, 4286644096  ;;  %v500_v25 = vmax.bf16 %v498_v14, %v496_v17  ;;  %v131_v26 = vld [vmem:[%s1385_s0 + $0x1e8] sm:$0xf]  ;;  %v523_v28 = vmax.bf16 %v521_v16, %v519_v19 }
  0x47   :  { %v147_v27 = vld [vmem:[%s1385_s0 + $0x228] sm:$0xf]  ;;  %v84_v29 = vld [vmem:[%s1385_s0 + $0x12c] sm:$0xf]  ;;  %v546_v30 = vmax.bf16 %v544_v23, %v541_v22  ;;  %v529_v31 = vsel %vm153_vm0, %v115_v18, 4286644096 }
  0x48   :  { %v100_v32 = vld [vmem:[%s1385_s0 + $0x16c] sm:$0xf]  ;;  %v552_v33 = vsel %vm153_vm0, %v68_v21, 4286644096  ;;  %v504_v34 = vmax.bf16 %v502_v15, %v500_v25  ;;  %v527_v35 = vmax.bf16 %v525_v20, %v523_v28  ;;  %v21_v37 = vld [vmem:[%s1385_s0 + $0x30] sm:$0xf] }
  0x49   :  { %v550_v36 = vmax.bf16 %v548_v24, %v546_v30  ;;  %v37_v38 = vld [vmem:[%s1385_s0 + $0x70] sm:$0xf]  ;;  %v533_v40 = vsel %vm153_vm0, %v131_v26, 4286644096  ;;  %v537_v41 = vsel %vm153_vm0, %v147_v27, 4286644096 }
  0x4a   :  { %v53_v39 = vld [vmem:[%s1385_s0 + $0xb0] sm:$0xf]  ;;  %v556_v42 = vsel %vm153_vm0, %v84_v29, 4286644096  ;;  %724 = vst.msk [vmem:[%s1386_s1 + $0x24] sm:$0xf] %vm153_vm0, %v504_v34  ;;  %v531_v43 = vmax.bf16 %v529_v31, %v527_v35 }
  0x4b   :  { %v116_v44 = vld [vmem:[%s1385_s0 + $0x1ac] sm:$0xf]  ;;  %v554_v45 = vmax.bf16 %v552_v33, %v550_v36  ;;  %v560_v46 = vsel %vm153_vm0, %v100_v32, 4286644096  ;;  %v69_v47 = vld [vmem:[%s1385_s0 + $0xf0] sm:$0xf] }
  0x4c   :  { %v576_v48 = vsel %vm153_vm0, %v21_v37, 4286644096  ;;  %v579_v49 = vsel %vm153_vm0, %v37_v38, 4286644096  ;;  %v583_v50 = vsel %vm153_vm0, %v53_v39, 4286644096  ;;  %v535_v51 = vmax.bf16 %v533_v40, %v531_v43 }
  0x4d   :  { %v132_v52 = vld [vmem:[%s1385_s0 + $0x1ec] sm:$0xf]  ;;  %v558_v54 = vmax.bf16 %v556_v42, %v554_v45  ;;  %v85_v55 = vld [vmem:[%s1385_s0 + $0x130] sm:$0xf]  ;;  %v581_v56 = vmax.bf16 %v579_v49, %v576_v48  ;;  %v564_v57 = vsel %vm153_vm0, %v116_v44, 4286644096 }
  0x4e   :  { %v148_v53 = vld [vmem:[%s1385_s0 + $0x22c] sm:$0xf]  ;;  %v101_v58 = vld [vmem:[%s1385_s0 + $0x170] sm:$0xf]  ;;  %v587_v59 = vsel %vm153_vm0, %v69_v47, 4286644096  ;;  %v539_v60 = vmax.bf16 %v537_v41, %v535_v51 }
  0x4f   :  { %v562_v61 = vmax.bf16 %v560_v46, %v558_v54  ;;  %v585_v62 = vmax.bf16 %v583_v50, %v581_v56  ;;  %v22_v63 = vld [vmem:[%s1385_s0 + $0x34] sm:$0xf]  ;;  %v568_v2 = vsel %vm153_vm0, %v132_v52, 4286644096  ;;  %v572_v3 = vsel %vm153_vm0, %v148_v53, 4286644096 }
  0x50   :  { %v38_v0 = vld [vmem:[%s1385_s0 + $0x74] sm:$0xf]  ;;  %v591_v4 = vsel %vm153_vm0, %v85_v55, 4286644096  ;;  %725 = vst.msk [vmem:[%s1386_s1 + $0x28] sm:$0xf] %vm153_vm0, %v539_v60 }
  0x51   :  { %v54_v1 = vld [vmem:[%s1385_s0 + $0xb4] sm:$0xf]  ;;  %v566_v5 = vmax.bf16 %v564_v57, %v562_v61  ;;  %v117_v6 = vld [vmem:[%s1385_s0 + $0x1b0] sm:$0xf]  ;;  %v589_v7 = vmax.bf16 %v587_v59, %v585_v62  ;;  %v595_v8 = vsel %vm153_vm0, %v101_v58, 4286644096 }
  0x52   :  { %v70_v9 = vld [vmem:[%s1385_s0 + $0xf4] sm:$0xf]  ;;  %v611_v10 = vsel %vm153_vm0, %v22_v63, 4286644096  ;;  %v614_v11 = vsel %vm153_vm0, %v38_v0, 4286644096 }
  0x53   :  { %v618_v12 = vsel %vm153_vm0, %v54_v1, 4286644096  ;;  %v570_v13 = vmax.bf16 %v568_v2, %v566_v5  ;;  %v133_v14 = vld [vmem:[%s1385_s0 + $0x1f0] sm:$0xf]  ;;  %v593_v16 = vmax.bf16 %v591_v4, %v589_v7  ;;  %v86_v17 = vld [vmem:[%s1385_s0 + $0x134] sm:$0xf]  ;;  %v616_v18 = vmax.bf16 %v614_v11, %v611_v10 }
  0x54   :  { %v149_v15 = vld [vmem:[%s1385_s0 + $0x230] sm:$0xf]  ;;  %v599_v19 = vsel %vm153_vm0, %v117_v6, 4286644096  ;;  %v102_v20 = vld [vmem:[%s1385_s0 + $0x174] sm:$0xf] }
  0x55   :  { %v622_v21 = vsel %vm153_vm0, %v70_v9, 4286644096  ;;  %v574_v22 = vmax.bf16 %v572_v3, %v570_v13  ;;  %v597_v23 = vmax.bf16 %v595_v8, %v593_v16  ;;  %v620_v24 = vmax.bf16 %v618_v12, %v616_v18  ;;  %v23_v25 = vld [vmem:[%s1385_s0 + $0x38] sm:$0xf]  ;;  %v118_v32 = vld [vmem:[%s1385_s0 + $0x1b4] sm:$0xf] }
  0x56   :  { %v39_v26 = vld [vmem:[%s1385_s0 + $0x78] sm:$0xf]  ;;  %v603_v28 = vsel %vm153_vm0, %v133_v14, 4286644096  ;;  %v607_v29 = vsel %vm153_vm0, %v149_v15, 4286644096 }
  0x57   :  { %v55_v27 = vld [vmem:[%s1385_s0 + $0xb8] sm:$0xf]  ;;  %v626_v30 = vsel %vm153_vm0, %v86_v17, 4286644096  ;;  %726 = vst.msk [vmem:[%s1386_s1 + $0x2c] sm:$0xf] %vm153_vm0, %v574_v22  ;;  %v601_v31 = vmax.bf16 %v599_v19, %v597_v23  ;;  %v624_v33 = vmax.bf16 %v622_v21, %v620_v24 }
  0x58   :  { %v630_v34 = vsel %vm153_vm0, %v102_v20, 4286644096  ;;  %v71_v35 = vld [vmem:[%s1385_s0 + $0xf8] sm:$0xf]  ;;  %v646_v36 = vsel %vm153_vm0, %v23_v25, 4286644096 }
  0x59   :  { %v649_v37 = vsel %vm153_vm0, %v39_v26, 4286644096  ;;  %v653_v38 = vsel %vm153_vm0, %v55_v27, 4286644096  ;;  %v605_v39 = vmax.bf16 %v603_v28, %v601_v31  ;;  %v134_v40 = vld [vmem:[%s1385_s0 + $0x1f4] sm:$0xf]  ;;  %v628_v42 = vmax.bf16 %v626_v30, %v624_v33 }
  0x5a   :  { %v150_v41 = vld [vmem:[%s1385_s0 + $0x234] sm:$0xf]  ;;  %v87_v43 = vld [vmem:[%s1385_s0 + $0x138] sm:$0xf]  ;;  %v651_v44 = vmax.bf16 %v649_v37, %v646_v36  ;;  %v634_v45 = vsel %vm153_vm0, %v118_v32, 4286644096 }
  0x5b   :  { %v103_v46 = vld [vmem:[%s1385_s0 + $0x178] sm:$0xf]  ;;  %v657_v47 = vsel %vm153_vm0, %v71_v35, 4286644096  ;;  %v609_v48 = vmax.bf16 %v607_v29, %v605_v39  ;;  %v632_v49 = vmax.bf16 %v630_v34, %v628_v42  ;;  %v24_v51 = vld [vmem:[%s1385_s0 + $0x3c] sm:$0xf] }
  0x5c   :  { %v655_v50 = vmax.bf16 %v653_v38, %v651_v44  ;;  %v40_v52 = vld [vmem:[%s1385_s0 + $0x7c] sm:$0xf]  ;;  %v638_v54 = vsel %vm153_vm0, %v134_v40, 4286644096  ;;  %v642_v55 = vsel %vm153_vm0, %v150_v41, 4286644096 }
  0x5d   :  { %v56_v53 = vld [vmem:[%s1385_s0 + $0xbc] sm:$0xf]  ;;  %v661_v56 = vsel %vm153_vm0, %v87_v43, 4286644096  ;;  %727 = vst.msk [vmem:[%s1386_s1 + $0x30] sm:$0xf] %vm153_vm0, %v609_v48  ;;  %v636_v57 = vmax.bf16 %v634_v45, %v632_v49 }
  0x5e   :  { %v119_v58 = vld [vmem:[%s1385_s0 + $0x1b8] sm:$0xf]  ;;  %v659_v59 = vmax.bf16 %v657_v47, %v655_v50  ;;  %v665_v60 = vsel %vm153_vm0, %v103_v46, 4286644096  ;;  %v72_v61 = vld [vmem:[%s1385_s0 + $0xfc] sm:$0xf] }
  0x5f   :  { %v681_v62 = vsel %vm153_vm0, %v24_v51, 4286644096  ;;  %v684_v63 = vsel %vm153_vm0, %v40_v52, 4286644096  ;;  %v688_v0 = vsel %vm153_vm0, %v56_v53, 4286644096  ;;  %v640_v1 = vmax.bf16 %v638_v54, %v636_v57 }
  0x60   :  { %v135_v2 = vld [vmem:[%s1385_s0 + $0x1f8] sm:$0xf]  ;;  %v663_v3 = vmax.bf16 %v661_v56, %v659_v59  ;;  %v88_v4 = vld [vmem:[%s1385_s0 + $0x13c] sm:$0xf]  ;;  %v686_v5 = vmax.bf16 %v684_v63, %v681_v62  ;;  %v669_v6 = vsel %vm153_vm0, %v119_v58, 4286644096 }
  0x61   :  { %v692_v7 = vsel %vm153_vm0, %v72_v61, 4286644096  ;;  %v644_v8 = vmax.bf16 %v642_v55, %v640_v1  ;;  %v151_v9 = vld [vmem:[%s1385_s0 + $0x238] sm:$0xf]  ;;  %v104_v11 = vld [vmem:[%s1385_s0 + $0x17c] sm:$0xf] }
  0x62   :  { %v667_v10 = vmax.bf16 %v665_v60, %v663_v3  ;;  %v690_v12 = vmax.bf16 %v688_v0, %v686_v5  ;;  %v673_v13 = vsel %vm153_vm0, %v135_v2, 4286644096  ;;  %v696_v14 = vsel %vm153_vm0, %v88_v4, 4286644096  ;;  %v120_v16 = vld [vmem:[%s1385_s0 + $0x1bc] sm:$0xf] }
  0x63   :  { %728 = vst.msk [vmem:[%s1386_s1 + $0x34] sm:$0xf] %vm153_vm0, %v644_v8  ;;  %v677_v18 = vsel %vm153_vm0, %v151_v9, 4286644096  ;;  %v700_v19 = vsel %vm153_vm0, %v104_v11, 4286644096 }
  0x64   :  { %v671_v15 = vmax.bf16 %v669_v6, %v667_v10  ;;  %v694_v17 = vmax.bf16 %v692_v7, %v690_v12  ;;  %v136_v21 = vld [vmem:[%s1385_s0 + $0x1fc] sm:$0xf]  ;;  %v704_v23 = vsel %vm153_vm0, %v120_v16, 4286644096 }
  0x65   :  { %v152_v25 = vld [vmem:[%s1385_s0 + $0x23c] sm:$0xf]  ;;  %v708_v27 = vsel %vm153_vm0, %v136_v21, 4286644096 }
  0x66   :  { %v675_v20 = vmax.bf16 %v673_v13, %v671_v15  ;;  %v698_v22 = vmax.bf16 %v696_v14, %v694_v17  ;;  %v712_v29 = vsel %vm153_vm0, %v152_v25, 4286644096 }
  0x68   :  { %v679_v24 = vmax.bf16 %v677_v18, %v675_v20  ;;  %v702_v26 = vmax.bf16 %v700_v19, %v698_v22 }
  0x6a   :  { %729 = vst.msk [vmem:[%s1386_s1 + $0x38] sm:$0xf] %vm153_vm0, %v679_v24  ;;  %v706_v28 = vmax.bf16 %v704_v23, %v702_v26 }
  0x6c   :  { %v710_v30 = vmax.bf16 %v708_v27, %v706_v28 }
  0x6e   :  { %v714_v31 = vmax.bf16 %v712_v29, %v710_v30 }
  0x70   :  { %730 = vst.msk [vmem:[%s1386_s1 + $0x3c] sm:$0xf] %vm153_vm0, %v714_v31 }

// kernel: fwd.36
= control target key start
LH: loop header
LB: loop body
LE: loop exit
PB: predicated region body
PF: predicated region fallthrough
CT: control target
= control target key end

     0   :  { %vm110_vm0 = vcmask 523264   ;;  %s579_s1 = inlined_call_operand.vmem [shape: bf16[64,128], index: 1, kind: input, shape index: {}]   ;;  %s580_s0 = inlined_call_operand.vmem [shape: bf16[128,64], index: 0, kind: input, shape index: {}]   ;;  %s581_s2 = inlined_call_operand.vmem [shape: f32[1,128], index: 2, kind: input, shape index: {}]   ;;  %s582_s3 = inlined_call_operand.vmem [shape: bf16[128,128], index: 3, kind: output, shape index: {}]  }
   0x1   :  { %v476_v0 = vld [vmem:[%s579_s1] sm:$0xff]   ;;  %v477_v1 = vld [vmem:[%s579_s1 + $0x8] sm:$0xff]   ;;  %v478_v2 = vld [vmem:[%s579_s1 + $0x10] sm:$0xff]  }
   0x2   :  { %444 = vmatprep.subr.bf16.mxu0 %v476_v0  ;;  %468 = vmatprep.subr.bf16.mxu1 %v476_v0  ;;  %v480_v3 = vld [vmem:[%s580_s0] sm:$0xff]   ;;  %v479_v5 = vld [vmem:[%s579_s1 + $0x18] sm:$0xff]   ;;  %v482_v6 = vld [vmem:[%s580_s0 + $0x8] sm:$0xff]  }
   0x3   :  { %445 = vmatpush3.bf16.msra.mxu0 %v476_v0  ;;  %472 = vmatpush3.bf16.msra.mxu1 %v476_v0  ;;  %v481_v4 = vld [vmem:[%s580_s0 + $0x20] sm:$0xff]   ;;  %v483_v7 = vld [vmem:[%s580_s0 + $0x28] sm:$0xff]   ;;  %v484_v8 = vld [vmem:[%s580_s0 + $0x10] sm:$0xff]  }
   0x4   :  { %446 = vmatprep.subr.bf16.mxu0 %v477_v1  ;;  %469 = vmatprep.subr.bf16.mxu1 %v477_v1  ;;  %v485_v9 = vld [vmem:[%s580_s0 + $0x30] sm:$0xff]   ;;  %v486_v10 = vld [vmem:[%s580_s0 + $0x18] sm:$0xff]   ;;  %v332_v12 = vld [vmem:[%s581_s2] ss:$0 sm:$0xff] }
   0x5   :  { %452 = vmatprep.mubr.msk.bf16.mxu0 %vm110_vm0, %v480_v3  ;;  %460 = vmatprep.mubr.msk.bf16.mxu1 %vm110_vm0, %v481_v4  ;;  %v487_v11 = vld [vmem:[%s580_s0 + $0x38] sm:$0xff]  }
   0x7   :  { %447 = vmatpush3.bf16.msra.mxu0 %v477_v1  ;;  %473 = vmatpush3.bf16.msra.mxu1 %v477_v1 }
   0x8   :  { %448 = vmatprep.subr.bf16.mxu0 %v478_v2  ;;  %470 = vmatprep.subr.bf16.mxu1 %v478_v2 }
   0xb   :  { %449 = vmatpush3.bf16.msra.mxu0 %v478_v2  ;;  %474 = vmatpush3.bf16.msra.mxu1 %v478_v2 }
   0xc   :  { %450 = vmatprep.subr.bf16.mxu0 %v479_v5  ;;  %471 = vmatprep.subr.bf16.mxu1 %v479_v5 }
   0xf   :  { %451 = vmatpush3.bf16.msra.mxu0 %v479_v5  ;;  %475 = vmatpush3.bf16.msra.mxu1 %v479_v5 }
  0x12   :  { %453 = vmatmul.mubr.msk.bf16.vlgmr.msra.gmra.mrb[0].mxu0 %vm110_vm0, %v482_v6  ;;  %461 = vmatmul.mubr.msk.bf16.vlgmr.msra.gmra.mrb[0].mxu1 %vm110_vm0, %v483_v7 }
  0x13   :  { %456 = vmatprep.mubr.msk.bf16.mxu0 %vm110_vm0, %v484_v8  ;;  %464 = vmatprep.mubr.msk.bf16.mxu1 %vm110_vm0, %v485_v9 }
  0x1a   :  { %457 = vmatmul.mubr.msk.bf16.gmra.mrb[4].mxu0 %vm110_vm0, %v486_v10  ;;  %465 = vmatmul.mubr.msk.bf16.gmra.mrb[4].mxu1 %vm110_vm0, %v487_v11 }
  0xe5   :  { %v454_v13 = vpop.f32.mrb[0].mxu0  ;;  %v462_v14 = vpop.f32.mrb[0].mxu1 }
  0xe6   :  { %v178_v15 = vadd.f32 %v454_v13, %v332_v12  ;;  %v210_v16 = vadd.f32 %v462_v14, %v332_v12  ;;  %v169_v17 = vpop.f32.mrb[1].mxu0  ;;  %v201_v18 = vpop.f32.mrb[1].mxu1 }
  0xe7   :  { %v170_v19 = vadd.f32 %v332_v12, %v169_v17  ;;  %v202_v20 = vadd.f32 %v332_v12, %v201_v18  ;;  %v455_v21 = vpop.f32.mrb[2].mxu0  ;;  %v463_v22 = vpop.f32.mrb[2].mxu1 }
  0xe8   :  { %v181_v23 = vadd.f32 %v455_v21, %v332_v12  ;;  %v213_v24 = vadd.f32 %v463_v22, %v332_v12  ;;  %v172_v25 = vpop.f32.mrb[3].mxu0  ;;  %v204_v26 = vpop.f32.mrb[3].mxu1  ;;  %v234_v29 = vmax.f32 %v178_v15, 0.0  ;;  %v242_v30 = vmax.f32 %v210_v16, 0.0 }
  0xe9   :  { %v173_v27 = vadd.f32 %v332_v12, %v172_v25  ;;  %v205_v28 = vadd.f32 %v332_v12, %v204_v26  ;;  %v232_v33 = vmax.f32 %v170_v19, 0.0  ;;  %v240_v34 = vmax.f32 %v202_v20, 0.0 }
  0xea   :  { %v235_v31 = vmax.f32 %v181_v23, 0.0  ;;  %v243_v32 = vmax.f32 %v213_v24, 0.0 }
  0xeb   :  { %v233_v35 = vmax.f32 %v173_v27, 0.0  ;;  %v241_v36 = vmax.f32 %v205_v28, 0.0 }
  0xec   :  { %v393_v37 = vpack.c.bf16 %v235_v31, %v234_v29  ;;  %v413_v38 = vpack.c.bf16 %v243_v32, %v242_v30 }
  0xed   :  { %v388_v39 = vpack.c.bf16 %v233_v35, %v232_v33  ;;  %v408_v40 = vpack.c.bf16 %v241_v36, %v240_v34  ;;  %v458_v41 = vpop.f32.mrb[4].mxu0  ;;  %v466_v42 = vpop.f32.mrb[4].mxu1 }
  0xee   :  { %425 = vst [vmem:[%s582_s3 + $0x8] sm:$0xff] %v393_v37   ;;  %429 = vst [vmem:[%s582_s3 + $0x28] sm:$0xff] %v413_v38   ;;  %v194_v43 = vadd.f32 %v458_v41, %v332_v12  ;;  %v226_v44 = vadd.f32 %v466_v42, %v332_v12  ;;  %v185_v45 = vpop.f32.mrb[5].mxu0  ;;  %v217_v46 = vpop.f32.mrb[5].mxu1 }
  0xef   :  { %389 = vst [vmem:[%s582_s3] sm:$0xff] %v388_v39   ;;  %428 = vst [vmem:[%s582_s3 + $0x20] sm:$0xff] %v408_v40   ;;  %v186_v47 = vadd.f32 %v332_v12, %v185_v45  ;;  %v218_v48 = vadd.f32 %v332_v12, %v217_v46  ;;  %v459_v49 = vpop.f32.mrb[6].mxu0  ;;  %v467_v50 = vpop.f32.mrb[6].mxu1 }
  0xf0   :  { %v197_v51 = vadd.f32 %v459_v49, %v332_v12  ;;  %v229_v52 = vadd.f32 %v467_v50, %v332_v12  ;;  %v188_v53 = vpop.f32.mrb[7].mxu0  ;;  %v220_v54 = vpop.f32.mrb[7].mxu1  ;;  %v238_v57 = vmax.f32 %v194_v43, 0.0  ;;  %v246_v58 = vmax.f32 %v226_v44, 0.0 }
  0xf1   :  { %v189_v55 = vadd.f32 %v332_v12, %v188_v53  ;;  %v221_v56 = vadd.f32 %v332_v12, %v220_v54  ;;  %v236_v61 = vmax.f32 %v186_v47, 0.0  ;;  %v244_v62 = vmax.f32 %v218_v48, 0.0 }
  0xf2   :  { %v239_v59 = vmax.f32 %v197_v51, 0.0  ;;  %v247_v60 = vmax.f32 %v229_v52, 0.0 }
  0xf3   :  { %v237_v63 = vmax.f32 %v189_v55, 0.0  ;;  %v245_v0 = vmax.f32 %v221_v56, 0.0 }
  0xf4   :  { %v403_v1 = vpack.c.bf16 %v239_v59, %v238_v57  ;;  %v423_v2 = vpack.c.bf16 %v247_v60, %v246_v58 }
  0xf5   :  { %v398_v3 = vpack.c.bf16 %v237_v63, %v236_v61  ;;  %v418_v4 = vpack.c.bf16 %v245_v0, %v244_v62 }
  0xf6   :  { %427 = vst [vmem:[%s582_s3 + $0x18] sm:$0xff] %v403_v1   ;;  %431 = vst [vmem:[%s582_s3 + $0x38] sm:$0xff] %v423_v2  }
  0xf7   :  { %426 = vst [vmem:[%s582_s3 + $0x10] sm:$0xff] %v398_v3   ;;  %430 = vst [vmem:[%s582_s3 + $0x30] sm:$0xff] %v418_v4  }

// kernel: fwd.37
= control target key start
LH: loop header
LB: loop body
LE: loop exit
PB: predicated region body
PF: predicated region fallthrough
CT: control target
= control target key end

     0   :  { %v644_v0 = vmov 0   ;;  %vm229_vm0 = vcmask 867328   ;;  %vm254_vm1 = vcmask 1044480   ;;  %s841_s1 = inlined_call_operand.vmem [shape: bf16[234,128], index: 1, kind: input, shape index: {}]   ;;  %s842_s0 = inlined_call_operand.vmem [shape: bf16[128,234], index: 0, kind: input, shape index: {}]   ;;  %s843_s2 = inlined_call_operand.vmem [shape: f32[1,128], index: 2, kind: input, shape index: {}]   ;;  %s844_s3 = inlined_call_operand.vmem [shape: bf16[128,128], index: 3, kind: output, shape index: {}]  }
   0x1   :  { %258 = vmatprep.subr.bf16.mxu0 %v644_v0  ;;  %574 = vmatprep.subr.bf16.mxu1 %v644_v0  ;;  %v605_v1 = vld [vmem:[%s841_s1] sm:$0xff]   ;;  %v606_v2 = vld [vmem:[%s841_s1 + $0x8] sm:$0xff]   ;;  %v607_v3 = vld [vmem:[%s841_s1 + $0x10] sm:$0xff]  }
   0x2   :  { %259 = vmatpush1.bf16.msra.mxu0 %v605_v1  ;;  %589 = vmatpush1.bf16.msra.mxu1 %v605_v1  ;;  %v608_v4 = vld [vmem:[%s841_s1 + $0x18] sm:$0xff]   ;;  %v609_v5 = vld [vmem:[%s841_s1 + $0x20] sm:$0xff]   ;;  %v610_v8 = vld [vmem:[%s841_s1 + $0x28] sm:$0xff]  }
   0x3   :  { %260 = vmatprep.subr.bf16.mxu0 %v644_v0  ;;  %575 = vmatprep.subr.bf16.mxu1 %v644_v0  ;;  %v622_v6 = vld [vmem:[%s842_s0 + $0x4] ss:$8 sps:$4 sm:$0xff]   ;;  %v611_v9 = vld [vmem:[%s841_s1 + $0x30] sm:$0xff]   ;;  %v612_v10 = vld [vmem:[%s841_s1 + $0x38] sm:$0xff]  }
   0x4   :  { %v625_v7 = vld [vmem:[%s842_s0 + $0x44] ss:$8 sps:$4 sm:$0xff]   ;;  %487 = vmatprep.mubr.msk.bf16.mxu0 %vm229_vm0, %v622_v6  ;;  %v615_v13 = vld [vmem:[%s841_s1 + $0x50] sm:$0xff]   ;;  %v616_v14 = vld [vmem:[%s841_s1 + $0x58] sm:$0xff]  }
   0x5   :  { %491 = vmatprep.mubr.msk.bf16.mxu1 %vm229_vm0, %v625_v7  ;;  %v613_v11 = vld [vmem:[%s841_s1 + $0x40] sm:$0xff]   ;;  %v614_v12 = vld [vmem:[%s841_s1 + $0x48] sm:$0xff]   ;;  %v619_v17 = vld [vmem:[%s841_s1 + $0x70] sm:$0x1f]  }
   0x6   :  { %261 = vmatpush1.bf16.msra.mxu0 %v606_v2  ;;  %590 = vmatpush1.bf16.msra.mxu1 %v606_v2  ;;  %v617_v15 = vld [vmem:[%s841_s1 + $0x60] sm:$0xff]   ;;  %v618_v16 = vld [vmem:[%s841_s1 + $0x68] sm:$0xff]   ;;  %v256_v18 = vsel %vm254_vm1, %v619_v17, 0  ;;  %v626_v21 = vld [vmem:[%s842_s0 + $0x14] ss:$8 sps:$4 sm:$0xff]  }
   0x7   :  { %262 = vmatprep.subr.bf16.mxu0 %v644_v0  ;;  %576 = vmatprep.subr.bf16.mxu1 %v644_v0  ;;  %v620_v19 = vld [vmem:[%s842_s0] ss:$8 sps:$4 sm:$0xff]   ;;  %v628_v22 = vld [vmem:[%s842_s0 + $0x54] ss:$8 sps:$4 sm:$0xff]   ;;  %v630_v23 = vld [vmem:[%s842_s0 + $0x10] ss:$8 sps:$4 sm:$0xff]  }
   0x8   :  { %v623_v20 = vld [vmem:[%s842_s0 + $0x40] ss:$8 sps:$4 sm:$0xff]   ;;  %v631_v24 = vld [vmem:[%s842_s0 + $0x50] ss:$8 sps:$4 sm:$0xff]   ;;  %v632_v25 = vld [vmem:[%s842_s0 + $0x24] ss:$8 sps:$4 sm:$0xff]  }
   0x9   :  { %v634_v26 = vld [vmem:[%s842_s0 + $0x64] ss:$8 sps:$4 sm:$0xff]   ;;  %v636_v27 = vld [vmem:[%s842_s0 + $0x20] ss:$8 sps:$4 sm:$0xff]   ;;  %v638_v29 = vld [vmem:[%s842_s0 + $0x34] ss:$8 sps:$4 sm:$0xff]  }
   0xa   :  { %263 = vmatpush1.bf16.msra.mxu0 %v607_v3  ;;  %591 = vmatpush1.bf16.msra.mxu1 %v607_v3  ;;  %v637_v28 = vld [vmem:[%s842_s0 + $0x60] ss:$8 sps:$4 sm:$0xff]   ;;  %v640_v30 = vld [vmem:[%s842_s0 + $0x74] ss:$8 sps:$4 sm:$0xff]   ;;  %v642_v31 = vld [vmem:[%s842_s0 + $0x30] ss:$8 sps:$4 sm:$0xff]  }
   0xb   :  { %264 = vmatprep.subr.bf16.mxu0 %v644_v0  ;;  %577 = vmatprep.subr.bf16.mxu1 %v644_v0  ;;  %v643_v32 = vld [vmem:[%s842_s0 + $0x70] ss:$8 sps:$4 sm:$0xff]   ;;  %v799_v33 = vld [vmem:[%s843_s2] ss:$0 sm:$0xff] }
   0xe   :  { %265 = vmatpush1.bf16.msra.mxu0 %v608_v4  ;;  %592 = vmatpush1.bf16.msra.mxu1 %v608_v4 }
   0xf   :  { %266 = vmatprep.subr.bf16.mxu0 %v644_v0  ;;  %578 = vmatprep.subr.bf16.mxu1 %v644_v0 }
  0x12   :  { %267 = vmatpush1.bf16.msra.mxu0 %v609_v5  ;;  %593 = vmatpush1.bf16.msra.mxu1 %v609_v5 }
  0x13   :  { %268 = vmatprep.subr.bf16.mxu0 %v644_v0  ;;  %579 = vmatprep.subr.bf16.mxu1 %v644_v0 }
  0x16   :  { %269 = vmatpush1.bf16.msra.mxu0 %v610_v8  ;;  %594 = vmatpush1.bf16.msra.mxu1 %v610_v8 }
  0x17   :  { %270 = vmatprep.subr.bf16.mxu0 %v644_v0  ;;  %580 = vmatprep.subr.bf16.mxu1 %v644_v0 }
  0x1a   :  { %271 = vmatpush1.bf16.msra.mxu0 %v611_v9  ;;  %595 = vmatpush1.bf16.msra.mxu1 %v611_v9 }
  0x1b   :  { %272 = vmatprep.subr.bf16.mxu0 %v644_v0  ;;  %581 = vmatprep.subr.bf16.mxu1 %v644_v0 }
  0x1e   :  { %273 = vmatpush1.bf16.msra.mxu0 %v612_v10  ;;  %596 = vmatpush1.bf16.msra.mxu1 %v612_v10 }
  0x1f   :  { %274 = vmatprep.subr.bf16.mxu0 %v644_v0  ;;  %582 = vmatprep.subr.bf16.mxu1 %v644_v0 }
  0x22   :  { %275 = vmatpush1.bf16.msra.mxu0 %v613_v11  ;;  %597 = vmatpush1.bf16.msra.mxu1 %v613_v11 }
  0x23   :  { %276 = vmatprep.subr.bf16.mxu0 %v644_v0  ;;  %583 = vmatprep.subr.bf16.mxu1 %v644_v0 }
  0x26   :  { %277 = vmatpush1.bf16.msra.mxu0 %v614_v12  ;;  %598 = vmatpush1.bf16.msra.mxu1 %v614_v12 }
  0x27   :  { %278 = vmatprep.subr.bf16.mxu0 %v644_v0  ;;  %584 = vmatprep.subr.bf16.mxu1 %v644_v0 }
  0x2a   :  { %279 = vmatpush1.bf16.msra.mxu0 %v615_v13  ;;  %599 = vmatpush1.bf16.msra.mxu1 %v615_v13 }
  0x2b   :  { %280 = vmatprep.subr.bf16.mxu0 %v644_v0  ;;  %585 = vmatprep.subr.bf16.mxu1 %v644_v0 }
  0x2e   :  { %281 = vmatpush1.bf16.msra.mxu0 %v616_v14  ;;  %600 = vmatpush1.bf16.msra.mxu1 %v616_v14 }
  0x2f   :  { %282 = vmatprep.subr.bf16.mxu0 %v644_v0  ;;  %586 = vmatprep.subr.bf16.mxu1 %v644_v0 }
  0x32   :  { %283 = vmatpush1.bf16.msra.mxu0 %v617_v15  ;;  %601 = vmatpush1.bf16.msra.mxu1 %v617_v15 }
  0x33   :  { %284 = vmatprep.subr.bf16.mxu0 %v644_v0  ;;  %587 = vmatprep.subr.bf16.mxu1 %v644_v0 }
  0x36   :  { %285 = vmatpush1.bf16.msra.mxu0 %v618_v16  ;;  %602 = vmatpush1.bf16.msra.mxu1 %v618_v16 }
  0x37   :  { %286 = vmatprep.subr.bf16.mxu0 %v644_v0  ;;  %588 = vmatprep.subr.bf16.mxu1 %v644_v0 }
  0x3a   :  { %287 = vmatpush1.bf16.msra.mxu0 %v256_v18  ;;  %603 = vmatpush1.bf16.msra.mxu1 %v256_v18 }
  0x3d   :  { %291 = vmatmul.mubr.bf16.vlgmr.msra.gmra.mrb[0].mxu0 %v620_v19  ;;  %323 = vmatmul.mubr.bf16.vlgmr.msra.gmra.mrb[0].mxu1 %v623_v20 }
  0x3e   :  { %488 = vmatprep.mubr.msk.bf16.mxu0 %vm229_vm0, %v626_v21  ;;  %492 = vmatprep.mubr.msk.bf16.mxu1 %vm229_vm0, %v628_v22 }
  0x45   :  { %299 = vmatmul.mubr.bf16.gmra.mrb[4].mxu0 %v630_v23  ;;  %331 = vmatmul.mubr.bf16.gmra.mrb[4].mxu1 %v631_v24 }
  0x46   :  { %489 = vmatprep.mubr.msk.bf16.mxu0 %vm229_vm0, %v632_v25  ;;  %493 = vmatprep.mubr.msk.bf16.mxu1 %vm229_vm0, %v634_v26 }
  0x4d   :  { %307 = vmatmul.mubr.bf16.gmra.mrb[8].mxu0 %v636_v27  ;;  %339 = vmatmul.mubr.bf16.gmra.mrb[8].mxu1 %v637_v28 }
  0x4e   :  { %490 = vmatprep.mubr.msk.bf16.mxu0 %vm229_vm0, %v638_v29  ;;  %494 = vmatprep.mubr.msk.bf16.mxu1 %vm229_vm0, %v640_v30 }
  0x55   :  { %315 = vmatmul.mubr.bf16.gmra.mrb[12].mxu0 %v642_v31  ;;  %347 = vmatmul.mubr.bf16.gmra.mrb[12].mxu1 %v643_v32 }
 0x110   :  { %v292_v34 = vpop.f32.mrb[0].mxu0  ;;  %v324_v35 = vpop.f32.mrb[0].mxu1 }
 0x111   :  { %v293_v36 = vadd.f32 %v799_v33, %v292_v34  ;;  %v325_v37 = vadd.f32 %v799_v33, %v324_v35  ;;  %v294_v38 = vpop.f32.mrb[1].mxu0  ;;  %v326_v39 = vpop.f32.mrb[1].mxu1 }
 0x112   :  { %v295_v40 = vpop.f32.mrb[2].mxu0  ;;  %v327_v41 = vpop.f32.mrb[2].mxu1 }
 0x113   :  { %v296_v42 = vadd.f32 %v799_v33, %v295_v40  ;;  %v328_v43 = vadd.f32 %v799_v33, %v327_v41  ;;  %v297_v44 = vpop.f32.mrb[3].mxu0  ;;  %v329_v45 = vpop.f32.mrb[3].mxu1  ;;  %v355_v46 = vmax.f32 %v293_v36, 0.0  ;;  %v363_v47 = vmax.f32 %v325_v37, 0.0 }
 0x115   :  { %v356_v48 = vmax.f32 %v296_v42, 0.0  ;;  %v364_v49 = vmax.f32 %v328_v43, 0.0 }
 0x117   :  { %v530_v50 = vpack.c.bf16 %v356_v48, %v355_v46  ;;  %v550_v51 = vpack.c.bf16 %v364_v49, %v363_v47 }
 0x118   :  { %v300_v52 = vpop.f32.mrb[4].mxu0  ;;  %v332_v53 = vpop.f32.mrb[4].mxu1 }
 0x119   :  { %531 = vst [vmem:[%s844_s3] sm:$0xff] %v530_v50   ;;  %570 = vst [vmem:[%s844_s3 + $0x20] sm:$0xff] %v550_v51   ;;  %v301_v54 = vadd.f32 %v799_v33, %v300_v52  ;;  %v333_v55 = vadd.f32 %v799_v33, %v332_v53  ;;  %v302_v56 = vpop.f32.mrb[5].mxu0  ;;  %v334_v57 = vpop.f32.mrb[5].mxu1 }
 0x11a   :  { %v303_v58 = vpop.f32.mrb[6].mxu0  ;;  %v335_v59 = vpop.f32.mrb[6].mxu1 }
 0x11b   :  { %v304_v60 = vadd.f32 %v799_v33, %v303_v58  ;;  %v336_v61 = vadd.f32 %v799_v33, %v335_v59  ;;  %v305_v62 = vpop.f32.mrb[7].mxu0  ;;  %v337_v63 = vpop.f32.mrb[7].mxu1  ;;  %v357_v0 = vmax.f32 %v301_v54, 0.0  ;;  %v365_v1 = vmax.f32 %v333_v55, 0.0 }
 0x11d   :  { %v358_v2 = vmax.f32 %v304_v60, 0.0  ;;  %v366_v3 = vmax.f32 %v336_v61, 0.0 }
 0x11f   :  { %v535_v4 = vpack.c.bf16 %v358_v2, %v357_v0  ;;  %v555_v5 = vpack.c.bf16 %v366_v3, %v365_v1 }
 0x120   :  { %v308_v6 = vpop.f32.mrb[8].mxu0  ;;  %v340_v7 = vpop.f32.mrb[8].mxu1 }
 0x121   :  { %567 = vst [vmem:[%s844_s3 + $0x8] sm:$0xff] %v535_v4   ;;  %571 = vst [vmem:[%s844_s3 + $0x28] sm:$0xff] %v555_v5   ;;  %v309_v8 = vadd.f32 %v799_v33, %v308_v6  ;;  %v341_v9 = vadd.f32 %v799_v33, %v340_v7  ;;  %v310_v10 = vpop.f32.mrb[9].mxu0  ;;  %v342_v11 = vpop.f32.mrb[9].mxu1 }
 0x122   :  { %v311_v12 = vpop.f32.mrb[10].mxu0  ;;  %v343_v13 = vpop.f32.mrb[10].mxu1 }
 0x123   :  { %v312_v14 = vadd.f32 %v799_v33, %v311_v12  ;;  %v344_v15 = vadd.f32 %v799_v33, %v343_v13  ;;  %v313_v16 = vpop.f32.mrb[11].mxu0  ;;  %v345_v17 = vpop.f32.mrb[11].mxu1  ;;  %v359_v18 = vmax.f32 %v309_v8, 0.0  ;;  %v367_v19 = vmax.f32 %v341_v9, 0.0 }
 0x125   :  { %v360_v20 = vmax.f32 %v312_v14, 0.0  ;;  %v368_v21 = vmax.f32 %v344_v15, 0.0 }
 0x127   :  { %v540_v22 = vpack.c.bf16 %v360_v20, %v359_v18  ;;  %v560_v23 = vpack.c.bf16 %v368_v21, %v367_v19 }
 0x128   :  { %v316_v24 = vpop.f32.mrb[12].mxu0  ;;  %v348_v25 = vpop.f32.mrb[12].mxu1 }
 0x129   :  { %568 = vst [vmem:[%s844_s3 + $0x10] sm:$0xff] %v540_v22   ;;  %572 = vst [vmem:[%s844_s3 + $0x30] sm:$0xff] %v560_v23   ;;  %v317_v26 = vadd.f32 %v799_v33, %v316_v24  ;;  %v349_v27 = vadd.f32 %v799_v33, %v348_v25  ;;  %v318_v28 = vpop.f32.mrb[13].mxu0  ;;  %v350_v29 = vpop.f32.mrb[13].mxu1 }
 0x12a   :  { %v319_v30 = vpop.f32.mrb[14].mxu0  ;;  %v351_v31 = vpop.f32.mrb[14].mxu1 }
 0x12b   :  { %v320_v32 = vadd.f32 %v799_v33, %v319_v30  ;;  %v352_v34 = vadd.f32 %v799_v33, %v351_v31  ;;  %v321_v35 = vpop.f32.mrb[15].mxu0  ;;  %v353_v36 = vpop.f32.mrb[15].mxu1  ;;  %v361_v37 = vmax.f32 %v317_v26, 0.0  ;;  %v369_v38 = vmax.f32 %v349_v27, 0.0 }
 0x12d   :  { %v362_v39 = vmax.f32 %v320_v32, 0.0  ;;  %v370_v40 = vmax.f32 %v352_v34, 0.0 }
 0x12f   :  { %v545_v41 = vpack.c.bf16 %v362_v39, %v361_v37  ;;  %v565_v42 = vpack.c.bf16 %v370_v40, %v369_v38 }
 0x131   :  { %569 = vst [vmem:[%s844_s3 + $0x18] sm:$0xff] %v545_v41   ;;  %573 = vst [vmem:[%s844_s3 + $0x38] sm:$0xff] %v565_v42  }

// kernel: fwd.41
= control target key start
LH: loop header
LB: loop body
LE: loop exit
PB: predicated region body
PF: predicated region fallthrough
CT: control target
= control target key end

     0   :  { %v470_v1 = vmov 0   ;;  %vm131_vm0 = vcmask 523264   ;;  %v41_v17 = vlaneseq  ;;  %s634_s1 = inlined_call_operand.vmem [shape: bf16[64,256], index: 1, kind: input, shape index: {}]   ;;  %s635_s0 = inlined_call_operand.vmem [shape: bf16[128,64], index: 0, kind: input, shape index: {}]   ;;  %s636_s2 = inlined_call_operand.vmem [shape: f32[1,256], index: 2, kind: input, shape index: {}]   ;;  %s637_s3 = inlined_call_operand.vmem [shape: bf16[128,256], index: 3, kind: output, shape index: {}]  }
   0x1   :  { %v450_v0 = vld [vmem:[%s634_s1 + $0x4] ss:$8 sps:$4 sm:$0xff]   ;;  %188 = vmatprep.mubr.bf16.mxu0 %v470_v1  ;;  %228 = vmatprep.mubr.bf16.mxu1 %v470_v1  ;;  %v452_v2 = vld [vmem:[%s634_s1] ss:$8 sps:$4 sm:$0xff]   ;;  %v453_v3 = vld [vmem:[%s634_s1 + $0x14] ss:$8 sps:$4 sm:$0xff]  }
   0x2   :  { %156 = vmatprep.subr.bf16.mxu0 %v450_v0  ;;  %441 = vmatprep.subr.bf16.mxu1 %v450_v0  ;;  %v455_v4 = vld [vmem:[%s634_s1 + $0x10] ss:$8 sps:$4 sm:$0xff]   ;;  %v456_v5 = vld [vmem:[%s634_s1 + $0x24] ss:$8 sps:$4 sm:$0xff]   ;;  %v458_v6 = vld [vmem:[%s634_s1 + $0x20] ss:$8 sps:$4 sm:$0xff]  }
   0x3   :  { %157 = vmatpush1.bf16.msra.mxu0 %v452_v2  ;;  %445 = vmatpush1.bf16.msra.mxu1 %v452_v2  ;;  %v459_v7 = vld [vmem:[%s634_s1 + $0x34] ss:$8 sps:$4 sm:$0xff]   ;;  %v461_v8 = vld [vmem:[%s634_s1 + $0x30] ss:$8 sps:$4 sm:$0xff]   ;;  %v462_v9 = vld [vmem:[%s635_s0] sm:$0xff]   ;;  %v42_v18 = vshrl.u32 %v41_v17, 7 }
   0x4   :  { %158 = vmatprep.subr.bf16.mxu0 %v453_v3  ;;  %442 = vmatprep.subr.bf16.mxu1 %v453_v3  ;;  %v463_v10 = vld [vmem:[%s635_s0 + $0x20] sm:$0xff]   ;;  %v464_v11 = vld [vmem:[%s635_s0 + $0x8] sm:$0xff]   ;;  %v466_v13 = vld [vmem:[%s635_s0 + $0x10] sm:$0xff]  }
   0x5   :  { %v465_v12 = vld [vmem:[%s635_s0 + $0x28] sm:$0xff]   ;;  %v467_v14 = vld [vmem:[%s635_s0 + $0x30] sm:$0xff]   ;;  %v468_v15 = vld [vmem:[%s635_s0 + $0x18] sm:$0xff]   ;;  %v43_v19 = vsub.s32 0, %v42_v18  ;;  %v47_v21 = vsub.s32 1, %v42_v18 }
   0x6   :  { %v469_v16 = vld [vmem:[%s635_s0 + $0x38] sm:$0xff]   ;;  %v39_v20 = vld [vmem:[%s636_s2] sm:$0x3] }
   0x7   :  { %159 = vmatpush1.bf16.msra.mxu0 %v455_v4  ;;  %446 = vmatpush1.bf16.msra.mxu1 %v455_v4  ;;  %v550_v22 = vrot.slane %v39_v20, %v43_v19  ;;  %v552_v23 = vrot.slane %v39_v20, %v47_v21 }
   0x8   :  { %160 = vmatprep.subr.bf16.mxu0 %v456_v5  ;;  %443 = vmatprep.subr.bf16.mxu1 %v456_v5 }
   0xb   :  { %161 = vmatpush1.bf16.msra.mxu0 %v458_v6  ;;  %447 = vmatpush1.bf16.msra.mxu1 %v458_v6 }
   0xc   :  { %162 = vmatprep.subr.bf16.mxu0 %v459_v7  ;;  %444 = vmatprep.subr.bf16.mxu1 %v459_v7 }
   0xf   :  { %163 = vmatpush1.bf16.msra.mxu0 %v461_v8  ;;  %448 = vmatpush1.bf16.msra.mxu1 %v461_v8 }
  0x12   :  { %401 = vmatmul.mubr.msk.bf16.vlgmr.msra.gmra.mrb[0].mxu0 %vm131_vm0, %v462_v9  ;;  %405 = vmatmul.mubr.msk.bf16.vlgmr.msra.gmra.mrb[0].mxu1 %vm131_vm0, %v463_v10 }
  0x13   :  { %198 = vmatprep.mubr.bf16.mxu0 %v470_v1  ;;  %238 = vmatprep.mubr.bf16.mxu1 %v470_v1 }
  0x1a   :  { %402 = vmatmul.mubr.msk.bf16.gmra.mrb[4].mxu0 %vm131_vm0, %v464_v11  ;;  %406 = vmatmul.mubr.msk.bf16.gmra.mrb[4].mxu1 %vm131_vm0, %v465_v12 }
  0x1b   :  { %208 = vmatprep.mubr.bf16.mxu0 %v470_v1  ;;  %248 = vmatprep.mubr.bf16.mxu1 %v470_v1 }
  0x22   :  { %403 = vmatmul.mubr.msk.bf16.gmra.mrb[8].mxu0 %vm131_vm0, %v466_v13  ;;  %407 = vmatmul.mubr.msk.bf16.gmra.mrb[8].mxu1 %vm131_vm0, %v467_v14 }
  0x23   :  { %218 = vmatprep.mubr.bf16.mxu0 %v470_v1  ;;  %258 = vmatprep.mubr.bf16.mxu1 %v470_v1 }
  0x2a   :  { %404 = vmatmul.mubr.msk.bf16.gmra.mrb[12].mxu0 %vm131_vm0, %v468_v15  ;;  %408 = vmatmul.mubr.msk.bf16.gmra.mrb[12].mxu1 %vm131_vm0, %v469_v16 }
  0xe5   :  { %v190_v24 = vpop.f32.mrb[0].mxu0  ;;  %v230_v25 = vpop.f32.mrb[0].mxu1 }
  0xe6   :  { %v191_v26 = vadd.f32 %v190_v24, %v550_v22  ;;  %v231_v27 = vadd.f32 %v230_v25, %v550_v22  ;;  %v192_v28 = vpop.f32.mrb[1].mxu0  ;;  %v232_v29 = vpop.f32.mrb[1].mxu1 }
  0xe7   :  { %v193_v30 = vadd.f32 %v192_v28, %v552_v23  ;;  %v233_v31 = vadd.f32 %v232_v29, %v552_v23  ;;  %v194_v32 = vpop.f32.mrb[2].mxu0  ;;  %v234_v33 = vpop.f32.mrb[2].mxu1 }
  0xe8   :  { %v195_v34 = vadd.f32 %v194_v32, %v550_v22  ;;  %v235_v35 = vadd.f32 %v234_v33, %v550_v22  ;;  %v196_v36 = vpop.f32.mrb[3].mxu0  ;;  %v236_v37 = vpop.f32.mrb[3].mxu1 }
  0xe9   :  { %v425_v38 = vpack.c.bf16 %v193_v30, %v191_v26  ;;  %v433_v39 = vpack.c.bf16 %v233_v31, %v231_v27  ;;  %v197_v40 = vadd.f32 %v196_v36, %v552_v23  ;;  %v237_v41 = vadd.f32 %v236_v37, %v552_v23 }
  0xeb   :  { %365 = vst [vmem:[%s637_s3] sm:$0xff] %v425_v38  ;;  %373 = vst [vmem:[%s637_s3 + $0x40] sm:$0xff] %v433_v39  ;;  %v426_v42 = vpack.c.bf16 %v197_v40, %v195_v34  ;;  %v434_v43 = vpack.c.bf16 %v237_v41, %v235_v35 }
  0xed   :  { %366 = vst [vmem:[%s637_s3 + $0x8] sm:$0xff] %v426_v42  ;;  %374 = vst [vmem:[%s637_s3 + $0x48] sm:$0xff] %v434_v43  ;;  %v200_v44 = vpop.f32.mrb[4].mxu0  ;;  %v240_v45 = vpop.f32.mrb[4].mxu1 }
  0xee   :  { %v201_v46 = vadd.f32 %v200_v44, %v550_v22  ;;  %v241_v47 = vadd.f32 %v240_v45, %v550_v22  ;;  %v202_v48 = vpop.f32.mrb[5].mxu0  ;;  %v242_v49 = vpop.f32.mrb[5].mxu1 }
  0xef   :  { %v203_v50 = vadd.f32 %v202_v48, %v552_v23  ;;  %v243_v51 = vadd.f32 %v242_v49, %v552_v23  ;;  %v204_v52 = vpop.f32.mrb[6].mxu0  ;;  %v244_v53 = vpop.f32.mrb[6].mxu1 }
  0xf0   :  { %v205_v54 = vadd.f32 %v204_v52, %v550_v22  ;;  %v245_v55 = vadd.f32 %v244_v53, %v550_v22  ;;  %v206_v56 = vpop.f32.mrb[7].mxu0  ;;  %v246_v57 = vpop.f32.mrb[7].mxu1 }
  0xf1   :  { %v427_v58 = vpack.c.bf16 %v203_v50, %v201_v46  ;;  %v435_v59 = vpack.c.bf16 %v243_v51, %v241_v47  ;;  %v207_v60 = vadd.f32 %v206_v56, %v552_v23  ;;  %v247_v61 = vadd.f32 %v246_v57, %v552_v23 }
  0xf3   :  { %367 = vst [vmem:[%s637_s3 + $0x10] sm:$0xff] %v427_v58  ;;  %375 = vst [vmem:[%s637_s3 + $0x50] sm:$0xff] %v435_v59  ;;  %v428_v62 = vpack.c.bf16 %v207_v60, %v205_v54  ;;  %v436_v63 = vpack.c.bf16 %v247_v61, %v245_v55 }
  0xf5   :  { %368 = vst [vmem:[%s637_s3 + $0x18] sm:$0xff] %v428_v62  ;;  %376 = vst [vmem:[%s637_s3 + $0x58] sm:$0xff] %v436_v63  ;;  %v210_v0 = vpop.f32.mrb[8].mxu0  ;;  %v250_v1 = vpop.f32.mrb[8].mxu1 }
  0xf6   :  { %v211_v2 = vadd.f32 %v210_v0, %v550_v22  ;;  %v251_v3 = vadd.f32 %v250_v1, %v550_v22  ;;  %v212_v4 = vpop.f32.mrb[9].mxu0  ;;  %v252_v5 = vpop.f32.mrb[9].mxu1 }
  0xf7   :  { %v213_v6 = vadd.f32 %v212_v4, %v552_v23  ;;  %v253_v7 = vadd.f32 %v252_v5, %v552_v23  ;;  %v214_v8 = vpop.f32.mrb[10].mxu0  ;;  %v254_v9 = vpop.f32.mrb[10].mxu1 }
  0xf8   :  { %v215_v10 = vadd.f32 %v214_v8, %v550_v22  ;;  %v255_v11 = vadd.f32 %v254_v9, %v550_v22  ;;  %v216_v12 = vpop.f32.mrb[11].mxu0  ;;  %v256_v13 = vpop.f32.mrb[11].mxu1 }
  0xf9   :  { %v429_v14 = vpack.c.bf16 %v213_v6, %v211_v2  ;;  %v437_v15 = vpack.c.bf16 %v253_v7, %v251_v3  ;;  %v217_v16 = vadd.f32 %v216_v12, %v552_v23  ;;  %v257_v17 = vadd.f32 %v256_v13, %v552_v23 }
  0xfb   :  { %369 = vst [vmem:[%s637_s3 + $0x20] sm:$0xff] %v429_v14  ;;  %377 = vst [vmem:[%s637_s3 + $0x60] sm:$0xff] %v437_v15  ;;  %v430_v18 = vpack.c.bf16 %v217_v16, %v215_v10  ;;  %v438_v19 = vpack.c.bf16 %v257_v17, %v255_v11 }
  0xfd   :  { %370 = vst [vmem:[%s637_s3 + $0x28] sm:$0xff] %v430_v18  ;;  %378 = vst [vmem:[%s637_s3 + $0x68] sm:$0xff] %v438_v19  ;;  %v220_v20 = vpop.f32.mrb[12].mxu0  ;;  %v260_v21 = vpop.f32.mrb[12].mxu1 }
  0xfe   :  { %v221_v24 = vadd.f32 %v220_v20, %v550_v22  ;;  %v261_v25 = vadd.f32 %v260_v21, %v550_v22  ;;  %v222_v26 = vpop.f32.mrb[13].mxu0  ;;  %v262_v27 = vpop.f32.mrb[13].mxu1 }
  0xff   :  { %v223_v28 = vadd.f32 %v222_v26, %v552_v23  ;;  %v263_v29 = vadd.f32 %v262_v27, %v552_v23  ;;  %v224_v30 = vpop.f32.mrb[14].mxu0  ;;  %v264_v31 = vpop.f32.mrb[14].mxu1 }
 0x100   :  { %v225_v32 = vadd.f32 %v224_v30, %v550_v22  ;;  %v265_v33 = vadd.f32 %v264_v31, %v550_v22  ;;  %v226_v34 = vpop.f32.mrb[15].mxu0  ;;  %v266_v35 = vpop.f32.mrb[15].mxu1 }
 0x101   :  { %v431_v36 = vpack.c.bf16 %v223_v28, %v221_v24  ;;  %v439_v37 = vpack.c.bf16 %v263_v29, %v261_v25  ;;  %v227_v38 = vadd.f32 %v226_v34, %v552_v23  ;;  %v267_v39 = vadd.f32 %v266_v35, %v552_v23 }
 0x103   :  { %371 = vst [vmem:[%s637_s3 + $0x30] sm:$0xff] %v431_v36  ;;  %379 = vst [vmem:[%s637_s3 + $0x70] sm:$0xff] %v439_v37  ;;  %v432_v40 = vpack.c.bf16 %v227_v38, %v225_v32  ;;  %v440_v41 = vpack.c.bf16 %v267_v39, %v265_v33 }
 0x105   :  { %372 = vst [vmem:[%s637_s3 + $0x38] sm:$0xff] %v432_v40  ;;  %380 = vst [vmem:[%s637_s3 + $0x78] sm:$0xff] %v440_v41 }

// kernel: fwd.42
= control target key start
LH: loop header
LB: loop body
LE: loop exit
PB: predicated region body
PF: predicated region fallthrough
CT: control target
= control target key end

     0   :  { %v643_v1 = vmov 0   ;;  %vm189_vm0 = vcmask 1043456   ;;  %vm164_vm1 = vcmask 850944   ;;  %v49_v25 = vlaneseq  ;;  %s963_s1 = inlined_call_operand.vmem [shape: bf16[104,256], index: 1, kind: input, shape index: {}]   ;;  %s964_s0 = inlined_call_operand.vmem [shape: bf16[128,104], index: 0, kind: input, shape index: {}]   ;;  %s965_s2 = inlined_call_operand.vmem [shape: f32[1,256], index: 2, kind: input, shape index: {}]   ;;  %s966_s3 = inlined_call_operand.vmem [shape: bf16[128,256], index: 3, kind: input, shape index: {}]   ;;  %s967_s4 = inlined_call_operand.vmem [shape: bf16[128,256], index: 4, kind: output, shape index: {}]  }
   0x1   :  { %v615_v0 = vld [vmem:[%s963_s1 + $0x4] ss:$8 sps:$4 sm:$0xff]   ;;  %228 = vmatprep.mubr.bf16.mxu0 %v643_v1  ;;  %268 = vmatprep.mubr.bf16.mxu1 %v643_v1  ;;  %v617_v2 = vld [vmem:[%s963_s1] ss:$8 sps:$4 sm:$0xff]   ;;  %v618_v3 = vld [vmem:[%s963_s1 + $0x14] ss:$8 sps:$4 sm:$0xff]  }
   0x2   :  { %196 = vmatprep.subr.bf16.mxu0 %v615_v0  ;;  %600 = vmatprep.subr.bf16.mxu1 %v615_v0  ;;  %v620_v4 = vld [vmem:[%s963_s1 + $0x10] ss:$8 sps:$4 sm:$0xff]   ;;  %v621_v5 = vld [vmem:[%s963_s1 + $0x24] ss:$8 sps:$4 sm:$0xff]   ;;  %v623_v6 = vld [vmem:[%s963_s1 + $0x20] ss:$8 sps:$4 sm:$0xff]  }
   0x3   :  { %197 = vmatpush1.bf16.msra.mxu0 %v617_v2  ;;  %607 = vmatpush1.bf16.msra.mxu1 %v617_v2  ;;  %v624_v7 = vld [vmem:[%s963_s1 + $0x34] ss:$8 sps:$4 sm:$0xff]   ;;  %v626_v8 = vld [vmem:[%s963_s1 + $0x30] ss:$8 sps:$4 sm:$0xff]   ;;  %v627_v9 = vld [vmem:[%s963_s1 + $0x44] ss:$8 sps:$4 sm:$0xff]  }
   0x4   :  { %198 = vmatprep.subr.bf16.mxu0 %v618_v3  ;;  %601 = vmatprep.subr.bf16.mxu1 %v618_v3  ;;  %v629_v10 = vld [vmem:[%s963_s1 + $0x40] ss:$8 sps:$4 sm:$0xff]   ;;  %v630_v11 = vld [vmem:[%s963_s1 + $0x54] ss:$8 sps:$4 sm:$0xff]   ;;  %v632_v13 = vld [vmem:[%s963_s1 + $0x50] ss:$8 sps:$4 sm:$0xff]  }
   0x5   :  { %v46_v12 = vld [vmem:[%s963_s1 + $0x60] sm:$0xff]  ;;  %v637_v19 = vld [vmem:[%s964_s0 + $0x8] sm:$0xff]   ;;  %v639_v21 = vld [vmem:[%s964_s0 + $0x10] sm:$0xff]   ;;  %v50_v26 = vshrl.u32 %v49_v25, 7 }
   0x6   :  { %v558_v14 = vcombine.high %v46_v12, %v46_v12  ;;  %v557_v15 = vcombine.low %v46_v12, %v46_v12  ;;  %v635_v17 = vld [vmem:[%s964_s0] sm:$0xff]   ;;  %v638_v20 = vld [vmem:[%s964_s0 + $0x28] sm:$0xff]   ;;  %v640_v22 = vld [vmem:[%s964_s0 + $0x30] sm:$0xff]  }
   0x7   :  { %199 = vmatpush1.bf16.msra.mxu0 %v620_v4  ;;  %608 = vmatpush1.bf16.msra.mxu1 %v620_v4  ;;  %v636_v18 = vld [vmem:[%s964_s0 + $0x20] sm:$0xff]   ;;  %v641_v23 = vld [vmem:[%s964_s0 + $0x18] sm:$0xff]   ;;  %v51_v27 = vsub.s32 0, %v50_v26  ;;  %v55_v28 = vsub.s32 1, %v50_v26  ;;  %v310_v32 = vld [vmem:[%s966_s3 + $0x8] sm:$0xff] }
   0x8   :  { %200 = vmatprep.subr.bf16.mxu0 %v621_v5  ;;  %602 = vmatprep.subr.bf16.mxu1 %v621_v5  ;;  %v191_v16 = vsel %vm189_vm0, %v557_v15, 0  ;;  %v642_v24 = vld [vmem:[%s964_s0 + $0x38] sm:$0xff]   ;;  %v47_v29 = vld [vmem:[%s965_s2] sm:$0x3]  ;;  %v318_v33 = vld [vmem:[%s966_s3 + $0x48] sm:$0xff]  ;;  %v327_v44 = vunpack.c.l.bf16 %v310_v32  ;;  %v328_v46 = vunpack.c.h.bf16 %v310_v32 }
   0x9   :  { %v309_v30 = vld [vmem:[%s966_s3] sm:$0xff]  ;;  %v763_v34 = vrot.slane %v47_v29, %v51_v27  ;;  %v765_v35 = vrot.slane %v47_v29, %v55_v28  ;;  %v770_v36 = vld [vmem:[%s966_s3 + $0x10] sm:$0xff]  ;;  %v780_v42 = vld [vmem:[%s966_s3 + $0x18] sm:$0xff]  ;;  %v343_v45 = vunpack.c.l.bf16 %v318_v33  ;;  %v344_v47 = vunpack.c.h.bf16 %v318_v33 }
   0xa   :  { %v317_v31 = vld [vmem:[%s966_s3 + $0x40] sm:$0xff]  ;;  %v775_v37 = vld [vmem:[%s966_s3 + $0x50] sm:$0xff]  ;;  %v325_v38 = vunpack.c.l.bf16 %v309_v30  ;;  %v326_v40 = vunpack.c.h.bf16 %v309_v30  ;;  %v785_v43 = vld [vmem:[%s966_s3 + $0x58] sm:$0xff]  ;;  %v329_v50 = vunpack.c.l.bf16 %v770_v36  ;;  %v330_v52 = vunpack.c.h.bf16 %v770_v36 }
   0xb   :  { %201 = vmatpush1.bf16.msra.mxu0 %v623_v6  ;;  %609 = vmatpush1.bf16.msra.mxu1 %v623_v6  ;;  %v341_v39 = vunpack.c.l.bf16 %v317_v31  ;;  %v342_v41 = vunpack.c.h.bf16 %v317_v31  ;;  %v790_v48 = vld [vmem:[%s966_s3 + $0x20] sm:$0xff]  ;;  %v345_v51 = vunpack.c.l.bf16 %v775_v37  ;;  %v346_v53 = vunpack.c.h.bf16 %v775_v37 }
   0xc   :  { %202 = vmatprep.subr.bf16.mxu0 %v624_v7  ;;  %603 = vmatprep.subr.bf16.mxu1 %v624_v7  ;;  %v795_v49 = vld [vmem:[%s966_s3 + $0x60] sm:$0xff]  ;;  %v331_v56 = vunpack.c.l.bf16 %v780_v42  ;;  %v347_v57 = vunpack.c.l.bf16 %v785_v43  ;;  %v332_v58 = vunpack.c.h.bf16 %v780_v42  ;;  %v348_v59 = vunpack.c.h.bf16 %v785_v43 }
   0xd   :  { %v333_v0 = vunpack.c.l.bf16 %v790_v48  ;;  %v334_v6 = vunpack.c.h.bf16 %v790_v48  ;;  %v350_v7 = vunpack.c.h.bf16 %v795_v49 }
   0xf   :  { %203 = vmatpush1.bf16.msra.mxu0 %v626_v8  ;;  %610 = vmatpush1.bf16.msra.mxu1 %v626_v8 }
  0x10   :  { %204 = vmatprep.subr.bf16.mxu0 %v627_v9  ;;  %604 = vmatprep.subr.bf16.mxu1 %v627_v9 }
  0x13   :  { %205 = vmatpush1.bf16.msra.mxu0 %v629_v10  ;;  %611 = vmatpush1.bf16.msra.mxu1 %v629_v10 }
  0x14   :  { %206 = vmatprep.subr.bf16.mxu0 %v630_v11  ;;  %605 = vmatprep.subr.bf16.mxu1 %v630_v11 }
  0x17   :  { %207 = vmatpush1.bf16.msra.mxu0 %v632_v13  ;;  %612 = vmatpush1.bf16.msra.mxu1 %v632_v13 }
  0x18   :  { %559 = vmatprep.subr.msk.bf16.mxu0 %vm189_vm0, %v558_v14  ;;  %606 = vmatprep.subr.msk.bf16.mxu1 %vm189_vm0, %v558_v14 }
  0x1b   :  { %209 = vmatpush1.bf16.msra.mxu0 %v191_v16  ;;  %613 = vmatpush1.bf16.msra.mxu1 %v191_v16 }
  0x1e   :  { %560 = vmatmul.mubr.msk.bf16.vlgmr.msra.gmra.mrb[0].mxu0 %vm164_vm1, %v635_v17  ;;  %564 = vmatmul.mubr.msk.bf16.vlgmr.msra.gmra.mrb[0].mxu1 %vm164_vm1, %v636_v18  ;;  %v820_v18 = vld [vmem:[%s966_s3 + $0x28] sm:$0xff] }
  0x1f   :  { %238 = vmatprep.mubr.bf16.mxu0 %v643_v1  ;;  %278 = vmatprep.mubr.bf16.mxu1 %v643_v1  ;;  %v335_v30 = vunpack.c.l.bf16 %v820_v18 }
  0x26   :  { %561 = vmatmul.mubr.msk.bf16.gmra.mrb[4].mxu0 %vm164_vm1, %v637_v19  ;;  %565 = vmatmul.mubr.msk.bf16.gmra.mrb[4].mxu1 %vm164_vm1, %v638_v20  ;;  %v825_v19 = vld [vmem:[%s966_s3 + $0x68] sm:$0xff] }
  0x27   :  { %248 = vmatprep.mubr.bf16.mxu0 %v643_v1  ;;  %288 = vmatprep.mubr.bf16.mxu1 %v643_v1  ;;  %v351_v31 = vunpack.c.l.bf16 %v825_v19 }
  0x2e   :  { %562 = vmatmul.mubr.msk.bf16.gmra.mrb[8].mxu0 %vm164_vm1, %v639_v21  ;;  %566 = vmatmul.mubr.msk.bf16.gmra.mrb[8].mxu1 %vm164_vm1, %v640_v22 }
  0x2f   :  { %258 = vmatprep.mubr.bf16.mxu0 %v643_v1  ;;  %298 = vmatprep.mubr.bf16.mxu1 %v643_v1  ;;  %v349_v1 = vunpack.c.l.bf16 %v795_v49 }
  0x36   :  { %563 = vmatmul.mubr.msk.bf16.gmra.mrb[12].mxu0 %vm164_vm1, %v641_v23  ;;  %567 = vmatmul.mubr.msk.bf16.gmra.mrb[12].mxu1 %vm164_vm1, %v642_v24 }
  0xf1   :  { %v230_v54 = vpop.f32.mrb[0].mxu0  ;;  %v270_v55 = vpop.f32.mrb[0].mxu1 }
  0xf2   :  { %v231_v60 = vadd.f32 %v230_v54, %v763_v34  ;;  %v271_v61 = vadd.f32 %v270_v55, %v763_v34  ;;  %v232_v62 = vpop.f32.mrb[1].mxu0  ;;  %v272_v63 = vpop.f32.mrb[1].mxu1 }
  0xf3   :  { %v233_v2 = vadd.f32 %v232_v62, %v765_v35  ;;  %v273_v3 = vadd.f32 %v272_v63, %v765_v35  ;;  %v234_v4 = vpop.f32.mrb[2].mxu0  ;;  %v274_v5 = vpop.f32.mrb[2].mxu1 }
  0xf4   :  { %v357_v8 = vadd.f32 %v325_v38, %v231_v60  ;;  %v373_v9 = vadd.f32 %v341_v39, %v271_v61  ;;  %v235_v10 = vadd.f32 %v234_v4, %v763_v34  ;;  %v275_v11 = vadd.f32 %v274_v5, %v763_v34  ;;  %v236_v12 = vpop.f32.mrb[3].mxu0  ;;  %v276_v13 = vpop.f32.mrb[3].mxu1 }
  0xf5   :  { %v358_v14 = vadd.f32 %v326_v40, %v233_v2  ;;  %v374_v15 = vadd.f32 %v342_v41, %v273_v3  ;;  %v237_v16 = vadd.f32 %v236_v12, %v765_v35  ;;  %v277_v17 = vadd.f32 %v276_v13, %v765_v35 }
  0xf6   :  { %v389_v20 = vmax.f32 %v357_v8, 0.0  ;;  %v405_v21 = vmax.f32 %v373_v9, 0.0  ;;  %v359_v22 = vadd.f32 %v327_v44, %v235_v10  ;;  %v375_v23 = vadd.f32 %v343_v45, %v275_v11 }
  0xf7   :  { %v390_v24 = vmax.f32 %v358_v14, 0.0  ;;  %v406_v25 = vmax.f32 %v374_v15, 0.0  ;;  %v360_v26 = vadd.f32 %v328_v46, %v237_v16  ;;  %v376_v27 = vadd.f32 %v344_v47, %v277_v17  ;;  %v862_v14 = vld [vmem:[%s966_s3 + $0x30] sm:$0xff] }
  0xf8   :  { %v391_v28 = vmax.f32 %v359_v22, 0.0  ;;  %v407_v29 = vmax.f32 %v375_v23, 0.0  ;;  %v336_v46 = vunpack.c.h.bf16 %v820_v18  ;;  %v352_v47 = vunpack.c.h.bf16 %v825_v19  ;;  %v867_v15 = vld [vmem:[%s966_s3 + $0x70] sm:$0xff] }
  0xf9   :  { %v584_v32 = vpack.c.bf16 %v390_v24, %v389_v20  ;;  %v592_v33 = vpack.c.bf16 %v406_v25, %v405_v21  ;;  %v392_v38 = vmax.f32 %v360_v26, 0.0  ;;  %v408_v39 = vmax.f32 %v376_v27, 0.0  ;;  %v240_v40 = vpop.f32.mrb[4].mxu0  ;;  %v280_v41 = vpop.f32.mrb[4].mxu1 }
  0xfa   :  { %v241_v54 = vadd.f32 %v240_v40, %v763_v34  ;;  %v281_v44 = vadd.f32 %v280_v41, %v763_v34  ;;  %v242_v45 = vpop.f32.mrb[5].mxu0  ;;  %v282_v55 = vpop.f32.mrb[5].mxu1  ;;  %v337_v24 = vunpack.c.l.bf16 %v862_v14  ;;  %v353_v25 = vunpack.c.l.bf16 %v867_v15 }
  0xfb   :  { %517 = vst [vmem:[%s967_s4] sm:$0xff] %v584_v32  ;;  %525 = vst [vmem:[%s967_s4 + $0x40] sm:$0xff] %v592_v33  ;;  %v585_v60 = vpack.c.bf16 %v392_v38, %v391_v28  ;;  %v593_v61 = vpack.c.bf16 %v408_v39, %v407_v29  ;;  %v243_v62 = vadd.f32 %v242_v45, %v765_v35  ;;  %v244_v2 = vpop.f32.mrb[6].mxu0  ;;  %v284_v3 = vpop.f32.mrb[6].mxu1  ;;  %v338_v43 = vunpack.c.h.bf16 %v862_v14 }
  0xfc   :  { %v283_v63 = vadd.f32 %v282_v55, %v765_v35  ;;  %v361_v4 = vadd.f32 %v329_v50, %v241_v54  ;;  %v377_v5 = vadd.f32 %v345_v51, %v281_v44  ;;  %v245_v8 = vadd.f32 %v244_v2, %v763_v34  ;;  %v246_v10 = vpop.f32.mrb[7].mxu0  ;;  %v286_v11 = vpop.f32.mrb[7].mxu1 }
  0xfd   :  { %v285_v9 = vadd.f32 %v284_v3, %v763_v34  ;;  %518 = vst [vmem:[%s967_s4 + $0x8] sm:$0xff] %v585_v60  ;;  %526 = vst [vmem:[%s967_s4 + $0x48] sm:$0xff] %v593_v61  ;;  %v362_v50 = vadd.f32 %v330_v52, %v243_v62  ;;  %v247_v12 = vadd.f32 %v246_v10, %v765_v35 }
  0xfe   :  { %v378_v51 = vadd.f32 %v346_v53, %v283_v63  ;;  %v287_v13 = vadd.f32 %v286_v11, %v765_v35  ;;  %v393_v16 = vmax.f32 %v361_v4, 0.0  ;;  %v409_v36 = vmax.f32 %v377_v5, 0.0  ;;  %v316_v4 = vld [vmem:[%s966_s3 + $0x38] sm:$0xff] }
  0xff   :  { %v363_v37 = vadd.f32 %v331_v56, %v245_v8  ;;  %v379_v52 = vadd.f32 %v347_v57, %v285_v9  ;;  %v394_v53 = vmax.f32 %v362_v50, 0.0  ;;  %v364_v20 = vadd.f32 %v332_v58, %v247_v12  ;;  %v324_v5 = vld [vmem:[%s966_s3 + $0x78] sm:$0xff] }
 0x100   :  { %v410_v17 = vmax.f32 %v378_v51, 0.0  ;;  %v380_v21 = vadd.f32 %v348_v59, %v287_v13  ;;  %v354_v59 = vunpack.c.h.bf16 %v867_v15  ;;  %v339_v12 = vunpack.c.l.bf16 %v316_v4 }
 0x101   :  { %v395_v22 = vmax.f32 %v363_v37, 0.0  ;;  %v411_v23 = vmax.f32 %v379_v52, 0.0  ;;  %v586_v26 = vpack.c.bf16 %v394_v53, %v393_v16  ;;  %v396_v56 = vmax.f32 %v364_v20, 0.0  ;;  %v250_v29 = vpop.f32.mrb[8].mxu0  ;;  %v290_v57 = vpop.f32.mrb[8].mxu1 }
 0x102   :  { %v594_v27 = vpack.c.bf16 %v410_v17, %v409_v36  ;;  %v412_v28 = vmax.f32 %v380_v21, 0.0  ;;  %v251_v32 = vadd.f32 %v250_v29, %v763_v34  ;;  %v291_v42 = vadd.f32 %v290_v57, %v763_v34  ;;  %v252_v58 = vpop.f32.mrb[9].mxu0  ;;  %v292_v33 = vpop.f32.mrb[9].mxu1 }
 0x103   :  { %519 = vst [vmem:[%s967_s4 + $0x10] sm:$0xff] %v586_v26  ;;  %v587_v38 = vpack.c.bf16 %v396_v56, %v395_v22  ;;  %v253_v40 = vadd.f32 %v252_v58, %v765_v35  ;;  %v293_v41 = vadd.f32 %v292_v33, %v765_v35  ;;  %v254_v54 = vpop.f32.mrb[10].mxu0  ;;  %v294_v44 = vpop.f32.mrb[10].mxu1  ;;  %v355_v13 = vunpack.c.l.bf16 %v324_v5 }
 0x104   :  { %527 = vst [vmem:[%s967_s4 + $0x50] sm:$0xff] %v594_v27  ;;  %v595_v39 = vpack.c.bf16 %v412_v28, %v411_v23  ;;  %v365_v45 = vadd.f32 %v333_v0, %v251_v32  ;;  %v381_v55 = vadd.f32 %v349_v1, %v291_v42  ;;  %v255_v60 = vadd.f32 %v254_v54, %v763_v34  ;;  %v256_v62 = vpop.f32.mrb[11].mxu0  ;;  %v296_v63 = vpop.f32.mrb[11].mxu1 }
 0x105   :  { %v295_v61 = vadd.f32 %v294_v44, %v763_v34  ;;  %520 = vst [vmem:[%s967_s4 + $0x18] sm:$0xff] %v587_v38  ;;  %v366_v0 = vadd.f32 %v334_v6, %v253_v40  ;;  %v382_v1 = vadd.f32 %v350_v7, %v293_v41  ;;  %v257_v2 = vadd.f32 %v256_v62, %v765_v35 }
 0x106   :  { %528 = vst [vmem:[%s967_s4 + $0x58] sm:$0xff] %v595_v39  ;;  %v297_v3 = vadd.f32 %v296_v63, %v765_v35  ;;  %v397_v8 = vmax.f32 %v365_v45, 0.0  ;;  %v413_v9 = vmax.f32 %v381_v55, 0.0  ;;  %v367_v48 = vadd.f32 %v335_v30, %v255_v60 }
 0x107   :  { %v383_v49 = vadd.f32 %v351_v31, %v295_v61  ;;  %v398_v6 = vmax.f32 %v366_v0, 0.0  ;;  %v414_v7 = vmax.f32 %v382_v1, 0.0  ;;  %v368_v10 = vadd.f32 %v336_v46, %v257_v2 }
 0x108   :  { %v384_v11 = vadd.f32 %v352_v47, %v297_v3  ;;  %v399_v50 = vmax.f32 %v367_v48, 0.0  ;;  %v340_v46 = vunpack.c.h.bf16 %v316_v4  ;;  %v356_v21 = vunpack.c.h.bf16 %v324_v5 }
 0x109   :  { %v415_v51 = vmax.f32 %v383_v49, 0.0  ;;  %v588_v16 = vpack.c.bf16 %v398_v6, %v397_v8  ;;  %v596_v36 = vpack.c.bf16 %v414_v7, %v413_v9  ;;  %v400_v37 = vmax.f32 %v368_v10, 0.0  ;;  %v260_v30 = vpop.f32.mrb[12].mxu0  ;;  %v300_v53 = vpop.f32.mrb[12].mxu1 }
 0x10a   :  { %v416_v52 = vmax.f32 %v384_v11, 0.0  ;;  %v261_v31 = vadd.f32 %v260_v30, %v763_v34  ;;  %v301_v17 = vadd.f32 %v300_v53, %v763_v34  ;;  %v262_v20 = vpop.f32.mrb[13].mxu0  ;;  %v302_v18 = vpop.f32.mrb[13].mxu1 }
 0x10b   :  { %521 = vst [vmem:[%s967_s4 + $0x20] sm:$0xff] %v588_v16  ;;  %529 = vst [vmem:[%s967_s4 + $0x60] sm:$0xff] %v596_v36  ;;  %v589_v19 = vpack.c.bf16 %v400_v37, %v399_v50  ;;  %v263_v22 = vadd.f32 %v262_v20, %v765_v35  ;;  %v303_v23 = vadd.f32 %v302_v18, %v765_v35  ;;  %v264_v26 = vpop.f32.mrb[14].mxu0  ;;  %v304_v27 = vpop.f32.mrb[14].mxu1 }
 0x10c   :  { %v597_v47 = vpack.c.bf16 %v416_v52, %v415_v51  ;;  %v369_v56 = vadd.f32 %v337_v24, %v261_v31  ;;  %v385_v28 = vadd.f32 %v353_v25, %v301_v17  ;;  %v265_v29 = vadd.f32 %v264_v26, %v763_v34  ;;  %v266_v32 = vpop.f32.mrb[15].mxu0  ;;  %v306_v42 = vpop.f32.mrb[15].mxu1 }
 0x10d   :  { %v305_v57 = vadd.f32 %v304_v27, %v763_v34  ;;  %522 = vst [vmem:[%s967_s4 + $0x28] sm:$0xff] %v589_v19  ;;  %v370_v24 = vadd.f32 %v338_v43, %v263_v22  ;;  %v386_v25 = vadd.f32 %v354_v59, %v303_v23  ;;  %v267_v58 = vadd.f32 %v266_v32, %v765_v35 }
 0x10e   :  { %530 = vst [vmem:[%s967_s4 + $0x68] sm:$0xff] %v597_v47  ;;  %v307_v34 = vadd.f32 %v306_v42, %v765_v35  ;;  %v401_v33 = vmax.f32 %v369_v56, 0.0  ;;  %v417_v38 = vmax.f32 %v385_v28, 0.0  ;;  %v371_v39 = vadd.f32 %v339_v12, %v265_v29 }
 0x10f   :  { %v387_v40 = vadd.f32 %v355_v13, %v305_v57  ;;  %v402_v41 = vmax.f32 %v370_v24, 0.0  ;;  %v418_v54 = vmax.f32 %v386_v25, 0.0  ;;  %v372_v44 = vadd.f32 %v340_v46, %v267_v58 }
 0x110   :  { %v388_v45 = vadd.f32 %v356_v21, %v307_v34  ;;  %v403_v55 = vmax.f32 %v371_v39, 0.0 }
 0x111   :  { %v419_v60 = vmax.f32 %v387_v40, 0.0  ;;  %v590_v61 = vpack.c.bf16 %v402_v41, %v401_v33  ;;  %v598_v14 = vpack.c.bf16 %v418_v54, %v417_v38  ;;  %v404_v43 = vmax.f32 %v372_v44, 0.0 }
 0x112   :  { %v420_v62 = vmax.f32 %v388_v45, 0.0 }
 0x113   :  { %523 = vst [vmem:[%s967_s4 + $0x30] sm:$0xff] %v590_v61  ;;  %531 = vst [vmem:[%s967_s4 + $0x70] sm:$0xff] %v598_v14  ;;  %v591_v35 = vpack.c.bf16 %v404_v43, %v403_v55 }
 0x114   :  { %v599_v15 = vpack.c.bf16 %v420_v62, %v419_v60 }
 0x115   :  { %524 = vst [vmem:[%s967_s4 + $0x38] sm:$0xff] %v591_v35 }
 0x116   :  { %532 = vst [vmem:[%s967_s4 + $0x78] sm:$0xff] %v599_v15 }

// kernel: fwd.40
= control target key start
LH: loop header
LB: loop body
LE: loop exit
PB: predicated region body
PF: predicated region fallthrough
CT: control target
= control target key end

     0   :  { %v1163_v0 = vmov 0   ;;  %vm299_vm0 = vcmask 211968   ;;  %vm748_vm1 = vcmask 207872   ;;  %s1833_s1 = inlined_call_operand.vmem [shape: f32[128,1], index: 1, kind: input, shape index: {}]   ;;  %s1834_s0 = inlined_call_operand.vmem [shape: bf16[9,128,26], index: 0, kind: input, shape index: {}]   ;;  %s1835_s2 = inlined_call_operand.vmem [shape: bf16[128,26], index: 2, kind: output, shape index: {}]  }
   0x1   :  { %1162 = vset.pattern.permute.xlu1 %v1163_v0  ;;  %1161 = vset.pattern.permute.xlu0 %v1163_v0  ;;  %v574_v1 = vld [vmem:[%s1833_s1 + $0x10] sm:$0xff]  ;;  %v572_v2 = vld [vmem:[%s1833_s1] sm:$0xff]  ;;  %v575_v3 = vld [vmem:[%s1833_s1 + $0x18] sm:$0xff] }
   0x2   :  { %600 = vperm.xlu1 %1162, %v574_v1   ;;  %590 = vperm.xlu0 %1161, %v572_v2   ;;  %v573_v4 = vld [vmem:[%s1833_s1 + $0x8] sm:$0xff]  ;;  %v576_v6 = vld [vmem:[%s1833_s1 + $0x20] sm:$0xff]  ;;  %v579_v7 = vld [vmem:[%s1833_s1 + $0x38] sm:$0xff] }
   0x3   :  { %v577_v5 = vld [vmem:[%s1833_s1 + $0x28] sm:$0xff]  ;;  %v578_v8 = vld [vmem:[%s1833_s1 + $0x30] sm:$0xff]  ;;  %v580_v10 = vld [vmem:[%s1833_s1 + $0x40] sm:$0xff] }
   0x4   :  { %v581_v9 = vld [vmem:[%s1833_s1 + $0x48] sm:$0xff]  ;;  %v583_v11 = vld [vmem:[%s1833_s1 + $0x58] sm:$0xff]  ;;  %v582_v12 = vld [vmem:[%s1833_s1 + $0x50] sm:$0xff] }
   0x5   :  { %v585_v13 = vld [vmem:[%s1833_s1 + $0x68] sm:$0xff]  ;;  %v584_v14 = vld [vmem:[%s1833_s1 + $0x60] sm:$0xff]  ;;  %v587_v15 = vld [vmem:[%s1833_s1 + $0x78] sm:$0xff] }
   0x6   :  { %605 = vperm.xlu1 %1162, %v575_v3   ;;  %595 = vperm.xlu0 %1161, %v573_v4   ;;  %v586_v16 = vld [vmem:[%s1833_s1 + $0x70] sm:$0xff]  ;;  %v1089_v17 = vld [vmem:[%s1834_s0 + $0x8] sm:$0xff]   ;;  %v802_v19 = vld [vmem:[%s1834_s0] sm:$0xff]  }
   0x7   :  { %v1097_v18 = vld [vmem:[%s1834_s0 + $0x48] sm:$0xff]   ;;  %v1096_v20 = vld [vmem:[%s1834_s0 + $0x40] sm:$0xff]   ;;  %v807_v21 = vunpack.c.l.bf16 %v1089_v17  ;;  %v803_v24 = vunpack.c.l.bf16 %v802_v19  ;;  %v808_v27 = vunpack.c.h.bf16 %v1089_v17  ;;  %v804_v60 = vunpack.c.h.bf16 %v802_v19 }
   0x8   :  { %v839_v22 = vunpack.c.l.bf16 %v1097_v18  ;;  %v1105_v23 = vld [vmem:[%s1834_s0 + $0x88] sm:$0xff]   ;;  %v835_v25 = vunpack.c.l.bf16 %v1096_v20  ;;  %v1245_v26 = vld [vmem:[%s1834_s0 + $0x80] sm:$0xff]   ;;  %v840_v28 = vunpack.c.h.bf16 %v1097_v18  ;;  %v836_v61 = vunpack.c.h.bf16 %v1096_v20 }
   0x9   :  { %v871_v29 = vunpack.c.l.bf16 %v1105_v23  ;;  %v334_v30 = vsel %vm299_vm0, %v807_v21, 0.0  ;;  %v1113_v32 = vld [vmem:[%s1834_s0 + $0xc8] sm:$0xff]   ;;  %v867_v33 = vunpack.c.l.bf16 %v1245_v26  ;;  %v300_v34 = vsel %vm299_vm0, %v803_v24, 0.0  ;;  %v1258_v36 = vld [vmem:[%s1834_s0 + $0xc0] sm:$0xff]  }
   0xa   :  { %615 = vperm.xlu1 %1162, %v577_v5   ;;  %610 = vperm.xlu0 %1161, %v576_v6   ;;  %v335_v31 = vsel %vm299_vm0, %v839_v22, 0.0  ;;  %v301_v35 = vsel %vm299_vm0, %v835_v25, 0.0  ;;  %v872_v37 = vunpack.c.h.bf16 %v1105_v23  ;;  %v351_v38 = vsel %vm299_vm0, %v808_v27, 0.0  ;;  %v1121_v44 = vld [vmem:[%s1834_s0 + $0x108] sm:$0xff]   ;;  %v1270_v46 = vld [vmem:[%s1834_s0 + $0x100] sm:$0xff]  }
   0xb   :  { %v352_v39 = vsel %vm299_vm0, %v840_v28, 0.0  ;;  %v336_v40 = vadd.f32 %v335_v31, %v334_v30  ;;  %v903_v41 = vunpack.c.l.bf16 %v1113_v32  ;;  %v337_v42 = vsel %vm299_vm0, %v871_v29, 0.0  ;;  %v1129_v53 = vld [vmem:[%s1834_s0 + $0x148] sm:$0xff]   ;;  %v1282_v57 = vld [vmem:[%s1834_s0 + $0x140] sm:$0xff]  }
   0xc   :  { %v302_v43 = vadd.f32 %v301_v35, %v300_v34  ;;  %v899_v45 = vunpack.c.l.bf16 %v1258_v36  ;;  %v303_v47 = vsel %vm299_vm0, %v867_v33, 0.0  ;;  %v353_v48 = vadd.f32 %v352_v39, %v351_v38  ;;  %v1137_v2 = vld [vmem:[%s1834_s0 + $0x188] sm:$0xff]   ;;  %v1314_v22 = vld [vmem:[%s1834_s0 + $0x1c0] sm:$0xff]   ;;  %v1330_v34 = vld [vmem:[%s1834_s0 + $0x10] sm:$0xff]  }
   0xd   :  { %v904_v49 = vunpack.c.h.bf16 %v1113_v32  ;;  %v354_v50 = vsel %vm299_vm0, %v872_v37, 0.0  ;;  %v338_v51 = vadd.f32 %v337_v42, %v336_v40  ;;  %v935_v52 = vunpack.c.l.bf16 %v1121_v44  ;;  %v1307_v17 = vld [vmem:[%s1834_s0 + $0x208] sm:$0xff]   ;;  %v1319_v23 = vld [vmem:[%s1834_s0 + $0x200] sm:$0xff]   ;;  %v1335_v35 = vld [vmem:[%s1834_s0 + $0x50] sm:$0xff]  }
   0xe   :  { %625 = vperm.xlu1 %1162, %v579_v7   ;;  %620 = vperm.xlu0 %1161, %v578_v8   ;;  %v339_v54 = vsel %vm299_vm0, %v903_v41, 0.0  ;;  %v931_v55 = vunpack.c.l.bf16 %v1270_v46  ;;  %v304_v56 = vadd.f32 %v303_v47, %v302_v43  ;;  %v305_v58 = vsel %vm299_vm0, %v899_v45, 0.0  ;;  %v1295_v7 = vld [vmem:[%s1834_s0 + $0x180] sm:$0xff]  }
   0xf   :  { %v355_v59 = vadd.f32 %v354_v50, %v353_v48  ;;  %v936_v62 = vunpack.c.h.bf16 %v1121_v44  ;;  %v356_v63 = vsel %vm299_vm0, %v904_v49, 0.0  ;;  %v967_v0 = vunpack.c.l.bf16 %v1129_v53 }
  0x10   :  { %v340_v1 = vadd.f32 %v339_v54, %v338_v51  ;;  %v341_v3 = vsel %vm299_vm0, %v935_v52, 0.0  ;;  %v963_v4 = vunpack.c.l.bf16 %v1282_v57  ;;  %v306_v5 = vadd.f32 %v305_v58, %v304_v56  ;;  %v1350_v52 = vld [vmem:[%s1834_s0 + $0x90] sm:$0xff]  }
  0x11   :  { %v307_v6 = vsel %vm299_vm0, %v931_v55, 0.0  ;;  %v357_v8 = vadd.f32 %v356_v63, %v355_v59  ;;  %v343_v18 = vsel %vm299_vm0, %v967_v0, 0.0  ;;  %v995_v19 = vunpack.c.l.bf16 %v1295_v7  ;;  %v1372_v0 = vld [vmem:[%s1834_s0 + $0x150] sm:$0xff]  }
  0x12   :  { %635 = vperm.xlu1 %1162, %v581_v9   ;;  %630 = vperm.xlu0 %1161, %v580_v10   ;;  %v868_v9 = vunpack.c.h.bf16 %v1245_v26  ;;  %v317_v10 = vsel %vm299_vm0, %v804_v60, 0.0  ;;  %v308_v20 = vadd.f32 %v307_v6, %v306_v5  ;;  %v309_v24 = vsel %vm299_vm0, %v963_v4, 0.0 }
  0x13   :  { %v900_v26 = vunpack.c.h.bf16 %v1258_v36  ;;  %v1000_v28 = vunpack.c.h.bf16 %v1137_v2  ;;  %v1063_v31 = vunpack.c.l.bf16 %v1307_v17  ;;  %v1027_v36 = vunpack.c.l.bf16 %v1314_v22 }
  0x14   :  { %v320_v27 = vsel %vm299_vm0, %v868_v9, 0.0  ;;  %v1059_v37 = vunpack.c.l.bf16 %v1319_v23  ;;  %v310_v38 = vadd.f32 %v309_v24, %v308_v20  ;;  %v311_v40 = vsel %vm299_vm0, %v995_v19, 0.0  ;;  %v1387_v9 = vld [vmem:[%s1834_s0 + $0x1d0] sm:$0xff]  }
  0x15   :  { %v932_v42 = vunpack.c.h.bf16 %v1270_v46  ;;  %v322_v43 = vsel %vm299_vm0, %v900_v26, 0.0  ;;  %v362_v45 = vsel %vm299_vm0, %v1000_v28, 0.0  ;;  %v812_v47 = vunpack.c.h.bf16 %v1330_v34 }
  0x16   :  { %645 = vperm.xlu1 %1162, %v583_v11   ;;  %640 = vperm.xlu0 %1161, %v582_v12   ;;  %v318_v11 = vsel %vm299_vm0, %v836_v61, 0.0  ;;  %v968_v12 = vunpack.c.h.bf16 %v1129_v53  ;;  %v844_v48 = vunpack.c.h.bf16 %v1335_v35  ;;  %v349_v51 = vsel %vm299_vm0, %v1063_v31, 0.0  ;;  %v1360_v61 = vld [vmem:[%s1834_s0 + $0xd0] sm:$0xff]   ;;  %v1099_v31 = vld [vmem:[%s1834_s0 + $0x58] sm:$0xff]  }
  0x17   :  { %v319_v21 = vadd.f32 %v318_v11, %v317_v10  ;;  %v312_v46 = vadd.f32 %v311_v40, %v310_v38  ;;  %v313_v53 = vsel %vm299_vm0, %v1027_v36, 0.0  ;;  %v964_v54 = vunpack.c.h.bf16 %v1282_v57  ;;  %v1367_v57 = vld [vmem:[%s1834_s0 + $0x110] sm:$0xff]  }
  0x18   :  { %v360_v29 = vsel %vm299_vm0, %v968_v12, 0.0  ;;  %v315_v56 = vsel %vm299_vm0, %v1059_v37, 0.0  ;;  %v1064_v58 = vunpack.c.h.bf16 %v1307_v17  ;;  %v324_v60 = vsel %vm299_vm0, %v932_v42, 0.0 }
  0x19   :  { %v321_v39 = vadd.f32 %v320_v27, %v319_v21  ;;  %v876_v63 = vunpack.c.h.bf16 %v1350_v52  ;;  %v996_v4 = vunpack.c.h.bf16 %v1295_v7  ;;  %v1028_v5 = vunpack.c.h.bf16 %v1314_v22 }
  0x1a   :  { %655 = vperm.xlu1 %1162, %v585_v13   ;;  %650 = vperm.xlu0 %1161, %v584_v14   ;;  %v358_v13 = vsel %vm299_vm0, %v936_v62, 0.0  ;;  %v999_v14 = vunpack.c.l.bf16 %v1137_v2  ;;  %v386_v2 = vsel %vm299_vm0, %v844_v48, 0.0  ;;  %v1060_v6 = vunpack.c.h.bf16 %v1319_v23 }
  0x1b   :  { %v359_v25 = vadd.f32 %v358_v13, %v357_v8  ;;  %v323_v55 = vadd.f32 %v322_v43, %v321_v39  ;;  %v1382_v8 = vld [vmem:[%s1834_s0 + $0x190] sm:$0xff]   ;;  %v314_v10 = vadd.f32 %v313_v53, %v312_v46  ;;  %v326_v12 = vsel %vm299_vm0, %v964_v54, 0.0 }
  0x1c   :  { %v345_v33 = vsel %vm299_vm0, %v999_v14, 0.0  ;;  %v908_v7 = vunpack.c.h.bf16 %v1360_v61  ;;  %v1394_v13 = vld [vmem:[%s1834_s0 + $0x210] sm:$0xff]   ;;  %v1004_v19 = vunpack.c.h.bf16 %v1382_v8  ;;  %v1036_v20 = vunpack.c.h.bf16 %v1387_v9 }
  0x1d   :  { %v361_v41 = vadd.f32 %v360_v29, %v359_v25  ;;  %v325_v11 = vadd.f32 %v324_v60, %v323_v55  ;;  %v388_v21 = vsel %vm299_vm0, %v876_v63, 0.0  ;;  %v328_v23 = vsel %vm299_vm0, %v996_v4, 0.0  ;;  %v1115_v60 = vld [vmem:[%s1834_s0 + $0xd8] sm:$0xff]   ;;  %v1108_v4 = vld [vmem:[%s1834_s0 + $0xa0] sm:$0xff]  }
  0x1e   :  { %665 = vperm.xlu1 %1162, %v587_v15   ;;  %660 = vperm.xlu0 %1161, %v586_v16   ;;  %v342_v15 = vadd.f32 %v341_v3, %v340_v1  ;;  %v1145_v16 = vld [vmem:[%s1834_s0 + $0x1c8] sm:$0xff]   ;;  %v385_v1 = vsel %vm299_vm0, %v812_v47, 0.0  ;;  %v330_v24 = vsel %vm299_vm0, %v1028_v5, 0.0  ;;  %v1068_v25 = vunpack.c.h.bf16 %v1394_v13  ;;  %v1107_v47 = vld [vmem:[%s1834_s0 + $0x98] sm:$0xff]  }
  0x1f   :  { %v1031_v30 = vunpack.c.l.bf16 %v1145_v16  ;;  %v1032_v44 = vunpack.c.h.bf16 %v1145_v16  ;;  %v363_v59 = vadd.f32 %v362_v45, %v361_v41  ;;  %v972_v16 = vunpack.c.h.bf16 %v1372_v0 }
  0x20   :  { %v344_v32 = vadd.f32 %v343_v18, %v342_v15  ;;  %v940_v15 = vunpack.c.h.bf16 %v1367_v57  ;;  %v387_v17 = vadd.f32 %v386_v2, %v385_v1  ;;  %v366_v18 = vsel %vm299_vm0, %v1064_v58, 0.0 }
  0x21   :  { %v347_v50 = vsel %vm299_vm0, %v1031_v30, 0.0  ;;  %v364_v62 = vsel %vm299_vm0, %v1032_v44, 0.0  ;;  %v1407_v26 = vadd.f32 %v315_v56, %v314_v10  ;;  %v327_v27 = vadd.f32 %v326_v12, %v325_v11  ;;  %v1091_v30 = vld [vmem:[%s1834_s0 + $0x18] sm:$0xff]  }
  0x22   :  { %v346_v49 = vadd.f32 %v345_v33, %v344_v32  ;;  %v365_v14 = vadd.f32 %v364_v62, %v363_v59  ;;  %v332_v28 = vsel %vm299_vm0, %v1060_v6, 0.0  ;;  %v390_v29 = vsel %vm299_vm0, %v908_v7, 0.0 }
  0x23   :  { %v389_v33 = vadd.f32 %v388_v21, %v387_v17  ;;  %v392_v36 = vsel %vm299_vm0, %v940_v15, 0.0  ;;  %v1421_v37 = vsel %vm299_vm0, %v972_v16, 0.0  ;;  %v1424_v38 = vsel %vm299_vm0, %v1004_v19, 0.0 }
  0x24   :  { %v348_v3 = vadd.f32 %v347_v50, %v346_v49  ;;  %v1417_v32 = vadd.f32 %v366_v18, %v365_v14  ;;  %v1427_v39 = vsel %vm299_vm0, %v1036_v20, 0.0  ;;  %v811_v40 = vunpack.c.l.bf16 %v1330_v34  ;;  %v1092_v34 = vld [vmem:[%s1834_s0 + $0x20] sm:$0xff]  }
  0x25   :  { %v843_v41 = vunpack.c.l.bf16 %v1335_v35  ;;  %v1432_v42 = vsel %vm299_vm0, %v1068_v25, 0.0  ;;  %v875_v43 = vunpack.c.l.bf16 %v1350_v52  ;;  %v816_v44 = vunpack.c.h.bf16 %v1091_v30  ;;  %v1100_v35 = vld [vmem:[%s1834_s0 + $0x60] sm:$0xff]  }
  0x26   :  { %v1402_v22 = vadd.f32 %v349_v51, %v348_v3  ;;  %v848_v45 = vunpack.c.h.bf16 %v1099_v31  ;;  %v329_v48 = vadd.f32 %v328_v23, %v327_v27  ;;  %v907_v49 = vunpack.c.l.bf16 %v1360_v61  ;;  %v1116_v20 = vld [vmem:[%s1834_s0 + $0xe0] sm:$0xff]  }
  0x27   :  { %v815_v50 = vunpack.c.l.bf16 %v1091_v30  ;;  %v847_v51 = vunpack.c.l.bf16 %v1099_v31  ;;  %v391_v52 = vadd.f32 %v390_v29, %v389_v33  ;;  %v939_v46 = vunpack.c.l.bf16 %v1367_v57  ;;  %v1131_v31 = vld [vmem:[%s1834_s0 + $0x158] sm:$0xff]  }
  0x28   :  { %v971_v53 = vunpack.c.l.bf16 %v1372_v0  ;;  %v1003_v54 = vunpack.c.l.bf16 %v1382_v8  ;;  %v1035_v55 = vunpack.c.l.bf16 %v1387_v9  ;;  %v368_v56 = vsel %vm299_vm0, %v811_v40, 0.0 }
  0x29   :  { %v369_v58 = vsel %vm299_vm0, %v843_v41, 0.0  ;;  %v880_v59 = vunpack.c.h.bf16 %v1107_v47  ;;  %v419_v61 = vsel %vm299_vm0, %v816_v44, 0.0  ;;  %v420_v62 = vsel %vm299_vm0, %v848_v45, 0.0 }
  0x2a   :  { %v820_v63 = vunpack.c.h.bf16 %v1092_v34  ;;  %v852_v57 = vunpack.c.h.bf16 %v1100_v35  ;;  %v1067_v0 = vunpack.c.l.bf16 %v1394_v13  ;;  %v879_v1 = vunpack.c.l.bf16 %v1107_v47  ;;  %v1123_v13 = vld [vmem:[%s1834_s0 + $0x118] sm:$0xff]   ;;  %v1124_v47 = vld [vmem:[%s1834_s0 + $0x120] sm:$0xff]  }
  0x2b   :  { %v402_v2 = vsel %vm299_vm0, %v815_v50, 0.0  ;;  %v403_v3 = vsel %vm299_vm0, %v847_v51, 0.0  ;;  %v331_v5 = vadd.f32 %v330_v24, %v329_v48  ;;  %v393_v6 = vadd.f32 %v392_v36, %v391_v52 }
  0x2c   :  { %v370_v8 = vadd.f32 %v369_v58, %v368_v56  ;;  %v371_v9 = vsel %vm299_vm0, %v875_v43, 0.0  ;;  %v373_v10 = vsel %vm299_vm0, %v907_v49, 0.0  ;;  %v912_v11 = vunpack.c.h.bf16 %v1115_v60 }
  0x2d   :  { %v421_v12 = vadd.f32 %v420_v62, %v419_v61  ;;  %v422_v7 = vsel %vm299_vm0, %v880_v59, 0.0  ;;  %v404_v14 = vadd.f32 %v403_v3, %v402_v2  ;;  %v884_v15 = vunpack.c.h.bf16 %v1108_v4 }
  0x2e   :  { %v453_v16 = vsel %vm299_vm0, %v820_v63, 0.0  ;;  %v454_v17 = vsel %vm299_vm0, %v852_v57, 0.0  ;;  %v911_v18 = vunpack.c.l.bf16 %v1115_v60  ;;  %v405_v19 = vsel %vm299_vm0, %v879_v1, 0.0  ;;  %v1132_v57 = vld [vmem:[%s1834_s0 + $0x160] sm:$0xff]  }
  0x2f   :  { %v819_v21 = vunpack.c.l.bf16 %v1092_v34  ;;  %v851_v23 = vunpack.c.l.bf16 %v1100_v35  ;;  %v1474_v24 = vadd.f32 %v332_v28, %v331_v5  ;;  %v372_v25 = vadd.f32 %v371_v9, %v370_v8  ;;  %v1147_v9 = vld [vmem:[%s1834_s0 + $0x1d8] sm:$0xff]  }
  0x30   :  { %v375_v27 = vsel %vm299_vm0, %v939_v46, 0.0  ;;  %v377_v29 = vsel %vm299_vm0, %v971_v53, 0.0  ;;  %v944_v30 = vunpack.c.h.bf16 %v1123_v13  ;;  %v423_v33 = vadd.f32 %v422_v7, %v421_v12  ;;  %v1139_v46 = vld [vmem:[%s1834_s0 + $0x198] sm:$0xff]  }
  0x31   :  { %v424_v36 = vsel %vm299_vm0, %v912_v11, 0.0  ;;  %v455_v40 = vadd.f32 %v454_v17, %v453_v16  ;;  %v943_v41 = vunpack.c.l.bf16 %v1123_v13  ;;  %v406_v43 = vadd.f32 %v405_v19, %v404_v14  ;;  %v1140_v14 = vld [vmem:[%s1834_s0 + $0x1a0] sm:$0xff]  }
  0x32   :  { %v916_v44 = vunpack.c.h.bf16 %v1116_v20  ;;  %v456_v28 = vsel %vm299_vm0, %v884_v15, 0.0  ;;  %v407_v45 = vsel %vm299_vm0, %v911_v18, 0.0  ;;  %v883_v48 = vunpack.c.l.bf16 %v1108_v4 }
  0x33   :  { %v436_v49 = vsel %vm299_vm0, %v819_v21, 0.0  ;;  %v437_v50 = vsel %vm299_vm0, %v851_v23, 0.0  ;;  %v374_v51 = vadd.f32 %v373_v10, %v372_v25  ;;  %v379_v34 = vsel %vm299_vm0, %v1003_v54, 0.0 }
  0x34   :  { %v1491_v35 = vsel %vm299_vm0, %v1035_v55, 0.0  ;;  %v976_v52 = vunpack.c.h.bf16 %v1131_v31  ;;  %v425_v53 = vadd.f32 %v424_v36, %v423_v33  ;;  %v426_v56 = vsel %vm299_vm0, %v944_v30, 0.0  ;;  %v1534_v30 = vld [vmem:[%s1834_s0 + $0xa8] sm:$0xff]  }
  0x35   :  { %v975_v58 = vunpack.c.l.bf16 %v1131_v31  ;;  %v457_v59 = vadd.f32 %v456_v28, %v455_v40  ;;  %v408_v60 = vadd.f32 %v407_v45, %v406_v43  ;;  %v948_v61 = vunpack.c.h.bf16 %v1124_v47  ;;  %v1155_v31 = vld [vmem:[%s1834_s0 + $0x218] sm:$0xff]  }
  0x36   :  { %v458_v62 = vsel %vm299_vm0, %v916_v44, 0.0  ;;  %v438_v63 = vadd.f32 %v437_v50, %v436_v49  ;;  %v395_v54 = vadd.f32 %v1421_v37, %v393_v6  ;;  %v409_v55 = vsel %vm299_vm0, %v943_v41, 0.0  ;;  %v1511_v37 = vld [vmem:[%s1834_s0 + $0x28] sm:$0xff]  }
  0x37   :  { %v915_v1 = vunpack.c.l.bf16 %v1116_v20  ;;  %v439_v2 = vsel %vm299_vm0, %v883_v48, 0.0  ;;  %v376_v3 = vadd.f32 %v375_v27, %v374_v51  ;;  %v1505_v4 = vsel %vm299_vm0, %v1067_v0, 0.0  ;;  %v1516_v6 = vld [vmem:[%s1834_s0 + $0x68] sm:$0xff]  }
  0x38   :  { %v1008_v5 = vunpack.c.h.bf16 %v1139_v46  ;;  %v428_v8 = vsel %vm299_vm0, %v976_v52, 0.0  ;;  %v427_v10 = vadd.f32 %v426_v56, %v425_v53  ;;  %v1007_v0 = vunpack.c.l.bf16 %v1139_v46  ;;  %v1553_v53 = vld [vmem:[%s1834_s0 + $0xe8] sm:$0xff]  }
  0x39   :  { %v411_v11 = vsel %vm299_vm0, %v975_v58, 0.0  ;;  %v459_v12 = vadd.f32 %v458_v62, %v457_v59  ;;  %v410_v7 = vadd.f32 %v409_v55, %v408_v60  ;;  %v980_v13 = vunpack.c.h.bf16 %v1132_v57  ;;  %v1156_v62 = vld [vmem:[%s1834_s0 + $0x220] sm:$0xff]  }
  0x3a   :  { %v460_v15 = vsel %vm299_vm0, %v948_v61, 0.0  ;;  %v440_v16 = vadd.f32 %v439_v2, %v438_v63  ;;  %v947_v17 = vunpack.c.l.bf16 %v1124_v47  ;;  %v441_v18 = vsel %vm299_vm0, %v915_v1, 0.0 }
  0x3b   :  { %v824_v19 = vunpack.c.h.bf16 %v1511_v37  ;;  %v856_v20 = vunpack.c.h.bf16 %v1516_v6  ;;  %v397_v21 = vadd.f32 %v1424_v38, %v395_v54  ;;  %v378_v23 = vadd.f32 %v377_v29, %v376_v3  ;;  %v1148_v38 = vld [vmem:[%s1834_s0 + $0x1e0] sm:$0xff]  }
  0x3c   :  { %v1040_v25 = vunpack.c.h.bf16 %v1147_v9  ;;  %v430_v27 = vsel %vm299_vm0, %v1008_v5, 0.0  ;;  %v429_v33 = vadd.f32 %v428_v8, %v427_v10  ;;  %v413_v36 = vsel %vm299_vm0, %v1007_v0, 0.0 }
  0x3d   :  { %v1012_v40 = vunpack.c.h.bf16 %v1140_v14  ;;  %v461_v41 = vadd.f32 %v460_v15, %v459_v12  ;;  %v412_v43 = vadd.f32 %v411_v11, %v410_v7  ;;  %v462_v29 = vsel %vm299_vm0, %v980_v13, 0.0  ;;  %v1579_v7 = vld [vmem:[%s1834_s0 + $0x1a8] sm:$0xff]  }
  0x3e   :  { %v979_v44 = vunpack.c.l.bf16 %v1132_v57  ;;  %v442_v28 = vadd.f32 %v441_v18, %v440_v16  ;;  %v443_v45 = vsel %vm299_vm0, %v947_v17, 0.0  ;;  %v888_v47 = vunpack.c.h.bf16 %v1534_v30 }
  0x3f   :  { %v487_v48 = vsel %vm299_vm0, %v824_v19, 0.0  ;;  %v488_v49 = vsel %vm299_vm0, %v856_v20, 0.0  ;;  %v399_v50 = vadd.f32 %v1427_v39, %v397_v21  ;;  %v1072_v51 = vunpack.c.h.bf16 %v1155_v31 }
  0x40   :  { %v432_v52 = vsel %vm299_vm0, %v1040_v25, 0.0  ;;  %v1039_v46 = vunpack.c.l.bf16 %v1147_v9  ;;  %v380_v56 = vadd.f32 %v379_v34, %v378_v23  ;;  %v431_v58 = vadd.f32 %v430_v27, %v429_v33  ;;  %v1570_v9 = vld [vmem:[%s1834_s0 + $0x128] sm:$0xff]  }
  0x41   :  { %v1044_v59 = vunpack.c.h.bf16 %v1148_v38  ;;  %v463_v60 = vadd.f32 %v462_v29, %v461_v41  ;;  %v414_v61 = vadd.f32 %v413_v36, %v412_v43  ;;  %v464_v39 = vsel %vm299_vm0, %v1012_v40, 0.0  ;;  %v1590_v27 = vld [vmem:[%s1834_s0 + $0x1e8] sm:$0xff]  }
  0x42   :  { %v444_v63 = vadd.f32 %v443_v45, %v442_v28  ;;  %v489_v54 = vadd.f32 %v488_v49, %v487_v48  ;;  %v1011_v55 = vunpack.c.l.bf16 %v1140_v14  ;;  %v445_v57 = vsel %vm299_vm0, %v979_v44, 0.0  ;;  %v1157_v41 = vld [vmem:[%s1834_s0 + $0x228] sm:$0xff]  }
  0x43   :  { %v920_v1 = vunpack.c.h.bf16 %v1553_v53  ;;  %v490_v2 = vsel %vm299_vm0, %v888_v47, 0.0  ;;  %v1563_v34 = vadd.f32 %v1432_v42, %v399_v50  ;;  %v434_v3 = vsel %vm299_vm0, %v1072_v51, 0.0  ;;  %v1133_v42 = vld [vmem:[%s1834_s0 + $0x168] sm:$0xff]  }
  0x44   :  { %v1071_v5 = vunpack.c.l.bf16 %v1155_v31  ;;  %v415_v8 = vsel %vm299_vm0, %v1039_v46, 0.0  ;;  %v382_v10 = vadd.f32 %v1491_v35, %v380_v56  ;;  %v433_v0 = vadd.f32 %v432_v52, %v431_v58 }
  0x45   :  { %v1076_v11 = vunpack.c.h.bf16 %v1156_v62  ;;  %v465_v12 = vadd.f32 %v464_v39, %v463_v60  ;;  %v466_v13 = vsel %vm299_vm0, %v1044_v59, 0.0  ;;  %v1043_v14 = vunpack.c.l.bf16 %v1148_v38 }
  0x46   :  { %v446_v15 = vadd.f32 %v445_v57, %v444_v63  ;;  %v491_v16 = vadd.f32 %v490_v2, %v489_v54  ;;  %v416_v17 = vadd.f32 %v415_v8, %v414_v61  ;;  %v447_v35 = vsel %vm299_vm0, %v1011_v55, 0.0 }
  0x47   :  { %v952_v18 = vunpack.c.h.bf16 %v1570_v9  ;;  %v492_v19 = vsel %vm299_vm0, %v920_v1, 0.0  ;;  %v417_v20 = vsel %vm299_vm0, %v1071_v5, 0.0  ;;  %v1075_v21 = vunpack.c.l.bf16 %v1156_v62 }
  0x48   :  { %v984_v23 = vunpack.c.h.bf16 %v1133_v42  ;;  %v1016_v25 = vunpack.c.h.bf16 %v1579_v7  ;;  %v1593_v31 = vadd.f32 %v1505_v4, %v382_v10  ;;  %v1595_v33 = vadd.f32 %v434_v3, %v433_v0  ;;  %v1095_v10 = vld [vmem:[%s1834_s0 + $0x38] sm:$0xff]  }
  0x49   :  { %v467_v36 = vadd.f32 %v466_v13, %v465_v12  ;;  %v468_v40 = vsel %vm299_vm0, %v1076_v11, 0.0  ;;  %v448_v43 = vadd.f32 %v447_v35, %v446_v15  ;;  %v493_v38 = vadd.f32 %v492_v19, %v491_v16 }
  0x4a   :  { %v823_v29 = vunpack.c.l.bf16 %v1511_v37  ;;  %v855_v44 = vunpack.c.l.bf16 %v1516_v6  ;;  %v1603_v28 = vadd.f32 %v417_v20, %v416_v17  ;;  %v449_v4 = vsel %vm299_vm0, %v1043_v14, 0.0  ;;  %v1094_v37 = vld [vmem:[%s1834_s0 + $0x30] sm:$0xff]  }
  0x4b   :  { %v1048_v45 = vunpack.c.h.bf16 %v1590_v27  ;;  %v494_v47 = vsel %vm299_vm0, %v952_v18, 0.0  ;;  %v451_v48 = vsel %vm299_vm0, %v1075_v21, 0.0  ;;  %v1080_v49 = vunpack.c.h.bf16 %v1157_v41  ;;  %v1102_v6 = vld [vmem:[%s1834_s0 + $0x70] sm:$0xff]  }
  0x4c   :  { %v496_v50 = vsel %vm299_vm0, %v984_v23, 0.0  ;;  %v498_v51 = vsel %vm299_vm0, %v1016_v25, 0.0  ;;  %v1617_v52 = vadd.f32 %v468_v40, %v467_v36  ;;  %v887_v46 = vunpack.c.l.bf16 %v1534_v30  ;;  %v1118_v17 = vld [vmem:[%s1834_s0 + $0xf0] sm:$0xff]   ;;  %v1111_v25 = vld [vmem:[%s1834_s0 + $0xb8] sm:$0xff]  }
  0x4d   :  { %v919_v56 = vunpack.c.l.bf16 %v1553_v53  ;;  %v951_v58 = vunpack.c.l.bf16 %v1570_v9  ;;  %v450_v59 = vadd.f32 %v449_v4, %v448_v43  ;;  %v495_v60 = vadd.f32 %v494_v47, %v493_v38  ;;  %v1110_v53 = vld [vmem:[%s1834_s0 + $0xb0] sm:$0xff]  }
  0x4e   :  { %v470_v61 = vsel %vm299_vm0, %v823_v29, 0.0  ;;  %v471_v62 = vsel %vm299_vm0, %v855_v44, 0.0  ;;  %v500_v39 = vsel %vm299_vm0, %v1048_v45, 0.0  ;;  %v983_v63 = vunpack.c.l.bf16 %v1133_v42  ;;  %v1126_v44 = vld [vmem:[%s1834_s0 + $0x130] sm:$0xff]  }
  0x4f   :  { %v828_v54 = vunpack.c.h.bf16 %v1094_v37  ;;  %v860_v55 = vunpack.c.h.bf16 %v1102_v6  ;;  %v1626_v57 = vsel %vm299_vm0, %v1080_v49, 0.0  ;;  %v1015_v30 = vunpack.c.l.bf16 %v1579_v7  ;;  %v1103_v7 = vld [vmem:[%s1834_s0 + $0x78] sm:$0xff]   ;;  %v1672_v4 = vld [vmem:[%s1834_s0 + $0x170] sm:$0xff]  }
  0x50   :  { %v827_v1 = vunpack.c.l.bf16 %v1094_v37  ;;  %v859_v2 = vunpack.c.l.bf16 %v1102_v6  ;;  %v1047_v3 = vunpack.c.l.bf16 %v1590_v27  ;;  %v1079_v5 = vunpack.c.l.bf16 %v1157_v41  ;;  %v1677_v45 = vld [vmem:[%s1834_s0 + $0x1b0] sm:$0xff]  }
  0x51   :  { %v472_v8 = vadd.f32 %v471_v62, %v470_v61  ;;  %v473_v9 = vsel %vm299_vm0, %v887_v46, 0.0  ;;  %v1637_v0 = vadd.f32 %v451_v48, %v450_v59  ;;  %v497_v11 = vadd.f32 %v496_v50, %v495_v60 }
  0x52   :  { %v475_v12 = vsel %vm299_vm0, %v919_v56, 0.0  ;;  %v477_v42 = vsel %vm299_vm0, %v951_v58, 0.0  ;;  %v1645_v13 = vsel %vm299_vm0, %v983_v63, 0.0  ;;  %v892_v14 = vunpack.c.h.bf16 %v1110_v53 }
  0x53   :  { %v521_v15 = vsel %vm299_vm0, %v828_v54, 0.0  ;;  %v522_v16 = vsel %vm299_vm0, %v860_v55, 0.0  ;;  %v891_v35 = vunpack.c.l.bf16 %v1110_v53  ;;  %v504_v18 = vsel %vm299_vm0, %v827_v1, 0.0  ;;  %v1119_v54 = vld [vmem:[%s1834_s0 + $0xf8] sm:$0xff]   ;;  %v1700_v53 = vld [vmem:[%s1834_s0 + $0x230] sm:$0xff]  }
  0x54   :  { %v505_v19 = vsel %vm299_vm0, %v859_v2, 0.0  ;;  %v832_v20 = vunpack.c.h.bf16 %v1095_v10  ;;  %v1655_v21 = vsel %vm299_vm0, %v1015_v30, 0.0  ;;  %v864_v23 = vunpack.c.h.bf16 %v1103_v7  ;;  %v1695_v30 = vld [vmem:[%s1834_s0 + $0x1f0] sm:$0xff]  }
  0x55   :  { %v831_v27 = vunpack.c.l.bf16 %v1095_v10  ;;  %v863_v36 = vunpack.c.l.bf16 %v1103_v7  ;;  %v499_v40 = vadd.f32 %v498_v51, %v497_v11  ;;  %v474_v41 = vadd.f32 %v473_v9, %v472_v8 }
  0x56   :  { %v1661_v43 = vsel %vm299_vm0, %v1047_v3, 0.0  ;;  %v1664_v38 = vsel %vm299_vm0, %v1079_v5, 0.0  ;;  %v924_v29 = vunpack.c.h.bf16 %v1118_v17  ;;  %v523_v47 = vadd.f32 %v522_v16, %v521_v15 }
  0x57   :  { %v524_v48 = vsel %vm299_vm0, %v892_v14, 0.0  ;;  %v506_v49 = vadd.f32 %v505_v19, %v504_v18  ;;  %v923_v50 = vunpack.c.l.bf16 %v1118_v17  ;;  %v507_v51 = vsel %vm299_vm0, %v891_v35, 0.0  ;;  %v1127_v35 = vld [vmem:[%s1834_s0 + $0x138] sm:$0xff]  }
  0x58   :  { %v896_v37 = vunpack.c.h.bf16 %v1111_v25  ;;  %v555_v6 = vsel %vm299_vm0, %v832_v20, 0.0  ;;  %v556_v46 = vsel %vm299_vm0, %v864_v23, 0.0  ;;  %v895_v56 = vunpack.c.l.bf16 %v1111_v25 }
  0x59   :  { %v538_v58 = vsel %vm299_vm0, %v831_v27, 0.0  ;;  %v539_v59 = vsel %vm299_vm0, %v863_v36, 0.0  ;;  %v476_v60 = vadd.f32 %v475_v12, %v474_v41  ;;  %v956_v61 = vunpack.c.h.bf16 %v1126_v44 }
  0x5a   :  { %v988_v62 = vunpack.c.h.bf16 %v1672_v4  ;;  %v1020_v63 = vunpack.c.h.bf16 %v1677_v45  ;;  %v1690_v55 = vadd.f32 %v500_v39, %v499_v40  ;;  %v525_v1 = vadd.f32 %v524_v48, %v523_v47 }
  0x5b   :  { %v955_v2 = vunpack.c.l.bf16 %v1126_v44  ;;  %v508_v3 = vadd.f32 %v507_v51, %v506_v49  ;;  %v526_v5 = vsel %vm299_vm0, %v924_v29, 0.0  ;;  %v509_v8 = vsel %vm299_vm0, %v923_v50, 0.0 }
  0x5c   :  { %v557_v9 = vadd.f32 %v556_v46, %v555_v6  ;;  %v540_v39 = vadd.f32 %v539_v59, %v538_v58  ;;  %v928_v10 = vunpack.c.h.bf16 %v1119_v54  ;;  %v558_v11 = vsel %vm299_vm0, %v896_v37, 0.0 }
  0x5d   :  { %v927_v12 = vunpack.c.l.bf16 %v1119_v54  ;;  %v541_v7 = vsel %vm299_vm0, %v895_v56, 0.0  ;;  %v478_v14 = vadd.f32 %v477_v42, %v476_v60  ;;  %v1052_v15 = vunpack.c.h.bf16 %v1695_v30 }
  0x5e   :  { %v1084_v16 = vunpack.c.h.bf16 %v1700_v53  ;;  %v528_v17 = vsel %vm299_vm0, %v956_v61, 0.0  ;;  %v527_v20 = vadd.f32 %v526_v5, %v525_v1  ;;  %v987_v23 = vunpack.c.l.bf16 %v1672_v4 }
  0x5f   :  { %v510_v25 = vadd.f32 %v509_v8, %v508_v3  ;;  %v511_v27 = vsel %vm299_vm0, %v955_v2, 0.0  ;;  %v559_v40 = vadd.f32 %v558_v11, %v557_v9  ;;  %v542_v41 = vadd.f32 %v541_v7, %v540_v39 }
  0x60   :  { %v960_v29 = vunpack.c.h.bf16 %v1127_v35  ;;  %v560_v44 = vsel %vm299_vm0, %v928_v10, 0.0  ;;  %v959_v47 = vunpack.c.l.bf16 %v1127_v35  ;;  %v543_v48 = vsel %vm299_vm0, %v927_v12, 0.0 }
  0x61   :  { %v480_v51 = vadd.f32 %v1645_v13, %v478_v14  ;;  %v530_v4 = vsel %vm299_vm0, %v988_v62, 0.0  ;;  %v529_v6 = vadd.f32 %v528_v17, %v527_v20  ;;  %v1019_v46 = vunpack.c.l.bf16 %v1677_v45 }
  0x62   :  { %v512_v56 = vadd.f32 %v511_v27, %v510_v25  ;;  %v513_v58 = vsel %vm299_vm0, %v987_v23, 0.0  ;;  %v561_v60 = vadd.f32 %v560_v44, %v559_v40  ;;  %v544_v61 = vadd.f32 %v543_v48, %v542_v41 }
  0x63   :  { %v562_v62 = vsel %vm299_vm0, %v960_v29, 0.0  ;;  %v545_v1 = vsel %vm299_vm0, %v959_v47, 0.0  ;;  %v482_v5 = vadd.f32 %v1655_v21, %v480_v51  ;;  %v532_v8 = vsel %vm299_vm0, %v1020_v63, 0.0 }
  0x64   :  { %v531_v39 = vadd.f32 %v530_v4, %v529_v6  ;;  %v1051_v10 = vunpack.c.l.bf16 %v1695_v30  ;;  %v514_v11 = vadd.f32 %v513_v58, %v512_v56  ;;  %v515_v12 = vsel %vm299_vm0, %v1019_v46, 0.0 }
  0x65   :  { %v563_v7 = vadd.f32 %v562_v62, %v561_v60  ;;  %v546_v14 = vadd.f32 %v545_v1, %v544_v61  ;;  %v534_v25 = vsel %vm299_vm0, %v1052_v15, 0.0  ;;  %v1083_v27 = vunpack.c.l.bf16 %v1700_v53 }
  0x66   :  { %v533_v40 = vadd.f32 %v532_v8, %v531_v39  ;;  %v516_v41 = vadd.f32 %v515_v12, %v514_v11  ;;  %v517_v29 = vsel %vm299_vm0, %v1051_v10, 0.0 }
  0x67   :  { %v519_v58 = vsel %vm299_vm0, %v1083_v27, 0.0 }
  0x68   :  { %v535_v46 = vadd.f32 %v534_v25, %v533_v40  ;;  %v518_v56 = vadd.f32 %v517_v29, %v516_v41 }
  0x81   :  { %v601_v18 = vpop.permute.xlu1 %600  ;;  %v591_v19 = vpop.permute.xlu0 %590 }
  0x82   :  { %v670_v42 = vmul.f32 %v601_v18, %v1402_v22  ;;  %v668_v36 = vmul.f32 %v591_v19, %v1407_v26  ;;  %v1135_v22 = vld [vmem:[%s1834_s0 + $0x178] sm:$0xff]  }
  0x83   :  { %v992_v45 = vunpack.c.h.bf16 %v1135_v22  ;;  %v991_v54 = vunpack.c.l.bf16 %v1135_v22  ;;  %v503_v22 = vadd.f32 %v1626_v57, %v1690_v55 }
  0x84   :  { %v787_v49 = vpack.c.bf16 %v670_v42, %v670_v42  ;;  %v785_v50 = vpack.c.bf16 %v668_v36, %v668_v36  ;;  %v484_v36 = vadd.f32 %v1661_v43, %v482_v5 }
  0x85   :  { %v606_v37 = vpop.permute.xlu1 %605  ;;  %v596_v26 = vpop.permute.xlu0 %595  ;;  %v564_v35 = vsel %vm299_vm0, %v992_v45, 0.0  ;;  %v547_v19 = vsel %vm299_vm0, %v991_v54, 0.0 }
  0x86   :  { %751 = vst.msk [vmem:[%s1835_s2 + $0x8] sm:$0xf] %vm748_vm1, %v787_v49  ;;  %749 = vst.msk [vmem:[%s1835_s2] sm:$0xf] %vm748_vm1, %v785_v50  ;;  %v671_v13 = vmul.f32 %v606_v37, %v1417_v32  ;;  %v669_v59 = vmul.f32 %v596_v26, %v1474_v24  ;;  %v1143_v32 = vld [vmem:[%s1834_s0 + $0x1b8] sm:$0xff]   ;;  %v565_v44 = vadd.f32 %v564_v35, %v563_v7  ;;  %v536_v37 = vsel %vm299_vm0, %v1084_v16, 0.0 }
  0x87   :  { %v1024_v17 = vunpack.c.h.bf16 %v1143_v32  ;;  %v1023_v18 = vunpack.c.l.bf16 %v1143_v32  ;;  %v548_v43 = vadd.f32 %v547_v19, %v546_v14  ;;  %v486_v6 = vadd.f32 %v1664_v38, %v484_v36 }
  0x88   :  { %v788_v2 = vpack.c.bf16 %v671_v13, %v671_v13  ;;  %v786_v3 = vpack.c.bf16 %v669_v59, %v669_v59  ;;  %v537_v1 = vadd.f32 %v536_v37, %v535_v46 }
  0x89   :  { %v616_v9 = vpop.permute.xlu1 %615  ;;  %v611_v24 = vpop.permute.xlu0 %610  ;;  %v566_v48 = vsel %vm299_vm0, %v1024_v17, 0.0  ;;  %v549_v50 = vsel %vm299_vm0, %v1023_v18, 0.0 }
  0x8a   :  { %752 = vst.msk [vmem:[%s1835_s2 + $0xc] sm:$0xf] %vm748_vm1, %v788_v2  ;;  %750 = vst.msk [vmem:[%s1835_s2 + $0x4] sm:$0xf] %vm748_vm1, %v786_v3  ;;  %v673_v21 = vmul.f32 %v616_v9, %v1563_v34  ;;  %v672_v63 = vmul.f32 %v611_v24, %v1593_v31  ;;  %v1151_v34 = vld [vmem:[%s1834_s0 + $0x1f8] sm:$0xff]   ;;  %v567_v53 = vadd.f32 %v566_v48, %v565_v44 }
  0x8b   :  { %v1056_v47 = vunpack.c.h.bf16 %v1151_v34  ;;  %v1055_v49 = vunpack.c.l.bf16 %v1151_v34  ;;  %v550_v38 = vadd.f32 %v549_v50, %v548_v43  ;;  %v520_v2 = vadd.f32 %v519_v58, %v518_v56 }
  0x8c   :  { %v790_v20 = vpack.c.bf16 %v673_v21, %v673_v21  ;;  %v789_v23 = vpack.c.bf16 %v672_v63, %v672_v63 }
  0x8d   :  { %v626_v31 = vpop.permute.xlu1 %625  ;;  %v621_v42 = vpop.permute.xlu0 %620  ;;  %v568_v13 = vsel %vm299_vm0, %v1056_v47, 0.0  ;;  %v551_v60 = vsel %vm299_vm0, %v1055_v49, 0.0 }
  0x8e   :  { %754 = vst.msk [vmem:[%s1835_s2 + $0x14] sm:$0xf] %vm748_vm1, %v790_v20  ;;  %753 = vst.msk [vmem:[%s1835_s2 + $0x10] sm:$0xf] %vm748_vm1, %v789_v23  ;;  %v675_v30 = vmul.f32 %v626_v31, %v1595_v33  ;;  %v674_v15 = vmul.f32 %v621_v42, %v1603_v28  ;;  %v1159_v33 = vld [vmem:[%s1834_s0 + $0x238] sm:$0xff]   ;;  %v569_v3 = vadd.f32 %v568_v13, %v567_v53 }
  0x8f   :  { %v1088_v16 = vunpack.c.h.bf16 %v1159_v33  ;;  %v1087_v59 = vunpack.c.l.bf16 %v1159_v33  ;;  %v552_v5 = vadd.f32 %v551_v60, %v550_v38 }
  0x90   :  { %v792_v51 = vpack.c.bf16 %v675_v30, %v675_v30  ;;  %v791_v4 = vpack.c.bf16 %v674_v15, %v674_v15 }
  0x91   :  { %v636_v28 = vpop.permute.xlu1 %635  ;;  %v631_v26 = vpop.permute.xlu0 %630  ;;  %v570_v8 = vsel %vm299_vm0, %v1088_v16, 0.0  ;;  %v553_v32 = vsel %vm299_vm0, %v1087_v59, 0.0 }
  0x92   :  { %756 = vst.msk [vmem:[%s1835_s2 + $0x1c] sm:$0xf] %vm748_vm1, %v792_v51  ;;  %755 = vst.msk [vmem:[%s1835_s2 + $0x18] sm:$0xf] %vm748_vm1, %v791_v4  ;;  %v677_v57 = vmul.f32 %v636_v28, %v1617_v52  ;;  %v676_v55 = vmul.f32 %v631_v26, %v1637_v0  ;;  %v571_v21 = vadd.f32 %v570_v8, %v569_v3 }
  0x93   :  { %v554_v63 = vadd.f32 %v553_v32, %v552_v5 }
  0x94   :  { %v794_v61 = vpack.c.bf16 %v677_v57, %v677_v57  ;;  %v793_v45 = vpack.c.bf16 %v676_v55, %v676_v55 }
  0x95   :  { %v646_v62 = vpop.permute.xlu1 %645  ;;  %v641_v54 = vpop.permute.xlu0 %640 }
  0x96   :  { %758 = vst.msk [vmem:[%s1835_s2 + $0x24] sm:$0xf] %vm748_vm1, %v794_v61  ;;  %757 = vst.msk [vmem:[%s1835_s2 + $0x20] sm:$0xf] %vm748_vm1, %v793_v45  ;;  %v679_v52 = vmul.f32 %v646_v62, %v503_v22  ;;  %v678_v0 = vmul.f32 %v641_v54, %v486_v6 }
  0x98   :  { %v796_v9 = vpack.c.bf16 %v679_v52, %v679_v52  ;;  %v795_v24 = vpack.c.bf16 %v678_v0, %v678_v0 }
  0x99   :  { %v656_v39 = vpop.permute.xlu1 %655  ;;  %v651_v10 = vpop.permute.xlu0 %650 }
  0x9a   :  { %760 = vst.msk [vmem:[%s1835_s2 + $0x2c] sm:$0xf] %vm748_vm1, %v796_v9  ;;  %759 = vst.msk [vmem:[%s1835_s2 + $0x28] sm:$0xf] %vm748_vm1, %v795_v24  ;;  %v681_v11 = vmul.f32 %v656_v39, %v537_v1  ;;  %v680_v12 = vmul.f32 %v651_v10, %v520_v2 }
  0x9c   :  { %v798_v7 = vpack.c.bf16 %v681_v11, %v681_v11  ;;  %v797_v14 = vpack.c.bf16 %v680_v12, %v680_v12 }
  0x9d   :  { %v666_v17 = vpop.permute.xlu1 %665  ;;  %v661_v35 = vpop.permute.xlu0 %660 }
  0x9e   :  { %762 = vst.msk [vmem:[%s1835_s2 + $0x34] sm:$0xf] %vm748_vm1, %v798_v7  ;;  %761 = vst.msk [vmem:[%s1835_s2 + $0x30] sm:$0xf] %vm748_vm1, %v797_v14  ;;  %v683_v18 = vmul.f32 %v666_v17, %v571_v21  ;;  %v682_v19 = vmul.f32 %v661_v35, %v554_v63 }
  0xa0   :  { %v800_v20 = vpack.c.bf16 %v683_v18, %v683_v18  ;;  %v799_v23 = vpack.c.bf16 %v682_v19, %v682_v19 }
  0xa2   :  { %764 = vst.msk [vmem:[%s1835_s2 + $0x3c] sm:$0xf] %vm748_vm1, %v800_v20  ;;  %763 = vst.msk [vmem:[%s1835_s2 + $0x38] sm:$0xf] %vm748_vm1, %v799_v23 }

// kernel: fwd.43
= control target key start
LH: loop header
LB: loop body
LE: loop exit
PB: predicated region body
PF: predicated region fallthrough
CT: control target
= control target key end

     0   :  { %s836_s1 = inlined_call_operand.vmem [shape: bf16[256,128], index: 1, kind: input, shape index: {}]   ;;  %s837_s0 = inlined_call_operand.vmem [shape: bf16[128,256], index: 0, kind: input, shape index: {}]   ;;  %s838_s2 = inlined_call_operand.vmem [shape: f32[1,128], index: 2, kind: input, shape index: {}]   ;;  %s839_s3 = inlined_call_operand.vmem [shape: bf16[128,128], index: 3, kind: output, shape index: {}]  }
   0x1   :  { %v635_v0 = vld [vmem:[%s836_s1 + $0x40] sm:$0xff]   ;;  %v637_v2 = vld [vmem:[%s836_s1 + $0x48] sm:$0xff]   ;;  %v639_v4 = vld [vmem:[%s836_s1 + $0x50] sm:$0xff]  }
   0x2   :  { %v636_v1 = vld [vmem:[%s836_s1] sm:$0xff]   ;;  %555 = vmatprep.subr.bf16.mxu0 %v635_v0  ;;  %619 = vmatprep.subr.bf16.mxu1 %v635_v0  ;;  %v638_v3 = vld [vmem:[%s836_s1 + $0x8] sm:$0xff]   ;;  %v640_v5 = vld [vmem:[%s836_s1 + $0x10] sm:$0xff]  }
   0x3   :  { %556 = vmatpush3.bf16.msra.mxu0 %v636_v1  ;;  %627 = vmatpush3.bf16.msra.mxu1 %v636_v1  ;;  %v641_v6 = vld [vmem:[%s836_s1 + $0x58] sm:$0xff]   ;;  %v643_v8 = vld [vmem:[%s836_s1 + $0x60] sm:$0xff]   ;;  %v645_v10 = vld [vmem:[%s836_s1 + $0x68] sm:$0xff]  }
   0x4   :  { %557 = vmatprep.subr.bf16.mxu0 %v637_v2  ;;  %620 = vmatprep.subr.bf16.mxu1 %v637_v2  ;;  %v642_v7 = vld [vmem:[%s836_s1 + $0x18] sm:$0xff]   ;;  %v644_v9 = vld [vmem:[%s836_s1 + $0x20] sm:$0xff]   ;;  %v646_v13 = vld [vmem:[%s836_s1 + $0x28] sm:$0xff]  }
   0x5   :  { %v653_v11 = vld [vmem:[%s837_s0 + $0x4] ss:$8 sps:$4 sm:$0xff]   ;;  %v647_v14 = vld [vmem:[%s836_s1 + $0x70] sm:$0xff]   ;;  %v649_v16 = vld [vmem:[%s836_s1 + $0x78] sm:$0xff]  }
   0x6   :  { %v656_v12 = vld [vmem:[%s837_s0 + $0x44] ss:$8 sps:$4 sm:$0xff]   ;;  %278 = vmatprep.mubr.bf16.mxu0 %v653_v11  ;;  %v648_v15 = vld [vmem:[%s836_s1 + $0x30] sm:$0xff]   ;;  %v650_v17 = vld [vmem:[%s836_s1 + $0x38] sm:$0xff]  }
   0x7   :  { %558 = vmatpush3.bf16.msra.mxu0 %v638_v3  ;;  %628 = vmatpush3.bf16.msra.mxu1 %v638_v3  ;;  %v651_v18 = vld [vmem:[%s837_s0] ss:$8 sps:$4 sm:$0xff]   ;;  %v657_v20 = vld [vmem:[%s837_s0 + $0x14] ss:$8 sps:$4 sm:$0xff]   ;;  %v661_v22 = vld [vmem:[%s837_s0 + $0x10] ss:$8 sps:$4 sm:$0xff]  }
   0x8   :  { %559 = vmatprep.subr.bf16.mxu0 %v639_v4  ;;  %621 = vmatprep.subr.bf16.mxu1 %v639_v4  ;;  %v654_v19 = vld [vmem:[%s837_s0 + $0x40] ss:$8 sps:$4 sm:$0xff]   ;;  %v659_v21 = vld [vmem:[%s837_s0 + $0x54] ss:$8 sps:$4 sm:$0xff]   ;;  %v662_v23 = vld [vmem:[%s837_s0 + $0x50] ss:$8 sps:$4 sm:$0xff]  }
   0x9   :  { %310 = vmatprep.mubr.bf16.mxu1 %v656_v12  ;;  %v663_v24 = vld [vmem:[%s837_s0 + $0x24] ss:$8 sps:$4 sm:$0xff]   ;;  %v667_v26 = vld [vmem:[%s837_s0 + $0x20] ss:$8 sps:$4 sm:$0xff]   ;;  %v669_v28 = vld [vmem:[%s837_s0 + $0x34] ss:$8 sps:$4 sm:$0xff]  }
   0xa   :  { %v665_v25 = vld [vmem:[%s837_s0 + $0x64] ss:$8 sps:$4 sm:$0xff]   ;;  %v668_v27 = vld [vmem:[%s837_s0 + $0x60] ss:$8 sps:$4 sm:$0xff]   ;;  %v671_v29 = vld [vmem:[%s837_s0 + $0x74] ss:$8 sps:$4 sm:$0xff]  }
   0xb   :  { %560 = vmatpush3.bf16.msra.mxu0 %v640_v5  ;;  %629 = vmatpush3.bf16.msra.mxu1 %v640_v5  ;;  %v673_v30 = vld [vmem:[%s837_s0 + $0x30] ss:$8 sps:$4 sm:$0xff]   ;;  %v794_v34 = vld [vmem:[%s838_s2] ss:$0 sm:$0xff] }
   0xc   :  { %561 = vmatprep.subr.bf16.mxu0 %v641_v6  ;;  %622 = vmatprep.subr.bf16.mxu1 %v641_v6  ;;  %v674_v31 = vld [vmem:[%s837_s0 + $0x70] ss:$8 sps:$4 sm:$0xff]  }
   0xf   :  { %562 = vmatpush3.bf16.msra.mxu0 %v642_v7  ;;  %630 = vmatpush3.bf16.msra.mxu1 %v642_v7 }
  0x10   :  { %563 = vmatprep.subr.bf16.mxu0 %v643_v8  ;;  %623 = vmatprep.subr.bf16.mxu1 %v643_v8 }
  0x13   :  { %564 = vmatpush3.bf16.msra.mxu0 %v644_v9  ;;  %631 = vmatpush3.bf16.msra.mxu1 %v644_v9 }
  0x14   :  { %565 = vmatprep.subr.bf16.mxu0 %v645_v10  ;;  %624 = vmatprep.subr.bf16.mxu1 %v645_v10 }
  0x17   :  { %566 = vmatpush3.bf16.msra.mxu0 %v646_v13  ;;  %632 = vmatpush3.bf16.msra.mxu1 %v646_v13 }
  0x18   :  { %567 = vmatprep.subr.bf16.mxu0 %v647_v14  ;;  %625 = vmatprep.subr.bf16.mxu1 %v647_v14 }
  0x1b   :  { %568 = vmatpush3.bf16.msra.mxu0 %v648_v15  ;;  %633 = vmatpush3.bf16.msra.mxu1 %v648_v15 }
  0x1c   :  { %569 = vmatprep.subr.bf16.mxu0 %v649_v16  ;;  %626 = vmatprep.subr.bf16.mxu1 %v649_v16 }
  0x1f   :  { %570 = vmatpush3.bf16.msra.mxu0 %v650_v17  ;;  %634 = vmatpush3.bf16.msra.mxu1 %v650_v17 }
  0x22   :  { %279 = vmatmul.mubr.bf16.vlgmr.msra.gmra.mrb[0].mxu0 %v651_v18  ;;  %311 = vmatmul.mubr.bf16.vlgmr.msra.gmra.mrb[0].mxu1 %v654_v19 }
  0x23   :  { %286 = vmatprep.mubr.bf16.mxu0 %v657_v20  ;;  %318 = vmatprep.mubr.bf16.mxu1 %v659_v21 }
  0x2a   :  { %287 = vmatmul.mubr.bf16.gmra.mrb[4].mxu0 %v661_v22  ;;  %319 = vmatmul.mubr.bf16.gmra.mrb[4].mxu1 %v662_v23 }
  0x2b   :  { %294 = vmatprep.mubr.bf16.mxu0 %v663_v24  ;;  %326 = vmatprep.mubr.bf16.mxu1 %v665_v25 }
  0x32   :  { %295 = vmatmul.mubr.bf16.gmra.mrb[8].mxu0 %v667_v26  ;;  %327 = vmatmul.mubr.bf16.gmra.mrb[8].mxu1 %v668_v27 }
  0x33   :  { %302 = vmatprep.mubr.bf16.mxu0 %v669_v28  ;;  %334 = vmatprep.mubr.bf16.mxu1 %v671_v29 }
  0x3a   :  { %303 = vmatmul.mubr.bf16.gmra.mrb[12].mxu0 %v673_v30  ;;  %335 = vmatmul.mubr.bf16.gmra.mrb[12].mxu1 %v674_v31 }
  0xf5   :  { %v571_v32 = vpop.f32.mrb[0].mxu0  ;;  %v595_v33 = vpop.f32.mrb[0].mxu1 }
  0xf6   :  { %v572_v35 = vpop.f32.mrb[1].mxu0  ;;  %v596_v36 = vpop.f32.mrb[1].mxu1 }
  0xf7   :  { %v573_v37 = vadd.f32 %v572_v35, %v571_v32  ;;  %v597_v38 = vadd.f32 %v596_v36, %v595_v33  ;;  %v574_v39 = vpop.f32.mrb[2].mxu0  ;;  %v598_v40 = vpop.f32.mrb[2].mxu1 }
  0xf8   :  { %v575_v41 = vpop.f32.mrb[3].mxu0  ;;  %v599_v42 = vpop.f32.mrb[3].mxu1 }
  0xf9   :  { %v281_v43 = vadd.f32 %v573_v37, %v794_v34  ;;  %v313_v44 = vadd.f32 %v597_v38, %v794_v34  ;;  %v576_v45 = vadd.f32 %v575_v41, %v574_v39  ;;  %v600_v46 = vadd.f32 %v599_v42, %v598_v40 }
  0xfb   :  { %v284_v47 = vadd.f32 %v576_v45, %v794_v34  ;;  %v316_v48 = vadd.f32 %v600_v46, %v794_v34  ;;  %v343_v49 = vmax.f32 %v281_v43, 0.0  ;;  %v351_v50 = vmax.f32 %v313_v44, 0.0 }
  0xfd   :  { %v344_v51 = vmax.f32 %v284_v47, 0.0  ;;  %v352_v52 = vmax.f32 %v316_v48, 0.0  ;;  %v577_v53 = vpop.f32.mrb[4].mxu0  ;;  %v601_v54 = vpop.f32.mrb[4].mxu1 }
  0xfe   :  { %v578_v55 = vpop.f32.mrb[5].mxu0  ;;  %v602_v56 = vpop.f32.mrb[5].mxu1 }
  0xff   :  { %v511_v57 = vpack.c.bf16 %v344_v51, %v343_v49  ;;  %v531_v58 = vpack.c.bf16 %v352_v52, %v351_v50  ;;  %v579_v59 = vadd.f32 %v578_v55, %v577_v53  ;;  %v603_v60 = vadd.f32 %v602_v56, %v601_v54  ;;  %v580_v61 = vpop.f32.mrb[6].mxu0  ;;  %v604_v62 = vpop.f32.mrb[6].mxu1 }
 0x100   :  { %v581_v63 = vpop.f32.mrb[7].mxu0  ;;  %v605_v0 = vpop.f32.mrb[7].mxu1 }
 0x101   :  { %512 = vst [vmem:[%s839_s3] sm:$0xff] %v511_v57   ;;  %551 = vst [vmem:[%s839_s3 + $0x20] sm:$0xff] %v531_v58   ;;  %v289_v1 = vadd.f32 %v579_v59, %v794_v34  ;;  %v321_v2 = vadd.f32 %v603_v60, %v794_v34  ;;  %v582_v3 = vadd.f32 %v581_v63, %v580_v61 }
 0x102   :  { %v606_v4 = vadd.f32 %v605_v0, %v604_v62 }
 0x103   :  { %v292_v5 = vadd.f32 %v582_v3, %v794_v34  ;;  %v345_v7 = vmax.f32 %v289_v1, 0.0  ;;  %v353_v8 = vmax.f32 %v321_v2, 0.0 }
 0x104   :  { %v324_v6 = vadd.f32 %v606_v4, %v794_v34 }
 0x105   :  { %v346_v9 = vmax.f32 %v292_v5, 0.0  ;;  %v583_v11 = vpop.f32.mrb[8].mxu0  ;;  %v607_v12 = vpop.f32.mrb[8].mxu1 }
 0x106   :  { %v354_v10 = vmax.f32 %v324_v6, 0.0  ;;  %v584_v13 = vpop.f32.mrb[9].mxu0  ;;  %v608_v14 = vpop.f32.mrb[9].mxu1 }
 0x107   :  { %v516_v15 = vpack.c.bf16 %v346_v9, %v345_v7  ;;  %v585_v17 = vadd.f32 %v584_v13, %v583_v11  ;;  %v609_v18 = vadd.f32 %v608_v14, %v607_v12  ;;  %v586_v19 = vpop.f32.mrb[10].mxu0  ;;  %v610_v20 = vpop.f32.mrb[10].mxu1 }
 0x108   :  { %v536_v16 = vpack.c.bf16 %v354_v10, %v353_v8  ;;  %v587_v21 = vpop.f32.mrb[11].mxu0  ;;  %v611_v22 = vpop.f32.mrb[11].mxu1 }
 0x109   :  { %548 = vst [vmem:[%s839_s3 + $0x8] sm:$0xff] %v516_v15   ;;  %v297_v23 = vadd.f32 %v585_v17, %v794_v34  ;;  %v329_v24 = vadd.f32 %v609_v18, %v794_v34  ;;  %v588_v25 = vadd.f32 %v587_v21, %v586_v19  ;;  %v612_v26 = vadd.f32 %v611_v22, %v610_v20 }
 0x10a   :  { %552 = vst [vmem:[%s839_s3 + $0x28] sm:$0xff] %v536_v16  }
 0x10b   :  { %v300_v27 = vadd.f32 %v588_v25, %v794_v34  ;;  %v332_v28 = vadd.f32 %v612_v26, %v794_v34  ;;  %v347_v29 = vmax.f32 %v297_v23, 0.0  ;;  %v355_v30 = vmax.f32 %v329_v24, 0.0 }
 0x10d   :  { %v348_v31 = vmax.f32 %v300_v27, 0.0  ;;  %v356_v32 = vmax.f32 %v332_v28, 0.0  ;;  %v589_v33 = vpop.f32.mrb[12].mxu0  ;;  %v613_v35 = vpop.f32.mrb[12].mxu1 }
 0x10e   :  { %v590_v36 = vpop.f32.mrb[13].mxu0  ;;  %v614_v37 = vpop.f32.mrb[13].mxu1 }
 0x10f   :  { %v521_v38 = vpack.c.bf16 %v348_v31, %v347_v29  ;;  %v541_v39 = vpack.c.bf16 %v356_v32, %v355_v30  ;;  %v591_v40 = vadd.f32 %v590_v36, %v589_v33  ;;  %v615_v41 = vadd.f32 %v614_v37, %v613_v35  ;;  %v592_v42 = vpop.f32.mrb[14].mxu0  ;;  %v616_v43 = vpop.f32.mrb[14].mxu1 }
 0x110   :  { %v593_v44 = vpop.f32.mrb[15].mxu0  ;;  %v617_v45 = vpop.f32.mrb[15].mxu1 }
 0x111   :  { %549 = vst [vmem:[%s839_s3 + $0x10] sm:$0xff] %v521_v38   ;;  %553 = vst [vmem:[%s839_s3 + $0x30] sm:$0xff] %v541_v39   ;;  %v305_v46 = vadd.f32 %v591_v40, %v794_v34  ;;  %v337_v47 = vadd.f32 %v615_v41, %v794_v34  ;;  %v594_v48 = vadd.f32 %v593_v44, %v592_v42 }
 0x112   :  { %v618_v49 = vadd.f32 %v617_v45, %v616_v43 }
 0x113   :  { %v308_v50 = vadd.f32 %v594_v48, %v794_v34  ;;  %v349_v52 = vmax.f32 %v305_v46, 0.0  ;;  %v357_v53 = vmax.f32 %v337_v47, 0.0 }
 0x114   :  { %v340_v51 = vadd.f32 %v618_v49, %v794_v34 }
 0x115   :  { %v350_v54 = vmax.f32 %v308_v50, 0.0 }
 0x116   :  { %v358_v55 = vmax.f32 %v340_v51, 0.0 }
 0x117   :  { %v526_v56 = vpack.c.bf16 %v350_v54, %v349_v52 }
 0x118   :  { %v546_v57 = vpack.c.bf16 %v358_v55, %v357_v53 }
 0x119   :  { %550 = vst [vmem:[%s839_s3 + $0x18] sm:$0xff] %v526_v56  }
 0x11a   :  { %554 = vst [vmem:[%s839_s3 + $0x38] sm:$0xff] %v546_v57  }

// kernel: fwd.53
= control target key start
LH: loop header
LB: loop body
LE: loop exit
PB: predicated region body
PF: predicated region fallthrough
CT: control target
= control target key end

     0   :  { %v158_v0 = vmov 0   ;;  %s246_s1 = inlined_call_operand.vmem [shape: f32[32,1], index: 1, kind: input, shape index: {}]   ;;  %s247_s0 = inlined_call_operand.vmem [shape: bf16[4,32,256], index: 0, kind: input, shape index: {}]   ;;  %s248_s2 = inlined_call_operand.vmem [shape: bf16[32,256], index: 2, kind: output, shape index: {}]  }
   0x1   :  { %157 = vset.pattern.permute.xlu1 %v158_v0  ;;  %156 = vset.pattern.permute.xlu0 %v158_v0  ;;  %v85_v1 = vld [vmem:[%s246_s1 + $0x10] sm:$0xff]  ;;  %v83_v2 = vld [vmem:[%s246_s1] sm:$0xff]  ;;  %v86_v3 = vld [vmem:[%s246_s1 + $0x18] sm:$0xff] }
   0x2   :  { %99 = vperm.xlu1 %157, %v85_v1   ;;  %89 = vperm.xlu0 %156, %v83_v2   ;;  %v84_v4 = vld [vmem:[%s246_s1 + $0x8] sm:$0xff]  ;;  %v13_v5 = vld [vmem:[%s247_s0 + $0x10] sm:$0xff]  ;;  %v11_v11 = vld [vmem:[%s247_s0] sm:$0xff] }
   0x3   :  { %v17_v6 = vld [vmem:[%s247_s0 + $0x30] sm:$0xff]  ;;  %v31_v7 = vunpack.c.l.bf16 %v13_v5  ;;  %v32_v8 = vunpack.c.h.bf16 %v13_v5  ;;  %v15_v12 = vld [vmem:[%s247_s0 + $0x20] sm:$0xff]  ;;  %v14_v14 = vld [vmem:[%s247_s0 + $0x18] sm:$0xff]  ;;  %v27_v16 = vunpack.c.l.bf16 %v11_v11  ;;  %v28_v17 = vunpack.c.h.bf16 %v11_v11 }
   0x4   :  { %v39_v9 = vunpack.c.l.bf16 %v17_v6  ;;  %v40_v10 = vunpack.c.h.bf16 %v17_v6  ;;  %v21_v13 = vld [vmem:[%s247_s0 + $0x50] sm:$0xff]  ;;  %v18_v15 = vld [vmem:[%s247_s0 + $0x38] sm:$0xff]  ;;  %v35_v18 = vunpack.c.l.bf16 %v15_v12  ;;  %v36_v19 = vunpack.c.h.bf16 %v15_v12  ;;  %v12_v20 = vld [vmem:[%s247_s0 + $0x8] sm:$0xff] }
   0x5   :  { %v16_v21 = vld [vmem:[%s247_s0 + $0x28] sm:$0xff]  ;;  %v47_v22 = vunpack.c.l.bf16 %v21_v13  ;;  %v48_v23 = vunpack.c.h.bf16 %v21_v13  ;;  %v19_v26 = vld [vmem:[%s247_s0 + $0x40] sm:$0xff]  ;;  %v25_v27 = vld [vmem:[%s247_s0 + $0x70] sm:$0xff]  ;;  %v33_v28 = vunpack.c.l.bf16 %v14_v14  ;;  %v34_v29 = vunpack.c.h.bf16 %v14_v14 }
   0x6   :  { %104 = vperm.xlu1 %157, %v86_v3   ;;  %94 = vperm.xlu0 %156, %v84_v4   ;;  %v71_v24 = vadd.f32 %v39_v9, %v31_v7  ;;  %v74_v25 = vadd.f32 %v40_v10, %v32_v8  ;;  %v41_v30 = vunpack.c.l.bf16 %v18_v15  ;;  %v42_v31 = vunpack.c.h.bf16 %v18_v15  ;;  %v22_v32 = vld [vmem:[%s247_s0 + $0x58] sm:$0xff]  ;;  %v20_v41 = vld [vmem:[%s247_s0 + $0x48] sm:$0xff]  ;;  %v23_v46 = vld [vmem:[%s247_s0 + $0x60] sm:$0xff] }
   0x7   :  { %v29_v33 = vunpack.c.l.bf16 %v12_v20  ;;  %v30_v34 = vunpack.c.h.bf16 %v12_v20  ;;  %v37_v35 = vunpack.c.l.bf16 %v16_v21  ;;  %v38_v36 = vunpack.c.h.bf16 %v16_v21  ;;  %v26_v51 = vld [vmem:[%s247_s0 + $0x78] sm:$0xff]  ;;  %v24_v60 = vld [vmem:[%s247_s0 + $0x68] sm:$0xff] }
   0x8   :  { %v43_v37 = vunpack.c.l.bf16 %v19_v26  ;;  %v44_v38 = vunpack.c.h.bf16 %v19_v26  ;;  %v59_v39 = vadd.f32 %v35_v18, %v27_v16  ;;  %v62_v40 = vadd.f32 %v36_v19, %v28_v17 }
   0x9   :  { %v55_v42 = vunpack.c.l.bf16 %v25_v27  ;;  %v56_v43 = vunpack.c.h.bf16 %v25_v27  ;;  %v72_v44 = vadd.f32 %v71_v24, %v47_v22  ;;  %v75_v45 = vadd.f32 %v74_v25, %v48_v23 }
   0xa   :  { %v49_v47 = vunpack.c.l.bf16 %v22_v32  ;;  %v50_v48 = vunpack.c.h.bf16 %v22_v32  ;;  %v77_v49 = vadd.f32 %v41_v30, %v33_v28  ;;  %v80_v50 = vadd.f32 %v42_v31, %v34_v29 }
   0xb   :  { %v45_v52 = vunpack.c.l.bf16 %v20_v41  ;;  %v46_v53 = vunpack.c.h.bf16 %v20_v41  ;;  %v65_v54 = vadd.f32 %v37_v35, %v29_v33  ;;  %v68_v55 = vadd.f32 %v38_v36, %v30_v34 }
   0xc   :  { %v51_v56 = vunpack.c.l.bf16 %v23_v46  ;;  %v52_v57 = vunpack.c.h.bf16 %v23_v46  ;;  %v60_v58 = vadd.f32 %v59_v39, %v43_v37  ;;  %v63_v59 = vadd.f32 %v62_v40, %v44_v38 }
   0xd   :  { %v57_v61 = vunpack.c.l.bf16 %v26_v51  ;;  %v58_v62 = vunpack.c.h.bf16 %v26_v51  ;;  %v78_v63 = vadd.f32 %v77_v49, %v49_v47  ;;  %v81_v0 = vadd.f32 %v80_v50, %v50_v48 }
   0xe   :  { %v53_v1 = vunpack.c.l.bf16 %v24_v60  ;;  %v54_v2 = vunpack.c.h.bf16 %v24_v60  ;;  %v66_v3 = vadd.f32 %v65_v54, %v45_v52  ;;  %v69_v4 = vadd.f32 %v68_v55, %v46_v53 }
   0xf   :  { %v73_v5 = vadd.f32 %v72_v44, %v55_v42  ;;  %v76_v6 = vadd.f32 %v75_v45, %v56_v43  ;;  %v61_v7 = vadd.f32 %v60_v58, %v51_v56  ;;  %v64_v8 = vadd.f32 %v63_v59, %v52_v57 }
  0x10   :  { %v79_v11 = vadd.f32 %v78_v63, %v57_v61  ;;  %v82_v12 = vadd.f32 %v81_v0, %v58_v62  ;;  %v67_v13 = vadd.f32 %v66_v3, %v53_v1  ;;  %v70_v14 = vadd.f32 %v69_v4, %v54_v2 }
  0x81   :  { %v100_v9 = vpop.permute.xlu1 %99  ;;  %v90_v10 = vpop.permute.xlu0 %89 }
  0x82   :  { %v111_v15 = vmul.f32 %v100_v9, %v73_v5  ;;  %v112_v16 = vmul.f32 %v100_v9, %v76_v6  ;;  %v107_v17 = vmul.f32 %v90_v10, %v61_v7  ;;  %v108_v18 = vmul.f32 %v90_v10, %v64_v8 }
  0x84   :  { %v153_v19 = vpack.c.bf16 %v112_v16, %v111_v15  ;;  %v151_v20 = vpack.c.bf16 %v108_v18, %v107_v17 }
  0x85   :  { %v105_v21 = vpop.permute.xlu1 %104  ;;  %v95_v22 = vpop.permute.xlu0 %94 }
  0x86   :  { %141 = vst [vmem:[%s248_s2 + $0x10] sm:$0xff] %v153_v19  ;;  %139 = vst [vmem:[%s248_s2] sm:$0xff] %v151_v20  ;;  %v113_v23 = vmul.f32 %v105_v21, %v79_v11  ;;  %v114_v24 = vmul.f32 %v105_v21, %v82_v12  ;;  %v109_v25 = vmul.f32 %v95_v22, %v67_v13 }
  0x87   :  { %v110_v26 = vmul.f32 %v95_v22, %v70_v14 }
  0x88   :  { %v154_v27 = vpack.c.bf16 %v114_v24, %v113_v23 }
  0x89   :  { %v152_v28 = vpack.c.bf16 %v110_v26, %v109_v25 }
  0x8a   :  { %142 = vst [vmem:[%s248_s2 + $0x18] sm:$0xff] %v154_v27 }
  0x8b   :  { %140 = vst [vmem:[%s248_s2 + $0x8] sm:$0xff] %v152_v28 }

// kernel: fwd.54
= control target key start
LH: loop header
LB: loop body
LE: loop exit
PB: predicated region body
PF: predicated region fallthrough
CT: control target
= control target key end

     0   :  { %s1092_s12 = smov 0   ;;  %s1094_s13 = smov 0   ;;  %s1286_s0 = inlined_call_operand.vmem [shape: bf16[32,256], index: 0, kind: input, shape index: {}]   ;;  %s1287_s1 = inlined_call_operand.vmem [shape: bf16[256,512], index: 1, kind: input, shape index: {}]   ;;  %s1288_s2 = inlined_call_operand.vmem [shape: f32[1,512], index: 2, kind: input, shape index: {}]   ;;  %s1289_s3 = inlined_call_operand.vmem [shape: bf16[32,512], index: 3, kind: output, shape index: {}]  }
   0x1   :  { %s1096_s14 = smov 0   ;;  %s1098_s15 = smov 0  }
   0x2   :  { %s1100_s16 = smov 0  }
   0x3 LB: > { %s22_s17 = sadd.s32 1, %s1066_s15  ;;  %s843_s18 = sadd.s32 4294967295, %s1070_s16   ;;  %s1070_s16 = sphi %s1100_s16, %s13_s16   ;;  %s1066_s15 = sphi %s1098_s15, %s1294_s15   ;;  %s1062_s14 = sphi %s1096_s14, %s1293_s14   ;;  %s1058_s13 = sphi %s1094_s13, %s1292_s13   ;;  %s1054_s12 = sphi %s1092_s12, %s1291_s12  }
   0x4   : > { %p23_p0 = scmp.ge.s32.totalorder %s22_s17, 2  ;;  %p65_p1 = scmp.ne.s32.totalorder %s1058_s13, %s1054_s12 }
   0x5   : > { %p66_p2 = scmp.eq.s32.totalorder %s1070_s16, 0  ;;  %p123_p4 = scmp.eq.s32.totalorder %s843_s18, 1 }
   0x6   : > { %s1296_s17 = smov (%p23_p0, %s22_s17), 0  ;;  %s58_s20 = sadd.s32 1, %s1058_s13 }
   0x7   : > { %p67_p3 = por %p66_p2, %p65_p1  ;;  %s55_s19 = ssub.s32 %s1066_s15, %s1296_s17 }
   0x8   : > { %p56_p5 = scmp.eq.s32.totalorder %s55_s19, 0  ;;  %p1127_p6 = por %p123_p4, %p65_p1 }
   0x9   : > { %p847_p7 = scmp.ge.s32.totalorder %s1070_s16, 2 }
   0xa   : > { %s1132_s22 = scalar_select %p56_p5, %s1058_s13, %s58_s20  }
   0xb   : > { %155 = sbr.rel (%p847_p7) target bundleno = 38 (0x26), region = 20 }
  0x12   : > { %158 = sbr.rel (!%p67_p3) target bundleno = 38 (0x26), region = 24  ;;  %s160_s23 = sand.u32 (%p67_p3), 1, %s1058_s13  }
  0x13   : > { %s900_s24 = sshll.u32 (%p67_p3), %s1066_s15, 3  ;;  %s848_s25 = sshll.u32 (%p67_p3), %s160_s23, 8 }
  0x14   : > { %s1140_s28 = scalar_lea.vmem (%p67_p3), %s1287_s1, %s900_s24  ;;  %s1145_s29 = scalar_lea.vmem (%p67_p3), [#allocation2], %s848_s25 }
  0x15   : > { %v255_v0 = vld [vmem:[%s1140_s28] sm:$0xff] (%p67_p3)  ;;  %v257_v1 = vld [vmem:[%s1140_s28 + $0x10] sm:$0xff] (%p67_p3) }
  0x16   : > { %v259_v2 = vld [vmem:[%s1140_s28 + $0x20] sm:$0xff] (%p67_p3)  ;;  %256 = vst [vmem:[%s1145_s29] sm:$0xff] (%p67_p3), %v255_v0  ;;  %258 = vst [vmem:[%s1145_s29 + $0x8] sm:$0xff] (%p67_p3), %v257_v1  ;;  %v261_v3 = vld [vmem:[%s1140_s28 + $0x30] sm:$0xff] (%p67_p3) }
  0x17   : > { %260 = vst [vmem:[%s1145_s29 + $0x10] sm:$0xff] (%p67_p3), %v259_v2  ;;  %v263_v4 = vld [vmem:[%s1140_s28 + $0x40] sm:$0xff] (%p67_p3)  ;;  %v265_v5 = vld [vmem:[%s1140_s28 + $0x50] sm:$0xff] (%p67_p3)  ;;  %262 = vst [vmem:[%s1145_s29 + $0x18] sm:$0xff] (%p67_p3), %v261_v3 }
  0x18   : > { %264 = vst [vmem:[%s1145_s29 + $0x20] sm:$0xff] (%p67_p3), %v263_v4  ;;  %266 = vst [vmem:[%s1145_s29 + $0x28] sm:$0xff] (%p67_p3), %v265_v5  ;;  %v267_v6 = vld [vmem:[%s1140_s28 + $0x60] sm:$0xff] (%p67_p3)  ;;  %v269_v7 = vld [vmem:[%s1140_s28 + $0x70] sm:$0xff] (%p67_p3) }
  0x19   : > { %v271_v8 = vld [vmem:[%s1140_s28 + $0x80] sm:$0xff]  ;;  %268 = vst [vmem:[%s1145_s29 + $0x30] sm:$0xff] %v267_v6  ;;  %270 = vst [vmem:[%s1145_s29 + $0x38] sm:$0xff] %v269_v7  ;;  %v273_v9 = vld [vmem:[%s1140_s28 + $0x90] sm:$0xff] }
  0x1a   : > { %272 = vst [vmem:[%s1145_s29 + $0x40] sm:$0xff] %v271_v8  ;;  %v275_v10 = vld [vmem:[%s1140_s28 + $0xa0] sm:$0xff]  ;;  %v277_v11 = vld [vmem:[%s1140_s28 + $0xb0] sm:$0xff]  ;;  %274 = vst [vmem:[%s1145_s29 + $0x48] sm:$0xff] %v273_v9 }
  0x1b   : > { %276 = vst [vmem:[%s1145_s29 + $0x50] sm:$0xff] %v275_v10  ;;  %278 = vst [vmem:[%s1145_s29 + $0x58] sm:$0xff] %v277_v11  ;;  %v279_v12 = vld [vmem:[%s1140_s28 + $0xc0] sm:$0xff]  ;;  %v281_v13 = vld [vmem:[%s1140_s28 + $0xd0] sm:$0xff] }
  0x1c   : > { %v283_v14 = vld [vmem:[%s1140_s28 + $0xe0] sm:$0xff]  ;;  %280 = vst [vmem:[%s1145_s29 + $0x60] sm:$0xff] %v279_v12  ;;  %282 = vst [vmem:[%s1145_s29 + $0x68] sm:$0xff] %v281_v13  ;;  %v285_v15 = vld [vmem:[%s1140_s28 + $0xf0] sm:$0xff] }
  0x1d   : > { %284 = vst [vmem:[%s1145_s29 + $0x70] sm:$0xff] %v283_v14  ;;  %v287_v16 = vld [vmem:[%s1140_s28 + $0x100] sm:$0xff]  ;;  %v289_v17 = vld [vmem:[%s1140_s28 + $0x110] sm:$0xff]  ;;  %286 = vst [vmem:[%s1145_s29 + $0x78] sm:$0xff] %v285_v15 }
  0x1e   : > { %288 = vst [vmem:[%s1145_s29 + $0x80] sm:$0xff] %v287_v16  ;;  %290 = vst [vmem:[%s1145_s29 + $0x88] sm:$0xff] %v289_v17  ;;  %v291_v18 = vld [vmem:[%s1140_s28 + $0x120] sm:$0xff]  ;;  %v293_v19 = vld [vmem:[%s1140_s28 + $0x130] sm:$0xff] }
  0x1f   : > { %v295_v20 = vld [vmem:[%s1140_s28 + $0x140] sm:$0xff]  ;;  %292 = vst [vmem:[%s1145_s29 + $0x90] sm:$0xff] %v291_v18  ;;  %294 = vst [vmem:[%s1145_s29 + $0x98] sm:$0xff] %v293_v19  ;;  %v297_v21 = vld [vmem:[%s1140_s28 + $0x150] sm:$0xff] }
  0x20   : > { %296 = vst [vmem:[%s1145_s29 + $0xa0] sm:$0xff] %v295_v20  ;;  %v299_v22 = vld [vmem:[%s1140_s28 + $0x160] sm:$0xff]  ;;  %v301_v23 = vld [vmem:[%s1140_s28 + $0x170] sm:$0xff]  ;;  %298 = vst [vmem:[%s1145_s29 + $0xa8] sm:$0xff] %v297_v21 }
  0x21   : > { %300 = vst [vmem:[%s1145_s29 + $0xb0] sm:$0xff] %v299_v22  ;;  %302 = vst [vmem:[%s1145_s29 + $0xb8] sm:$0xff] %v301_v23  ;;  %v303_v24 = vld [vmem:[%s1140_s28 + $0x180] sm:$0xff]  ;;  %v305_v25 = vld [vmem:[%s1140_s28 + $0x190] sm:$0xff] }
  0x22   : > { %v307_v26 = vld [vmem:[%s1140_s28 + $0x1a0] sm:$0xff]  ;;  %304 = vst [vmem:[%s1145_s29 + $0xc0] sm:$0xff] %v303_v24  ;;  %306 = vst [vmem:[%s1145_s29 + $0xc8] sm:$0xff] %v305_v25  ;;  %v309_v27 = vld [vmem:[%s1140_s28 + $0x1b0] sm:$0xff] }
  0x23   : > { %308 = vst [vmem:[%s1145_s29 + $0xd0] sm:$0xff] %v307_v26  ;;  %v311_v28 = vld [vmem:[%s1140_s28 + $0x1c0] sm:$0xff]  ;;  %v313_v29 = vld [vmem:[%s1140_s28 + $0x1d0] sm:$0xff]  ;;  %310 = vst [vmem:[%s1145_s29 + $0xd8] sm:$0xff] %v309_v27 }
  0x24   : > { %312 = vst [vmem:[%s1145_s29 + $0xe0] sm:$0xff] %v311_v28  ;;  %314 = vst [vmem:[%s1145_s29 + $0xe8] sm:$0xff] %v313_v29  ;;  %v315_v30 = vld [vmem:[%s1140_s28 + $0x1e0] sm:$0xff]  ;;  %v317_v31 = vld [vmem:[%s1140_s28 + $0x1f0] sm:$0xff] }
  0x25   : > { %316 = vst [vmem:[%s1145_s29 + $0xf0] sm:$0xff] %v315_v30  ;;  %318 = vst [vmem:[%s1145_s29 + $0xf8] sm:$0xff] %v317_v31 }
  0x26 PF: > { %p851_p8 = scmp.ge.s32.totalorder %s1070_s16, 1  ;;  %p331_p9 = scmp.lt.s32.totalorder %s1070_s16, 3 }
  0x28   : > { %p332_p10 = pnand %p851_p8, %p331_p9 }
  0x29   : > { %s338_s30 = sand.u32 (!%p332_p10), 1, %s1054_s12   ;;  %v1028_v32 = vld [vmem:[%s1286_s0 + $0x4] ss:$8 sps:$4 sm:$0xff] (!%p332_p10)   ;;  %v1031_v33 = vld [vmem:[%s1286_s0 + $0x14] ss:$8 sps:$4 sm:$0xff] (!%p332_p10)   ;;  %s854_s20 = sshll.u32 (!%p332_p10), %s1062_s14, 1  ;;  %v423_v4 = vlaneseq (!%p332_p10) }
  0x2a   : > { %335 = sbr.rel (%p332_p10) target bundleno = 337 (0x151), region = 66  ;;  %s852_s4 = sshll.u32 (!%p332_p10), %s338_s30, 8  ;;  %645 = vmatprep.mubr.bf16.mxu0 (!%p332_p10), %v1028_v32  ;;  %655 = vmatprep.mubr.bf16.mxu1 (!%p332_p10), %v1031_v33  ;;  %v1026_v2 = vld [vmem:[%s1286_s0] ss:$8 sps:$4 sm:$0xff] (!%p332_p10)   ;;  %v1029_v3 = vld [vmem:[%s1286_s0 + $0x10] ss:$8 sps:$4 sm:$0xff] (!%p332_p10)  }
  0x2b   : > { %s1219_s9 = scalar_lea.vmem (!%p332_p10), [#allocation2], %s852_s4  ;;  %p379_p11 = scmp.lt.s32.totalorder (!%p332_p10), %s854_s20, 3  ;;  %v424_v5 = vshrl.u32 (!%p332_p10), %v423_v4, 7 }
  0x2c   : > { %v978_v34 = vld [vmem:[%s1219_s9 + $0x4] ss:$8 sps:$4 sm:$0xff] (!%p332_p10)   ;;  %v980_v35 = vld [vmem:[%s1219_s9] ss:$8 sps:$4 sm:$0xff] (!%p332_p10)   ;;  %v981_v36 = vld [vmem:[%s1219_s9 + $0x14] ss:$8 sps:$4 sm:$0xff] (!%p332_p10)  }
  0x2d   : > { %613 = vmatprep.subr.bf16.mxu0 (!%p332_p10), %v978_v34  ;;  %906 = vmatprep.subr.bf16.mxu1 (!%p332_p10), %v978_v34  ;;  %v983_v37 = vld [vmem:[%s1219_s9 + $0x10] ss:$8 sps:$4 sm:$0xff] (!%p332_p10)   ;;  %v984_v38 = vld [vmem:[%s1219_s9 + $0x24] ss:$8 sps:$4 sm:$0xff] (!%p332_p10)   ;;  %v986_v39 = vld [vmem:[%s1219_s9 + $0x20] ss:$8 sps:$4 sm:$0xff] (!%p332_p10)  }
  0x2e   : > { %614 = vmatpush1.bf16.msra.mxu0 (!%p332_p10), %v980_v35  ;;  %922 = vmatpush1.bf16.msra.mxu1 (!%p332_p10), %v980_v35  ;;  %v987_v40 = vld [vmem:[%s1219_s9 + $0x34] ss:$8 sps:$4 sm:$0xff] (!%p332_p10)   ;;  %v989_v41 = vld [vmem:[%s1219_s9 + $0x30] ss:$8 sps:$4 sm:$0xff] (!%p332_p10)   ;;  %v990_v42 = vld [vmem:[%s1219_s9 + $0x44] ss:$8 sps:$4 sm:$0xff] (!%p332_p10)  }
  0x2f   : > { %615 = vmatprep.subr.bf16.mxu0 (!%p332_p10), %v981_v36  ;;  %907 = vmatprep.subr.bf16.mxu1 (!%p332_p10), %v981_v36  ;;  %v992_v43 = vld [vmem:[%s1219_s9 + $0x40] ss:$8 sps:$4 sm:$0xff] (!%p332_p10)   ;;  %v993_v44 = vld [vmem:[%s1219_s9 + $0x54] ss:$8 sps:$4 sm:$0xff] (!%p332_p10)   ;;  %v995_v45 = vld [vmem:[%s1219_s9 + $0x50] ss:$8 sps:$4 sm:$0xff] (!%p332_p10)  }
  0x30   : > { %v996_v46 = vld [vmem:[%s1219_s9 + $0x64] ss:$8 sps:$4 sm:$0xff] (!%p332_p10)   ;;  %v998_v47 = vld [vmem:[%s1219_s9 + $0x60] ss:$8 sps:$4 sm:$0xff] (!%p332_p10)   ;;  %v999_v48 = vld [vmem:[%s1219_s9 + $0x74] ss:$8 sps:$4 sm:$0xff] (!%p332_p10)  }
  0x31   : > { %v1001_v49 = vld [vmem:[%s1219_s9 + $0x70] ss:$8 sps:$4 sm:$0xff]   ;;  %v1002_v50 = vld [vmem:[%s1219_s9 + $0x84] ss:$8 sps:$4 sm:$0xff]   ;;  %v1004_v51 = vld [vmem:[%s1219_s9 + $0x80] ss:$8 sps:$4 sm:$0xff]  }
  0x32   : > { %616 = vmatpush1.bf16.msra.mxu0 %v983_v37  ;;  %923 = vmatpush1.bf16.msra.mxu1 %v983_v37  ;;  %v1005_v52 = vld [vmem:[%s1219_s9 + $0x94] ss:$8 sps:$4 sm:$0xff]   ;;  %v1007_v53 = vld [vmem:[%s1219_s9 + $0x90] ss:$8 sps:$4 sm:$0xff]   ;;  %v1008_v54 = vld [vmem:[%s1219_s9 + $0xa4] ss:$8 sps:$4 sm:$0xff]  }
  0x33   : > { %617 = vmatprep.subr.bf16.mxu0 %v984_v38  ;;  %908 = vmatprep.subr.bf16.mxu1 %v984_v38  ;;  %v1010_v55 = vld [vmem:[%s1219_s9 + $0xa0] ss:$8 sps:$4 sm:$0xff]   ;;  %v1011_v56 = vld [vmem:[%s1219_s9 + $0xb4] ss:$8 sps:$4 sm:$0xff]   ;;  %v1013_v57 = vld [vmem:[%s1219_s9 + $0xb0] ss:$8 sps:$4 sm:$0xff]  }
  0x34   : > { %v1014_v58 = vld [vmem:[%s1219_s9 + $0xc4] ss:$8 sps:$4 sm:$0xff]   ;;  %v1016_v59 = vld [vmem:[%s1219_s9 + $0xc0] ss:$8 sps:$4 sm:$0xff]   ;;  %v1017_v60 = vld [vmem:[%s1219_s9 + $0xd4] ss:$8 sps:$4 sm:$0xff]  }
  0x35   : > { %v1019_v61 = vld [vmem:[%s1219_s9 + $0xd0] ss:$8 sps:$4 sm:$0xff]   ;;  %v1020_v62 = vld [vmem:[%s1219_s9 + $0xe4] ss:$8 sps:$4 sm:$0xff]   ;;  %v1022_v63 = vld [vmem:[%s1219_s9 + $0xe0] ss:$8 sps:$4 sm:$0xff]  }
  0x36   : > { %618 = vmatpush1.bf16.msra.mxu0 %v986_v39  ;;  %924 = vmatpush1.bf16.msra.mxu1 %v986_v39  ;;  %v1023_v0 = vld [vmem:[%s1219_s9 + $0xf4] ss:$8 sps:$4 sm:$0xff]   ;;  %v1025_v1 = vld [vmem:[%s1219_s9 + $0xf0] ss:$8 sps:$4 sm:$0xff]   ;;  %s1298_s20 = smov (!%p379_p11, %s854_s20), 3  ;;  %v425_v6 = vsub.s32 0, %v424_v5 }
  0x37   : > { %619 = vmatprep.subr.bf16.mxu0 %v987_v40  ;;  %909 = vmatprep.subr.bf16.mxu1 %v987_v40  ;;  %s381_s25 = scalar_lea.vmem %s1288_s2, %s1298_s20  ;;  %v429_v8 = vsub.s32 1, %v424_v5  ;;  %s853_s26 = sshll.u32 %s338_s30, 5 }
  0x38   : > { %v421_v7 = vld [vmem:[%s381_s25] sm:$0x3]  ;;  %s369_s27 = scalar_lea.vmem [#allocation3], %s853_s26  ;;  %s905_s12 = sshll.u32 (%p1127_p6), %s1062_s14, 3 }
  0x39   : > { %v426_v9 = vrot.slane %v421_v7, %v425_v6  ;;  %v430_v10 = vrot.slane %v421_v7, %v429_v8  ;;  %s706_s30 = scalar_lea.vmem (%p1127_p6), %s1289_s3, %s905_s12 }
  0x3a   : > { %620 = vmatpush1.bf16.msra.mxu0 %v989_v41  ;;  %925 = vmatpush1.bf16.msra.mxu1 %v989_v41 }
  0x3b   : > { %621 = vmatprep.subr.bf16.mxu0 %v990_v42  ;;  %910 = vmatprep.subr.bf16.mxu1 %v990_v42 }
  0x3e   : > { %622 = vmatpush1.bf16.msra.mxu0 %v992_v43  ;;  %926 = vmatpush1.bf16.msra.mxu1 %v992_v43 }
  0x3f   : > { %623 = vmatprep.subr.bf16.mxu0 %v993_v44  ;;  %911 = vmatprep.subr.bf16.mxu1 %v993_v44 }
  0x42   : > { %624 = vmatpush1.bf16.msra.mxu0 %v995_v45  ;;  %927 = vmatpush1.bf16.msra.mxu1 %v995_v45 }
  0x43   : > { %625 = vmatprep.subr.bf16.mxu0 %v996_v46  ;;  %912 = vmatprep.subr.bf16.mxu1 %v996_v46 }
  0x46   : > { %626 = vmatpush1.bf16.msra.mxu0 %v998_v47  ;;  %928 = vmatpush1.bf16.msra.mxu1 %v998_v47 }
  0x47   : > { %627 = vmatprep.subr.bf16.mxu0 %v999_v48  ;;  %913 = vmatprep.subr.bf16.mxu1 %v999_v48 }
  0x4a   : > { %628 = vmatpush1.bf16.msra.mxu0 %v1001_v49  ;;  %929 = vmatpush1.bf16.msra.mxu1 %v1001_v49 }
  0x4b   : > { %629 = vmatprep.subr.bf16.mxu0 %v1002_v50  ;;  %914 = vmatprep.subr.bf16.mxu1 %v1002_v50 }
  0x4e   : > { %630 = vmatpush1.bf16.msra.mxu0 %v1004_v51  ;;  %930 = vmatpush1.bf16.msra.mxu1 %v1004_v51 }
  0x4f   : > { %631 = vmatprep.subr.bf16.mxu0 %v1005_v52  ;;  %915 = vmatprep.subr.bf16.mxu1 %v1005_v52 }
  0x52   : > { %632 = vmatpush1.bf16.msra.mxu0 %v1007_v53  ;;  %931 = vmatpush1.bf16.msra.mxu1 %v1007_v53 }
  0x53   : > { %633 = vmatprep.subr.bf16.mxu0 %v1008_v54  ;;  %916 = vmatprep.subr.bf16.mxu1 %v1008_v54 }
  0x56   : > { %634 = vmatpush1.bf16.msra.mxu0 %v1010_v55  ;;  %932 = vmatpush1.bf16.msra.mxu1 %v1010_v55 }
  0x57   : > { %635 = vmatprep.subr.bf16.mxu0 %v1011_v56  ;;  %917 = vmatprep.subr.bf16.mxu1 %v1011_v56 }
  0x5a   : > { %636 = vmatpush1.bf16.msra.mxu0 %v1013_v57  ;;  %933 = vmatpush1.bf16.msra.mxu1 %v1013_v57 }
  0x5b   : > { %637 = vmatprep.subr.bf16.mxu0 %v1014_v58  ;;  %918 = vmatprep.subr.bf16.mxu1 %v1014_v58 }
  0x5e   : > { %638 = vmatpush1.bf16.msra.mxu0 %v1016_v59  ;;  %934 = vmatpush1.bf16.msra.mxu1 %v1016_v59 }
  0x5f   : > { %639 = vmatprep.subr.bf16.mxu0 %v1017_v60  ;;  %919 = vmatprep.subr.bf16.mxu1 %v1017_v60 }
  0x62   : > { %640 = vmatpush1.bf16.msra.mxu0 %v1019_v61  ;;  %935 = vmatpush1.bf16.msra.mxu1 %v1019_v61 }
  0x63   : > { %641 = vmatprep.subr.bf16.mxu0 %v1020_v62  ;;  %920 = vmatprep.subr.bf16.mxu1 %v1020_v62 }
  0x66   : > { %642 = vmatpush1.bf16.msra.mxu0 %v1022_v63  ;;  %936 = vmatpush1.bf16.msra.mxu1 %v1022_v63 }
  0x67   : > { %643 = vmatprep.subr.bf16.mxu0 %v1023_v0  ;;  %921 = vmatprep.subr.bf16.mxu1 %v1023_v0 }
  0x6a   : > { %644 = vmatpush1.bf16.msra.mxu0 %v1025_v1  ;;  %937 = vmatpush1.bf16.msra.mxu1 %v1025_v1 }
  0x6d   : > { %646 = vmatmul.mubr.bf16.vlgmr.msra.gmra.mrb[0].mxu0 %v1026_v2  ;;  %656 = vmatmul.mubr.bf16.vlgmr.msra.gmra.mrb[0].mxu1 %v1029_v3 }
 0x140   : > { %v647_v11 = vpop.f32.mrb[0].mxu0  ;;  %v657_v12 = vpop.f32.mrb[0].mxu1 }
 0x141   : > { %v648_v13 = vadd.f32 %v647_v11, %v426_v9  ;;  %v658_v14 = vadd.f32 %v657_v12, %v426_v9  ;;  %v649_v15 = vpop.f32.mrb[1].mxu0  ;;  %v659_v16 = vpop.f32.mrb[1].mxu1 }
 0x142   : > { %v650_v17 = vadd.f32 %v649_v15, %v430_v10  ;;  %v660_v18 = vadd.f32 %v659_v16, %v430_v10  ;;  %v651_v19 = vpop.f32.mrb[2].mxu0  ;;  %v661_v20 = vpop.f32.mrb[2].mxu1  ;;  %700 = sbr.rel (!%p1127_p6) target bundleno = 337 (0x151), region = 74 }
 0x143   : > { %v652_v21 = vadd.f32 %v651_v19, %v426_v9  ;;  %v662_v22 = vadd.f32 %v661_v20, %v426_v9  ;;  %v653_v23 = vpop.f32.mrb[3].mxu0  ;;  %v663_v24 = vpop.f32.mrb[3].mxu1 }
 0x144   : > { %v901_v25 = vpack.c.bf16 %v650_v17, %v648_v13  ;;  %v903_v26 = vpack.c.bf16 %v660_v18, %v658_v14  ;;  %v654_v27 = vadd.f32 %v653_v23, %v430_v10  ;;  %v664_v28 = vadd.f32 %v663_v24, %v430_v10 }
 0x146   : > { %690 = vst [vmem:[%s369_s27] sm:$0xff] %v901_v25  ;;  %692 = vst [vmem:[%s369_s27 + $0x10] sm:$0xff] %v903_v26  ;;  %v902_v29 = vpack.c.bf16 %v654_v27, %v652_v21  ;;  %v904_v30 = vpack.c.bf16 %v664_v28, %v662_v22 }
 0x148   : > { %691 = vst [vmem:[%s369_s27 + $0x8] sm:$0xff] %v902_v29  ;;  %693 = vst [vmem:[%s369_s27 + $0x18] sm:$0xff] %v904_v30 }
 0x14d   : > { %v740_v31 = vld [vmem:[%s369_s27] sm:$0xff]  ;;  %v744_v33 = vld [vmem:[%s369_s27 + $0x10] sm:$0xff] }
 0x14e   : > { %741 = vst [vmem:[%s706_s30] sm:$0xff] %v740_v31  ;;  %745 = vst [vmem:[%s706_s30 + $0x20] sm:$0xff] %v744_v33 }
 0x14f   : > { %v742_v32 = vld [vmem:[%s369_s27 + $0x8] sm:$0xff]  ;;  %v746_v34 = vld [vmem:[%s369_s27 + $0x18] sm:$0xff] }
 0x150   : > { %743 = vst [vmem:[%s706_s30 + $0x10] sm:$0xff] %v742_v32  ;;  %747 = vst [vmem:[%s706_s30 + $0x30] sm:$0xff] %v746_v34 }
 0x151 PF: > { %s13_s16 = sadd.s32 1, %s1070_s16   ;;  %s1291_s12 = smov %s1058_s13 }
 0x152   : > { %p10_p12 = scmp.ge.s32.totalorder %s13_s16, 4   ;;  %s1292_s13 = smov %s1132_s22 }
 0x153   : > { %s1293_s14 = smov %s1066_s15  ;;  %s1294_s15 = smov %s1296_s17 }
 0x154   :  { %12 = sbr.rel (!%p10_p12) target bundleno = 3 (0x3), region = 149 }

// kernel: fwd.48
= control target key start
LH: loop header
LB: loop body
LE: loop exit
PB: predicated region body
PF: predicated region fallthrough
CT: control target
= control target key end

     0   :  { %v64_v48 = vlaneseq  ;;  %s1010_s1 = inlined_call_operand.vmem [shape: bf16[256,256], index: 1, kind: input, shape index: {}]   ;;  %s1011_s0 = inlined_call_operand.vmem [shape: bf16[128,256], index: 0, kind: input, shape index: {}]   ;;  %s1012_s2 = inlined_call_operand.vmem [shape: f32[1,256], index: 2, kind: input, shape index: {}]   ;;  %s1013_s3 = inlined_call_operand.vmem [shape: bf16[128,256], index: 3, kind: output, shape index: {}]  }
   0x1   :  { %v687_v0 = vld [vmem:[%s1010_s1 + $0x4] ss:$8 sps:$4 sm:$0xff]   ;;  %v689_v1 = vld [vmem:[%s1010_s1] ss:$8 sps:$4 sm:$0xff]   ;;  %v690_v2 = vld [vmem:[%s1010_s1 + $0x14] ss:$8 sps:$4 sm:$0xff]  }
   0x2   :  { %314 = vmatprep.subr.bf16.mxu0 %v687_v0  ;;  %655 = vmatprep.subr.bf16.mxu1 %v687_v0  ;;  %v692_v3 = vld [vmem:[%s1010_s1 + $0x10] ss:$8 sps:$4 sm:$0xff]   ;;  %v693_v4 = vld [vmem:[%s1010_s1 + $0x24] ss:$8 sps:$4 sm:$0xff]   ;;  %v695_v5 = vld [vmem:[%s1010_s1 + $0x20] ss:$8 sps:$4 sm:$0xff]  }
   0x3   :  { %315 = vmatpush1.bf16.msra.mxu0 %v689_v1  ;;  %671 = vmatpush1.bf16.msra.mxu1 %v689_v1  ;;  %v696_v6 = vld [vmem:[%s1010_s1 + $0x34] ss:$8 sps:$4 sm:$0xff]   ;;  %v698_v7 = vld [vmem:[%s1010_s1 + $0x30] ss:$8 sps:$4 sm:$0xff]   ;;  %v699_v8 = vld [vmem:[%s1010_s1 + $0x44] ss:$8 sps:$4 sm:$0xff]  }
   0x4   :  { %316 = vmatprep.subr.bf16.mxu0 %v690_v2  ;;  %656 = vmatprep.subr.bf16.mxu1 %v690_v2  ;;  %v701_v9 = vld [vmem:[%s1010_s1 + $0x40] ss:$8 sps:$4 sm:$0xff]   ;;  %v702_v10 = vld [vmem:[%s1010_s1 + $0x54] ss:$8 sps:$4 sm:$0xff]   ;;  %v704_v11 = vld [vmem:[%s1010_s1 + $0x50] ss:$8 sps:$4 sm:$0xff]  }
   0x5   :  { %v705_v12 = vld [vmem:[%s1010_s1 + $0x64] ss:$8 sps:$4 sm:$0xff]   ;;  %v707_v14 = vld [vmem:[%s1010_s1 + $0x60] ss:$8 sps:$4 sm:$0xff]   ;;  %v708_v16 = vld [vmem:[%s1010_s1 + $0x74] ss:$8 sps:$4 sm:$0xff]  }
   0x6   :  { %v737_v13 = vld [vmem:[%s1011_s0 + $0x4] ss:$8 sps:$4 sm:$0xff]   ;;  %v710_v17 = vld [vmem:[%s1010_s1 + $0x70] ss:$8 sps:$4 sm:$0xff]   ;;  %v713_v19 = vld [vmem:[%s1010_s1 + $0x80] ss:$8 sps:$4 sm:$0xff]  }
   0x7   :  { %317 = vmatpush1.bf16.msra.mxu0 %v692_v3  ;;  %672 = vmatpush1.bf16.msra.mxu1 %v692_v3  ;;  %v740_v15 = vld [vmem:[%s1011_s0 + $0x44] ss:$8 sps:$4 sm:$0xff]   ;;  %v714_v20 = vld [vmem:[%s1010_s1 + $0x94] ss:$8 sps:$4 sm:$0xff]   ;;  %v716_v21 = vld [vmem:[%s1010_s1 + $0x90] ss:$8 sps:$4 sm:$0xff]  }
   0x8   :  { %318 = vmatprep.subr.bf16.mxu0 %v693_v4  ;;  %657 = vmatprep.subr.bf16.mxu1 %v693_v4  ;;  %v711_v18 = vld [vmem:[%s1010_s1 + $0x84] ss:$8 sps:$4 sm:$0xff]   ;;  %v719_v23 = vld [vmem:[%s1010_s1 + $0xa0] ss:$8 sps:$4 sm:$0xff]   ;;  %v720_v24 = vld [vmem:[%s1010_s1 + $0xb4] ss:$8 sps:$4 sm:$0xff]  }
   0x9   :  { %346 = vmatprep.mubr.bf16.mxu0 %v737_v13  ;;  %386 = vmatprep.mubr.bf16.mxu1 %v740_v15  ;;  %v717_v22 = vld [vmem:[%s1010_s1 + $0xa4] ss:$8 sps:$4 sm:$0xff]   ;;  %v722_v25 = vld [vmem:[%s1010_s1 + $0xb0] ss:$8 sps:$4 sm:$0xff]   ;;  %v725_v27 = vld [vmem:[%s1010_s1 + $0xc0] ss:$8 sps:$4 sm:$0xff]  }
   0xa   :  { %v723_v26 = vld [vmem:[%s1010_s1 + $0xc4] ss:$8 sps:$4 sm:$0xff]   ;;  %v726_v28 = vld [vmem:[%s1010_s1 + $0xd4] ss:$8 sps:$4 sm:$0xff]   ;;  %v728_v29 = vld [vmem:[%s1010_s1 + $0xd0] ss:$8 sps:$4 sm:$0xff]  }
   0xb   :  { %319 = vmatpush1.bf16.msra.mxu0 %v695_v5  ;;  %673 = vmatpush1.bf16.msra.mxu1 %v695_v5  ;;  %v729_v30 = vld [vmem:[%s1010_s1 + $0xe4] ss:$8 sps:$4 sm:$0xff]   ;;  %v731_v31 = vld [vmem:[%s1010_s1 + $0xe0] ss:$8 sps:$4 sm:$0xff]   ;;  %v732_v32 = vld [vmem:[%s1010_s1 + $0xf4] ss:$8 sps:$4 sm:$0xff]  }
   0xc   :  { %320 = vmatprep.subr.bf16.mxu0 %v696_v6  ;;  %658 = vmatprep.subr.bf16.mxu1 %v696_v6  ;;  %v734_v33 = vld [vmem:[%s1010_s1 + $0xf0] ss:$8 sps:$4 sm:$0xff]   ;;  %v735_v34 = vld [vmem:[%s1011_s0] ss:$8 sps:$4 sm:$0xff]   ;;  %v741_v36 = vld [vmem:[%s1011_s0 + $0x14] ss:$8 sps:$4 sm:$0xff]  }
   0xd   :  { %v738_v35 = vld [vmem:[%s1011_s0 + $0x40] ss:$8 sps:$4 sm:$0xff]   ;;  %v743_v37 = vld [vmem:[%s1011_s0 + $0x54] ss:$8 sps:$4 sm:$0xff]   ;;  %v745_v38 = vld [vmem:[%s1011_s0 + $0x10] ss:$8 sps:$4 sm:$0xff]  }
   0xe   :  { %v746_v39 = vld [vmem:[%s1011_s0 + $0x50] ss:$8 sps:$4 sm:$0xff]   ;;  %v747_v40 = vld [vmem:[%s1011_s0 + $0x24] ss:$8 sps:$4 sm:$0xff]   ;;  %v751_v42 = vld [vmem:[%s1011_s0 + $0x20] ss:$8 sps:$4 sm:$0xff]  }
   0xf   :  { %321 = vmatpush1.bf16.msra.mxu0 %v698_v7  ;;  %674 = vmatpush1.bf16.msra.mxu1 %v698_v7  ;;  %v749_v41 = vld [vmem:[%s1011_s0 + $0x64] ss:$8 sps:$4 sm:$0xff]   ;;  %v752_v43 = vld [vmem:[%s1011_s0 + $0x60] ss:$8 sps:$4 sm:$0xff]   ;;  %v753_v44 = vld [vmem:[%s1011_s0 + $0x34] ss:$8 sps:$4 sm:$0xff]  }
  0x10   :  { %322 = vmatprep.subr.bf16.mxu0 %v699_v8  ;;  %659 = vmatprep.subr.bf16.mxu1 %v699_v8  ;;  %v755_v45 = vld [vmem:[%s1011_s0 + $0x74] ss:$8 sps:$4 sm:$0xff]   ;;  %v757_v46 = vld [vmem:[%s1011_s0 + $0x30] ss:$8 sps:$4 sm:$0xff]   ;;  %v65_v49 = vshrl.u32 %v64_v48, 7 }
  0x11   :  { %v758_v47 = vld [vmem:[%s1011_s0 + $0x70] ss:$8 sps:$4 sm:$0xff]   ;;  %v62_v51 = vld [vmem:[%s1012_s2] sm:$0x3] }
  0x12   :  { %v66_v50 = vsub.s32 0, %v65_v49  ;;  %v70_v52 = vsub.s32 1, %v65_v49 }
  0x13   :  { %323 = vmatpush1.bf16.msra.mxu0 %v701_v9  ;;  %675 = vmatpush1.bf16.msra.mxu1 %v701_v9 }
  0x14   :  { %324 = vmatprep.subr.bf16.mxu0 %v702_v10  ;;  %660 = vmatprep.subr.bf16.mxu1 %v702_v10  ;;  %v926_v53 = vrot.slane %v62_v51, %v66_v50  ;;  %v928_v54 = vrot.slane %v62_v51, %v70_v52 }
  0x17   :  { %325 = vmatpush1.bf16.msra.mxu0 %v704_v11  ;;  %676 = vmatpush1.bf16.msra.mxu1 %v704_v11 }
  0x18   :  { %326 = vmatprep.subr.bf16.mxu0 %v705_v12  ;;  %661 = vmatprep.subr.bf16.mxu1 %v705_v12 }
  0x1b   :  { %327 = vmatpush1.bf16.msra.mxu0 %v707_v14  ;;  %677 = vmatpush1.bf16.msra.mxu1 %v707_v14 }
  0x1c   :  { %328 = vmatprep.subr.bf16.mxu0 %v708_v16  ;;  %662 = vmatprep.subr.bf16.mxu1 %v708_v16 }
  0x1f   :  { %329 = vmatpush1.bf16.msra.mxu0 %v710_v17  ;;  %678 = vmatpush1.bf16.msra.mxu1 %v710_v17 }
  0x20   :  { %330 = vmatprep.subr.bf16.mxu0 %v711_v18  ;;  %663 = vmatprep.subr.bf16.mxu1 %v711_v18 }
  0x23   :  { %331 = vmatpush1.bf16.msra.mxu0 %v713_v19  ;;  %679 = vmatpush1.bf16.msra.mxu1 %v713_v19 }
  0x24   :  { %332 = vmatprep.subr.bf16.mxu0 %v714_v20  ;;  %664 = vmatprep.subr.bf16.mxu1 %v714_v20 }
  0x27   :  { %333 = vmatpush1.bf16.msra.mxu0 %v716_v21  ;;  %680 = vmatpush1.bf16.msra.mxu1 %v716_v21 }
  0x28   :  { %334 = vmatprep.subr.bf16.mxu0 %v717_v22  ;;  %665 = vmatprep.subr.bf16.mxu1 %v717_v22 }
  0x2b   :  { %335 = vmatpush1.bf16.msra.mxu0 %v719_v23  ;;  %681 = vmatpush1.bf16.msra.mxu1 %v719_v23 }
  0x2c   :  { %336 = vmatprep.subr.bf16.mxu0 %v720_v24  ;;  %666 = vmatprep.subr.bf16.mxu1 %v720_v24 }
  0x2f   :  { %337 = vmatpush1.bf16.msra.mxu0 %v722_v25  ;;  %682 = vmatpush1.bf16.msra.mxu1 %v722_v25 }
  0x30   :  { %338 = vmatprep.subr.bf16.mxu0 %v723_v26  ;;  %667 = vmatprep.subr.bf16.mxu1 %v723_v26 }
  0x33   :  { %339 = vmatpush1.bf16.msra.mxu0 %v725_v27  ;;  %683 = vmatpush1.bf16.msra.mxu1 %v725_v27 }
  0x34   :  { %340 = vmatprep.subr.bf16.mxu0 %v726_v28  ;;  %668 = vmatprep.subr.bf16.mxu1 %v726_v28 }
  0x37   :  { %341 = vmatpush1.bf16.msra.mxu0 %v728_v29  ;;  %684 = vmatpush1.bf16.msra.mxu1 %v728_v29 }
  0x38   :  { %342 = vmatprep.subr.bf16.mxu0 %v729_v30  ;;  %669 = vmatprep.subr.bf16.mxu1 %v729_v30 }
  0x3b   :  { %343 = vmatpush1.bf16.msra.mxu0 %v731_v31  ;;  %685 = vmatpush1.bf16.msra.mxu1 %v731_v31 }
  0x3c   :  { %344 = vmatprep.subr.bf16.mxu0 %v732_v32  ;;  %670 = vmatprep.subr.bf16.mxu1 %v732_v32 }
  0x3f   :  { %345 = vmatpush1.bf16.msra.mxu0 %v734_v33  ;;  %686 = vmatpush1.bf16.msra.mxu1 %v734_v33 }
  0x42   :  { %347 = vmatmul.mubr.bf16.vlgmr.msra.gmra.mrb[0].mxu0 %v735_v34  ;;  %387 = vmatmul.mubr.bf16.vlgmr.msra.gmra.mrb[0].mxu1 %v738_v35 }
  0x43   :  { %356 = vmatprep.mubr.bf16.mxu0 %v741_v36  ;;  %396 = vmatprep.mubr.bf16.mxu1 %v743_v37 }
  0x4a   :  { %357 = vmatmul.mubr.bf16.gmra.mrb[4].mxu0 %v745_v38  ;;  %397 = vmatmul.mubr.bf16.gmra.mrb[4].mxu1 %v746_v39 }
  0x4b   :  { %366 = vmatprep.mubr.bf16.mxu0 %v747_v40  ;;  %406 = vmatprep.mubr.bf16.mxu1 %v749_v41 }
  0x52   :  { %367 = vmatmul.mubr.bf16.gmra.mrb[8].mxu0 %v751_v42  ;;  %407 = vmatmul.mubr.bf16.gmra.mrb[8].mxu1 %v752_v43 }
  0x53   :  { %376 = vmatprep.mubr.bf16.mxu0 %v753_v44  ;;  %416 = vmatprep.mubr.bf16.mxu1 %v755_v45 }
  0x5a   :  { %377 = vmatmul.mubr.bf16.gmra.mrb[12].mxu0 %v757_v46  ;;  %417 = vmatmul.mubr.bf16.gmra.mrb[12].mxu1 %v758_v47 }
 0x115   :  { %v348_v55 = vpop.f32.mrb[0].mxu0  ;;  %v388_v56 = vpop.f32.mrb[0].mxu1 }
 0x116   :  { %v349_v57 = vadd.f32 %v348_v55, %v926_v53  ;;  %v389_v58 = vadd.f32 %v388_v56, %v926_v53  ;;  %v350_v59 = vpop.f32.mrb[1].mxu0  ;;  %v390_v60 = vpop.f32.mrb[1].mxu1 }
 0x117   :  { %v351_v61 = vadd.f32 %v350_v59, %v928_v54  ;;  %v391_v62 = vadd.f32 %v390_v60, %v928_v54  ;;  %v352_v63 = vpop.f32.mrb[2].mxu0  ;;  %v392_v0 = vpop.f32.mrb[2].mxu1 }
 0x118   :  { %v427_v1 = vmax.f32 %v349_v57, 0.0  ;;  %v443_v2 = vmax.f32 %v389_v58, 0.0  ;;  %v353_v3 = vadd.f32 %v352_v63, %v926_v53  ;;  %v393_v4 = vadd.f32 %v392_v0, %v926_v53  ;;  %v354_v5 = vpop.f32.mrb[3].mxu0  ;;  %v394_v6 = vpop.f32.mrb[3].mxu1 }
 0x119   :  { %v428_v7 = vmax.f32 %v351_v61, 0.0  ;;  %v444_v8 = vmax.f32 %v391_v62, 0.0  ;;  %v355_v9 = vadd.f32 %v354_v5, %v928_v54  ;;  %v395_v10 = vadd.f32 %v394_v6, %v928_v54 }
 0x11a   :  { %v429_v11 = vmax.f32 %v353_v3, 0.0  ;;  %v445_v12 = vmax.f32 %v393_v4, 0.0 }
 0x11b   :  { %v639_v13 = vpack.c.bf16 %v428_v7, %v427_v1  ;;  %v647_v14 = vpack.c.bf16 %v444_v8, %v443_v2  ;;  %v430_v15 = vmax.f32 %v355_v9, 0.0  ;;  %v446_v16 = vmax.f32 %v395_v10, 0.0 }
 0x11d   :  { %555 = vst [vmem:[%s1013_s3] sm:$0xff] %v639_v13  ;;  %563 = vst [vmem:[%s1013_s3 + $0x40] sm:$0xff] %v647_v14  ;;  %v640_v17 = vpack.c.bf16 %v430_v15, %v429_v11  ;;  %v648_v18 = vpack.c.bf16 %v446_v16, %v445_v12  ;;  %v358_v19 = vpop.f32.mrb[4].mxu0  ;;  %v398_v20 = vpop.f32.mrb[4].mxu1 }
 0x11e   :  { %v359_v21 = vadd.f32 %v358_v19, %v926_v53  ;;  %v399_v22 = vadd.f32 %v398_v20, %v926_v53  ;;  %v360_v23 = vpop.f32.mrb[5].mxu0  ;;  %v400_v24 = vpop.f32.mrb[5].mxu1 }
 0x11f   :  { %556 = vst [vmem:[%s1013_s3 + $0x8] sm:$0xff] %v640_v17  ;;  %564 = vst [vmem:[%s1013_s3 + $0x48] sm:$0xff] %v648_v18  ;;  %v361_v25 = vadd.f32 %v360_v23, %v928_v54  ;;  %v401_v26 = vadd.f32 %v400_v24, %v928_v54  ;;  %v362_v27 = vpop.f32.mrb[6].mxu0  ;;  %v402_v28 = vpop.f32.mrb[6].mxu1 }
 0x120   :  { %v431_v29 = vmax.f32 %v359_v21, 0.0  ;;  %v447_v30 = vmax.f32 %v399_v22, 0.0  ;;  %v363_v31 = vadd.f32 %v362_v27, %v926_v53  ;;  %v403_v32 = vadd.f32 %v402_v28, %v926_v53  ;;  %v364_v33 = vpop.f32.mrb[7].mxu0  ;;  %v404_v34 = vpop.f32.mrb[7].mxu1 }
 0x121   :  { %v432_v35 = vmax.f32 %v361_v25, 0.0  ;;  %v448_v36 = vmax.f32 %v401_v26, 0.0  ;;  %v365_v37 = vadd.f32 %v364_v33, %v928_v54  ;;  %v405_v38 = vadd.f32 %v404_v34, %v928_v54 }
 0x122   :  { %v433_v39 = vmax.f32 %v363_v31, 0.0  ;;  %v449_v40 = vmax.f32 %v403_v32, 0.0 }
 0x123   :  { %v641_v41 = vpack.c.bf16 %v432_v35, %v431_v29  ;;  %v649_v42 = vpack.c.bf16 %v448_v36, %v447_v30  ;;  %v434_v43 = vmax.f32 %v365_v37, 0.0  ;;  %v450_v44 = vmax.f32 %v405_v38, 0.0 }
 0x125   :  { %557 = vst [vmem:[%s1013_s3 + $0x10] sm:$0xff] %v641_v41  ;;  %565 = vst [vmem:[%s1013_s3 + $0x50] sm:$0xff] %v649_v42  ;;  %v642_v45 = vpack.c.bf16 %v434_v43, %v433_v39  ;;  %v650_v46 = vpack.c.bf16 %v450_v44, %v449_v40  ;;  %v368_v47 = vpop.f32.mrb[8].mxu0  ;;  %v408_v48 = vpop.f32.mrb[8].mxu1 }
 0x126   :  { %v369_v49 = vadd.f32 %v368_v47, %v926_v53  ;;  %v409_v50 = vadd.f32 %v408_v48, %v926_v53  ;;  %v370_v51 = vpop.f32.mrb[9].mxu0  ;;  %v410_v52 = vpop.f32.mrb[9].mxu1 }
 0x127   :  { %558 = vst [vmem:[%s1013_s3 + $0x18] sm:$0xff] %v642_v45  ;;  %566 = vst [vmem:[%s1013_s3 + $0x58] sm:$0xff] %v650_v46  ;;  %v371_v55 = vadd.f32 %v370_v51, %v928_v54  ;;  %v411_v56 = vadd.f32 %v410_v52, %v928_v54  ;;  %v372_v57 = vpop.f32.mrb[10].mxu0  ;;  %v412_v58 = vpop.f32.mrb[10].mxu1 }
 0x128   :  { %v435_v59 = vmax.f32 %v369_v49, 0.0  ;;  %v451_v60 = vmax.f32 %v409_v50, 0.0  ;;  %v373_v61 = vadd.f32 %v372_v57, %v926_v53  ;;  %v413_v62 = vadd.f32 %v412_v58, %v926_v53  ;;  %v374_v63 = vpop.f32.mrb[11].mxu0  ;;  %v414_v0 = vpop.f32.mrb[11].mxu1 }
 0x129   :  { %v436_v1 = vmax.f32 %v371_v55, 0.0  ;;  %v452_v2 = vmax.f32 %v411_v56, 0.0  ;;  %v375_v3 = vadd.f32 %v374_v63, %v928_v54  ;;  %v415_v4 = vadd.f32 %v414_v0, %v928_v54 }
 0x12a   :  { %v437_v5 = vmax.f32 %v373_v61, 0.0  ;;  %v453_v6 = vmax.f32 %v413_v62, 0.0 }
 0x12b   :  { %v643_v7 = vpack.c.bf16 %v436_v1, %v435_v59  ;;  %v651_v8 = vpack.c.bf16 %v452_v2, %v451_v60  ;;  %v438_v9 = vmax.f32 %v375_v3, 0.0  ;;  %v454_v10 = vmax.f32 %v415_v4, 0.0 }
 0x12d   :  { %559 = vst [vmem:[%s1013_s3 + $0x20] sm:$0xff] %v643_v7  ;;  %567 = vst [vmem:[%s1013_s3 + $0x60] sm:$0xff] %v651_v8  ;;  %v644_v11 = vpack.c.bf16 %v438_v9, %v437_v5  ;;  %v652_v12 = vpack.c.bf16 %v454_v10, %v453_v6  ;;  %v378_v13 = vpop.f32.mrb[12].mxu0  ;;  %v418_v14 = vpop.f32.mrb[12].mxu1 }
 0x12e   :  { %v379_v15 = vadd.f32 %v378_v13, %v926_v53  ;;  %v419_v16 = vadd.f32 %v418_v14, %v926_v53  ;;  %v380_v17 = vpop.f32.mrb[13].mxu0  ;;  %v420_v18 = vpop.f32.mrb[13].mxu1 }
 0x12f   :  { %560 = vst [vmem:[%s1013_s3 + $0x28] sm:$0xff] %v644_v11  ;;  %568 = vst [vmem:[%s1013_s3 + $0x68] sm:$0xff] %v652_v12  ;;  %v381_v19 = vadd.f32 %v380_v17, %v928_v54  ;;  %v421_v20 = vadd.f32 %v420_v18, %v928_v54  ;;  %v382_v21 = vpop.f32.mrb[14].mxu0  ;;  %v422_v22 = vpop.f32.mrb[14].mxu1 }
 0x130   :  { %v439_v23 = vmax.f32 %v379_v15, 0.0  ;;  %v455_v24 = vmax.f32 %v419_v16, 0.0  ;;  %v383_v25 = vadd.f32 %v382_v21, %v926_v53  ;;  %v423_v26 = vadd.f32 %v422_v22, %v926_v53  ;;  %v384_v27 = vpop.f32.mrb[15].mxu0  ;;  %v424_v28 = vpop.f32.mrb[15].mxu1 }
 0x131   :  { %v440_v29 = vmax.f32 %v381_v19, 0.0  ;;  %v456_v30 = vmax.f32 %v421_v20, 0.0  ;;  %v385_v31 = vadd.f32 %v384_v27, %v928_v54  ;;  %v425_v32 = vadd.f32 %v424_v28, %v928_v54 }
 0x132   :  { %v441_v33 = vmax.f32 %v383_v25, 0.0  ;;  %v457_v34 = vmax.f32 %v423_v26, 0.0 }
 0x133   :  { %v645_v35 = vpack.c.bf16 %v440_v29, %v439_v23  ;;  %v653_v36 = vpack.c.bf16 %v456_v30, %v455_v24  ;;  %v442_v37 = vmax.f32 %v385_v31, 0.0  ;;  %v458_v38 = vmax.f32 %v425_v32, 0.0 }
 0x135   :  { %561 = vst [vmem:[%s1013_s3 + $0x30] sm:$0xff] %v645_v35  ;;  %569 = vst [vmem:[%s1013_s3 + $0x70] sm:$0xff] %v653_v36  ;;  %v646_v53 = vpack.c.bf16 %v442_v37, %v441_v33  ;;  %v654_v39 = vpack.c.bf16 %v458_v38, %v457_v34 }
 0x137   :  { %562 = vst [vmem:[%s1013_s3 + $0x38] sm:$0xff] %v646_v53  ;;  %570 = vst [vmem:[%s1013_s3 + $0x78] sm:$0xff] %v654_v39 }

// kernel: fwd.49
= control target key start
LH: loop header
LB: loop body
LE: loop exit
PB: predicated region body
PF: predicated region fallthrough
CT: control target
= control target key end

     0   :  { %v572_v0 = vmov 0   ;;  %vm304_vm0 = vcmask 687104   ;;  %vm311_vm1 = vcmask 1041408   ;;  %s732_s1 = inlined_call_operand.vmem [shape: bf16[468,128], index: 1, kind: input, shape index: {}]   ;;  %s733_s0 = inlined_call_operand.vmem [shape: bf16[32,468], index: 0, kind: input, shape index: {}]   ;;  %s734_s2 = inlined_call_operand.vmem [shape: f32[1,128], index: 2, kind: input, shape index: {}]   ;;  %s735_s3 = inlined_call_operand.vmem [shape: bf16[32,128], index: 3, kind: output, shape index: {}]  }
   0x1   :  { %364 = vmatprep.subr.bf16.mxu1 %v572_v0  ;;  %v530_v1 = vld [vmem:[%s732_s1 + $0x80] sm:$0xff]   ;;  %v531_v2 = vld [vmem:[%s732_s1 + $0x88] sm:$0xff]   ;;  %v532_v5 = vld [vmem:[%s732_s1 + $0x90] sm:$0xff]  }
   0x2   :  { %365 = vmatpush1.bf16.msra.mxu1 %v530_v1  ;;  %v534_v3 = vld [vmem:[%s732_s1 + $0x40] sm:$0xff]   ;;  %v537_v6 = vld [vmem:[%s732_s1 + $0x48] sm:$0xff]   ;;  %v533_v8 = vld [vmem:[%s732_s1 + $0x98] sm:$0xff]  }
   0x3   :  { %366 = vmatprep.subr.bf16.mxu1 %v572_v0  ;;  %v535_v4 = vld [vmem:[%s732_s1] sm:$0xff]   ;;  %501 = vmatprep.subr.bf16.mxu0 %v534_v3  ;;  %v538_v7 = vld [vmem:[%s732_s1 + $0x8] sm:$0xff]   ;;  %v540_v9 = vld [vmem:[%s732_s1 + $0x50] sm:$0xff]  }
   0x4   :  { %502 = vmatpush3.bf16.msra.mxu0 %v535_v4  ;;  %v541_v10 = vld [vmem:[%s732_s1 + $0x10] sm:$0xff]   ;;  %v543_v11 = vld [vmem:[%s732_s1 + $0x58] sm:$0xff]   ;;  %v536_v12 = vld [vmem:[%s732_s1 + $0xa0] sm:$0xff]  }
   0x5   :  { %503 = vmatprep.subr.bf16.mxu0 %v537_v6  ;;  %v544_v13 = vld [vmem:[%s732_s1 + $0x18] sm:$0xff]   ;;  %v546_v14 = vld [vmem:[%s732_s1 + $0x60] sm:$0xff]   ;;  %v539_v15 = vld [vmem:[%s732_s1 + $0xa8] sm:$0xff]  }
   0x6   :  { %367 = vmatpush1.bf16.msra.mxu1 %v531_v2  ;;  %v547_v16 = vld [vmem:[%s732_s1 + $0x20] sm:$0xff]   ;;  %v549_v17 = vld [vmem:[%s732_s1 + $0x68] sm:$0xff]   ;;  %v542_v18 = vld [vmem:[%s732_s1 + $0xb0] sm:$0xff]  }
   0x7   :  { %368 = vmatprep.subr.bf16.mxu1 %v572_v0  ;;  %v550_v19 = vld [vmem:[%s732_s1 + $0x28] sm:$0xff]   ;;  %v552_v20 = vld [vmem:[%s732_s1 + $0x70] sm:$0xff]   ;;  %v545_v21 = vld [vmem:[%s732_s1 + $0xb8] sm:$0xff]  }
   0x8   :  { %504 = vmatpush3.bf16.msra.mxu0 %v538_v7  ;;  %v553_v22 = vld [vmem:[%s732_s1 + $0x30] sm:$0xff]   ;;  %v555_v23 = vld [vmem:[%s732_s1 + $0x78] sm:$0xff]   ;;  %v548_v25 = vld [vmem:[%s732_s1 + $0xc0] sm:$0xff]  }
   0x9   :  { %505 = vmatprep.subr.bf16.mxu0 %v540_v9  ;;  %v560_v24 = vld [vmem:[%s733_s0 + $0x4] ss:$16 sps:$4 sm:$0xff]   ;;  %v556_v26 = vld [vmem:[%s732_s1 + $0x38] sm:$0xff]   ;;  %v551_v28 = vld [vmem:[%s732_s1 + $0xc8] sm:$0xff]  }
   0xa   :  { %369 = vmatpush1.bf16.msra.mxu1 %v532_v5  ;;  %347 = vmatprep.mubr.bf16.mxu0 %v560_v24  ;;  %v567_v27 = vld [vmem:[%s733_s0 + $0xc] ss:$16 sps:$4 sm:$0xff]   ;;  %v558_v29 = vld [vmem:[%s733_s0] ss:$16 sps:$4 sm:$0xff]   ;;  %v563_v30 = vld [vmem:[%s733_s0 + $0x24] ss:$16 sps:$4 sm:$0xff]  }
   0xb   :  { %370 = vmatprep.subr.bf16.mxu1 %v572_v0  ;;  %480 = vmatprep.mubr.msk.bf16.mxu1 %vm304_vm0, %v567_v27  ;;  %v554_v31 = vld [vmem:[%s732_s1 + $0xd0] sm:$0xff]   ;;  %v557_v32 = vld [vmem:[%s732_s1 + $0xd8] sm:$0xff]   ;;  %v561_v34 = vld [vmem:[%s732_s1 + $0xe0] sm:$0xff]  }
   0xc   :  { %506 = vmatpush3.bf16.msra.mxu0 %v541_v10  ;;  %v568_v33 = vld [vmem:[%s733_s0 + $0x20] ss:$16 sps:$4 sm:$0xff]   ;;  %v562_v35 = vld [vmem:[%s732_s1 + $0xe8] ss:$0 sps:$4 sm:$0x33]  }
   0xd   :  { %507 = vmatprep.subr.bf16.mxu0 %v543_v11  ;;  %v313_v36 = vsel %vm311_vm1, %v562_v35, 0  ;;  %v565_v37 = vld [vmem:[%s733_s0 + $0x8] ss:$16 sps:$4 sm:$0xff]   ;;  %v569_v38 = vld [vmem:[%s733_s0 + $0x2c] ss:$16 sps:$4 sm:$0xff]  }
   0xe   :  { %371 = vmatpush1.bf16.msra.mxu1 %v533_v8  ;;  %v571_v39 = vld [vmem:[%s733_s0 + $0x28] ss:$16 sps:$4 sm:$0xff]   ;;  %v441_v52 = vld [vmem:[%s734_s2] ss:$0 sm:$0xff] }
   0xf   :  { %372 = vmatprep.subr.bf16.mxu1 %v572_v0 }
  0x10   :  { %508 = vmatpush3.bf16.msra.mxu0 %v544_v13 }
  0x11   :  { %509 = vmatprep.subr.bf16.mxu0 %v546_v14 }
  0x12   :  { %373 = vmatpush1.bf16.msra.mxu1 %v536_v12 }
  0x13   :  { %374 = vmatprep.subr.bf16.mxu1 %v572_v0 }
  0x14   :  { %510 = vmatpush3.bf16.msra.mxu0 %v547_v16 }
  0x15   :  { %511 = vmatprep.subr.bf16.mxu0 %v549_v17 }
  0x16   :  { %375 = vmatpush1.bf16.msra.mxu1 %v539_v15 }
  0x17   :  { %376 = vmatprep.subr.bf16.mxu1 %v572_v0 }
  0x18   :  { %512 = vmatpush3.bf16.msra.mxu0 %v550_v19 }
  0x19   :  { %513 = vmatprep.subr.bf16.mxu0 %v552_v20 }
  0x1a   :  { %377 = vmatpush1.bf16.msra.mxu1 %v542_v18 }
  0x1b   :  { %378 = vmatprep.subr.bf16.mxu1 %v572_v0 }
  0x1c   :  { %514 = vmatpush3.bf16.msra.mxu0 %v553_v22 }
  0x1d   :  { %515 = vmatprep.subr.bf16.mxu0 %v555_v23 }
  0x1e   :  { %379 = vmatpush1.bf16.msra.mxu1 %v545_v21 }
  0x1f   :  { %380 = vmatprep.subr.bf16.mxu1 %v572_v0 }
  0x20   :  { %516 = vmatpush3.bf16.msra.mxu0 %v556_v26 }
  0x22   :  { %381 = vmatpush1.bf16.msra.mxu1 %v548_v25 }
  0x23   :  { %382 = vmatprep.subr.bf16.mxu1 %v572_v0  ;;  %348 = vmatmul.mubr.bf16.vlgmr.msra.gmra.mrb[0].mxu0 %v558_v29 }
  0x24   :  { %355 = vmatprep.mubr.bf16.mxu0 %v563_v30 }
  0x26   :  { %383 = vmatpush1.bf16.msra.mxu1 %v551_v28 }
  0x27   :  { %384 = vmatprep.subr.bf16.mxu1 %v572_v0 }
  0x2a   :  { %385 = vmatpush1.bf16.msra.mxu1 %v554_v31 }
  0x2b   :  { %386 = vmatprep.subr.bf16.mxu1 %v572_v0  ;;  %356 = vmatmul.mubr.bf16.gmra.mrb[4].mxu0 %v568_v33 }
  0x2e   :  { %387 = vmatpush1.bf16.msra.mxu1 %v557_v32 }
  0x2f   :  { %388 = vmatprep.subr.bf16.mxu1 %v572_v0 }
  0x32   :  { %389 = vmatpush1.bf16.msra.mxu1 %v561_v34 }
  0x33   :  { %390 = vmatprep.subr.bf16.mxu1 %v572_v0 }
  0x36   :  { %391 = vmatpush1.bf16.msra.mxu1 %v313_v36 }
  0x39   :  { %397 = vmatmul.mubr.bf16.vlgmr.msra.gmra.mrb[0].mxu1 %v565_v37 }
  0x3a   :  { %481 = vmatprep.mubr.msk.bf16.mxu1 %vm304_vm0, %v569_v38 }
  0x41   :  { %405 = vmatmul.mubr.bf16.gmra.mrb[4].mxu1 %v571_v39 }
  0xf6   :  { %v517_v40 = vpop.f32.mrb[0].mxu0 }
  0xf7   :  { %v518_v41 = vpop.f32.mrb[1].mxu0 }
  0xf8   :  { %v519_v42 = vadd.f32 %v518_v41, %v517_v40  ;;  %v520_v43 = vpop.f32.mrb[2].mxu0 }
  0xf9   :  { %v521_v44 = vpop.f32.mrb[3].mxu0 }
  0xfa   :  { %v522_v45 = vadd.f32 %v521_v44, %v520_v43  ;;  %v350_v53 = vadd.f32 %v519_v42, %v441_v52 }
  0xfc   :  { %v353_v57 = vadd.f32 %v522_v45, %v441_v52 }
  0xfe   :  { %v523_v46 = vpop.f32.mrb[4].mxu0 }
  0xff   :  { %v524_v47 = vpop.f32.mrb[5].mxu0 }
 0x100   :  { %v525_v48 = vadd.f32 %v524_v47, %v523_v46  ;;  %v526_v49 = vpop.f32.mrb[6].mxu0 }
 0x101   :  { %v527_v50 = vpop.f32.mrb[7].mxu0 }
 0x102   :  { %v528_v51 = vadd.f32 %v527_v50, %v526_v49  ;;  %v358_v63 = vadd.f32 %v525_v48, %v441_v52 }
 0x104   :  { %v361_v4 = vadd.f32 %v528_v51, %v441_v52 }
 0x10c   :  { %v398_v54 = vpop.f32.mrb[0].mxu1 }
 0x10d   :  { %v399_v55 = vadd.f32 %v398_v54, %v350_v53  ;;  %v400_v56 = vpop.f32.mrb[1].mxu1 }
 0x10e   :  { %v401_v58 = vpop.f32.mrb[2].mxu1 }
 0x10f   :  { %v402_v59 = vadd.f32 %v401_v58, %v353_v57  ;;  %v403_v60 = vpop.f32.mrb[3].mxu1  ;;  %v413_v61 = vmax.f32 %v399_v55, 0.0 }
 0x111   :  { %v414_v62 = vmax.f32 %v402_v59, 0.0 }
 0x113   :  { %v493_v0 = vpack.c.bf16 %v414_v62, %v413_v61 }
 0x114   :  { %v406_v1 = vpop.f32.mrb[4].mxu1 }
 0x115   :  { %494 = vst [vmem:[%s735_s3] sm:$0xff] %v493_v0   ;;  %v407_v2 = vadd.f32 %v406_v1, %v358_v63  ;;  %v408_v3 = vpop.f32.mrb[5].mxu1 }
 0x116   :  { %v409_v5 = vpop.f32.mrb[6].mxu1 }
 0x117   :  { %v410_v6 = vadd.f32 %v409_v5, %v361_v4  ;;  %v411_v7 = vpop.f32.mrb[7].mxu1  ;;  %v415_v8 = vmax.f32 %v407_v2, 0.0 }
 0x119   :  { %v416_v9 = vmax.f32 %v410_v6, 0.0 }
 0x11b   :  { %v498_v10 = vpack.c.bf16 %v416_v9, %v415_v8 }
 0x11d   :  { %500 = vst [vmem:[%s735_s3 + $0x8] sm:$0xff] %v498_v10  }

// kernel: fwd.52
= control target key start
LH: loop header
LB: loop body
LE: loop exit
PB: predicated region body
PF: predicated region fallthrough
CT: control target
= control target key end

     0   :  { %v305_v0 = vmov 0   ;;  %vm83_vm0 = vcmask 424960   ;;  %vm196_vm1 = vcmask 420864   ;;  %s435_s1 = inlined_call_operand.vmem [shape: f32[32,1], index: 1, kind: input, shape index: {}]   ;;  %s436_s0 = inlined_call_operand.vmem [shape: bf16[9,32,52], index: 0, kind: input, shape index: {}]   ;;  %s437_s2 = inlined_call_operand.vmem [shape: bf16[32,52], index: 2, kind: output, shape index: {}]  }
   0x1   :  { %304 = vset.pattern.permute.xlu1 %v305_v0  ;;  %303 = vset.pattern.permute.xlu0 %v305_v0  ;;  %v154_v1 = vld [vmem:[%s435_s1 + $0x10] sm:$0xff]  ;;  %v152_v2 = vld [vmem:[%s435_s1] sm:$0xff]  ;;  %v155_v3 = vld [vmem:[%s435_s1 + $0x18] sm:$0xff] }
   0x2   :  { %168 = vperm.xlu1 %304, %v154_v1   ;;  %158 = vperm.xlu0 %303, %v152_v2   ;;  %v153_v4 = vld [vmem:[%s435_s1 + $0x8] sm:$0xff]  ;;  %v287_v6 = vld [vmem:[%s436_s0 + $0x18] sm:$0xff]   ;;  %v214_v7 = vld [vmem:[%s436_s0] sm:$0xff]  }
   0x3   :  { %v285_v5 = vld [vmem:[%s436_s0 + $0x8] sm:$0xff]   ;;  %v286_v8 = vld [vmem:[%s436_s0 + $0x10] sm:$0xff]   ;;  %v227_v10 = vunpack.c.l.bf16 %v287_v6  ;;  %v215_v12 = vunpack.c.l.bf16 %v214_v7  ;;  %v288_v14 = vld [vmem:[%s436_s0 + $0x20] sm:$0xff]   ;;  %v228_v21 = vunpack.c.h.bf16 %v287_v6  ;;  %v216_v25 = vunpack.c.h.bf16 %v214_v7 }
   0x4   :  { %v219_v9 = vunpack.c.l.bf16 %v285_v5  ;;  %v289_v11 = vld [vmem:[%s436_s0 + $0x28] sm:$0xff]   ;;  %v223_v13 = vunpack.c.l.bf16 %v286_v8  ;;  %v220_v16 = vunpack.c.h.bf16 %v285_v5  ;;  %v291_v17 = vld [vmem:[%s436_s0 + $0x38] sm:$0xff]   ;;  %v231_v20 = vunpack.c.l.bf16 %v288_v14  ;;  %v290_v22 = vld [vmem:[%s436_s0 + $0x30] sm:$0xff]  }
   0x5   :  { %v235_v15 = vunpack.c.l.bf16 %v289_v11  ;;  %v119_v19 = vsel %vm83_vm0, %v227_v10, 0.0  ;;  %v84_v23 = vsel %vm83_vm0, %v215_v12, 0.0  ;;  %v224_v26 = vunpack.c.h.bf16 %v286_v8  ;;  %v293_v31 = vld [vmem:[%s436_s0 + $0x48] sm:$0xff]   ;;  %v292_v33 = vld [vmem:[%s436_s0 + $0x40] sm:$0xff]   ;;  %v295_v45 = vld [vmem:[%s436_s0 + $0x58] sm:$0xff]  }
   0x6   :  { %173 = vperm.xlu1 %304, %v155_v3   ;;  %163 = vperm.xlu0 %303, %v153_v4   ;;  %v118_v18 = vsel %vm83_vm0, %v219_v9, 0.0  ;;  %v85_v24 = vsel %vm83_vm0, %v223_v13, 0.0  ;;  %v243_v27 = vunpack.c.l.bf16 %v291_v17  ;;  %v236_v30 = vunpack.c.h.bf16 %v289_v11  ;;  %v294_v46 = vld [vmem:[%s436_s0 + $0x50] sm:$0xff]   ;;  %v297_v59 = vld [vmem:[%s436_s0 + $0x68] sm:$0xff]   ;;  %v296_v60 = vld [vmem:[%s436_s0 + $0x60] sm:$0xff]  }
   0x7   :  { %v120_v28 = vadd.f32 %v119_v19, %v118_v18  ;;  %v121_v29 = vsel %vm83_vm0, %v235_v15, 0.0  ;;  %v239_v32 = vunpack.c.l.bf16 %v290_v22  ;;  %v86_v34 = vadd.f32 %v85_v24, %v84_v23  ;;  %v299_v9 = vld [vmem:[%s436_s0 + $0x78] sm:$0xff]   ;;  %v298_v11 = vld [vmem:[%s436_s0 + $0x70] sm:$0xff]   ;;  %v301_v23 = vld [vmem:[%s436_s0 + $0x88] sm:$0xff]  }
   0x8   :  { %v87_v35 = vsel %vm83_vm0, %v231_v20, 0.0  ;;  %v135_v36 = vsel %vm83_vm0, %v220_v16, 0.0  ;;  %v136_v37 = vsel %vm83_vm0, %v228_v21, 0.0  ;;  %v232_v38 = vunpack.c.h.bf16 %v288_v14 }
   0x9   :  { %v101_v39 = vsel %vm83_vm0, %v216_v25, 0.0  ;;  %v102_v40 = vsel %vm83_vm0, %v224_v26, 0.0  ;;  %v251_v41 = vunpack.c.l.bf16 %v293_v31  ;;  %v122_v42 = vadd.f32 %v121_v29, %v120_v28  ;;  %v300_v25 = vld [vmem:[%s436_s0 + $0x80] sm:$0xff]  }
   0xa   :  { %v123_v43 = vsel %vm83_vm0, %v243_v27, 0.0  ;;  %v247_v44 = vunpack.c.l.bf16 %v292_v33  ;;  %v88_v47 = vadd.f32 %v87_v35, %v86_v34  ;;  %v89_v48 = vsel %vm83_vm0, %v239_v32, 0.0 }
   0xb   :  { %v137_v49 = vadd.f32 %v136_v37, %v135_v36  ;;  %v103_v50 = vadd.f32 %v102_v40, %v101_v39  ;;  %v244_v51 = vunpack.c.h.bf16 %v291_v17  ;;  %v138_v52 = vsel %vm83_vm0, %v236_v30, 0.0 }
   0xc   :  { %v240_v53 = vunpack.c.h.bf16 %v290_v22  ;;  %v104_v54 = vsel %vm83_vm0, %v232_v38, 0.0  ;;  %v259_v55 = vunpack.c.l.bf16 %v295_v45  ;;  %v124_v56 = vadd.f32 %v123_v43, %v122_v42 }
   0xd   :  { %v125_v57 = vsel %vm83_vm0, %v251_v41, 0.0  ;;  %v255_v58 = vunpack.c.l.bf16 %v294_v46  ;;  %v90_v61 = vadd.f32 %v89_v48, %v88_v47  ;;  %v91_v62 = vsel %vm83_vm0, %v247_v44, 0.0 }
   0xe   :  { %v139_v63 = vadd.f32 %v138_v52, %v137_v49  ;;  %v105_v0 = vadd.f32 %v104_v54, %v103_v50  ;;  %v252_v1 = vunpack.c.h.bf16 %v293_v31  ;;  %v140_v2 = vsel %vm83_vm0, %v244_v51, 0.0 }
   0xf   :  { %v248_v3 = vunpack.c.h.bf16 %v292_v33  ;;  %v106_v4 = vsel %vm83_vm0, %v240_v53, 0.0  ;;  %v267_v5 = vunpack.c.l.bf16 %v297_v59  ;;  %v127_v6 = vsel %vm83_vm0, %v259_v55, 0.0 }
  0x10   :  { %v263_v7 = vunpack.c.l.bf16 %v296_v60  ;;  %v93_v8 = vsel %vm83_vm0, %v255_v58, 0.0  ;;  %v126_v10 = vadd.f32 %v125_v57, %v124_v56  ;;  %v92_v12 = vadd.f32 %v91_v62, %v90_v61 }
  0x11   :  { %v141_v13 = vadd.f32 %v140_v2, %v139_v63  ;;  %v107_v14 = vadd.f32 %v106_v4, %v105_v0  ;;  %v260_v15 = vunpack.c.h.bf16 %v295_v45  ;;  %v142_v16 = vsel %vm83_vm0, %v252_v1, 0.0 }
  0x12   :  { %v256_v17 = vunpack.c.h.bf16 %v294_v46  ;;  %v108_v18 = vsel %vm83_vm0, %v248_v3, 0.0  ;;  %v275_v19 = vunpack.c.l.bf16 %v299_v9  ;;  %v129_v20 = vsel %vm83_vm0, %v267_v5, 0.0 }
  0x13   :  { %v271_v21 = vunpack.c.l.bf16 %v298_v11  ;;  %v95_v22 = vsel %vm83_vm0, %v263_v7, 0.0  ;;  %v128_v24 = vadd.f32 %v127_v6, %v126_v10  ;;  %v94_v26 = vadd.f32 %v93_v8, %v92_v12 }
  0x14   :  { %v143_v27 = vadd.f32 %v142_v16, %v141_v13  ;;  %v109_v28 = vadd.f32 %v108_v18, %v107_v14  ;;  %v268_v29 = vunpack.c.h.bf16 %v297_v59  ;;  %v144_v30 = vsel %vm83_vm0, %v260_v15, 0.0 }
  0x15   :  { %v264_v31 = vunpack.c.h.bf16 %v296_v60  ;;  %v110_v32 = vsel %vm83_vm0, %v256_v17, 0.0  ;;  %v283_v33 = vunpack.c.l.bf16 %v301_v23  ;;  %v131_v34 = vsel %vm83_vm0, %v275_v19, 0.0 }
  0x16   :  { %v279_v35 = vunpack.c.l.bf16 %v300_v25  ;;  %v97_v36 = vsel %vm83_vm0, %v271_v21, 0.0  ;;  %v130_v37 = vadd.f32 %v129_v20, %v128_v24  ;;  %v96_v38 = vadd.f32 %v95_v22, %v94_v26 }
  0x17   :  { %v145_v39 = vadd.f32 %v144_v30, %v143_v27  ;;  %v111_v40 = vadd.f32 %v110_v32, %v109_v28  ;;  %v276_v41 = vunpack.c.h.bf16 %v299_v9  ;;  %v146_v42 = vsel %vm83_vm0, %v268_v29, 0.0 }
  0x18   :  { %v272_v43 = vunpack.c.h.bf16 %v298_v11  ;;  %v112_v44 = vsel %vm83_vm0, %v264_v31, 0.0  ;;  %v133_v45 = vsel %vm83_vm0, %v283_v33, 0.0  ;;  %v99_v46 = vsel %vm83_vm0, %v279_v35, 0.0 }
  0x19   :  { %v132_v47 = vadd.f32 %v131_v34, %v130_v37  ;;  %v98_v48 = vadd.f32 %v97_v36, %v96_v38  ;;  %v147_v49 = vadd.f32 %v146_v42, %v145_v39  ;;  %v113_v50 = vadd.f32 %v112_v44, %v111_v40 }
  0x1a   :  { %v284_v51 = vunpack.c.h.bf16 %v301_v23  ;;  %v148_v52 = vsel %vm83_vm0, %v276_v41, 0.0  ;;  %v280_v53 = vunpack.c.h.bf16 %v300_v25  ;;  %v114_v54 = vsel %vm83_vm0, %v272_v43, 0.0 }
  0x1b   :  { %v134_v55 = vadd.f32 %v133_v45, %v132_v47  ;;  %v100_v56 = vadd.f32 %v99_v46, %v98_v48  ;;  %v149_v57 = vadd.f32 %v148_v52, %v147_v49  ;;  %v115_v58 = vadd.f32 %v114_v54, %v113_v50 }
  0x1c   :  { %v150_v59 = vsel %vm83_vm0, %v284_v51, 0.0  ;;  %v116_v60 = vsel %vm83_vm0, %v280_v53, 0.0 }
  0x1d   :  { %v151_v1 = vadd.f32 %v150_v59, %v149_v57  ;;  %v117_v2 = vadd.f32 %v116_v60, %v115_v58 }
  0x81   :  { %v169_v61 = vpop.permute.xlu1 %168  ;;  %v159_v62 = vpop.permute.xlu0 %158 }
  0x82   :  { %v178_v63 = vmul.f32 %v169_v61, %v134_v55  ;;  %v176_v0 = vmul.f32 %v159_v62, %v100_v56 }
  0x84   :  { %v211_v3 = vpack.c.bf16 %v178_v63, %v178_v63  ;;  %v209_v4 = vpack.c.bf16 %v176_v0, %v176_v0 }
  0x85   :  { %v174_v5 = vpop.permute.xlu1 %173  ;;  %v164_v6 = vpop.permute.xlu0 %163 }
  0x86   :  { %199 = vst.msk [vmem:[%s437_s2 + $0x8] sm:$0xf] %vm196_vm1, %v211_v3  ;;  %197 = vst.msk [vmem:[%s437_s2] sm:$0xf] %vm196_vm1, %v209_v4  ;;  %v179_v7 = vmul.f32 %v174_v5, %v151_v1  ;;  %v177_v8 = vmul.f32 %v164_v6, %v117_v2 }
  0x88   :  { %v212_v9 = vpack.c.bf16 %v179_v7, %v179_v7  ;;  %v210_v10 = vpack.c.bf16 %v177_v8, %v177_v8 }
  0x8a   :  { %200 = vst.msk [vmem:[%s437_s2 + $0xc] sm:$0xf] %vm196_vm1, %v212_v9  ;;  %198 = vst.msk [vmem:[%s437_s2 + $0x4] sm:$0xf] %vm196_vm1, %v210_v10 }

// kernel: fwd.55
= control target key start
LH: loop header
LB: loop body
LE: loop exit
PB: predicated region body
PF: predicated region fallthrough
CT: control target
= control target key end

     0   :  { %s1179_s15 = smov 0   ;;  %s1181_s16 = smov 0   ;;  %s1372_s0 = inlined_call_operand.vmem [shape: bf16[32,208], index: 0, kind: input, shape index: {}]   ;;  %s1373_s1 = inlined_call_operand.vmem [shape: bf16[208,512], index: 1, kind: input, shape index: {}]   ;;  %s1374_s2 = inlined_call_operand.vmem [shape: f32[1,512], index: 2, kind: input, shape index: {}]   ;;  %s1375_s3 = inlined_call_operand.vmem [shape: bf16[32,512], index: 3, kind: input, shape index: {}]   ;;  %s1376_s4 = inlined_call_operand.vmem [shape: bf16[32,512], index: 4, kind: output, shape index: {}]  }
   0x1   :  { %s1183_s17 = smov 0   ;;  %s1185_s18 = smov 0  }
   0x2   :  { %s1187_s19 = smov 0  }
   0x3 LB: > { %s23_s20 = sadd.s32 1, %s1148_s18  ;;  %s939_s21 = sadd.s32 4294967295, %s1152_s19   ;;  %s1152_s19 = sphi %s1187_s19, %s14_s19   ;;  %s1148_s18 = sphi %s1185_s18, %s1382_s18   ;;  %s1144_s17 = sphi %s1183_s17, %s1381_s17   ;;  %s1140_s16 = sphi %s1181_s16, %s1380_s16   ;;  %s1136_s15 = sphi %s1179_s15, %s1379_s15  }
   0x4   : > { %p24_p0 = scmp.ge.s32.totalorder %s23_s20, 2  ;;  %p66_p1 = scmp.ne.s32.totalorder %s1140_s16, %s1136_s15 }
   0x5   : > { %p67_p2 = scmp.eq.s32.totalorder %s1152_s19, 0  ;;  %p152_p4 = scmp.eq.s32.totalorder %s939_s21, 1 }
   0x6   : > { %s1384_s20 = smov (%p24_p0, %s23_s20), 0  ;;  %s59_s24 = sadd.s32 1, %s1140_s16 }
   0x7   : > { %p1211_p3 = por %p67_p2, %p66_p1  ;;  %s56_s23 = ssub.s32 %s1148_s18, %s1384_s20 }
   0x8   : > { %p57_p5 = scmp.eq.s32.totalorder %s56_s23, 0  ;;  %p1218_p6 = por %p152_p4, %p66_p1 }
   0x9   : > { %p943_p7 = scmp.ge.s32.totalorder %s1152_s19, 2 }
   0xa   : > { %s1223_s26 = scalar_select %p57_p5, %s1140_s16, %s59_s24  }
   0xb   : > { %184 = sbr.rel (%p943_p7) target bundleno = 42 (0x2a), region = 20 }
  0x12   : > { %187 = sbr.rel (!%p1211_p3) target bundleno = 35 (0x23), region = 24  ;;  %s189_s27 = sand.u32 (%p1211_p3), 1, %s1140_s16  }
  0x13   : > { %s994_s28 = sshll.u32 (%p1211_p3), %s1148_s18, 3  ;;  %s1027_s29 = smul.u32 (%p1211_p3), 208, %s189_s27 }
  0x14   : > { %s1233_s6 = scalar_lea.vmem (%p1211_p3), %s1373_s1, %s994_s28 }
  0x15   : > { %v272_v0 = vld [vmem:[%s1233_s6] sm:$0xff] (%p1211_p3)  ;;  %v274_v1 = vld [vmem:[%s1233_s6 + $0x10] sm:$0xff] (%p1211_p3)  ;;  %s1241_s7 = scalar_lea.vmem (%p1211_p3), [#allocation2], %s1027_s29 }
  0x16   : > { %v276_v2 = vld [vmem:[%s1233_s6 + $0x20] sm:$0xff] (%p1211_p3)  ;;  %v278_v3 = vld [vmem:[%s1233_s6 + $0x30] sm:$0xff] (%p1211_p3)  ;;  %273 = vst [vmem:[%s1241_s7] sm:$0xff] (%p1211_p3), %v272_v0  ;;  %275 = vst [vmem:[%s1241_s7 + $0x8] sm:$0xff] (%p1211_p3), %v274_v1 }
  0x17   : > { %v280_v4 = vld [vmem:[%s1233_s6 + $0x40] sm:$0xff] (%p1211_p3)  ;;  %v282_v5 = vld [vmem:[%s1233_s6 + $0x50] sm:$0xff] (%p1211_p3)  ;;  %277 = vst [vmem:[%s1241_s7 + $0x10] sm:$0xff] (%p1211_p3), %v276_v2  ;;  %279 = vst [vmem:[%s1241_s7 + $0x18] sm:$0xff] (%p1211_p3), %v278_v3 }
  0x18   : > { %281 = vst [vmem:[%s1241_s7 + $0x20] sm:$0xff] (%p1211_p3), %v280_v4  ;;  %283 = vst [vmem:[%s1241_s7 + $0x28] sm:$0xff] (%p1211_p3), %v282_v5  ;;  %v284_v6 = vld [vmem:[%s1233_s6 + $0x60] sm:$0xff] (%p1211_p3)  ;;  %v286_v7 = vld [vmem:[%s1233_s6 + $0x70] sm:$0xff] (%p1211_p3) }
  0x19   : > { %v288_v8 = vld [vmem:[%s1233_s6 + $0x80] sm:$0xff]  ;;  %285 = vst [vmem:[%s1241_s7 + $0x30] sm:$0xff] %v284_v6  ;;  %287 = vst [vmem:[%s1241_s7 + $0x38] sm:$0xff] %v286_v7  ;;  %v290_v9 = vld [vmem:[%s1233_s6 + $0x90] sm:$0xff] }
  0x1a   : > { %289 = vst [vmem:[%s1241_s7 + $0x40] sm:$0xff] %v288_v8  ;;  %v292_v10 = vld [vmem:[%s1233_s6 + $0xa0] sm:$0xff]  ;;  %v294_v11 = vld [vmem:[%s1233_s6 + $0xb0] sm:$0xff]  ;;  %291 = vst [vmem:[%s1241_s7 + $0x48] sm:$0xff] %v290_v9 }
  0x1b   : > { %293 = vst [vmem:[%s1241_s7 + $0x50] sm:$0xff] %v292_v10  ;;  %295 = vst [vmem:[%s1241_s7 + $0x58] sm:$0xff] %v294_v11  ;;  %v296_v12 = vld [vmem:[%s1233_s6 + $0xc0] sm:$0xff]  ;;  %v298_v13 = vld [vmem:[%s1233_s6 + $0xd0] sm:$0xff] }
  0x1c   : > { %v300_v14 = vld [vmem:[%s1233_s6 + $0xe0] sm:$0xff]  ;;  %297 = vst [vmem:[%s1241_s7 + $0x60] sm:$0xff] %v296_v12  ;;  %299 = vst [vmem:[%s1241_s7 + $0x68] sm:$0xff] %v298_v13  ;;  %v302_v15 = vld [vmem:[%s1233_s6 + $0xf0] sm:$0xff] }
  0x1d   : > { %301 = vst [vmem:[%s1241_s7 + $0x70] sm:$0xff] %v300_v14  ;;  %v304_v16 = vld [vmem:[%s1233_s6 + $0x100] sm:$0xff]  ;;  %v306_v17 = vld [vmem:[%s1233_s6 + $0x110] sm:$0xff]  ;;  %303 = vst [vmem:[%s1241_s7 + $0x78] sm:$0xff] %v302_v15 }
  0x1e   : > { %305 = vst [vmem:[%s1241_s7 + $0x80] sm:$0xff] %v304_v16  ;;  %307 = vst [vmem:[%s1241_s7 + $0x88] sm:$0xff] %v306_v17  ;;  %v308_v18 = vld [vmem:[%s1233_s6 + $0x120] sm:$0xff]  ;;  %v310_v19 = vld [vmem:[%s1233_s6 + $0x130] sm:$0xff] }
  0x1f   : > { %v312_v20 = vld [vmem:[%s1233_s6 + $0x140] sm:$0xff]  ;;  %309 = vst [vmem:[%s1241_s7 + $0x90] sm:$0xff] %v308_v18  ;;  %311 = vst [vmem:[%s1241_s7 + $0x98] sm:$0xff] %v310_v19  ;;  %v314_v21 = vld [vmem:[%s1233_s6 + $0x150] sm:$0xff] }
  0x20   : > { %313 = vst [vmem:[%s1241_s7 + $0xa0] sm:$0xff] %v312_v20  ;;  %v316_v22 = vld [vmem:[%s1233_s6 + $0x160] sm:$0xff]  ;;  %v318_v23 = vld [vmem:[%s1233_s6 + $0x170] sm:$0xff]  ;;  %315 = vst [vmem:[%s1241_s7 + $0xa8] sm:$0xff] %v314_v21 }
  0x21   : > { %317 = vst [vmem:[%s1241_s7 + $0xb0] sm:$0xff] %v316_v22  ;;  %319 = vst [vmem:[%s1241_s7 + $0xb8] sm:$0xff] %v318_v23  ;;  %v320_v24 = vld [vmem:[%s1233_s6 + $0x180] sm:$0xff]  ;;  %v322_v25 = vld [vmem:[%s1233_s6 + $0x190] sm:$0xff] }
  0x22   : > { %321 = vst [vmem:[%s1241_s7 + $0xc0] sm:$0xff] %v320_v24  ;;  %323 = vst [vmem:[%s1241_s7 + $0xc8] sm:$0xff] %v322_v25 }
  0x23 PF: > { %337 = sbr.rel (!%p1211_p3) target bundleno = 42 (0x2a), region = 66  ;;  %s339_s8 = sand.u32 (%p1211_p3), 1, %s1140_s16  }
  0x24   : > { %s995_s9 = sshll.u32 (%p1211_p3), %s1148_s18, 3  ;;  %s946_s10 = sshll.u32 (%p1211_p3), %s339_s8, 5 }
  0x25   : > { %s347_s13 = scalar_lea.vmem (%p1211_p3), %s1375_s3, %s995_s9  ;;  %s341_s14 = scalar_lea.vmem (%p1211_p3), [#allocation3], %s946_s10 }
  0x26   : > { %v381_v26 = vld [vmem:[%s347_s13] sm:$0xff] (%p1211_p3)  ;;  %v383_v27 = vld [vmem:[%s347_s13 + $0x10] sm:$0xff] (%p1211_p3) }
  0x27   : > { %v385_v28 = vld [vmem:[%s347_s13 + $0x20] sm:$0xff] (%p1211_p3)  ;;  %382 = vst [vmem:[%s341_s14] sm:$0xff] (%p1211_p3), %v381_v26  ;;  %384 = vst [vmem:[%s341_s14 + $0x8] sm:$0xff] (%p1211_p3), %v383_v27  ;;  %v387_v29 = vld [vmem:[%s347_s13 + $0x30] sm:$0xff] (%p1211_p3) }
  0x28   : > { %386 = vst [vmem:[%s341_s14 + $0x10] sm:$0xff] (%p1211_p3), %v385_v28  ;;  %388 = vst [vmem:[%s341_s14 + $0x18] sm:$0xff] (%p1211_p3), %v387_v29 }
  0x2a PF: > { %p949_p8 = scmp.ge.s32.totalorder %s1152_s19, 1  ;;  %p393_p9 = scmp.lt.s32.totalorder %s1152_s19, 3 }
  0x2c   : > { %p394_p10 = pnand %p949_p8, %p393_p9 }
  0x2d   : > { %s400_s21 = sand.u32 (!%p394_p10), 1, %s1136_s15   ;;  %vm653_vm0 = vcmask (!%p394_p10), 654336   ;;  %v1110_v30 = vld [vmem:[%s1372_s0 + $0x4] ss:$8 sps:$4 sm:$0xff] (!%p394_p10)   ;;  %v1113_v31 = vld [vmem:[%s1372_s0 + $0x14] ss:$8 sps:$4 sm:$0xff] (!%p394_p10)   ;;  %v495_v60 = vlaneseq (!%p394_p10) }
  0x2e   : > { %397 = sbr.rel (%p394_p10) target bundleno = 335 (0x14f), region = 104  ;;  %983 = vmatprep.mubr.msk.bf16.mxu0 (!%p394_p10), %vm653_vm0, %v1110_v30  ;;  %984 = vmatprep.mubr.msk.bf16.mxu1 (!%p394_p10), %vm653_vm0, %v1113_v31  ;;  %v1108_v58 = vld [vmem:[%s1372_s0] ss:$8 sps:$4 sm:$0xff] (!%p394_p10)   ;;  %v1111_v59 = vld [vmem:[%s1372_s0 + $0x10] ss:$8 sps:$4 sm:$0xff] (!%p394_p10)   ;;  %s952_s8 = sshll.u32 (!%p394_p10), %s1144_s17, 1 }
  0x2f   : > { %s1028_s22 = smul.u32 (!%p394_p10), 208, %s400_s21  ;;  %p454_p11 = scmp.lt.s32.totalorder (!%p394_p10), %s952_s8, 3  ;;  %v496_v61 = vshrl.u32 (!%p394_p10), %v495_v60, 7 }
  0x30   : > { %s1344_s9 = sshll.u32 (!%p394_p10), %s400_s21, 5 }
  0x31   : > { %s1307_s29 = scalar_lea.vmem (!%p394_p10), [#allocation2], %s1028_s22  ;;  %v497_v62 = vsub.s32 (!%p394_p10), 0, %v496_v61  ;;  %v501_v0 = vsub.s32 (!%p394_p10), 1, %v496_v61  ;;  %s409_s13 = scalar_lea.vmem (!%p394_p10), [#allocation3], %s1344_s9 }
  0x32   : > { %v1069_v32 = vld [vmem:[%s1307_s29 + $0x4] ss:$8 sps:$4 sm:$0xff] (!%p394_p10)   ;;  %v1071_v33 = vld [vmem:[%s1307_s29] ss:$8 sps:$4 sm:$0xff] (!%p394_p10)   ;;  %v1072_v34 = vld [vmem:[%s1307_s29 + $0x14] ss:$8 sps:$4 sm:$0xff] (!%p394_p10)  }
  0x33   : > { %660 = vmatprep.subr.bf16.mxu0 (!%p394_p10), %v1069_v32  ;;  %1001 = vmatprep.subr.bf16.mxu1 (!%p394_p10), %v1069_v32  ;;  %v1074_v35 = vld [vmem:[%s1307_s29 + $0x10] ss:$8 sps:$4 sm:$0xff] (!%p394_p10)   ;;  %v1075_v36 = vld [vmem:[%s1307_s29 + $0x24] ss:$8 sps:$4 sm:$0xff] (!%p394_p10)   ;;  %v1077_v37 = vld [vmem:[%s1307_s29 + $0x20] ss:$8 sps:$4 sm:$0xff] (!%p394_p10)  }
  0x34   : > { %661 = vmatpush1.bf16.msra.mxu0 (!%p394_p10), %v1071_v33  ;;  %1014 = vmatpush1.bf16.msra.mxu1 (!%p394_p10), %v1071_v33  ;;  %v1078_v38 = vld [vmem:[%s1307_s29 + $0x34] ss:$8 sps:$4 sm:$0xff] (!%p394_p10)   ;;  %v1080_v39 = vld [vmem:[%s1307_s29 + $0x30] ss:$8 sps:$4 sm:$0xff] (!%p394_p10)   ;;  %v1081_v40 = vld [vmem:[%s1307_s29 + $0x44] ss:$8 sps:$4 sm:$0xff] (!%p394_p10)  }
  0x35   : > { %662 = vmatprep.subr.bf16.mxu0 %v1072_v34  ;;  %1002 = vmatprep.subr.bf16.mxu1 %v1072_v34  ;;  %v1083_v41 = vld [vmem:[%s1307_s29 + $0x40] ss:$8 sps:$4 sm:$0xff]   ;;  %v1084_v42 = vld [vmem:[%s1307_s29 + $0x54] ss:$8 sps:$4 sm:$0xff]   ;;  %v1086_v43 = vld [vmem:[%s1307_s29 + $0x50] ss:$8 sps:$4 sm:$0xff]  }
  0x36   : > { %v1087_v44 = vld [vmem:[%s1307_s29 + $0x64] ss:$8 sps:$4 sm:$0xff]   ;;  %v1089_v45 = vld [vmem:[%s1307_s29 + $0x60] ss:$8 sps:$4 sm:$0xff]   ;;  %v1090_v46 = vld [vmem:[%s1307_s29 + $0x74] ss:$8 sps:$4 sm:$0xff]  }
  0x37   : > { %v1092_v47 = vld [vmem:[%s1307_s29 + $0x70] ss:$8 sps:$4 sm:$0xff]   ;;  %v1093_v48 = vld [vmem:[%s1307_s29 + $0x84] ss:$8 sps:$4 sm:$0xff]   ;;  %v1095_v49 = vld [vmem:[%s1307_s29 + $0x80] ss:$8 sps:$4 sm:$0xff]  }
  0x38   : > { %663 = vmatpush1.bf16.msra.mxu0 %v1074_v35  ;;  %1015 = vmatpush1.bf16.msra.mxu1 %v1074_v35  ;;  %v1096_v50 = vld [vmem:[%s1307_s29 + $0x94] ss:$8 sps:$4 sm:$0xff]   ;;  %v1098_v51 = vld [vmem:[%s1307_s29 + $0x90] ss:$8 sps:$4 sm:$0xff]   ;;  %v1099_v52 = vld [vmem:[%s1307_s29 + $0xa4] ss:$8 sps:$4 sm:$0xff]  }
  0x39   : > { %664 = vmatprep.subr.bf16.mxu0 %v1075_v36  ;;  %1003 = vmatprep.subr.bf16.mxu1 %v1075_v36  ;;  %v1101_v53 = vld [vmem:[%s1307_s29 + $0xa0] ss:$8 sps:$4 sm:$0xff]   ;;  %v1102_v54 = vld [vmem:[%s1307_s29 + $0xb4] ss:$8 sps:$4 sm:$0xff]   ;;  %v1104_v55 = vld [vmem:[%s1307_s29 + $0xb0] ss:$8 sps:$4 sm:$0xff]  }
  0x3a   : > { %v1105_v56 = vld [vmem:[%s1307_s29 + $0xc4] ss:$8 sps:$4 sm:$0xff]   ;;  %v1107_v57 = vld [vmem:[%s1307_s29 + $0xc0] ss:$8 sps:$4 sm:$0xff]   ;;  %s1386_s8 = smov (!%p454_p11, %s952_s8), 3  ;;  %s444_s15 = scalar_lea.vmem [#allocation4], %s1344_s9 }
  0x3b   : > { %s456_s12 = scalar_lea.vmem %s1374_s2, %s1386_s8  ;;  %v713_v1 = vld [vmem:[%s409_s13] sm:$0xff]  ;;  %v715_v2 = vld [vmem:[%s409_s13 + $0x10] sm:$0xff]  ;;  %v714_v5 = vld [vmem:[%s409_s13 + $0x8] sm:$0xff]  ;;  %s1000_s14 = sshll.u32 (%p1218_p6), %s1144_s17, 3 }
  0x3c   : > { %665 = vmatpush1.bf16.msra.mxu0 %v1077_v37  ;;  %1016 = vmatpush1.bf16.msra.mxu1 %v1077_v37  ;;  %v493_v63 = vld [vmem:[%s456_s12] sm:$0x3]  ;;  %v716_v6 = vld [vmem:[%s409_s13 + $0x18] sm:$0xff]  ;;  %v717_v7 = vunpack.c.l.bf16 %v713_v1  ;;  %v721_v8 = vunpack.c.l.bf16 %v715_v2  ;;  %v718_v11 = vunpack.c.h.bf16 %v713_v1  ;;  %v722_v12 = vunpack.c.h.bf16 %v715_v2  ;;  %s781_s23 = scalar_lea.vmem (%p1218_p6), %s1376_s4, %s1000_s14 }
  0x3d   : > { %666 = vmatprep.subr.bf16.mxu0 %v1078_v38  ;;  %1004 = vmatprep.subr.bf16.mxu1 %v1078_v38  ;;  %v498_v3 = vrot.slane %v493_v63, %v497_v62  ;;  %v502_v4 = vrot.slane %v493_v63, %v501_v0  ;;  %v719_v17 = vunpack.c.l.bf16 %v714_v5  ;;  %v723_v18 = vunpack.c.l.bf16 %v716_v6 }
  0x3e   : > { %v720_v23 = vunpack.c.h.bf16 %v714_v5  ;;  %v724_v24 = vunpack.c.h.bf16 %v716_v6 }
  0x40   : > { %667 = vmatpush1.bf16.msra.mxu0 %v1080_v39  ;;  %1017 = vmatpush1.bf16.msra.mxu1 %v1080_v39 }
  0x41   : > { %668 = vmatprep.subr.bf16.mxu0 %v1081_v40  ;;  %1005 = vmatprep.subr.bf16.mxu1 %v1081_v40 }
  0x44   : > { %669 = vmatpush1.bf16.msra.mxu0 %v1083_v41  ;;  %1018 = vmatpush1.bf16.msra.mxu1 %v1083_v41 }
  0x45   : > { %670 = vmatprep.subr.bf16.mxu0 %v1084_v42  ;;  %1006 = vmatprep.subr.bf16.mxu1 %v1084_v42 }
  0x48   : > { %671 = vmatpush1.bf16.msra.mxu0 %v1086_v43  ;;  %1019 = vmatpush1.bf16.msra.mxu1 %v1086_v43 }
  0x49   : > { %672 = vmatprep.subr.bf16.mxu0 %v1087_v44  ;;  %1007 = vmatprep.subr.bf16.mxu1 %v1087_v44 }
  0x4c   : > { %673 = vmatpush1.bf16.msra.mxu0 %v1089_v45  ;;  %1020 = vmatpush1.bf16.msra.mxu1 %v1089_v45 }
  0x4d   : > { %674 = vmatprep.subr.bf16.mxu0 %v1090_v46  ;;  %1008 = vmatprep.subr.bf16.mxu1 %v1090_v46 }
  0x50   : > { %675 = vmatpush1.bf16.msra.mxu0 %v1092_v47  ;;  %1021 = vmatpush1.bf16.msra.mxu1 %v1092_v47 }
  0x51   : > { %676 = vmatprep.subr.bf16.mxu0 %v1093_v48  ;;  %1009 = vmatprep.subr.bf16.mxu1 %v1093_v48 }
  0x54   : > { %677 = vmatpush1.bf16.msra.mxu0 %v1095_v49  ;;  %1022 = vmatpush1.bf16.msra.mxu1 %v1095_v49 }
  0x55   : > { %678 = vmatprep.subr.bf16.mxu0 %v1096_v50  ;;  %1010 = vmatprep.subr.bf16.mxu1 %v1096_v50 }
  0x58   : > { %679 = vmatpush1.bf16.msra.mxu0 %v1098_v51  ;;  %1023 = vmatpush1.bf16.msra.mxu1 %v1098_v51 }
  0x59   : > { %680 = vmatprep.subr.bf16.mxu0 %v1099_v52  ;;  %1011 = vmatprep.subr.bf16.mxu1 %v1099_v52 }
  0x5c   : > { %681 = vmatpush1.bf16.msra.mxu0 %v1101_v53  ;;  %1024 = vmatpush1.bf16.msra.mxu1 %v1101_v53 }
  0x5d   : > { %682 = vmatprep.subr.bf16.mxu0 %v1102_v54  ;;  %1012 = vmatprep.subr.bf16.mxu1 %v1102_v54 }
  0x60   : > { %683 = vmatpush1.bf16.msra.mxu0 %v1104_v55  ;;  %1025 = vmatpush1.bf16.msra.mxu1 %v1104_v55 }
  0x61   : > { %684 = vmatprep.subr.bf16.mxu0 %v1105_v56  ;;  %1013 = vmatprep.subr.bf16.mxu1 %v1105_v56 }
  0x64   : > { %685 = vmatpush1.bf16.msra.mxu0 %v1107_v57  ;;  %1026 = vmatpush1.bf16.msra.mxu1 %v1107_v57 }
  0x67   : > { %693 = vmatmul.mubr.bf16.vlgmr.msra.gmra.mrb[0].mxu0 %v1108_v58  ;;  %703 = vmatmul.mubr.bf16.vlgmr.msra.gmra.mrb[0].mxu1 %v1111_v59 }
 0x13a   : > { %v694_v9 = vpop.f32.mrb[0].mxu0  ;;  %v704_v10 = vpop.f32.mrb[0].mxu1 }
 0x13b   : > { %v695_v13 = vadd.f32 %v694_v9, %v498_v3  ;;  %v705_v14 = vadd.f32 %v704_v10, %v498_v3  ;;  %v696_v15 = vpop.f32.mrb[1].mxu0  ;;  %v706_v16 = vpop.f32.mrb[1].mxu1 }
 0x13c   : > { %v697_v19 = vadd.f32 %v696_v15, %v502_v4  ;;  %v707_v20 = vadd.f32 %v706_v16, %v502_v4  ;;  %v698_v21 = vpop.f32.mrb[2].mxu0  ;;  %v708_v22 = vpop.f32.mrb[2].mxu1 }
 0x13d   : > { %v725_v25 = vadd.f32 %v717_v7, %v695_v13  ;;  %v729_v26 = vadd.f32 %v721_v8, %v705_v14  ;;  %v699_v27 = vadd.f32 %v698_v21, %v498_v3  ;;  %v709_v28 = vadd.f32 %v708_v22, %v498_v3  ;;  %v700_v29 = vpop.f32.mrb[3].mxu0  ;;  %v710_v30 = vpop.f32.mrb[3].mxu1 }
 0x13e   : > { %v726_v31 = vadd.f32 %v718_v11, %v697_v19  ;;  %v730_v32 = vadd.f32 %v722_v12, %v707_v20  ;;  %v701_v33 = vadd.f32 %v700_v29, %v502_v4  ;;  %v711_v34 = vadd.f32 %v710_v30, %v502_v4 }
 0x13f   : > { %v733_v35 = vmax.f32 %v725_v25, 0.0  ;;  %v737_v36 = vmax.f32 %v729_v26, 0.0  ;;  %v727_v37 = vadd.f32 %v719_v17, %v699_v27  ;;  %v731_v38 = vadd.f32 %v723_v18, %v709_v28 }
 0x140   : > { %v734_v39 = vmax.f32 %v726_v31, 0.0  ;;  %v738_v40 = vmax.f32 %v730_v32, 0.0  ;;  %v728_v41 = vadd.f32 %v720_v23, %v701_v33  ;;  %v732_v42 = vadd.f32 %v724_v24, %v711_v34  ;;  %775 = sbr.rel (!%p1218_p6) target bundleno = 335 (0x14f), region = 116 }
 0x141   : > { %v735_v43 = vmax.f32 %v727_v37, 0.0  ;;  %v739_v44 = vmax.f32 %v731_v38, 0.0 }
 0x142   : > { %v996_v45 = vpack.c.bf16 %v734_v39, %v733_v35  ;;  %v998_v46 = vpack.c.bf16 %v738_v40, %v737_v36  ;;  %v736_v47 = vmax.f32 %v728_v41, 0.0  ;;  %v740_v48 = vmax.f32 %v732_v42, 0.0 }
 0x144   : > { %765 = vst [vmem:[%s444_s15] sm:$0xff] %v996_v45  ;;  %767 = vst [vmem:[%s444_s15 + $0x10] sm:$0xff] %v998_v46  ;;  %v997_v49 = vpack.c.bf16 %v736_v47, %v735_v43  ;;  %v999_v50 = vpack.c.bf16 %v740_v48, %v739_v44 }
 0x146   : > { %766 = vst [vmem:[%s444_s15 + $0x8] sm:$0xff] %v997_v49  ;;  %768 = vst [vmem:[%s444_s15 + $0x18] sm:$0xff] %v999_v50 }
 0x14b   : > { %v815_v51 = vld [vmem:[%s444_s15] sm:$0xff]  ;;  %v819_v53 = vld [vmem:[%s444_s15 + $0x10] sm:$0xff] }
 0x14c   : > { %816 = vst [vmem:[%s781_s23] sm:$0xff] %v815_v51  ;;  %820 = vst [vmem:[%s781_s23 + $0x20] sm:$0xff] %v819_v53 }
 0x14d   : > { %v817_v52 = vld [vmem:[%s444_s15 + $0x8] sm:$0xff]  ;;  %v821_v54 = vld [vmem:[%s444_s15 + $0x18] sm:$0xff] }
 0x14e   : > { %818 = vst [vmem:[%s781_s23 + $0x10] sm:$0xff] %v817_v52  ;;  %822 = vst [vmem:[%s781_s23 + $0x30] sm:$0xff] %v821_v54 }
 0x14f PF: > { %s14_s19 = sadd.s32 1, %s1152_s19   ;;  %s1379_s15 = smov %s1140_s16 }
 0x150   : > { %p11_p12 = scmp.ge.s32.totalorder %s14_s19, 4   ;;  %s1380_s16 = smov %s1223_s26 }
 0x151   : > { %s1381_s17 = smov %s1148_s18  ;;  %s1382_s18 = smov %s1384_s20 }
 0x152   :  { %13 = sbr.rel (!%p11_p12) target bundleno = 3 (0x3), region = 199 }

// kernel: fwd.61
= control target key start
LH: loop header
LB: loop body
LE: loop exit
PB: predicated region body
PF: predicated region fallthrough
CT: control target
= control target key end

     0   :  { %v85_v0 = vmov 0   ;;  %s134_s1 = inlined_call_operand.vmem [shape: f32[8,1], index: 1, kind: input, shape index: {}]   ;;  %s135_s0 = inlined_call_operand.vmem [shape: bf16[4,8,512], index: 0, kind: input, shape index: {}]   ;;  %s136_s2 = inlined_call_operand.vmem [shape: bf16[8,512], index: 2, kind: output, shape index: {}]  }
   0x1   :  { %84 = vset.pattern.permute.xlu0 %v85_v0  ;;  %v47_v1 = vld [vmem:[%s134_s1] sm:$0xff]  ;;  %v12_v3 = vld [vmem:[%s135_s0 + $0x8] sm:$0xff]  ;;  %v13_v4 = vld [vmem:[%s135_s0 + $0x10] sm:$0xff] }
   0x2   :  { %50 = vperm.xlu0 %84, %v47_v1   ;;  %v11_v2 = vld [vmem:[%s135_s0] sm:$0xff]  ;;  %v14_v5 = vld [vmem:[%s135_s0 + $0x18] sm:$0xff]  ;;  %v21_v8 = vunpack.c.l.bf16 %v12_v3  ;;  %v22_v9 = vunpack.c.h.bf16 %v12_v3  ;;  %v16_v11 = vld [vmem:[%s135_s0 + $0x28] sm:$0xff]  ;;  %v23_v12 = vunpack.c.l.bf16 %v13_v4  ;;  %v24_v13 = vunpack.c.h.bf16 %v13_v4 }
   0x3   :  { %v19_v6 = vunpack.c.l.bf16 %v11_v2  ;;  %v20_v7 = vunpack.c.h.bf16 %v11_v2  ;;  %v15_v10 = vld [vmem:[%s135_s0 + $0x20] sm:$0xff]  ;;  %v25_v14 = vunpack.c.l.bf16 %v14_v5  ;;  %v26_v15 = vunpack.c.h.bf16 %v14_v5  ;;  %v17_v20 = vld [vmem:[%s135_s0 + $0x30] sm:$0xff]  ;;  %v18_v21 = vld [vmem:[%s135_s0 + $0x38] sm:$0xff] }
   0x4   :  { %v27_v16 = vunpack.c.l.bf16 %v15_v10  ;;  %v28_v17 = vunpack.c.h.bf16 %v15_v10  ;;  %v29_v18 = vunpack.c.l.bf16 %v16_v11  ;;  %v30_v19 = vunpack.c.h.bf16 %v16_v11 }
   0x5   :  { %v35_v22 = vadd.f32 %v23_v12, %v19_v6  ;;  %v38_v23 = vadd.f32 %v24_v13, %v20_v7  ;;  %v41_v24 = vadd.f32 %v25_v14, %v21_v8  ;;  %v44_v25 = vadd.f32 %v26_v15, %v22_v9 }
   0x6   :  { %v31_v26 = vunpack.c.l.bf16 %v17_v20  ;;  %v32_v27 = vunpack.c.h.bf16 %v17_v20  ;;  %v33_v28 = vunpack.c.l.bf16 %v18_v21  ;;  %v34_v29 = vunpack.c.h.bf16 %v18_v21 }
   0x7   :  { %v36_v30 = vadd.f32 %v35_v22, %v27_v16  ;;  %v39_v31 = vadd.f32 %v38_v23, %v28_v17  ;;  %v42_v32 = vadd.f32 %v41_v24, %v29_v18  ;;  %v45_v33 = vadd.f32 %v44_v25, %v30_v19 }
   0x9   :  { %v37_v34 = vadd.f32 %v36_v30, %v31_v26  ;;  %v40_v35 = vadd.f32 %v39_v31, %v32_v27  ;;  %v43_v36 = vadd.f32 %v42_v32, %v33_v28  ;;  %v46_v37 = vadd.f32 %v45_v33, %v34_v29 }
  0x81   :  { %v51_v38 = vpop.permute.xlu0 %50 }
  0x82   :  { %v53_v39 = vmul.f32 %v51_v38, %v37_v34  ;;  %v54_v40 = vmul.f32 %v51_v38, %v40_v35  ;;  %v55_v41 = vmul.f32 %v51_v38, %v43_v36  ;;  %v56_v42 = vmul.f32 %v51_v38, %v46_v37 }
  0x84   :  { %v81_v43 = vpack.c.bf16 %v54_v40, %v53_v39  ;;  %v82_v44 = vpack.c.bf16 %v56_v42, %v55_v41 }
  0x86   :  { %73 = vst [vmem:[%s136_s2] sm:$0xff] %v81_v43  ;;  %74 = vst [vmem:[%s136_s2 + $0x8] sm:$0xff] %v82_v44 }

// kernel: fwd.62
= control target key start
LH: loop header
LB: loop body
LE: loop exit
PB: predicated region body
PF: predicated region fallthrough
CT: control target
= control target key end

     0   :  { %s1425_s12 = smov 0   ;;  %s1427_s13 = smov 0   ;;  %s1709_s0 = inlined_call_operand.vmem [shape: bf16[8,512], index: 0, kind: input, shape index: {}]   ;;  %s1710_s1 = inlined_call_operand.vmem [shape: bf16[512,1024], index: 1, kind: input, shape index: {}]   ;;  %s1711_s2 = inlined_call_operand.vmem [shape: f32[1,1024], index: 2, kind: input, shape index: {}]   ;;  %s1712_s3 = inlined_call_operand.vmem [shape: bf16[8,1024], index: 3, kind: output, shape index: {}]  }
   0x1   :  { %s1429_s14 = smov 0   ;;  %s1431_s15 = smov 0  }
   0x2   :  { %s1433_s16 = smov 0  }
   0x3 LB: > { %s22_s17 = sadd.s32 1, %s1399_s15  ;;  %p65_p1 = scmp.ne.s32.totalorder %s1391_s13, %s1387_s12  ;;  %s1403_s16 = sphi %s1433_s16, %s13_s16   ;;  %s1399_s15 = sphi %s1431_s15, %s1716_s15   ;;  %s1395_s14 = sphi %s1429_s14, %s1715_s14   ;;  %s1391_s13 = sphi %s1427_s13, %s1714_s13   ;;  %s1387_s12 = sphi %s1425_s12, %s1713_s12  }
   0x4   : > { %p23_p0 = scmp.ge.s32.totalorder %s22_s17, 4  ;;  %p66_p2 = scmp.eq.s32.totalorder %s1403_s16, 0 }
   0x5   : > { %s58_s19 = sadd.s32 1, %s1391_s13  ;;  %p1139_p5 = scmp.ge.s32.totalorder %s1403_s16, 4 }
   0x6   : > { %s1718_s17 = smov (%p23_p0, %s22_s17), 0  ;;  %p67_p3 = por %p66_p2, %p65_p1 }
   0x7   : > { %s55_s18 = ssub.s32 %s1399_s15, %s1718_s17  ;;  %153 = sbr.rel (%p1139_p5) target bundleno = 82 (0x52), region = 20 }
   0x8   : > { %p56_p4 = scmp.eq.s32.totalorder %s55_s18, 0 }
   0xa   : > { %s1460_s20 = scalar_select %p56_p4, %s1391_s13, %s58_s19  }
   0xe   : > { %156 = sbr.rel (!%p67_p3) target bundleno = 82 (0x52), region = 24  ;;  %s158_s21 = sand.u32 (%p67_p3), 1, %s1391_s13  }
   0xf   : > { %s1219_s22 = sshll.u32 (%p67_p3), %s1399_s15, 3  ;;  %s1140_s23 = sshll.u32 (%p67_p3), %s158_s21, 9 }
  0x10   : > { %s1468_s26 = scalar_lea.vmem (%p67_p3), %s1710_s1, %s1219_s22  ;;  %s1473_s27 = scalar_lea.vmem (%p67_p3), [#allocation2], %s1140_s23 }
  0x11   : > { %v317_v0 = vld [vmem:[%s1468_s26] sm:$0xff] (%p67_p3) }
  0x12   : > { %v319_v1 = vld [vmem:[%s1468_s26 + $0x20] sm:$0xff] (%p67_p3)  ;;  %318 = vst [vmem:[%s1473_s27] sm:$0xff] (%p67_p3), %v317_v0 }
  0x13   : > { %v321_v2 = vld [vmem:[%s1468_s26 + $0x40] sm:$0xff] (%p67_p3)  ;;  %320 = vst [vmem:[%s1473_s27 + $0x8] sm:$0xff] (%p67_p3), %v319_v1 }
  0x14   : > { %322 = vst [vmem:[%s1473_s27 + $0x10] sm:$0xff] (%p67_p3), %v321_v2  ;;  %v323_v3 = vld [vmem:[%s1468_s26 + $0x60] sm:$0xff] (%p67_p3) }
  0x15   : > { %v325_v4 = vld [vmem:[%s1468_s26 + $0x80] sm:$0xff]  ;;  %324 = vst [vmem:[%s1473_s27 + $0x18] sm:$0xff] %v323_v3 }
  0x16   : > { %v327_v5 = vld [vmem:[%s1468_s26 + $0xa0] sm:$0xff]  ;;  %326 = vst [vmem:[%s1473_s27 + $0x20] sm:$0xff] %v325_v4 }
  0x17   : > { %328 = vst [vmem:[%s1473_s27 + $0x28] sm:$0xff] %v327_v5  ;;  %v329_v6 = vld [vmem:[%s1468_s26 + $0xc0] sm:$0xff] }
  0x18   : > { %v331_v7 = vld [vmem:[%s1468_s26 + $0xe0] sm:$0xff]  ;;  %330 = vst [vmem:[%s1473_s27 + $0x30] sm:$0xff] %v329_v6 }
  0x19   : > { %v333_v8 = vld [vmem:[%s1468_s26 + $0x100] sm:$0xff]  ;;  %332 = vst [vmem:[%s1473_s27 + $0x38] sm:$0xff] %v331_v7 }
  0x1a   : > { %334 = vst [vmem:[%s1473_s27 + $0x40] sm:$0xff] %v333_v8  ;;  %v335_v9 = vld [vmem:[%s1468_s26 + $0x120] sm:$0xff] }
  0x1b   : > { %v337_v10 = vld [vmem:[%s1468_s26 + $0x140] sm:$0xff]  ;;  %336 = vst [vmem:[%s1473_s27 + $0x48] sm:$0xff] %v335_v9 }
  0x1c   : > { %v339_v11 = vld [vmem:[%s1468_s26 + $0x160] sm:$0xff]  ;;  %338 = vst [vmem:[%s1473_s27 + $0x50] sm:$0xff] %v337_v10 }
  0x1d   : > { %340 = vst [vmem:[%s1473_s27 + $0x58] sm:$0xff] %v339_v11  ;;  %v341_v12 = vld [vmem:[%s1468_s26 + $0x180] sm:$0xff] }
  0x1e   : > { %v343_v13 = vld [vmem:[%s1468_s26 + $0x1a0] sm:$0xff]  ;;  %342 = vst [vmem:[%s1473_s27 + $0x60] sm:$0xff] %v341_v12 }
  0x1f   : > { %v345_v14 = vld [vmem:[%s1468_s26 + $0x1c0] sm:$0xff]  ;;  %344 = vst [vmem:[%s1473_s27 + $0x68] sm:$0xff] %v343_v13 }
  0x20   : > { %346 = vst [vmem:[%s1473_s27 + $0x70] sm:$0xff] %v345_v14  ;;  %v347_v15 = vld [vmem:[%s1468_s26 + $0x1e0] sm:$0xff] }
  0x21   : > { %v349_v16 = vld [vmem:[%s1468_s26 + $0x200] sm:$0xff]  ;;  %348 = vst [vmem:[%s1473_s27 + $0x78] sm:$0xff] %v347_v15 }
  0x22   : > { %v351_v17 = vld [vmem:[%s1468_s26 + $0x220] sm:$0xff]  ;;  %350 = vst [vmem:[%s1473_s27 + $0x80] sm:$0xff] %v349_v16 }
  0x23   : > { %352 = vst [vmem:[%s1473_s27 + $0x88] sm:$0xff] %v351_v17  ;;  %v353_v18 = vld [vmem:[%s1468_s26 + $0x240] sm:$0xff] }
  0x24   : > { %v355_v19 = vld [vmem:[%s1468_s26 + $0x260] sm:$0xff]  ;;  %354 = vst [vmem:[%s1473_s27 + $0x90] sm:$0xff] %v353_v18 }
  0x25   : > { %v357_v20 = vld [vmem:[%s1468_s26 + $0x280] sm:$0xff]  ;;  %356 = vst [vmem:[%s1473_s27 + $0x98] sm:$0xff] %v355_v19 }
  0x26   : > { %358 = vst [vmem:[%s1473_s27 + $0xa0] sm:$0xff] %v357_v20  ;;  %v359_v21 = vld [vmem:[%s1468_s26 + $0x2a0] sm:$0xff] }
  0x27   : > { %v361_v22 = vld [vmem:[%s1468_s26 + $0x2c0] sm:$0xff]  ;;  %360 = vst [vmem:[%s1473_s27 + $0xa8] sm:$0xff] %v359_v21 }
  0x28   : > { %v363_v23 = vld [vmem:[%s1468_s26 + $0x2e0] sm:$0xff]  ;;  %362 = vst [vmem:[%s1473_s27 + $0xb0] sm:$0xff] %v361_v22 }
  0x29   : > { %364 = vst [vmem:[%s1473_s27 + $0xb8] sm:$0xff] %v363_v23  ;;  %v365_v24 = vld [vmem:[%s1468_s26 + $0x300] sm:$0xff] }
  0x2a   : > { %v367_v25 = vld [vmem:[%s1468_s26 + $0x320] sm:$0xff]  ;;  %366 = vst [vmem:[%s1473_s27 + $0xc0] sm:$0xff] %v365_v24 }
  0x2b   : > { %v369_v26 = vld [vmem:[%s1468_s26 + $0x340] sm:$0xff]  ;;  %368 = vst [vmem:[%s1473_s27 + $0xc8] sm:$0xff] %v367_v25 }
  0x2c   : > { %370 = vst [vmem:[%s1473_s27 + $0xd0] sm:$0xff] %v369_v26  ;;  %v371_v27 = vld [vmem:[%s1468_s26 + $0x360] sm:$0xff] }
  0x2d   : > { %v373_v28 = vld [vmem:[%s1468_s26 + $0x380] sm:$0xff]  ;;  %372 = vst [vmem:[%s1473_s27 + $0xd8] sm:$0xff] %v371_v27 }
  0x2e   : > { %v375_v29 = vld [vmem:[%s1468_s26 + $0x3a0] sm:$0xff]  ;;  %374 = vst [vmem:[%s1473_s27 + $0xe0] sm:$0xff] %v373_v28 }
  0x2f   : > { %376 = vst [vmem:[%s1473_s27 + $0xe8] sm:$0xff] %v375_v29  ;;  %v377_v30 = vld [vmem:[%s1468_s26 + $0x3c0] sm:$0xff] }
  0x30   : > { %v379_v31 = vld [vmem:[%s1468_s26 + $0x3e0] sm:$0xff]  ;;  %378 = vst [vmem:[%s1473_s27 + $0xf0] sm:$0xff] %v377_v30 }
  0x31   : > { %v381_v32 = vld [vmem:[%s1468_s26 + $0x400] sm:$0xff]  ;;  %380 = vst [vmem:[%s1473_s27 + $0xf8] sm:$0xff] %v379_v31 }
  0x32   : > { %382 = vst [vmem:[%s1473_s27 + $0x100] sm:$0xff] %v381_v32  ;;  %v383_v33 = vld [vmem:[%s1468_s26 + $0x420] sm:$0xff] }
  0x33   : > { %v385_v34 = vld [vmem:[%s1468_s26 + $0x440] sm:$0xff]  ;;  %384 = vst [vmem:[%s1473_s27 + $0x108] sm:$0xff] %v383_v33 }
  0x34   : > { %v387_v35 = vld [vmem:[%s1468_s26 + $0x460] sm:$0xff]  ;;  %386 = vst [vmem:[%s1473_s27 + $0x110] sm:$0xff] %v385_v34 }
  0x35   : > { %388 = vst [vmem:[%s1473_s27 + $0x118] sm:$0xff] %v387_v35  ;;  %v389_v36 = vld [vmem:[%s1468_s26 + $0x480] sm:$0xff] }
  0x36   : > { %v391_v37 = vld [vmem:[%s1468_s26 + $0x4a0] sm:$0xff]  ;;  %390 = vst [vmem:[%s1473_s27 + $0x120] sm:$0xff] %v389_v36 }
  0x37   : > { %v393_v38 = vld [vmem:[%s1468_s26 + $0x4c0] sm:$0xff]  ;;  %392 = vst [vmem:[%s1473_s27 + $0x128] sm:$0xff] %v391_v37 }
  0x38   : > { %394 = vst [vmem:[%s1473_s27 + $0x130] sm:$0xff] %v393_v38  ;;  %v395_v39 = vld [vmem:[%s1468_s26 + $0x4e0] sm:$0xff] }
  0x39   : > { %v397_v40 = vld [vmem:[%s1468_s26 + $0x500] sm:$0xff]  ;;  %396 = vst [vmem:[%s1473_s27 + $0x138] sm:$0xff] %v395_v39 }
  0x3a   : > { %v399_v41 = vld [vmem:[%s1468_s26 + $0x520] sm:$0xff]  ;;  %398 = vst [vmem:[%s1473_s27 + $0x140] sm:$0xff] %v397_v40 }
  0x3b   : > { %400 = vst [vmem:[%s1473_s27 + $0x148] sm:$0xff] %v399_v41  ;;  %v401_v42 = vld [vmem:[%s1468_s26 + $0x540] sm:$0xff] }
  0x3c   : > { %v403_v43 = vld [vmem:[%s1468_s26 + $0x560] sm:$0xff]  ;;  %402 = vst [vmem:[%s1473_s27 + $0x150] sm:$0xff] %v401_v42 }
  0x3d   : > { %v405_v44 = vld [vmem:[%s1468_s26 + $0x580] sm:$0xff]  ;;  %404 = vst [vmem:[%s1473_s27 + $0x158] sm:$0xff] %v403_v43 }
  0x3e   : > { %406 = vst [vmem:[%s1473_s27 + $0x160] sm:$0xff] %v405_v44  ;;  %v407_v45 = vld [vmem:[%s1468_s26 + $0x5a0] sm:$0xff] }
  0x3f   : > { %v409_v46 = vld [vmem:[%s1468_s26 + $0x5c0] sm:$0xff]  ;;  %408 = vst [vmem:[%s1473_s27 + $0x168] sm:$0xff] %v407_v45 }
  0x40   : > { %v411_v47 = vld [vmem:[%s1468_s26 + $0x5e0] sm:$0xff]  ;;  %410 = vst [vmem:[%s1473_s27 + $0x170] sm:$0xff] %v409_v46 }
  0x41   : > { %412 = vst [vmem:[%s1473_s27 + $0x178] sm:$0xff] %v411_v47  ;;  %v413_v48 = vld [vmem:[%s1468_s26 + $0x600] sm:$0xff] }
  0x42   : > { %v415_v49 = vld [vmem:[%s1468_s26 + $0x620] sm:$0xff]  ;;  %414 = vst [vmem:[%s1473_s27 + $0x180] sm:$0xff] %v413_v48 }
  0x43   : > { %v417_v50 = vld [vmem:[%s1468_s26 + $0x640] sm:$0xff]  ;;  %416 = vst [vmem:[%s1473_s27 + $0x188] sm:$0xff] %v415_v49 }
  0x44   : > { %418 = vst [vmem:[%s1473_s27 + $0x190] sm:$0xff] %v417_v50  ;;  %v419_v51 = vld [vmem:[%s1468_s26 + $0x660] sm:$0xff] }
  0x45   : > { %v421_v52 = vld [vmem:[%s1468_s26 + $0x680] sm:$0xff]  ;;  %420 = vst [vmem:[%s1473_s27 + $0x198] sm:$0xff] %v419_v51 }
  0x46   : > { %v423_v53 = vld [vmem:[%s1468_s26 + $0x6a0] sm:$0xff]  ;;  %422 = vst [vmem:[%s1473_s27 + $0x1a0] sm:$0xff] %v421_v52 }
  0x47   : > { %424 = vst [vmem:[%s1473_s27 + $0x1a8] sm:$0xff] %v423_v53  ;;  %v425_v54 = vld [vmem:[%s1468_s26 + $0x6c0] sm:$0xff] }
  0x48   : > { %v427_v55 = vld [vmem:[%s1468_s26 + $0x6e0] sm:$0xff]  ;;  %426 = vst [vmem:[%s1473_s27 + $0x1b0] sm:$0xff] %v425_v54 }
  0x49   : > { %v429_v56 = vld [vmem:[%s1468_s26 + $0x700] sm:$0xff]  ;;  %428 = vst [vmem:[%s1473_s27 + $0x1b8] sm:$0xff] %v427_v55 }
  0x4a   : > { %430 = vst [vmem:[%s1473_s27 + $0x1c0] sm:$0xff] %v429_v56  ;;  %v431_v57 = vld [vmem:[%s1468_s26 + $0x720] sm:$0xff] }
  0x4b   : > { %v433_v58 = vld [vmem:[%s1468_s26 + $0x740] sm:$0xff]  ;;  %432 = vst [vmem:[%s1473_s27 + $0x1c8] sm:$0xff] %v431_v57 }
  0x4c   : > { %v435_v59 = vld [vmem:[%s1468_s26 + $0x760] sm:$0xff]  ;;  %434 = vst [vmem:[%s1473_s27 + $0x1d0] sm:$0xff] %v433_v58 }
  0x4d   : > { %436 = vst [vmem:[%s1473_s27 + $0x1d8] sm:$0xff] %v435_v59  ;;  %v437_v60 = vld [vmem:[%s1468_s26 + $0x780] sm:$0xff] }
  0x4e   : > { %v439_v61 = vld [vmem:[%s1468_s26 + $0x7a0] sm:$0xff]  ;;  %438 = vst [vmem:[%s1473_s27 + $0x1e0] sm:$0xff] %v437_v60 }
  0x4f   : > { %v441_v62 = vld [vmem:[%s1468_s26 + $0x7c0] sm:$0xff]  ;;  %440 = vst [vmem:[%s1473_s27 + $0x1e8] sm:$0xff] %v439_v61 }
  0x50   : > { %442 = vst [vmem:[%s1473_s27 + $0x1f0] sm:$0xff] %v441_v62  ;;  %v443_v63 = vld [vmem:[%s1468_s26 + $0x7e0] sm:$0xff] }
  0x51   : > { %444 = vst [vmem:[%s1473_s27 + $0x1f8] sm:$0xff] %v443_v63 }
  0x52 PF: > { %p1143_p6 = scmp.ge.s32.totalorder %s1403_s16, 1  ;;  %p457_p7 = scmp.lt.s32.totalorder %s1403_s16, 5 }
  0x54   : > { %p458_p8 = pnand %p1143_p6, %p457_p7 }
  0x55   : > { %s464_s28 = sand.u32 (!%p458_p8), 1, %s1387_s12   ;;  %v1606_v0 = vld [vmem:[%s1709_s0] sm:$0xff] (!%p458_p8)  ;;  %v1611_v1 = vld [vmem:[%s1709_s0 + $0x8] sm:$0xff] (!%p458_p8)  ;;  %s1145_s8 = sshll.u32 (!%p458_p8), %s1395_s14, 1 }
  0x56   : > { %461 = sbr.rel (%p458_p8) target bundleno = 373 (0x175), region = 66  ;;  %s1144_s6 = sshll.u32 (!%p458_p8), %s464_s28, 9  ;;  %v1149_v2 = vcombine.high (!%p458_p8), %v1606_v0, %v1606_v0  ;;  %v1151_v3 = vcombine.high (!%p458_p8), %v1611_v1, %v1611_v1 }
  0x57   : > { %s1617_s7 = scalar_lea.vmem (!%p458_p8), [#allocation2], %s1144_s6  ;;  %p507_p9 = scmp.lt.s32.totalorder (!%p458_p8), %s1145_s8, 7 }
  0x58   : > { %v1265_v4 = vld [vmem:[%s1617_s7 + $0x4] ss:$8 sps:$4 sm:$0xff] (!%p458_p8)   ;;  %965 = vmatprep.mubr.bf16.mxu1 (!%p458_p8), %v1149_v2  ;;  %1006 = vmatprep.mubr.bf16.mxu0 (!%p458_p8), %v1151_v3  ;;  %v1269_v6 = vld [vmem:[%s1617_s7] ss:$8 sps:$4 sm:$0xff] (!%p458_p8)   ;;  %v1271_v8 = vld [vmem:[%s1617_s7 + $0x14] ss:$8 sps:$4 sm:$0xff] (!%p458_p8)  }
  0x59   : > { %v1267_v5 = vld [vmem:[%s1617_s7 + $0x104] ss:$8 sps:$4 sm:$0xff] (!%p458_p8)   ;;  %933 = vmatprep.subr.bf16.mxu1 (!%p458_p8), %v1265_v4  ;;  %v1270_v7 = vld [vmem:[%s1617_s7 + $0x100] ss:$8 sps:$4 sm:$0xff] (!%p458_p8)   ;;  %v1273_v9 = vld [vmem:[%s1617_s7 + $0x114] ss:$8 sps:$4 sm:$0xff] (!%p458_p8)  }
  0x5a   : > { %974 = vmatprep.subr.bf16.mxu0 (!%p458_p8), %v1267_v5  ;;  %934 = vmatpush1.bf16.msra.mxu1 (!%p458_p8), %v1269_v6  ;;  %v1275_v10 = vld [vmem:[%s1617_s7 + $0x10] ss:$8 sps:$4 sm:$0xff] (!%p458_p8)   ;;  %v1277_v12 = vld [vmem:[%s1617_s7 + $0x24] ss:$8 sps:$4 sm:$0xff] (!%p458_p8)   ;;  %v1281_v14 = vld [vmem:[%s1617_s7 + $0x20] ss:$8 sps:$4 sm:$0xff] (!%p458_p8)   ;;  %v1148_v6 = vcombine.low (!%p458_p8), %v1606_v0, %v1606_v0 }
  0x5b   : > { %975 = vmatpush1.bf16.msra.mxu0 (!%p458_p8), %v1270_v7  ;;  %935 = vmatprep.subr.bf16.mxu1 (!%p458_p8), %v1271_v8  ;;  %v1276_v11 = vld [vmem:[%s1617_s7 + $0x110] ss:$8 sps:$4 sm:$0xff] (!%p458_p8)   ;;  %v1279_v13 = vld [vmem:[%s1617_s7 + $0x124] ss:$8 sps:$4 sm:$0xff] (!%p458_p8)   ;;  %v1282_v15 = vld [vmem:[%s1617_s7 + $0x120] ss:$8 sps:$4 sm:$0xff] (!%p458_p8)   ;;  %v1150_v7 = vcombine.low (!%p458_p8), %v1611_v1, %v1611_v1  ;;  %v589_v8 = vlaneseq (!%p458_p8) }
  0x5c   : > { %976 = vmatprep.subr.bf16.mxu0 (!%p458_p8), %v1273_v9  ;;  %v1283_v16 = vld [vmem:[%s1617_s7 + $0x34] ss:$8 sps:$4 sm:$0xff] (!%p458_p8)   ;;  %v1287_v18 = vld [vmem:[%s1617_s7 + $0x30] ss:$8 sps:$4 sm:$0xff] (!%p458_p8)   ;;  %v1289_v20 = vld [vmem:[%s1617_s7 + $0x44] ss:$8 sps:$4 sm:$0xff] (!%p458_p8)  }
  0x5d   : > { %v1285_v17 = vld [vmem:[%s1617_s7 + $0x134] ss:$8 sps:$4 sm:$0xff]   ;;  %v1288_v19 = vld [vmem:[%s1617_s7 + $0x130] ss:$8 sps:$4 sm:$0xff]   ;;  %v1291_v21 = vld [vmem:[%s1617_s7 + $0x144] ss:$8 sps:$4 sm:$0xff]  }
  0x5e   : > { %936 = vmatpush1.bf16.msra.mxu1 %v1275_v10  ;;  %v1293_v22 = vld [vmem:[%s1617_s7 + $0x40] ss:$8 sps:$4 sm:$0xff]   ;;  %v1295_v24 = vld [vmem:[%s1617_s7 + $0x54] ss:$8 sps:$4 sm:$0xff]   ;;  %v1299_v26 = vld [vmem:[%s1617_s7 + $0x50] ss:$8 sps:$4 sm:$0xff]  }
  0x5f   : > { %977 = vmatpush1.bf16.msra.mxu0 %v1276_v11  ;;  %937 = vmatprep.subr.bf16.mxu1 %v1277_v12  ;;  %v1294_v23 = vld [vmem:[%s1617_s7 + $0x140] ss:$8 sps:$4 sm:$0xff]   ;;  %v1297_v25 = vld [vmem:[%s1617_s7 + $0x154] ss:$8 sps:$4 sm:$0xff]   ;;  %v1300_v27 = vld [vmem:[%s1617_s7 + $0x150] ss:$8 sps:$4 sm:$0xff]  }
  0x60   : > { %978 = vmatprep.subr.bf16.mxu0 %v1279_v13  ;;  %v1301_v28 = vld [vmem:[%s1617_s7 + $0x64] ss:$8 sps:$4 sm:$0xff]   ;;  %v1305_v30 = vld [vmem:[%s1617_s7 + $0x60] ss:$8 sps:$4 sm:$0xff]   ;;  %v1307_v32 = vld [vmem:[%s1617_s7 + $0x74] ss:$8 sps:$4 sm:$0xff]  }
  0x61   : > { %v1303_v29 = vld [vmem:[%s1617_s7 + $0x164] ss:$8 sps:$4 sm:$0xff]   ;;  %v1306_v31 = vld [vmem:[%s1617_s7 + $0x160] ss:$8 sps:$4 sm:$0xff]   ;;  %v1309_v33 = vld [vmem:[%s1617_s7 + $0x174] ss:$8 sps:$4 sm:$0xff]  }
  0x62   : > { %938 = vmatpush1.bf16.msra.mxu1 %v1281_v14  ;;  %v1311_v34 = vld [vmem:[%s1617_s7 + $0x70] ss:$8 sps:$4 sm:$0xff]   ;;  %v1313_v36 = vld [vmem:[%s1617_s7 + $0x84] ss:$8 sps:$4 sm:$0xff]   ;;  %v1317_v38 = vld [vmem:[%s1617_s7 + $0x80] ss:$8 sps:$4 sm:$0xff]  }
  0x63   : > { %979 = vmatpush1.bf16.msra.mxu0 %v1282_v15  ;;  %939 = vmatprep.subr.bf16.mxu1 %v1283_v16  ;;  %v1312_v35 = vld [vmem:[%s1617_s7 + $0x170] ss:$8 sps:$4 sm:$0xff]   ;;  %v1315_v37 = vld [vmem:[%s1617_s7 + $0x184] ss:$8 sps:$4 sm:$0xff]   ;;  %v1318_v39 = vld [vmem:[%s1617_s7 + $0x180] ss:$8 sps:$4 sm:$0xff]  }
  0x64   : > { %980 = vmatprep.subr.bf16.mxu0 %v1285_v17  ;;  %v1319_v40 = vld [vmem:[%s1617_s7 + $0x94] ss:$8 sps:$4 sm:$0xff]   ;;  %v1323_v42 = vld [vmem:[%s1617_s7 + $0x90] ss:$8 sps:$4 sm:$0xff]   ;;  %v1325_v44 = vld [vmem:[%s1617_s7 + $0xa4] ss:$8 sps:$4 sm:$0xff]  }
  0x65   : > { %v1321_v41 = vld [vmem:[%s1617_s7 + $0x194] ss:$8 sps:$4 sm:$0xff]   ;;  %v1324_v43 = vld [vmem:[%s1617_s7 + $0x190] ss:$8 sps:$4 sm:$0xff]   ;;  %v1327_v45 = vld [vmem:[%s1617_s7 + $0x1a4] ss:$8 sps:$4 sm:$0xff]  }
  0x66   : > { %940 = vmatpush1.bf16.msra.mxu1 %v1287_v18  ;;  %v1329_v46 = vld [vmem:[%s1617_s7 + $0xa0] ss:$8 sps:$4 sm:$0xff]   ;;  %v1331_v48 = vld [vmem:[%s1617_s7 + $0xb4] ss:$8 sps:$4 sm:$0xff]   ;;  %v1335_v50 = vld [vmem:[%s1617_s7 + $0xb0] ss:$8 sps:$4 sm:$0xff]  }
  0x67   : > { %981 = vmatpush1.bf16.msra.mxu0 %v1288_v19  ;;  %941 = vmatprep.subr.bf16.mxu1 %v1289_v20  ;;  %v1330_v47 = vld [vmem:[%s1617_s7 + $0x1a0] ss:$8 sps:$4 sm:$0xff]   ;;  %v1333_v49 = vld [vmem:[%s1617_s7 + $0x1b4] ss:$8 sps:$4 sm:$0xff]   ;;  %v1336_v51 = vld [vmem:[%s1617_s7 + $0x1b0] ss:$8 sps:$4 sm:$0xff]  }
  0x68   : > { %982 = vmatprep.subr.bf16.mxu0 %v1291_v21  ;;  %v1337_v52 = vld [vmem:[%s1617_s7 + $0xc4] ss:$8 sps:$4 sm:$0xff]   ;;  %v1341_v54 = vld [vmem:[%s1617_s7 + $0xc0] ss:$8 sps:$4 sm:$0xff]   ;;  %v1343_v56 = vld [vmem:[%s1617_s7 + $0xd4] ss:$8 sps:$4 sm:$0xff]  }
  0x69   : > { %v1339_v53 = vld [vmem:[%s1617_s7 + $0x1c4] ss:$8 sps:$4 sm:$0xff]   ;;  %v1342_v55 = vld [vmem:[%s1617_s7 + $0x1c0] ss:$8 sps:$4 sm:$0xff]   ;;  %v1345_v57 = vld [vmem:[%s1617_s7 + $0x1d4] ss:$8 sps:$4 sm:$0xff]  }
  0x6a   : > { %942 = vmatpush1.bf16.msra.mxu1 %v1293_v22  ;;  %v1347_v58 = vld [vmem:[%s1617_s7 + $0xd0] ss:$8 sps:$4 sm:$0xff]   ;;  %v1349_v60 = vld [vmem:[%s1617_s7 + $0xe4] ss:$8 sps:$4 sm:$0xff]   ;;  %v1353_v62 = vld [vmem:[%s1617_s7 + $0xe0] ss:$8 sps:$4 sm:$0xff]  }
  0x6b   : > { %983 = vmatpush1.bf16.msra.mxu0 %v1294_v23  ;;  %943 = vmatprep.subr.bf16.mxu1 %v1295_v24  ;;  %v1348_v59 = vld [vmem:[%s1617_s7 + $0x1d0] ss:$8 sps:$4 sm:$0xff]   ;;  %v1351_v61 = vld [vmem:[%s1617_s7 + $0x1e4] ss:$8 sps:$4 sm:$0xff]   ;;  %v1354_v63 = vld [vmem:[%s1617_s7 + $0x1e0] ss:$8 sps:$4 sm:$0xff]  }
  0x6c   : > { %984 = vmatprep.subr.bf16.mxu0 %v1297_v25  ;;  %v1355_v2 = vld [vmem:[%s1617_s7 + $0xf4] ss:$8 sps:$4 sm:$0xff]   ;;  %v1359_v4 = vld [vmem:[%s1617_s7 + $0xf0] ss:$8 sps:$4 sm:$0xff]   ;;  %s1720_s8 = smov (!%p507_p9, %s1145_s8), 7  ;;  %v590_v9 = vshrl.u32 %v589_v8, 7 }
  0x6d   : > { %v1357_v3 = vld [vmem:[%s1617_s7 + $0x1f4] ss:$8 sps:$4 sm:$0xff]   ;;  %v1360_v5 = vld [vmem:[%s1617_s7 + $0x1f0] ss:$8 sps:$4 sm:$0xff]   ;;  %s509_s11 = scalar_lea.vmem %s1711_s2, %s1720_s8  ;;  %s1147_s12 = sshll.u32 %s1720_s8, 2 }
  0x6e   : > { %944 = vmatpush1.bf16.msra.mxu1 %v1299_v26  ;;  %v591_v10 = vsub.s32 0, %v590_v9  ;;  %v587_v11 = vld [vmem:[%s509_s11] sm:$0x3]  ;;  %v595_v12 = vsub.s32 1, %v590_v9  ;;  %s519_s19 = scalar_lea.vmem %s1712_s3, %s1147_s12 }
  0x6f   : > { %985 = vmatpush1.bf16.msra.mxu0 %v1300_v27  ;;  %945 = vmatprep.subr.bf16.mxu1 %v1301_v28 }
  0x70   : > { %986 = vmatprep.subr.bf16.mxu0 %v1303_v29  ;;  %v592_v0 = vrot.slane %v587_v11, %v591_v10  ;;  %v596_v13 = vrot.slane %v587_v11, %v595_v12 }
  0x72   : > { %946 = vmatpush1.bf16.msra.mxu1 %v1305_v30 }
  0x73   : > { %987 = vmatpush1.bf16.msra.mxu0 %v1306_v31  ;;  %947 = vmatprep.subr.bf16.mxu1 %v1307_v32 }
  0x74   : > { %988 = vmatprep.subr.bf16.mxu0 %v1309_v33 }
  0x76   : > { %948 = vmatpush1.bf16.msra.mxu1 %v1311_v34 }
  0x77   : > { %989 = vmatpush1.bf16.msra.mxu0 %v1312_v35  ;;  %949 = vmatprep.subr.bf16.mxu1 %v1313_v36 }
  0x78   : > { %990 = vmatprep.subr.bf16.mxu0 %v1315_v37 }
  0x7a   : > { %950 = vmatpush1.bf16.msra.mxu1 %v1317_v38 }
  0x7b   : > { %991 = vmatpush1.bf16.msra.mxu0 %v1318_v39  ;;  %951 = vmatprep.subr.bf16.mxu1 %v1319_v40 }
  0x7c   : > { %992 = vmatprep.subr.bf16.mxu0 %v1321_v41 }
  0x7e   : > { %952 = vmatpush1.bf16.msra.mxu1 %v1323_v42 }
  0x7f   : > { %993 = vmatpush1.bf16.msra.mxu0 %v1324_v43  ;;  %953 = vmatprep.subr.bf16.mxu1 %v1325_v44 }
  0x80   : > { %994 = vmatprep.subr.bf16.mxu0 %v1327_v45 }
  0x82   : > { %954 = vmatpush1.bf16.msra.mxu1 %v1329_v46 }
  0x83   : > { %995 = vmatpush1.bf16.msra.mxu0 %v1330_v47  ;;  %955 = vmatprep.subr.bf16.mxu1 %v1331_v48 }
  0x84   : > { %996 = vmatprep.subr.bf16.mxu0 %v1333_v49 }
  0x86   : > { %956 = vmatpush1.bf16.msra.mxu1 %v1335_v50 }
  0x87   : > { %997 = vmatpush1.bf16.msra.mxu0 %v1336_v51  ;;  %957 = vmatprep.subr.bf16.mxu1 %v1337_v52 }
  0x88   : > { %998 = vmatprep.subr.bf16.mxu0 %v1339_v53 }
  0x8a   : > { %958 = vmatpush1.bf16.msra.mxu1 %v1341_v54 }
  0x8b   : > { %999 = vmatpush1.bf16.msra.mxu0 %v1342_v55  ;;  %959 = vmatprep.subr.bf16.mxu1 %v1343_v56 }
  0x8c   : > { %1000 = vmatprep.subr.bf16.mxu0 %v1345_v57 }
  0x8e   : > { %960 = vmatpush1.bf16.msra.mxu1 %v1347_v58 }
  0x8f   : > { %1001 = vmatpush1.bf16.msra.mxu0 %v1348_v59  ;;  %961 = vmatprep.subr.bf16.mxu1 %v1349_v60 }
  0x90   : > { %1002 = vmatprep.subr.bf16.mxu0 %v1351_v61 }
  0x92   : > { %962 = vmatpush1.bf16.msra.mxu1 %v1353_v62 }
  0x93   : > { %1003 = vmatpush1.bf16.msra.mxu0 %v1354_v63  ;;  %963 = vmatprep.subr.bf16.mxu1 %v1355_v2 }
  0x94   : > { %1004 = vmatprep.subr.bf16.mxu0 %v1357_v3 }
  0x96   : > { %964 = vmatpush1.bf16.msra.mxu1 %v1359_v4 }
  0x97   : > { %1005 = vmatpush1.bf16.msra.mxu0 %v1360_v5 }
  0x99   : > { %966 = vmatmul.mubr.bf16.vlgmr.msra.gmra.mrb[0].mxu1 %v1148_v6 }
  0x9a   : > { %1007 = vmatmul.mubr.bf16.vlgmr.msra.gmra.mrb[0].mxu0 %v1150_v7 }
 0x16c   : > { %v967_v14 = vpop.f32.mrb[0].mxu1 }
 0x16d   : > { %v1008_v1 = vpop.f32.mrb[0].mxu0  ;;  %v968_v15 = vadd.f32 %v967_v14, %v592_v0  ;;  %v969_v16 = vpop.f32.mrb[1].mxu1 }
 0x16e   : > { %v1010_v17 = vpop.f32.mrb[1].mxu0  ;;  %v970_v18 = vadd.f32 %v969_v16, %v596_v13  ;;  %v971_v19 = vpop.f32.mrb[2].mxu1 }
 0x16f   : > { %v1012_v20 = vpop.f32.mrb[2].mxu0  ;;  %v1009_v21 = vadd.f32 %v1008_v1, %v968_v15  ;;  %v972_v22 = vpop.f32.mrb[3].mxu1 }
 0x170   : > { %v1013_v23 = vpop.f32.mrb[3].mxu0  ;;  %v1011_v24 = vadd.f32 %v1010_v17, %v970_v18 }
 0x172   : > { %v1220_v25 = vpack.c.bf16 %v1011_v24, %v1009_v21 }
 0x174   : > { %1023 = vst [vmem:[%s519_s19] sm:$0xff] %v1220_v25 }
 0x175 PF: > { %s13_s16 = sadd.s32 1, %s1403_s16   ;;  %s1713_s12 = smov %s1391_s13 }
 0x176   : > { %p10_p10 = scmp.ge.s32.totalorder %s13_s16, 6   ;;  %s1714_s13 = smov %s1460_s20 }
 0x177   : > { %s1715_s14 = smov %s1399_s15  ;;  %s1716_s15 = smov %s1718_s17 }
 0x178   :  { %12 = sbr.rel (!%p10_p10) target bundleno = 3 (0x3), region = 111 }

// kernel: fwd.56
= control target key start
LH: loop header
LB: loop body
LE: loop exit
PB: predicated region body
PF: predicated region fallthrough
CT: control target
= control target key end

     0   :  { %s1571_s12 = smov 0   ;;  %s1573_s13 = smov 0   ;;  %s1883_s0 = inlined_call_operand.vmem [shape: bf16[32,512], index: 0, kind: input, shape index: {}]   ;;  %s1884_s1 = inlined_call_operand.vmem [shape: bf16[512,512], index: 1, kind: input, shape index: {}]   ;;  %s1885_s2 = inlined_call_operand.vmem [shape: f32[1,512], index: 2, kind: input, shape index: {}]   ;;  %s1886_s3 = inlined_call_operand.vmem [shape: bf16[32,512], index: 3, kind: output, shape index: {}]  }
   0x1   :  { %s1575_s14 = smov 0   ;;  %s1577_s15 = smov 0  }
   0x2   :  { %s1579_s16 = smov 0  }
   0x3 LB: > { %s22_s17 = sadd.s32 1, %s1545_s15  ;;  %s1248_s18 = sadd.s32 4294967295, %s1549_s16   ;;  %s1549_s16 = sphi %s1579_s16, %s13_s16   ;;  %s1545_s15 = sphi %s1577_s15, %s1891_s15   ;;  %s1541_s14 = sphi %s1575_s14, %s1890_s14   ;;  %s1537_s13 = sphi %s1573_s13, %s1889_s13   ;;  %s1533_s12 = sphi %s1571_s12, %s1888_s12  }
   0x4   : > { %p23_p0 = scmp.ge.s32.totalorder %s22_s17, 2  ;;  %p65_p1 = scmp.ne.s32.totalorder %s1537_s13, %s1533_s12 }
   0x5   : > { %p66_p2 = scmp.eq.s32.totalorder %s1549_s16, 0  ;;  %p123_p4 = scmp.eq.s32.totalorder %s1248_s18, 1 }
   0x6   : > { %s1893_s17 = smov (%p23_p0, %s22_s17), 0  ;;  %s58_s20 = sadd.s32 1, %s1537_s13 }
   0x7   : > { %p67_p3 = por %p66_p2, %p65_p1  ;;  %s55_s19 = ssub.s32 %s1545_s15, %s1893_s17 }
   0x8   : > { %p56_p5 = scmp.eq.s32.totalorder %s55_s19, 0  ;;  %p1606_p6 = por %p123_p4, %p65_p1 }
   0x9   : > { %p1252_p7 = scmp.ge.s32.totalorder %s1549_s16, 2 }
   0xa   : > { %s1611_s22 = scalar_select %p56_p5, %s1537_s13, %s58_s20  }
   0xb   : > { %155 = sbr.rel (%p1252_p7) target bundleno = 54 (0x36), region = 20 }
  0x12   : > { %158 = sbr.rel (!%p67_p3) target bundleno = 54 (0x36), region = 24  ;;  %s160_s23 = sand.u32 (%p67_p3), 1, %s1537_s13  }
  0x13   : > { %s1341_s24 = sshll.u32 (%p67_p3), %s1545_s15, 3  ;;  %s1253_s25 = sshll.u32 (%p67_p3), %s160_s23, 9 }
  0x14   : > { %s1619_s28 = scalar_lea.vmem (%p67_p3), %s1884_s1, %s1341_s24  ;;  %s1624_s29 = scalar_lea.vmem (%p67_p3), [#allocation2], %s1253_s25 }
  0x15   : > { %v319_v0 = vld [vmem:[%s1619_s28] sm:$0xff] (%p67_p3)  ;;  %v321_v1 = vld [vmem:[%s1619_s28 + $0x10] sm:$0xff] (%p67_p3) }
  0x16   : > { %v323_v2 = vld [vmem:[%s1619_s28 + $0x20] sm:$0xff] (%p67_p3)  ;;  %320 = vst [vmem:[%s1624_s29] sm:$0xff] (%p67_p3), %v319_v0  ;;  %322 = vst [vmem:[%s1624_s29 + $0x8] sm:$0xff] (%p67_p3), %v321_v1  ;;  %v325_v3 = vld [vmem:[%s1619_s28 + $0x30] sm:$0xff] (%p67_p3) }
  0x17   : > { %324 = vst [vmem:[%s1624_s29 + $0x10] sm:$0xff] (%p67_p3), %v323_v2  ;;  %v327_v4 = vld [vmem:[%s1619_s28 + $0x40] sm:$0xff] (%p67_p3)  ;;  %v329_v5 = vld [vmem:[%s1619_s28 + $0x50] sm:$0xff] (%p67_p3)  ;;  %326 = vst [vmem:[%s1624_s29 + $0x18] sm:$0xff] (%p67_p3), %v325_v3 }
  0x18   : > { %328 = vst [vmem:[%s1624_s29 + $0x20] sm:$0xff] (%p67_p3), %v327_v4  ;;  %330 = vst [vmem:[%s1624_s29 + $0x28] sm:$0xff] (%p67_p3), %v329_v5  ;;  %v331_v6 = vld [vmem:[%s1619_s28 + $0x60] sm:$0xff] (%p67_p3)  ;;  %v333_v7 = vld [vmem:[%s1619_s28 + $0x70] sm:$0xff] (%p67_p3) }
  0x19   : > { %v335_v8 = vld [vmem:[%s1619_s28 + $0x80] sm:$0xff]  ;;  %332 = vst [vmem:[%s1624_s29 + $0x30] sm:$0xff] %v331_v6  ;;  %334 = vst [vmem:[%s1624_s29 + $0x38] sm:$0xff] %v333_v7  ;;  %v337_v9 = vld [vmem:[%s1619_s28 + $0x90] sm:$0xff] }
  0x1a   : > { %336 = vst [vmem:[%s1624_s29 + $0x40] sm:$0xff] %v335_v8  ;;  %v339_v10 = vld [vmem:[%s1619_s28 + $0xa0] sm:$0xff]  ;;  %v341_v11 = vld [vmem:[%s1619_s28 + $0xb0] sm:$0xff]  ;;  %338 = vst [vmem:[%s1624_s29 + $0x48] sm:$0xff] %v337_v9 }
  0x1b   : > { %340 = vst [vmem:[%s1624_s29 + $0x50] sm:$0xff] %v339_v10  ;;  %342 = vst [vmem:[%s1624_s29 + $0x58] sm:$0xff] %v341_v11  ;;  %v343_v12 = vld [vmem:[%s1619_s28 + $0xc0] sm:$0xff]  ;;  %v345_v13 = vld [vmem:[%s1619_s28 + $0xd0] sm:$0xff] }
  0x1c   : > { %v347_v14 = vld [vmem:[%s1619_s28 + $0xe0] sm:$0xff]  ;;  %344 = vst [vmem:[%s1624_s29 + $0x60] sm:$0xff] %v343_v12  ;;  %346 = vst [vmem:[%s1624_s29 + $0x68] sm:$0xff] %v345_v13  ;;  %v349_v15 = vld [vmem:[%s1619_s28 + $0xf0] sm:$0xff] }
  0x1d   : > { %348 = vst [vmem:[%s1624_s29 + $0x70] sm:$0xff] %v347_v14  ;;  %v351_v16 = vld [vmem:[%s1619_s28 + $0x100] sm:$0xff]  ;;  %v353_v17 = vld [vmem:[%s1619_s28 + $0x110] sm:$0xff]  ;;  %350 = vst [vmem:[%s1624_s29 + $0x78] sm:$0xff] %v349_v15 }
  0x1e   : > { %352 = vst [vmem:[%s1624_s29 + $0x80] sm:$0xff] %v351_v16  ;;  %354 = vst [vmem:[%s1624_s29 + $0x88] sm:$0xff] %v353_v17  ;;  %v355_v18 = vld [vmem:[%s1619_s28 + $0x120] sm:$0xff]  ;;  %v357_v19 = vld [vmem:[%s1619_s28 + $0x130] sm:$0xff] }
  0x1f   : > { %v359_v20 = vld [vmem:[%s1619_s28 + $0x140] sm:$0xff]  ;;  %356 = vst [vmem:[%s1624_s29 + $0x90] sm:$0xff] %v355_v18  ;;  %358 = vst [vmem:[%s1624_s29 + $0x98] sm:$0xff] %v357_v19  ;;  %v361_v21 = vld [vmem:[%s1619_s28 + $0x150] sm:$0xff] }
  0x20   : > { %360 = vst [vmem:[%s1624_s29 + $0xa0] sm:$0xff] %v359_v20  ;;  %v363_v22 = vld [vmem:[%s1619_s28 + $0x160] sm:$0xff]  ;;  %v365_v23 = vld [vmem:[%s1619_s28 + $0x170] sm:$0xff]  ;;  %362 = vst [vmem:[%s1624_s29 + $0xa8] sm:$0xff] %v361_v21 }
  0x21   : > { %364 = vst [vmem:[%s1624_s29 + $0xb0] sm:$0xff] %v363_v22  ;;  %366 = vst [vmem:[%s1624_s29 + $0xb8] sm:$0xff] %v365_v23  ;;  %v367_v24 = vld [vmem:[%s1619_s28 + $0x180] sm:$0xff]  ;;  %v369_v25 = vld [vmem:[%s1619_s28 + $0x190] sm:$0xff] }
  0x22   : > { %v371_v26 = vld [vmem:[%s1619_s28 + $0x1a0] sm:$0xff]  ;;  %368 = vst [vmem:[%s1624_s29 + $0xc0] sm:$0xff] %v367_v24  ;;  %370 = vst [vmem:[%s1624_s29 + $0xc8] sm:$0xff] %v369_v25  ;;  %v373_v27 = vld [vmem:[%s1619_s28 + $0x1b0] sm:$0xff] }
  0x23   : > { %372 = vst [vmem:[%s1624_s29 + $0xd0] sm:$0xff] %v371_v26  ;;  %v375_v28 = vld [vmem:[%s1619_s28 + $0x1c0] sm:$0xff]  ;;  %v377_v29 = vld [vmem:[%s1619_s28 + $0x1d0] sm:$0xff]  ;;  %374 = vst [vmem:[%s1624_s29 + $0xd8] sm:$0xff] %v373_v27 }
  0x24   : > { %376 = vst [vmem:[%s1624_s29 + $0xe0] sm:$0xff] %v375_v28  ;;  %378 = vst [vmem:[%s1624_s29 + $0xe8] sm:$0xff] %v377_v29  ;;  %v379_v30 = vld [vmem:[%s1619_s28 + $0x1e0] sm:$0xff]  ;;  %v381_v31 = vld [vmem:[%s1619_s28 + $0x1f0] sm:$0xff] }
  0x25   : > { %v383_v32 = vld [vmem:[%s1619_s28 + $0x200] sm:$0xff]  ;;  %380 = vst [vmem:[%s1624_s29 + $0xf0] sm:$0xff] %v379_v30  ;;  %382 = vst [vmem:[%s1624_s29 + $0xf8] sm:$0xff] %v381_v31  ;;  %v385_v33 = vld [vmem:[%s1619_s28 + $0x210] sm:$0xff] }
  0x26   : > { %384 = vst [vmem:[%s1624_s29 + $0x100] sm:$0xff] %v383_v32  ;;  %v387_v34 = vld [vmem:[%s1619_s28 + $0x220] sm:$0xff]  ;;  %v389_v35 = vld [vmem:[%s1619_s28 + $0x230] sm:$0xff]  ;;  %386 = vst [vmem:[%s1624_s29 + $0x108] sm:$0xff] %v385_v33 }
  0x27   : > { %388 = vst [vmem:[%s1624_s29 + $0x110] sm:$0xff] %v387_v34  ;;  %390 = vst [vmem:[%s1624_s29 + $0x118] sm:$0xff] %v389_v35  ;;  %v391_v36 = vld [vmem:[%s1619_s28 + $0x240] sm:$0xff]  ;;  %v393_v37 = vld [vmem:[%s1619_s28 + $0x250] sm:$0xff] }
  0x28   : > { %v395_v38 = vld [vmem:[%s1619_s28 + $0x260] sm:$0xff]  ;;  %392 = vst [vmem:[%s1624_s29 + $0x120] sm:$0xff] %v391_v36  ;;  %394 = vst [vmem:[%s1624_s29 + $0x128] sm:$0xff] %v393_v37  ;;  %v397_v39 = vld [vmem:[%s1619_s28 + $0x270] sm:$0xff] }
  0x29   : > { %396 = vst [vmem:[%s1624_s29 + $0x130] sm:$0xff] %v395_v38  ;;  %v399_v40 = vld [vmem:[%s1619_s28 + $0x280] sm:$0xff]  ;;  %v401_v41 = vld [vmem:[%s1619_s28 + $0x290] sm:$0xff]  ;;  %398 = vst [vmem:[%s1624_s29 + $0x138] sm:$0xff] %v397_v39 }
  0x2a   : > { %400 = vst [vmem:[%s1624_s29 + $0x140] sm:$0xff] %v399_v40  ;;  %402 = vst [vmem:[%s1624_s29 + $0x148] sm:$0xff] %v401_v41  ;;  %v403_v42 = vld [vmem:[%s1619_s28 + $0x2a0] sm:$0xff]  ;;  %v405_v43 = vld [vmem:[%s1619_s28 + $0x2b0] sm:$0xff] }
  0x2b   : > { %v407_v44 = vld [vmem:[%s1619_s28 + $0x2c0] sm:$0xff]  ;;  %404 = vst [vmem:[%s1624_s29 + $0x150] sm:$0xff] %v403_v42  ;;  %406 = vst [vmem:[%s1624_s29 + $0x158] sm:$0xff] %v405_v43  ;;  %v409_v45 = vld [vmem:[%s1619_s28 + $0x2d0] sm:$0xff] }
  0x2c   : > { %408 = vst [vmem:[%s1624_s29 + $0x160] sm:$0xff] %v407_v44  ;;  %v411_v46 = vld [vmem:[%s1619_s28 + $0x2e0] sm:$0xff]  ;;  %v413_v47 = vld [vmem:[%s1619_s28 + $0x2f0] sm:$0xff]  ;;  %410 = vst [vmem:[%s1624_s29 + $0x168] sm:$0xff] %v409_v45 }
  0x2d   : > { %412 = vst [vmem:[%s1624_s29 + $0x170] sm:$0xff] %v411_v46  ;;  %414 = vst [vmem:[%s1624_s29 + $0x178] sm:$0xff] %v413_v47  ;;  %v415_v48 = vld [vmem:[%s1619_s28 + $0x300] sm:$0xff]  ;;  %v417_v49 = vld [vmem:[%s1619_s28 + $0x310] sm:$0xff] }
  0x2e   : > { %v419_v50 = vld [vmem:[%s1619_s28 + $0x320] sm:$0xff]  ;;  %416 = vst [vmem:[%s1624_s29 + $0x180] sm:$0xff] %v415_v48  ;;  %418 = vst [vmem:[%s1624_s29 + $0x188] sm:$0xff] %v417_v49  ;;  %v421_v51 = vld [vmem:[%s1619_s28 + $0x330] sm:$0xff] }
  0x2f   : > { %420 = vst [vmem:[%s1624_s29 + $0x190] sm:$0xff] %v419_v50  ;;  %v423_v52 = vld [vmem:[%s1619_s28 + $0x340] sm:$0xff]  ;;  %v425_v53 = vld [vmem:[%s1619_s28 + $0x350] sm:$0xff]  ;;  %422 = vst [vmem:[%s1624_s29 + $0x198] sm:$0xff] %v421_v51 }
  0x30   : > { %424 = vst [vmem:[%s1624_s29 + $0x1a0] sm:$0xff] %v423_v52  ;;  %426 = vst [vmem:[%s1624_s29 + $0x1a8] sm:$0xff] %v425_v53  ;;  %v427_v54 = vld [vmem:[%s1619_s28 + $0x360] sm:$0xff]  ;;  %v429_v55 = vld [vmem:[%s1619_s28 + $0x370] sm:$0xff] }
  0x31   : > { %v431_v56 = vld [vmem:[%s1619_s28 + $0x380] sm:$0xff]  ;;  %428 = vst [vmem:[%s1624_s29 + $0x1b0] sm:$0xff] %v427_v54  ;;  %430 = vst [vmem:[%s1624_s29 + $0x1b8] sm:$0xff] %v429_v55  ;;  %v433_v57 = vld [vmem:[%s1619_s28 + $0x390] sm:$0xff] }
  0x32   : > { %432 = vst [vmem:[%s1624_s29 + $0x1c0] sm:$0xff] %v431_v56  ;;  %v435_v58 = vld [vmem:[%s1619_s28 + $0x3a0] sm:$0xff]  ;;  %v437_v59 = vld [vmem:[%s1619_s28 + $0x3b0] sm:$0xff]  ;;  %434 = vst [vmem:[%s1624_s29 + $0x1c8] sm:$0xff] %v433_v57 }
  0x33   : > { %436 = vst [vmem:[%s1624_s29 + $0x1d0] sm:$0xff] %v435_v58  ;;  %438 = vst [vmem:[%s1624_s29 + $0x1d8] sm:$0xff] %v437_v59  ;;  %v439_v60 = vld [vmem:[%s1619_s28 + $0x3c0] sm:$0xff]  ;;  %v441_v61 = vld [vmem:[%s1619_s28 + $0x3d0] sm:$0xff] }
  0x34   : > { %v443_v62 = vld [vmem:[%s1619_s28 + $0x3e0] sm:$0xff]  ;;  %440 = vst [vmem:[%s1624_s29 + $0x1e0] sm:$0xff] %v439_v60  ;;  %442 = vst [vmem:[%s1624_s29 + $0x1e8] sm:$0xff] %v441_v61  ;;  %v445_v63 = vld [vmem:[%s1619_s28 + $0x3f0] sm:$0xff] }
  0x35   : > { %444 = vst [vmem:[%s1624_s29 + $0x1f0] sm:$0xff] %v443_v62  ;;  %446 = vst [vmem:[%s1624_s29 + $0x1f8] sm:$0xff] %v445_v63 }
  0x36 PF: > { %p1256_p8 = scmp.ge.s32.totalorder %s1549_s16, 1  ;;  %p459_p9 = scmp.lt.s32.totalorder %s1549_s16, 3 }
  0x38   : > { %p460_p10 = pnand %p1256_p8, %p459_p9 }
  0x39   : > { %s466_s30 = sand.u32 (!%p460_p10), 1, %s1533_s12   ;;  %v1501_v0 = vld [vmem:[%s1883_s0 + $0x4] ss:$16 sps:$4 sm:$0xff] (!%p460_p10)   ;;  %v1504_v1 = vld [vmem:[%s1883_s0 + $0xc] ss:$16 sps:$4 sm:$0xff] (!%p460_p10)  }
  0x3a   : > { %463 = sbr.rel (%p460_p10) target bundleno = 365 (0x16d), region = 66  ;;  %s1257_s4 = sshll.u32 (!%p460_p10), %s466_s30, 9  ;;  %989 = vmatprep.mubr.bf16.mxu1 (!%p460_p10), %v1501_v0  ;;  %1042 = vmatprep.mubr.bf16.mxu0 (!%p460_p10), %v1504_v1 }
  0x3b   : > { %s1762_s9 = scalar_lea.vmem (!%p460_p10), [#allocation2], %s1257_s4  ;;  %s1259_s4 = sshll.u32 (!%p460_p10), %s1541_s14, 1 }
  0x3c   : > { %v1403_v2 = vld [vmem:[%s1762_s9 + $0x4] ss:$8 sps:$4 sm:$0xff] (!%p460_p10)   ;;  %v1407_v4 = vld [vmem:[%s1762_s9] ss:$8 sps:$4 sm:$0xff] (!%p460_p10)   ;;  %v1409_v6 = vld [vmem:[%s1762_s9 + $0x14] ss:$8 sps:$4 sm:$0xff] (!%p460_p10)  }
  0x3d   : > { %v1405_v3 = vld [vmem:[%s1762_s9 + $0x104] ss:$8 sps:$4 sm:$0xff] (!%p460_p10)   ;;  %957 = vmatprep.subr.bf16.mxu1 (!%p460_p10), %v1403_v2  ;;  %v1408_v5 = vld [vmem:[%s1762_s9 + $0x100] ss:$8 sps:$4 sm:$0xff] (!%p460_p10)   ;;  %v1411_v7 = vld [vmem:[%s1762_s9 + $0x114] ss:$8 sps:$4 sm:$0xff] (!%p460_p10)  }
  0x3e   : > { %1010 = vmatprep.subr.bf16.mxu0 (!%p460_p10), %v1405_v3  ;;  %958 = vmatpush1.bf16.msra.mxu1 (!%p460_p10), %v1407_v4  ;;  %v1413_v8 = vld [vmem:[%s1762_s9 + $0x10] ss:$8 sps:$4 sm:$0xff] (!%p460_p10)   ;;  %v1415_v10 = vld [vmem:[%s1762_s9 + $0x24] ss:$8 sps:$4 sm:$0xff] (!%p460_p10)   ;;  %v1419_v12 = vld [vmem:[%s1762_s9 + $0x20] ss:$8 sps:$4 sm:$0xff] (!%p460_p10)  }
  0x3f   : > { %1011 = vmatpush1.bf16.msra.mxu0 (!%p460_p10), %v1408_v5  ;;  %959 = vmatprep.subr.bf16.mxu1 (!%p460_p10), %v1409_v6  ;;  %v1414_v9 = vld [vmem:[%s1762_s9 + $0x110] ss:$8 sps:$4 sm:$0xff] (!%p460_p10)   ;;  %v1417_v11 = vld [vmem:[%s1762_s9 + $0x124] ss:$8 sps:$4 sm:$0xff] (!%p460_p10)   ;;  %v1420_v13 = vld [vmem:[%s1762_s9 + $0x120] ss:$8 sps:$4 sm:$0xff] (!%p460_p10)  }
  0x40   : > { %1012 = vmatprep.subr.bf16.mxu0 (!%p460_p10), %v1411_v7  ;;  %v1421_v14 = vld [vmem:[%s1762_s9 + $0x34] ss:$8 sps:$4 sm:$0xff] (!%p460_p10)   ;;  %v1425_v16 = vld [vmem:[%s1762_s9 + $0x30] ss:$8 sps:$4 sm:$0xff] (!%p460_p10)   ;;  %v1427_v18 = vld [vmem:[%s1762_s9 + $0x44] ss:$8 sps:$4 sm:$0xff] (!%p460_p10)  }
  0x41   : > { %v1423_v15 = vld [vmem:[%s1762_s9 + $0x134] ss:$8 sps:$4 sm:$0xff]   ;;  %v1426_v17 = vld [vmem:[%s1762_s9 + $0x130] ss:$8 sps:$4 sm:$0xff]   ;;  %v1429_v19 = vld [vmem:[%s1762_s9 + $0x144] ss:$8 sps:$4 sm:$0xff]  }
  0x42   : > { %960 = vmatpush1.bf16.msra.mxu1 %v1413_v8  ;;  %v1431_v20 = vld [vmem:[%s1762_s9 + $0x40] ss:$8 sps:$4 sm:$0xff]   ;;  %v1433_v22 = vld [vmem:[%s1762_s9 + $0x54] ss:$8 sps:$4 sm:$0xff]   ;;  %v1437_v24 = vld [vmem:[%s1762_s9 + $0x50] ss:$8 sps:$4 sm:$0xff]   ;;  %v587_v8 = vlaneseq }
  0x43   : > { %1013 = vmatpush1.bf16.msra.mxu0 %v1414_v9  ;;  %961 = vmatprep.subr.bf16.mxu1 %v1415_v10  ;;  %v1432_v21 = vld [vmem:[%s1762_s9 + $0x140] ss:$8 sps:$4 sm:$0xff]   ;;  %v1435_v23 = vld [vmem:[%s1762_s9 + $0x154] ss:$8 sps:$4 sm:$0xff]   ;;  %v1438_v25 = vld [vmem:[%s1762_s9 + $0x150] ss:$8 sps:$4 sm:$0xff]  }
  0x44   : > { %1014 = vmatprep.subr.bf16.mxu0 %v1417_v11  ;;  %v1439_v26 = vld [vmem:[%s1762_s9 + $0x64] ss:$8 sps:$4 sm:$0xff]   ;;  %v1443_v28 = vld [vmem:[%s1762_s9 + $0x60] ss:$8 sps:$4 sm:$0xff]   ;;  %v1445_v30 = vld [vmem:[%s1762_s9 + $0x74] ss:$8 sps:$4 sm:$0xff]  }
  0x45   : > { %v1441_v27 = vld [vmem:[%s1762_s9 + $0x164] ss:$8 sps:$4 sm:$0xff]   ;;  %v1444_v29 = vld [vmem:[%s1762_s9 + $0x160] ss:$8 sps:$4 sm:$0xff]   ;;  %v1447_v31 = vld [vmem:[%s1762_s9 + $0x174] ss:$8 sps:$4 sm:$0xff]  }
  0x46   : > { %962 = vmatpush1.bf16.msra.mxu1 %v1419_v12  ;;  %v1449_v32 = vld [vmem:[%s1762_s9 + $0x70] ss:$8 sps:$4 sm:$0xff]   ;;  %v1451_v34 = vld [vmem:[%s1762_s9 + $0x84] ss:$8 sps:$4 sm:$0xff]   ;;  %v1455_v36 = vld [vmem:[%s1762_s9 + $0x80] ss:$8 sps:$4 sm:$0xff]  }
  0x47   : > { %1015 = vmatpush1.bf16.msra.mxu0 %v1420_v13  ;;  %963 = vmatprep.subr.bf16.mxu1 %v1421_v14  ;;  %v1450_v33 = vld [vmem:[%s1762_s9 + $0x170] ss:$8 sps:$4 sm:$0xff]   ;;  %v1453_v35 = vld [vmem:[%s1762_s9 + $0x184] ss:$8 sps:$4 sm:$0xff]   ;;  %v1456_v37 = vld [vmem:[%s1762_s9 + $0x180] ss:$8 sps:$4 sm:$0xff]  }
  0x48   : > { %1016 = vmatprep.subr.bf16.mxu0 %v1423_v15  ;;  %v1457_v38 = vld [vmem:[%s1762_s9 + $0x94] ss:$8 sps:$4 sm:$0xff]   ;;  %v1461_v40 = vld [vmem:[%s1762_s9 + $0x90] ss:$8 sps:$4 sm:$0xff]   ;;  %v1463_v42 = vld [vmem:[%s1762_s9 + $0xa4] ss:$8 sps:$4 sm:$0xff]  }
  0x49   : > { %v1459_v39 = vld [vmem:[%s1762_s9 + $0x194] ss:$8 sps:$4 sm:$0xff]   ;;  %v1462_v41 = vld [vmem:[%s1762_s9 + $0x190] ss:$8 sps:$4 sm:$0xff]   ;;  %v1465_v43 = vld [vmem:[%s1762_s9 + $0x1a4] ss:$8 sps:$4 sm:$0xff]  }
  0x4a   : > { %964 = vmatpush1.bf16.msra.mxu1 %v1425_v16  ;;  %v1467_v44 = vld [vmem:[%s1762_s9 + $0xa0] ss:$8 sps:$4 sm:$0xff]   ;;  %v1469_v46 = vld [vmem:[%s1762_s9 + $0xb4] ss:$8 sps:$4 sm:$0xff]   ;;  %v1473_v48 = vld [vmem:[%s1762_s9 + $0xb0] ss:$8 sps:$4 sm:$0xff]  }
  0x4b   : > { %1017 = vmatpush1.bf16.msra.mxu0 %v1426_v17  ;;  %965 = vmatprep.subr.bf16.mxu1 %v1427_v18  ;;  %v1468_v45 = vld [vmem:[%s1762_s9 + $0x1a0] ss:$8 sps:$4 sm:$0xff]   ;;  %v1471_v47 = vld [vmem:[%s1762_s9 + $0x1b4] ss:$8 sps:$4 sm:$0xff]   ;;  %v1474_v49 = vld [vmem:[%s1762_s9 + $0x1b0] ss:$8 sps:$4 sm:$0xff]  }
  0x4c   : > { %1018 = vmatprep.subr.bf16.mxu0 %v1429_v19  ;;  %v1475_v50 = vld [vmem:[%s1762_s9 + $0xc4] ss:$8 sps:$4 sm:$0xff]   ;;  %v1479_v52 = vld [vmem:[%s1762_s9 + $0xc0] ss:$8 sps:$4 sm:$0xff]   ;;  %v1481_v54 = vld [vmem:[%s1762_s9 + $0xd4] ss:$8 sps:$4 sm:$0xff]  }
  0x4d   : > { %v1477_v51 = vld [vmem:[%s1762_s9 + $0x1c4] ss:$8 sps:$4 sm:$0xff]   ;;  %v1480_v53 = vld [vmem:[%s1762_s9 + $0x1c0] ss:$8 sps:$4 sm:$0xff]   ;;  %v1483_v55 = vld [vmem:[%s1762_s9 + $0x1d4] ss:$8 sps:$4 sm:$0xff]  }
  0x4e   : > { %966 = vmatpush1.bf16.msra.mxu1 %v1431_v20  ;;  %v1485_v56 = vld [vmem:[%s1762_s9 + $0xd0] ss:$8 sps:$4 sm:$0xff]   ;;  %v1487_v58 = vld [vmem:[%s1762_s9 + $0xe4] ss:$8 sps:$4 sm:$0xff]   ;;  %v1491_v60 = vld [vmem:[%s1762_s9 + $0xe0] ss:$8 sps:$4 sm:$0xff]  }
  0x4f   : > { %1019 = vmatpush1.bf16.msra.mxu0 %v1432_v21  ;;  %967 = vmatprep.subr.bf16.mxu1 %v1433_v22  ;;  %v1486_v57 = vld [vmem:[%s1762_s9 + $0x1d0] ss:$8 sps:$4 sm:$0xff]   ;;  %v1489_v59 = vld [vmem:[%s1762_s9 + $0x1e4] ss:$8 sps:$4 sm:$0xff]   ;;  %v1492_v61 = vld [vmem:[%s1762_s9 + $0x1e0] ss:$8 sps:$4 sm:$0xff]  }
  0x50   : > { %1020 = vmatprep.subr.bf16.mxu0 %v1435_v23  ;;  %v1493_v62 = vld [vmem:[%s1762_s9 + $0xf4] ss:$8 sps:$4 sm:$0xff]   ;;  %v1497_v0 = vld [vmem:[%s1762_s9 + $0xf0] ss:$8 sps:$4 sm:$0xff]   ;;  %p507_p11 = scmp.lt.s32.totalorder %s1259_s4, 3  ;;  %v588_v9 = vshrl.u32 %v587_v8, 7 }
  0x51   : > { %v1495_v63 = vld [vmem:[%s1762_s9 + $0x1f4] ss:$8 sps:$4 sm:$0xff]   ;;  %v1498_v1 = vld [vmem:[%s1762_s9 + $0x1f0] ss:$8 sps:$4 sm:$0xff]   ;;  %s1258_s8 = sshll.u32 %s466_s30, 5  ;;  %s1346_s12 = sshll.u32 (%p1606_p6), %s1541_s14, 3 }
  0x52   : > { %968 = vmatpush1.bf16.msra.mxu1 %v1437_v24  ;;  %v1499_v2 = vld [vmem:[%s1883_s0] ss:$16 sps:$4 sm:$0xff]   ;;  %v1502_v3 = vld [vmem:[%s1883_s0 + $0x8] ss:$16 sps:$4 sm:$0xff]   ;;  %v1505_v4 = vld [vmem:[%s1883_s0 + $0x24] ss:$16 sps:$4 sm:$0xff]   ;;  %s1111_s11 = scalar_lea.vmem (%p1606_p6), %s1886_s3, %s1346_s12 }
  0x53   : > { %1021 = vmatpush1.bf16.msra.mxu0 %v1438_v25  ;;  %969 = vmatprep.subr.bf16.mxu1 %v1439_v26  ;;  %v1507_v5 = vld [vmem:[%s1883_s0 + $0x2c] ss:$16 sps:$4 sm:$0xff]   ;;  %v1509_v6 = vld [vmem:[%s1883_s0 + $0x20] ss:$16 sps:$4 sm:$0xff]   ;;  %v1510_v7 = vld [vmem:[%s1883_s0 + $0x28] ss:$16 sps:$4 sm:$0xff]  }
  0x54   : > { %1022 = vmatprep.subr.bf16.mxu0 %v1441_v27  ;;  %s1895_s4 = smov (!%p507_p11, %s1259_s4), 3  ;;  %v589_v10 = vsub.s32 0, %v588_v9  ;;  %v593_v12 = vsub.s32 1, %v588_v9  ;;  %s1852_s9 = scalar_lea.vmem [#allocation3], %s1258_s8 }
  0x55   : > { %s509_s7 = scalar_lea.vmem %s1885_s2, %s1895_s4 }
  0x56   : > { %970 = vmatpush1.bf16.msra.mxu1 %v1443_v28  ;;  %v585_v11 = vld [vmem:[%s509_s7] sm:$0x3] }
  0x57   : > { %1023 = vmatpush1.bf16.msra.mxu0 %v1444_v29  ;;  %971 = vmatprep.subr.bf16.mxu1 %v1445_v30  ;;  %v590_v13 = vrot.slane %v585_v11, %v589_v10  ;;  %v594_v14 = vrot.slane %v585_v11, %v593_v12 }
  0x58   : > { %1024 = vmatprep.subr.bf16.mxu0 %v1447_v31 }
  0x5a   : > { %972 = vmatpush1.bf16.msra.mxu1 %v1449_v32 }
  0x5b   : > { %1025 = vmatpush1.bf16.msra.mxu0 %v1450_v33  ;;  %973 = vmatprep.subr.bf16.mxu1 %v1451_v34 }
  0x5c   : > { %1026 = vmatprep.subr.bf16.mxu0 %v1453_v35 }
  0x5e   : > { %974 = vmatpush1.bf16.msra.mxu1 %v1455_v36 }
  0x5f   : > { %1027 = vmatpush1.bf16.msra.mxu0 %v1456_v37  ;;  %975 = vmatprep.subr.bf16.mxu1 %v1457_v38 }
  0x60   : > { %1028 = vmatprep.subr.bf16.mxu0 %v1459_v39 }
  0x62   : > { %976 = vmatpush1.bf16.msra.mxu1 %v1461_v40 }
  0x63   : > { %1029 = vmatpush1.bf16.msra.mxu0 %v1462_v41  ;;  %977 = vmatprep.subr.bf16.mxu1 %v1463_v42 }
  0x64   : > { %1030 = vmatprep.subr.bf16.mxu0 %v1465_v43 }
  0x66   : > { %978 = vmatpush1.bf16.msra.mxu1 %v1467_v44 }
  0x67   : > { %1031 = vmatpush1.bf16.msra.mxu0 %v1468_v45  ;;  %979 = vmatprep.subr.bf16.mxu1 %v1469_v46 }
  0x68   : > { %1032 = vmatprep.subr.bf16.mxu0 %v1471_v47 }
  0x6a   : > { %980 = vmatpush1.bf16.msra.mxu1 %v1473_v48 }
  0x6b   : > { %1033 = vmatpush1.bf16.msra.mxu0 %v1474_v49  ;;  %981 = vmatprep.subr.bf16.mxu1 %v1475_v50 }
  0x6c   : > { %1034 = vmatprep.subr.bf16.mxu0 %v1477_v51 }
  0x6e   : > { %982 = vmatpush1.bf16.msra.mxu1 %v1479_v52 }
  0x6f   : > { %1035 = vmatpush1.bf16.msra.mxu0 %v1480_v53  ;;  %983 = vmatprep.subr.bf16.mxu1 %v1481_v54 }
  0x70   : > { %1036 = vmatprep.subr.bf16.mxu0 %v1483_v55 }
  0x72   : > { %984 = vmatpush1.bf16.msra.mxu1 %v1485_v56 }
  0x73   : > { %1037 = vmatpush1.bf16.msra.mxu0 %v1486_v57  ;;  %985 = vmatprep.subr.bf16.mxu1 %v1487_v58 }
  0x74   : > { %1038 = vmatprep.subr.bf16.mxu0 %v1489_v59 }
  0x76   : > { %986 = vmatpush1.bf16.msra.mxu1 %v1491_v60 }
  0x77   : > { %1039 = vmatpush1.bf16.msra.mxu0 %v1492_v61  ;;  %987 = vmatprep.subr.bf16.mxu1 %v1493_v62 }
  0x78   : > { %1040 = vmatprep.subr.bf16.mxu0 %v1495_v63 }
  0x7a   : > { %988 = vmatpush1.bf16.msra.mxu1 %v1497_v0 }
  0x7b   : > { %1041 = vmatpush1.bf16.msra.mxu0 %v1498_v1 }
  0x7d   : > { %990 = vmatmul.mubr.bf16.vlgmr.msra.gmra.mrb[0].mxu1 %v1499_v2 }
  0x7e   : > { %1043 = vmatmul.mubr.bf16.vlgmr.msra.gmra.mrb[0].mxu0 %v1502_v3  ;;  %999 = vmatprep.mubr.bf16.mxu1 %v1505_v4 }
  0x7f   : > { %1052 = vmatprep.mubr.bf16.mxu0 %v1507_v5 }
  0x85   : > { %1000 = vmatmul.mubr.bf16.gmra.mrb[4].mxu1 %v1509_v6 }
  0x86   : > { %1053 = vmatmul.mubr.bf16.gmra.mrb[4].mxu0 %v1510_v7 }
 0x150   : > { %v991_v15 = vpop.f32.mrb[0].mxu1 }
 0x151   : > { %v1044_v16 = vpop.f32.mrb[0].mxu0  ;;  %v992_v17 = vadd.f32 %v991_v15, %v590_v13  ;;  %v993_v18 = vpop.f32.mrb[1].mxu1 }
 0x152   : > { %v1046_v19 = vpop.f32.mrb[1].mxu0  ;;  %v994_v20 = vadd.f32 %v993_v18, %v594_v14  ;;  %v995_v21 = vpop.f32.mrb[2].mxu1 }
 0x153   : > { %v1048_v22 = vpop.f32.mrb[2].mxu0  ;;  %v1045_v23 = vadd.f32 %v1044_v16, %v992_v17  ;;  %v996_v24 = vadd.f32 %v995_v21, %v590_v13  ;;  %v997_v25 = vpop.f32.mrb[3].mxu1 }
 0x154   : > { %v1050_v26 = vpop.f32.mrb[3].mxu0  ;;  %v1047_v27 = vadd.f32 %v1046_v19, %v994_v20  ;;  %v998_v28 = vadd.f32 %v997_v25, %v594_v14 }
 0x155   : > { %v1063_v29 = vmax.f32 %v1045_v23, 0.0  ;;  %v1049_v30 = vadd.f32 %v1048_v22, %v996_v24 }
 0x156   : > { %v1064_v31 = vmax.f32 %v1047_v27, 0.0  ;;  %v1051_v32 = vadd.f32 %v1050_v26, %v998_v28 }
 0x157   : > { %v1065_v33 = vmax.f32 %v1049_v30, 0.0 }
 0x158   : > { %v1342_v34 = vpack.c.bf16 %v1064_v31, %v1063_v29  ;;  %v1066_v35 = vmax.f32 %v1051_v32, 0.0  ;;  %v1001_v36 = vpop.f32.mrb[4].mxu1 }
 0x159   : > { %v1054_v37 = vpop.f32.mrb[4].mxu0  ;;  %v1002_v38 = vadd.f32 %v1001_v36, %v590_v13  ;;  %v1003_v39 = vpop.f32.mrb[5].mxu1 }
 0x15a   : > { %v1056_v40 = vpop.f32.mrb[5].mxu0  ;;  %1095 = vst [vmem:[%s1852_s9] sm:$0xff] %v1342_v34  ;;  %v1343_v41 = vpack.c.bf16 %v1066_v35, %v1065_v33  ;;  %v1004_v42 = vadd.f32 %v1003_v39, %v594_v14  ;;  %v1005_v43 = vpop.f32.mrb[6].mxu1 }
 0x15b   : > { %v1058_v44 = vpop.f32.mrb[6].mxu0  ;;  %v1055_v45 = vadd.f32 %v1054_v37, %v1002_v38  ;;  %v1006_v46 = vadd.f32 %v1005_v43, %v590_v13  ;;  %v1007_v47 = vpop.f32.mrb[7].mxu1 }
 0x15c   : > { %v1060_v48 = vpop.f32.mrb[7].mxu0  ;;  %1096 = vst [vmem:[%s1852_s9 + $0x8] sm:$0xff] %v1343_v41  ;;  %v1057_v49 = vadd.f32 %v1056_v40, %v1004_v42  ;;  %v1008_v50 = vadd.f32 %v1007_v47, %v594_v14 }
 0x15d   : > { %v1067_v51 = vmax.f32 %v1055_v45, 0.0  ;;  %v1059_v52 = vadd.f32 %v1058_v44, %v1006_v46 }
 0x15e   : > { %v1068_v53 = vmax.f32 %v1057_v49, 0.0  ;;  %v1061_v54 = vadd.f32 %v1060_v48, %v1008_v50  ;;  %1105 = sbr.rel (!%p1606_p6) target bundleno = 365 (0x16d), region = 74 }
 0x15f   : > { %v1069_v55 = vmax.f32 %v1059_v52, 0.0 }
 0x160   : > { %v1344_v56 = vpack.c.bf16 %v1068_v53, %v1067_v51  ;;  %v1070_v57 = vmax.f32 %v1061_v54, 0.0 }
 0x161   : > { %v1145_v59 = vld [vmem:[%s1852_s9] sm:$0xff] (%p1606_p6) }
 0x162   : > { %1097 = vst [vmem:[%s1852_s9 + $0x10] sm:$0xff] %v1344_v56  ;;  %v1345_v58 = vpack.c.bf16 %v1070_v57, %v1069_v55  ;;  %1146 = vst [vmem:[%s1111_s11] sm:$0xff] (%p1606_p6), %v1145_v59 }
 0x163   : > { %v1147_v60 = vld [vmem:[%s1852_s9 + $0x8] sm:$0xff] (%p1606_p6) }
 0x164   : > { %1098 = vst [vmem:[%s1852_s9 + $0x18] sm:$0xff] %v1345_v58  ;;  %1148 = vst [vmem:[%s1111_s11 + $0x10] sm:$0xff] (%p1606_p6), %v1147_v60 }
 0x169   : > { %v1149_v61 = vld [vmem:[%s1852_s9 + $0x10] sm:$0xff] }
 0x16a   : > { %1150 = vst [vmem:[%s1111_s11 + $0x20] sm:$0xff] %v1149_v61 }
 0x16b   : > { %v1151_v62 = vld [vmem:[%s1852_s9 + $0x18] sm:$0xff] }
 0x16c   : > { %1152 = vst [vmem:[%s1111_s11 + $0x30] sm:$0xff] %v1151_v62 }
 0x16d PF: > { %s13_s16 = sadd.s32 1, %s1549_s16   ;;  %s1888_s12 = smov %s1537_s13 }
 0x16e   : > { %p10_p12 = scmp.ge.s32.totalorder %s13_s16, 4   ;;  %s1889_s13 = smov %s1611_s22 }
 0x16f   : > { %s1890_s14 = smov %s1545_s15  ;;  %s1891_s15 = smov %s1893_s17 }
 0x170   :  { %12 = sbr.rel (!%p10_p12) target bundleno = 3 (0x3), region = 149 }

// kernel: fwd.57
= control target key start
LH: loop header
LB: loop body
LE: loop exit
PB: predicated region body
PF: predicated region fallthrough
CT: control target
= control target key end

     0   :  { %v899_v39 = vmov 0   ;;  %vm521_vm0 = vcmask 326656   ;;  %vm525_vm1 = vcmask 1043456   ;;  %s1126_s1 = inlined_call_operand.vmem [shape: bf16[936,128], index: 1, kind: input, shape index: {}]   ;;  %s1127_s0 = inlined_call_operand.vmem [shape: bf16[8,936], index: 0, kind: input, shape index: {}]   ;;  %s1128_s2 = inlined_call_operand.vmem [shape: f32[1,128], index: 2, kind: input, shape index: {}]   ;;  %s1129_s3 = inlined_call_operand.vmem [shape: bf16[8,128], index: 3, kind: output, shape index: {}]  }
   0x1   :  { %v832_v0 = vld [vmem:[%s1126_s1 + $0x40] sm:$0xff]   ;;  %v836_v4 = vld [vmem:[%s1126_s1 + $0x48] sm:$0xff]   ;;  %v840_v8 = vld [vmem:[%s1126_s1 + $0x50] sm:$0xff]  }
   0x2   :  { %v833_v1 = vld [vmem:[%s1126_s1 + $0xc0] sm:$0xff]   ;;  %765 = vmatprep.subr.bf16.mxu0 %v832_v0  ;;  %v837_v5 = vld [vmem:[%s1126_s1 + $0xc8] sm:$0xff]   ;;  %v841_v9 = vld [vmem:[%s1126_s1 + $0xd0] sm:$0xff]  }
   0x3   :  { %v834_v2 = vld [vmem:[%s1126_s1] sm:$0xff]   ;;  %787 = vmatprep.subr.bf16.mxu1 %v833_v1  ;;  %v838_v6 = vld [vmem:[%s1126_s1 + $0x8] sm:$0xff]   ;;  %v842_v10 = vld [vmem:[%s1126_s1 + $0x10] sm:$0xff]  }
   0x4   :  { %v835_v3 = vld [vmem:[%s1126_s1 + $0x80] sm:$0xff]   ;;  %766 = vmatpush3.bf16.msra.mxu0 %v834_v2  ;;  %v839_v7 = vld [vmem:[%s1126_s1 + $0x88] sm:$0xff]   ;;  %v843_v11 = vld [vmem:[%s1126_s1 + $0x90] sm:$0xff]  }
   0x5   :  { %788 = vmatpush3.bf16.msra.mxu1 %v835_v3  ;;  %767 = vmatprep.subr.bf16.mxu0 %v836_v4  ;;  %v844_v12 = vld [vmem:[%s1126_s1 + $0x58] sm:$0xff]   ;;  %v848_v16 = vld [vmem:[%s1126_s1 + $0x60] sm:$0xff]   ;;  %v852_v20 = vld [vmem:[%s1126_s1 + $0x68] sm:$0xff]  }
   0x6   :  { %789 = vmatprep.subr.bf16.mxu1 %v837_v5  ;;  %v845_v13 = vld [vmem:[%s1126_s1 + $0xd8] sm:$0xff]   ;;  %v849_v17 = vld [vmem:[%s1126_s1 + $0xe0] sm:$0xff]   ;;  %v853_v21 = vld [vmem:[%s1126_s1 + $0xe8] sm:$0xff]  }
   0x7   :  { %v846_v14 = vld [vmem:[%s1126_s1 + $0x18] sm:$0xff]   ;;  %v850_v18 = vld [vmem:[%s1126_s1 + $0x20] sm:$0xff]   ;;  %v854_v22 = vld [vmem:[%s1126_s1 + $0x28] sm:$0xff]  }
   0x8   :  { %768 = vmatpush3.bf16.msra.mxu0 %v838_v6  ;;  %v847_v15 = vld [vmem:[%s1126_s1 + $0x98] sm:$0xff]   ;;  %v851_v19 = vld [vmem:[%s1126_s1 + $0xa0] sm:$0xff]   ;;  %v855_v23 = vld [vmem:[%s1126_s1 + $0xa8] sm:$0xff]  }
   0x9   :  { %790 = vmatpush3.bf16.msra.mxu1 %v839_v7  ;;  %769 = vmatprep.subr.bf16.mxu0 %v840_v8  ;;  %v856_v24 = vld [vmem:[%s1126_s1 + $0x70] sm:$0xff]   ;;  %v860_v28 = vld [vmem:[%s1126_s1 + $0x78] sm:$0xff]   ;;  %v15_v32 = vld [vmem:[%s1127_s0] sm:$0xff] }
   0xa   :  { %791 = vmatprep.subr.bf16.mxu1 %v841_v9  ;;  %v857_v25 = vld [vmem:[%s1126_s1 + $0xf0] sm:$0xff]   ;;  %v861_v29 = vld [vmem:[%s1126_s1 + $0xf8] sm:$0xff]   ;;  %v16_v33 = vld [vmem:[%s1127_s0 + $0x8] sm:$0xff]  ;;  %v697_v34 = vcombine.low %v15_v32, %v15_v32  ;;  %v698_v35 = vcombine.high %v15_v32, %v15_v32 }
   0xb   :  { %v858_v26 = vld [vmem:[%s1126_s1 + $0x30] sm:$0xff]   ;;  %v862_v30 = vld [vmem:[%s1126_s1 + $0x38] sm:$0xff]   ;;  %v699_v36 = vcombine.low %v16_v33, %v16_v33  ;;  %v700_v37 = vcombine.high %v16_v33, %v16_v33  ;;  %v868_v38 = vld [vmem:[%s1126_s1 + $0x140] sm:$0xff]  }
   0xc   :  { %770 = vmatpush3.bf16.msra.mxu0 %v842_v10  ;;  %v859_v27 = vld [vmem:[%s1126_s1 + $0xb0] sm:$0xff]   ;;  %v863_v31 = vld [vmem:[%s1126_s1 + $0xb8] sm:$0xff]   ;;  %v869_v40 = vld [vmem:[%s1126_s1 + $0x100] sm:$0xff]   ;;  %561 = vmatprep.mubr.bf16.mxu0 %v698_v35 }
   0xd   :  { %792 = vmatpush3.bf16.msra.mxu1 %v843_v11  ;;  %771 = vmatprep.subr.bf16.mxu0 %v844_v12  ;;  %v870_v41 = vld [vmem:[%s1126_s1 + $0x180] sm:$0xff]   ;;  %v871_v42 = vld [vmem:[%s1126_s1 + $0x148] sm:$0xff]   ;;  %v874_v45 = vld [vmem:[%s1126_s1 + $0x150] sm:$0xff]  }
   0xe   :  { %793 = vmatprep.subr.bf16.mxu1 %v845_v13  ;;  %601 = vmatprep.mubr.bf16.mxu1 %v700_v37  ;;  %v872_v43 = vld [vmem:[%s1126_s1 + $0x108] sm:$0xff]   ;;  %v876_v46 = vld [vmem:[%s1126_s1 + $0x190] sm:$0xff]   ;;  %v877_v48 = vld [vmem:[%s1126_s1 + $0x158] sm:$0xff]  }
   0xf   :  { %v873_v44 = vld [vmem:[%s1126_s1 + $0x188] sm:$0xff]   ;;  %v875_v47 = vld [vmem:[%s1126_s1 + $0x110] sm:$0xff]   ;;  %v879_v49 = vld [vmem:[%s1126_s1 + $0x198] sm:$0xff]  }
  0x10   :  { %772 = vmatpush3.bf16.msra.mxu0 %v846_v14  ;;  %v878_v50 = vld [vmem:[%s1126_s1 + $0x118] sm:$0xff]   ;;  %v880_v51 = vld [vmem:[%s1126_s1 + $0x160] sm:$0xff]   ;;  %v883_v54 = vld [vmem:[%s1126_s1 + $0x168] sm:$0xff]  }
  0x11   :  { %794 = vmatpush3.bf16.msra.mxu1 %v847_v15  ;;  %773 = vmatprep.subr.bf16.mxu0 %v848_v16  ;;  %v882_v52 = vld [vmem:[%s1126_s1 + $0x1a0] sm:$0xff]   ;;  %v885_v55 = vld [vmem:[%s1126_s1 + $0x1a8] sm:$0xff]   ;;  %v886_v57 = vld [vmem:[%s1126_s1 + $0x170] sm:$0xff]  }
  0x12   :  { %795 = vmatprep.subr.bf16.mxu1 %v849_v17  ;;  %v881_v53 = vld [vmem:[%s1126_s1 + $0x120] sm:$0xff]   ;;  %v884_v56 = vld [vmem:[%s1126_s1 + $0x128] sm:$0xff]   ;;  %v17_v58 = vld [vmem:[%s1127_s0 + $0x10] sm:$0xff] }
  0x13   :  { %v888_v59 = vld [vmem:[%s1126_s1 + $0x1b0] sm:$0xff]   ;;  %v702_v60 = vcombine.high %v17_v58, %v17_v58  ;;  %v889_v62 = vld [vmem:[%s1126_s1 + $0x178] sm:$0xff]   ;;  %v701_v3 = vcombine.low %v17_v58, %v17_v58  ;;  %v894_v4 = vld [vmem:[%s1126_s1 + $0x1c0] sm:$0xff]  }
  0x14   :  { %774 = vmatpush3.bf16.msra.mxu0 %v850_v18  ;;  %v887_v61 = vld [vmem:[%s1126_s1 + $0x130] sm:$0xff]   ;;  %v18_v63 = vld [vmem:[%s1127_s0 + $0x18] sm:$0xff]  ;;  %v895_v5 = vld [vmem:[%s1126_s1 + $0x1c8] sm:$0xff]  }
  0x15   :  { %796 = vmatpush3.bf16.msra.mxu1 %v851_v19  ;;  %775 = vmatprep.subr.bf16.mxu0 %v852_v20  ;;  %v704_v0 = vcombine.high %v18_v63, %v18_v63  ;;  %v891_v1 = vld [vmem:[%s1126_s1 + $0x1b8] sm:$0xff]   ;;  %v896_v6 = vld [vmem:[%s1126_s1 + $0x1d0] ss:$0 sps:$4 sm:$0xff]   ;;  %v703_v8 = vcombine.low %v18_v63, %v18_v63  ;;  %v696_v11 = vld [vmem:[%s1128_s2] ss:$0 sm:$0xff] }
  0x16   :  { %797 = vmatprep.subr.bf16.mxu1 %v853_v21  ;;  %v890_v2 = vld [vmem:[%s1126_s1 + $0x138] sm:$0xff]   ;;  %v527_v7 = vsel %vm525_vm1, %v896_v6, 0 }
  0x18   :  { %776 = vmatpush3.bf16.msra.mxu0 %v854_v22 }
  0x19   :  { %798 = vmatpush3.bf16.msra.mxu1 %v855_v23  ;;  %777 = vmatprep.subr.bf16.mxu0 %v856_v24 }
  0x1a   :  { %799 = vmatprep.subr.bf16.mxu1 %v857_v25 }
  0x1c   :  { %778 = vmatpush3.bf16.msra.mxu0 %v858_v26 }
  0x1d   :  { %800 = vmatpush3.bf16.msra.mxu1 %v859_v27  ;;  %779 = vmatprep.subr.bf16.mxu0 %v860_v28 }
  0x1e   :  { %801 = vmatprep.subr.bf16.mxu1 %v861_v29 }
  0x20   :  { %780 = vmatpush3.bf16.msra.mxu0 %v862_v30 }
  0x21   :  { %802 = vmatpush3.bf16.msra.mxu1 %v863_v31  ;;  %809 = vmatprep.subr.bf16.mxu0 %v868_v38 }
  0x22   :  { %649 = vmatprep.subr.bf16.mxu1 %v899_v39 }
  0x23   :  { %562 = vmatmul.mubr.bf16.vlgmr.msra.gmra.mrb[0].mxu0 %v697_v34 }
  0x24   :  { %602 = vmatmul.mubr.bf16.vlgmr.msra.gmra.mrb[0].mxu1 %v699_v36  ;;  %810 = vmatpush3.bf16.msra.mxu0 %v869_v40 }
  0x25   :  { %650 = vmatpush1.bf16.msra.mxu1 %v870_v41  ;;  %811 = vmatprep.subr.bf16.mxu0 %v871_v42 }
  0x26   :  { %651 = vmatprep.subr.bf16.mxu1 %v899_v39  ;;  %641 = vmatprep.mubr.bf16.mxu0 %v702_v60 }
  0x27   :  { %764 = vmatprep.mubr.msk.bf16.mxu1 %vm521_vm0, %v704_v0 }
  0x28   :  { %812 = vmatpush3.bf16.msra.mxu0 %v872_v43 }
  0x29   :  { %652 = vmatpush1.bf16.msra.mxu1 %v873_v44  ;;  %813 = vmatprep.subr.bf16.mxu0 %v874_v45 }
  0x2a   :  { %653 = vmatprep.subr.bf16.mxu1 %v899_v39 }
  0x2c   :  { %814 = vmatpush3.bf16.msra.mxu0 %v875_v47 }
  0x2d   :  { %654 = vmatpush1.bf16.msra.mxu1 %v876_v46  ;;  %815 = vmatprep.subr.bf16.mxu0 %v877_v48 }
  0x2e   :  { %655 = vmatprep.subr.bf16.mxu1 %v899_v39 }
  0x30   :  { %816 = vmatpush3.bf16.msra.mxu0 %v878_v50 }
  0x31   :  { %656 = vmatpush1.bf16.msra.mxu1 %v879_v49  ;;  %817 = vmatprep.subr.bf16.mxu0 %v880_v51 }
  0x32   :  { %657 = vmatprep.subr.bf16.mxu1 %v899_v39 }
  0x34   :  { %818 = vmatpush3.bf16.msra.mxu0 %v881_v53 }
  0x35   :  { %658 = vmatpush1.bf16.msra.mxu1 %v882_v52  ;;  %819 = vmatprep.subr.bf16.mxu0 %v883_v54 }
  0x36   :  { %659 = vmatprep.subr.bf16.mxu1 %v899_v39 }
  0x38   :  { %820 = vmatpush3.bf16.msra.mxu0 %v884_v56 }
  0x39   :  { %660 = vmatpush1.bf16.msra.mxu1 %v885_v55  ;;  %821 = vmatprep.subr.bf16.mxu0 %v886_v57 }
  0x3a   :  { %661 = vmatprep.subr.bf16.mxu1 %v899_v39 }
  0x3c   :  { %822 = vmatpush3.bf16.msra.mxu0 %v887_v61 }
  0x3d   :  { %662 = vmatpush1.bf16.msra.mxu1 %v888_v59  ;;  %823 = vmatprep.subr.bf16.mxu0 %v889_v62 }
  0x3e   :  { %663 = vmatprep.subr.bf16.mxu1 %v899_v39 }
  0x40   :  { %824 = vmatpush3.bf16.msra.mxu0 %v890_v2 }
  0x41   :  { %664 = vmatpush1.bf16.msra.mxu1 %v891_v1 }
  0x42   :  { %665 = vmatprep.subr.bf16.mxu1 %v899_v39 }
  0x43   :  { %642 = vmatmul.mubr.bf16.vlgmr.msra.gmra.mrb[4].mxu0 %v701_v3 }
  0x45   :  { %666 = vmatpush1.bf16.msra.mxu1 %v894_v4 }
  0x46   :  { %667 = vmatprep.subr.bf16.mxu1 %v899_v39 }
  0x49   :  { %668 = vmatpush1.bf16.msra.mxu1 %v895_v5 }
  0x4a   :  { %669 = vmatprep.subr.bf16.mxu1 %v899_v39 }
  0x4d   :  { %670 = vmatpush1.bf16.msra.mxu1 %v527_v7 }
  0x50   :  { %682 = vmatmul.mubr.bf16.vlgmr.msra.gmra.mrb[4].mxu1 %v703_v8 }
  0xf6   :  { %v781_v9 = vpop.f32.mrb[0].mxu0 }
  0xf7   :  { %v803_v10 = vpop.f32.mrb[0].mxu1  ;;  %v782_v12 = vpop.f32.mrb[1].mxu0 }
  0xf8   :  { %v804_v13 = vpop.f32.mrb[1].mxu1  ;;  %v783_v14 = vadd.f32 %v782_v12, %v781_v9  ;;  %v784_v17 = vpop.f32.mrb[2].mxu0 }
  0xf9   :  { %v805_v15 = vadd.f32 %v804_v13, %v803_v10  ;;  %v806_v16 = vpop.f32.mrb[2].mxu1  ;;  %v785_v19 = vpop.f32.mrb[3].mxu0 }
  0xfa   :  { %v807_v18 = vpop.f32.mrb[3].mxu1  ;;  %v564_v20 = vadd.f32 %v783_v14, %v696_v11 }
  0xfc   :  { %v604_v21 = vadd.f32 %v805_v15, %v564_v20 }
 0x116   :  { %v825_v22 = vpop.f32.mrb[4].mxu0 }
 0x117   :  { %v826_v23 = vpop.f32.mrb[5].mxu0 }
 0x118   :  { %v827_v24 = vadd.f32 %v826_v23, %v825_v22  ;;  %v828_v25 = vpop.f32.mrb[6].mxu0 }
 0x119   :  { %v829_v26 = vpop.f32.mrb[7].mxu0 }
 0x11a   :  { %v644_v27 = vadd.f32 %v827_v24, %v604_v21 }
 0x123   :  { %v683_v28 = vpop.f32.mrb[4].mxu1 }
 0x124   :  { %v684_v29 = vadd.f32 %v683_v28, %v644_v27  ;;  %v685_v30 = vpop.f32.mrb[5].mxu1 }
 0x125   :  { %v686_v31 = vpop.f32.mrb[6].mxu1 }
 0x126   :  { %v689_v32 = vmax.f32 %v684_v29, 0.0  ;;  %v687_v33 = vpop.f32.mrb[7].mxu1 }
 0x128   :  { %v690_v34 = vpack.c.bf16 %v689_v32, %v689_v32 }
 0x12a   :  { %691 = vst [vmem:[%s1129_s3] sm:$0xf] %v690_v34 }

// kernel: fwd.60
= control target key start
LH: loop header
LB: loop body
LE: loop exit
PB: predicated region body
PF: predicated region fallthrough
CT: control target
= control target key end

     0   :  { %v82_v0 = vmov 0   ;;  %vm29_vm0 = vcmask 850944   ;;  %vm55_vm1 = vcmask 846848   ;;  %s128_s1 = inlined_call_operand.vmem [shape: f32[8,1], index: 1, kind: input, shape index: {}]   ;;  %s129_s0 = inlined_call_operand.vmem [shape: bf16[9,8,104], index: 0, kind: input, shape index: {}]   ;;  %s130_s2 = inlined_call_operand.vmem [shape: bf16[8,104], index: 2, kind: output, shape index: {}]  }
   0x1   :  { %81 = vset.pattern.permute.xlu0 %v82_v0  ;;  %v47_v1 = vld [vmem:[%s128_s1] sm:$0xff]  ;;  %v77_v5 = vld [vmem:[%s129_s0 + $0x8] sm:$0xff]   ;;  %v78_v12 = vld [vmem:[%s129_s0 + $0x10] sm:$0xff]  }
   0x2   :  { %50 = vperm.xlu0 %81, %v47_v1   ;;  %v62_v2 = vld [vmem:[%s129_s0] sm:$0xff]   ;;  %v67_v6 = vunpack.c.l.bf16 %v77_v5  ;;  %v68_v10 = vunpack.c.h.bf16 %v77_v5  ;;  %v71_v14 = vunpack.c.l.bf16 %v78_v12  ;;  %v72_v17 = vunpack.c.h.bf16 %v78_v12  ;;  %v79_v19 = vld [vmem:[%s129_s0 + $0x18] sm:$0xff]  }
   0x3   :  { %v63_v3 = vunpack.c.l.bf16 %v62_v2  ;;  %v64_v4 = vunpack.c.h.bf16 %v62_v2  ;;  %v75_v21 = vunpack.c.l.bf16 %v79_v19  ;;  %v76_v24 = vunpack.c.h.bf16 %v79_v19  ;;  %v19_v26 = vld [vmem:[%s129_s0 + $0x20] sm:$0xf] }
   0x4   :  { %v33_v11 = vsel %vm29_vm0, %v67_v6, 0.0  ;;  %v35_v15 = vsel %vm29_vm0, %v68_v10, 0.0  ;;  %v37_v18 = vsel %vm29_vm0, %v71_v14, 0.0  ;;  %v39_v22 = vsel %vm29_vm0, %v72_v17, 0.0 }
   0x5   :  { %v30_v7 = vsel %vm29_vm0, %v63_v3, 0.0  ;;  %v31_v8 = vsel %vm29_vm0, %v64_v4, 0.0  ;;  %v41_v25 = vsel %vm29_vm0, %v75_v21, 0.0  ;;  %v28_v28 = vunpack.c.l.bf16 %v19_v26 }
   0x6   :  { %v32_v9 = vadd.f32 %v31_v8, %v30_v7  ;;  %v43_v29 = vsel %vm29_vm0, %v76_v24, 0.0 }
   0x7   :  { %v45_v31 = vsel %vm29_vm0, %v28_v28, 0.0 }
   0x8   :  { %v34_v13 = vadd.f32 %v33_v11, %v32_v9 }
   0xa   :  { %v36_v16 = vadd.f32 %v35_v15, %v34_v13 }
   0xc   :  { %v38_v20 = vadd.f32 %v37_v18, %v36_v16 }
   0xe   :  { %v40_v23 = vadd.f32 %v39_v22, %v38_v20 }
  0x10   :  { %v42_v27 = vadd.f32 %v41_v25, %v40_v23 }
  0x12   :  { %v44_v30 = vadd.f32 %v43_v29, %v42_v27 }
  0x14   :  { %v46_v32 = vadd.f32 %v45_v31, %v44_v30 }
  0x81   :  { %v51_v33 = vpop.permute.xlu0 %50 }
  0x82   :  { %v53_v34 = vmul.f32 %v51_v33, %v46_v32 }
  0x84   :  { %v54_v35 = vpack.c.bf16 %v53_v34, %v53_v34 }
  0x86   :  { %56 = vst.msk [vmem:[%s130_s2] sm:$0xf] %vm55_vm1, %v54_v35 }

// kernel: fwd.63
= control target key start
LH: loop header
LB: loop body
LE: loop exit
PB: predicated region body
PF: predicated region fallthrough
CT: control target
= control target key end

     0   :  { %s1371_s15 = smov 0   ;;  %s1373_s16 = smov 0   ;;  %s1622_s0 = inlined_call_operand.vmem [shape: bf16[8,416], index: 0, kind: input, shape index: {}]   ;;  %s1623_s1 = inlined_call_operand.vmem [shape: bf16[416,1024], index: 1, kind: input, shape index: {}]   ;;  %s1624_s2 = inlined_call_operand.vmem [shape: f32[1,1024], index: 2, kind: input, shape index: {}]   ;;  %s1625_s3 = inlined_call_operand.vmem [shape: bf16[8,1024], index: 3, kind: input, shape index: {}]   ;;  %s1626_s4 = inlined_call_operand.vmem [shape: bf16[8,1024], index: 4, kind: output, shape index: {}]  }
   0x1   :  { %s1375_s17 = smov 0   ;;  %s1377_s18 = smov 0  }
   0x2   :  { %s1379_s19 = smov 0  }
   0x3 LB: > { %s23_s20 = sadd.s32 1, %s1340_s18  ;;  %p66_p1 = scmp.ne.s32.totalorder %s1332_s16, %s1328_s15  ;;  %s1344_s19 = sphi %s1379_s19, %s14_s19   ;;  %s1340_s18 = sphi %s1377_s18, %s1630_s18   ;;  %s1336_s17 = sphi %s1375_s17, %s1629_s17   ;;  %s1332_s16 = sphi %s1373_s16, %s1628_s16   ;;  %s1328_s15 = sphi %s1371_s15, %s1627_s15  }
   0x4   : > { %p24_p0 = scmp.ge.s32.totalorder %s23_s20, 4  ;;  %p67_p2 = scmp.eq.s32.totalorder %s1344_s19, 0 }
   0x5   : > { %s59_s22 = sadd.s32 1, %s1332_s16  ;;  %p1111_p5 = scmp.ge.s32.totalorder %s1344_s19, 4 }
   0x6   : > { %s1632_s20 = smov (%p24_p0, %s23_s20), 0  ;;  %p68_p3 = por %p67_p2, %p66_p1 }
   0x7   : > { %s56_s21 = ssub.s32 %s1340_s18, %s1632_s20  ;;  %182 = sbr.rel (%p1111_p5) target bundleno = 70 (0x46), region = 20 }
   0x8   : > { %p57_p4 = scmp.eq.s32.totalorder %s56_s21, 0 }
   0xa   : > { %s1406_s23 = scalar_select %p57_p4, %s1332_s16, %s59_s22  }
   0xe   : > { %185 = sbr.rel (!%p68_p3) target bundleno = 70 (0x46), region = 24  ;;  %s187_s24 = sand.u32 (%p68_p3), 1, %s1332_s16  }
   0xf   : > { %s1180_s25 = sshll.u32 (%p68_p3), %s1340_s18, 3  ;;  %s1182_s26 = smul.u32 (%p68_p3), 416, %s187_s24 }
  0x10   : > { %s1414_s29 = scalar_lea.vmem (%p68_p3), %s1623_s1, %s1180_s25 }
  0x11   : > { %v322_v0 = vld [vmem:[%s1414_s29] sm:$0xff] (%p68_p3)  ;;  %s1422_s30 = scalar_lea.vmem (%p68_p3), [#allocation2], %s1182_s26 }
  0x12   : > { %v324_v1 = vld [vmem:[%s1414_s29 + $0x20] sm:$0xff] (%p68_p3)  ;;  %323 = vst [vmem:[%s1422_s30] sm:$0xff] (%p68_p3), %v322_v0 }
  0x13   : > { %v326_v2 = vld [vmem:[%s1414_s29 + $0x40] sm:$0xff] (%p68_p3)  ;;  %325 = vst [vmem:[%s1422_s30 + $0x8] sm:$0xff] (%p68_p3), %v324_v1 }
  0x14   : > { %v328_v3 = vld [vmem:[%s1414_s29 + $0x60] sm:$0xff] (%p68_p3)  ;;  %327 = vst [vmem:[%s1422_s30 + $0x10] sm:$0xff] (%p68_p3), %v326_v2 }
  0x15   : > { %v330_v4 = vld [vmem:[%s1414_s29 + $0x80] sm:$0xff]  ;;  %329 = vst [vmem:[%s1422_s30 + $0x18] sm:$0xff] %v328_v3 }
  0x16   : > { %v332_v5 = vld [vmem:[%s1414_s29 + $0xa0] sm:$0xff]  ;;  %331 = vst [vmem:[%s1422_s30 + $0x20] sm:$0xff] %v330_v4 }
  0x17   : > { %333 = vst [vmem:[%s1422_s30 + $0x28] sm:$0xff] %v332_v5  ;;  %v334_v6 = vld [vmem:[%s1414_s29 + $0xc0] sm:$0xff] }
  0x18   : > { %v336_v7 = vld [vmem:[%s1414_s29 + $0xe0] sm:$0xff]  ;;  %335 = vst [vmem:[%s1422_s30 + $0x30] sm:$0xff] %v334_v6 }
  0x19   : > { %v338_v8 = vld [vmem:[%s1414_s29 + $0x100] sm:$0xff]  ;;  %337 = vst [vmem:[%s1422_s30 + $0x38] sm:$0xff] %v336_v7 }
  0x1a   : > { %339 = vst [vmem:[%s1422_s30 + $0x40] sm:$0xff] %v338_v8  ;;  %v340_v9 = vld [vmem:[%s1414_s29 + $0x120] sm:$0xff] }
  0x1b   : > { %v342_v10 = vld [vmem:[%s1414_s29 + $0x140] sm:$0xff]  ;;  %341 = vst [vmem:[%s1422_s30 + $0x48] sm:$0xff] %v340_v9 }
  0x1c   : > { %v344_v11 = vld [vmem:[%s1414_s29 + $0x160] sm:$0xff]  ;;  %343 = vst [vmem:[%s1422_s30 + $0x50] sm:$0xff] %v342_v10 }
  0x1d   : > { %345 = vst [vmem:[%s1422_s30 + $0x58] sm:$0xff] %v344_v11  ;;  %v346_v12 = vld [vmem:[%s1414_s29 + $0x180] sm:$0xff] }
  0x1e   : > { %v348_v13 = vld [vmem:[%s1414_s29 + $0x1a0] sm:$0xff]  ;;  %347 = vst [vmem:[%s1422_s30 + $0x60] sm:$0xff] %v346_v12 }
  0x1f   : > { %v350_v14 = vld [vmem:[%s1414_s29 + $0x1c0] sm:$0xff]  ;;  %349 = vst [vmem:[%s1422_s30 + $0x68] sm:$0xff] %v348_v13 }
  0x20   : > { %351 = vst [vmem:[%s1422_s30 + $0x70] sm:$0xff] %v350_v14  ;;  %v352_v15 = vld [vmem:[%s1414_s29 + $0x1e0] sm:$0xff] }
  0x21   : > { %v354_v16 = vld [vmem:[%s1414_s29 + $0x200] sm:$0xff]  ;;  %353 = vst [vmem:[%s1422_s30 + $0x78] sm:$0xff] %v352_v15 }
  0x22   : > { %v356_v17 = vld [vmem:[%s1414_s29 + $0x220] sm:$0xff]  ;;  %355 = vst [vmem:[%s1422_s30 + $0x80] sm:$0xff] %v354_v16 }
  0x23   : > { %357 = vst [vmem:[%s1422_s30 + $0x88] sm:$0xff] %v356_v17  ;;  %v358_v18 = vld [vmem:[%s1414_s29 + $0x240] sm:$0xff] }
  0x24   : > { %v360_v19 = vld [vmem:[%s1414_s29 + $0x260] sm:$0xff]  ;;  %359 = vst [vmem:[%s1422_s30 + $0x90] sm:$0xff] %v358_v18 }
  0x25   : > { %v362_v20 = vld [vmem:[%s1414_s29 + $0x280] sm:$0xff]  ;;  %361 = vst [vmem:[%s1422_s30 + $0x98] sm:$0xff] %v360_v19 }
  0x26   : > { %363 = vst [vmem:[%s1422_s30 + $0xa0] sm:$0xff] %v362_v20  ;;  %v364_v21 = vld [vmem:[%s1414_s29 + $0x2a0] sm:$0xff] }
  0x27   : > { %v366_v22 = vld [vmem:[%s1414_s29 + $0x2c0] sm:$0xff]  ;;  %365 = vst [vmem:[%s1422_s30 + $0xa8] sm:$0xff] %v364_v21 }
  0x28   : > { %v368_v23 = vld [vmem:[%s1414_s29 + $0x2e0] sm:$0xff]  ;;  %367 = vst [vmem:[%s1422_s30 + $0xb0] sm:$0xff] %v366_v22 }
  0x29   : > { %369 = vst [vmem:[%s1422_s30 + $0xb8] sm:$0xff] %v368_v23  ;;  %v370_v24 = vld [vmem:[%s1414_s29 + $0x300] sm:$0xff] }
  0x2a   : > { %v372_v25 = vld [vmem:[%s1414_s29 + $0x320] sm:$0xff]  ;;  %371 = vst [vmem:[%s1422_s30 + $0xc0] sm:$0xff] %v370_v24 }
  0x2b   : > { %v374_v26 = vld [vmem:[%s1414_s29 + $0x340] sm:$0xff]  ;;  %373 = vst [vmem:[%s1422_s30 + $0xc8] sm:$0xff] %v372_v25 }
  0x2c   : > { %375 = vst [vmem:[%s1422_s30 + $0xd0] sm:$0xff] %v374_v26  ;;  %v376_v27 = vld [vmem:[%s1414_s29 + $0x360] sm:$0xff] }
  0x2d   : > { %v378_v28 = vld [vmem:[%s1414_s29 + $0x380] sm:$0xff]  ;;  %377 = vst [vmem:[%s1422_s30 + $0xd8] sm:$0xff] %v376_v27 }
  0x2e   : > { %v380_v29 = vld [vmem:[%s1414_s29 + $0x3a0] sm:$0xff]  ;;  %379 = vst [vmem:[%s1422_s30 + $0xe0] sm:$0xff] %v378_v28 }
  0x2f   : > { %381 = vst [vmem:[%s1422_s30 + $0xe8] sm:$0xff] %v380_v29  ;;  %v382_v30 = vld [vmem:[%s1414_s29 + $0x3c0] sm:$0xff] }
  0x30   : > { %v384_v31 = vld [vmem:[%s1414_s29 + $0x3e0] sm:$0xff]  ;;  %383 = vst [vmem:[%s1422_s30 + $0xf0] sm:$0xff] %v382_v30 }
  0x31   : > { %v386_v32 = vld [vmem:[%s1414_s29 + $0x400] sm:$0xff]  ;;  %385 = vst [vmem:[%s1422_s30 + $0xf8] sm:$0xff] %v384_v31 }
  0x32   : > { %387 = vst [vmem:[%s1422_s30 + $0x100] sm:$0xff] %v386_v32  ;;  %v388_v33 = vld [vmem:[%s1414_s29 + $0x420] sm:$0xff] }
  0x33   : > { %v390_v34 = vld [vmem:[%s1414_s29 + $0x440] sm:$0xff]  ;;  %389 = vst [vmem:[%s1422_s30 + $0x108] sm:$0xff] %v388_v33 }
  0x34   : > { %v392_v35 = vld [vmem:[%s1414_s29 + $0x460] sm:$0xff]  ;;  %391 = vst [vmem:[%s1422_s30 + $0x110] sm:$0xff] %v390_v34 }
  0x35   : > { %393 = vst [vmem:[%s1422_s30 + $0x118] sm:$0xff] %v392_v35  ;;  %v394_v36 = vld [vmem:[%s1414_s29 + $0x480] sm:$0xff] }
  0x36   : > { %v396_v37 = vld [vmem:[%s1414_s29 + $0x4a0] sm:$0xff]  ;;  %395 = vst [vmem:[%s1422_s30 + $0x120] sm:$0xff] %v394_v36 }
  0x37   : > { %v398_v38 = vld [vmem:[%s1414_s29 + $0x4c0] sm:$0xff]  ;;  %397 = vst [vmem:[%s1422_s30 + $0x128] sm:$0xff] %v396_v37 }
  0x38   : > { %399 = vst [vmem:[%s1422_s30 + $0x130] sm:$0xff] %v398_v38  ;;  %v400_v39 = vld [vmem:[%s1414_s29 + $0x4e0] sm:$0xff] }
  0x39   : > { %v402_v40 = vld [vmem:[%s1414_s29 + $0x500] sm:$0xff]  ;;  %401 = vst [vmem:[%s1422_s30 + $0x138] sm:$0xff] %v400_v39 }
  0x3a   : > { %v404_v41 = vld [vmem:[%s1414_s29 + $0x520] sm:$0xff]  ;;  %403 = vst [vmem:[%s1422_s30 + $0x140] sm:$0xff] %v402_v40 }
  0x3b   : > { %405 = vst [vmem:[%s1422_s30 + $0x148] sm:$0xff] %v404_v41  ;;  %v406_v42 = vld [vmem:[%s1414_s29 + $0x540] sm:$0xff] }
  0x3c   : > { %v408_v43 = vld [vmem:[%s1414_s29 + $0x560] sm:$0xff]  ;;  %407 = vst [vmem:[%s1422_s30 + $0x150] sm:$0xff] %v406_v42 }
  0x3d   : > { %v410_v44 = vld [vmem:[%s1414_s29 + $0x580] sm:$0xff]  ;;  %409 = vst [vmem:[%s1422_s30 + $0x158] sm:$0xff] %v408_v43 }
  0x3e   : > { %411 = vst [vmem:[%s1422_s30 + $0x160] sm:$0xff] %v410_v44  ;;  %v412_v45 = vld [vmem:[%s1414_s29 + $0x5a0] sm:$0xff] }
  0x3f   : > { %v414_v46 = vld [vmem:[%s1414_s29 + $0x5c0] sm:$0xff]  ;;  %413 = vst [vmem:[%s1422_s30 + $0x168] sm:$0xff] %v412_v45 }
  0x40   : > { %v416_v47 = vld [vmem:[%s1414_s29 + $0x5e0] sm:$0xff]  ;;  %415 = vst [vmem:[%s1422_s30 + $0x170] sm:$0xff] %v414_v46 }
  0x41   : > { %417 = vst [vmem:[%s1422_s30 + $0x178] sm:$0xff] %v416_v47  ;;  %v418_v48 = vld [vmem:[%s1414_s29 + $0x600] sm:$0xff] }
  0x42   : > { %v420_v49 = vld [vmem:[%s1414_s29 + $0x620] sm:$0xff]  ;;  %419 = vst [vmem:[%s1422_s30 + $0x180] sm:$0xff] %v418_v48 }
  0x43   : > { %v422_v50 = vld [vmem:[%s1414_s29 + $0x640] sm:$0xff]  ;;  %421 = vst [vmem:[%s1422_s30 + $0x188] sm:$0xff] %v420_v49 }
  0x44   : > { %423 = vst [vmem:[%s1422_s30 + $0x190] sm:$0xff] %v422_v50  ;;  %v424_v51 = vld [vmem:[%s1414_s29 + $0x660] sm:$0xff] }
  0x45   : > { %425 = vst [vmem:[%s1422_s30 + $0x198] sm:$0xff] %v424_v51 }
  0x46 PF: > { %p1114_p6 = scmp.ge.s32.totalorder %s1344_s19, 1  ;;  %p451_p7 = scmp.lt.s32.totalorder %s1344_s19, 5 }
  0x48   : > { %p452_p8 = pnand %p1114_p6, %p451_p7 }
  0x49   : > { %s458_s5 = sand.u32 (!%p452_p8), 1, %s1328_s15   ;;  %v1528_v52 = vld [vmem:[%s1622_s0 + $0x8] sm:$0xff] (!%p452_p8)  ;;  %vm876_vm0 = vcmask (!%p452_p8), 261120   ;;  %v1533_v53 = vld [vmem:[%s1622_s0] sm:$0xff] (!%p452_p8)  ;;  %s1115_s12 = sshll.u32 (!%p452_p8), %s1336_s17, 1  ;;  %v593_v47 = vlaneseq (!%p452_p8) }
  0x4a   : > { %455 = sbr.rel (%p452_p8) target bundleno = 367 (0x16f), region = 70  ;;  %v1123_v54 = vcombine.high (!%p452_p8), %v1528_v52, %v1528_v52  ;;  %v1121_v55 = vcombine.high (!%p452_p8), %v1533_v53, %v1533_v53  ;;  %v1122_v38 = vcombine.low (!%p452_p8), %v1528_v52, %v1528_v52  ;;  %v1120_v45 = vcombine.low (!%p452_p8), %v1533_v53, %v1533_v53  ;;  %p512_p9 = scmp.lt.s32.totalorder (!%p452_p8), %s1115_s12, 7 }
  0x4b   : > { %s1183_s10 = smul.u32 (!%p452_p8), 416, %s458_s5  ;;  %v594_v51 = vshrl.u32 (!%p452_p8), %v593_v47, 7 }
  0x4c   : > { %1176 = vmatprep.mubr.msk.bf16.mxu1 (!%p452_p8), %vm876_vm0, %v1123_v54  ;;  %912 = vmatprep.mubr.bf16.mxu0 (!%p452_p8), %v1121_v55 }
  0x4d   : > { %s1539_s11 = scalar_lea.vmem (!%p452_p8), [#allocation2], %s1183_s10  ;;  %v595_v52 = vsub.s32 (!%p452_p8), 0, %v594_v51  ;;  %v599_v55 = vsub.s32 (!%p452_p8), 1, %v594_v51 }
  0x4e   : > { %v1224_v56 = vld [vmem:[%s1539_s11 + $0x4] ss:$8 sps:$4 sm:$0xff] (!%p452_p8)   ;;  %v1226_v57 = vld [vmem:[%s1539_s11] ss:$8 sps:$4 sm:$0xff] (!%p452_p8)   ;;  %v1227_v58 = vld [vmem:[%s1539_s11 + $0x14] ss:$8 sps:$4 sm:$0xff] (!%p452_p8)  }
  0x4f   : > { %880 = vmatprep.subr.bf16.mxu0 (!%p452_p8), %v1224_v56  ;;  %v1229_v59 = vld [vmem:[%s1539_s11 + $0x10] ss:$8 sps:$4 sm:$0xff] (!%p452_p8)   ;;  %v1230_v60 = vld [vmem:[%s1539_s11 + $0x24] ss:$8 sps:$4 sm:$0xff] (!%p452_p8)   ;;  %v1232_v61 = vld [vmem:[%s1539_s11 + $0x20] ss:$8 sps:$4 sm:$0xff] (!%p452_p8)  }
  0x50   : > { %881 = vmatpush1.bf16.msra.mxu0 (!%p452_p8), %v1226_v57  ;;  %v1233_v62 = vld [vmem:[%s1539_s11 + $0x34] ss:$8 sps:$4 sm:$0xff] (!%p452_p8)   ;;  %v1242_v63 = vld [vmem:[%s1539_s11 + $0x104] ss:$8 sps:$4 sm:$0xff] (!%p452_p8)   ;;  %v1235_v0 = vld [vmem:[%s1539_s11 + $0x30] ss:$8 sps:$4 sm:$0xff] (!%p452_p8)  }
  0x51   : > { %882 = vmatprep.subr.bf16.mxu0 %v1227_v58  ;;  %921 = vmatprep.subr.bf16.mxu1 %v1242_v63  ;;  %v1246_v1 = vld [vmem:[%s1539_s11 + $0x100] ss:$8 sps:$4 sm:$0xff]   ;;  %v1248_v2 = vld [vmem:[%s1539_s11 + $0x114] ss:$8 sps:$4 sm:$0xff]   ;;  %v1236_v3 = vld [vmem:[%s1539_s11 + $0x44] ss:$8 sps:$4 sm:$0xff]  }
  0x52   : > { %922 = vmatpush1.bf16.msra.mxu1 %v1246_v1  ;;  %v1252_v4 = vld [vmem:[%s1539_s11 + $0x110] ss:$8 sps:$4 sm:$0xff]   ;;  %v1254_v5 = vld [vmem:[%s1539_s11 + $0x124] ss:$8 sps:$4 sm:$0xff]   ;;  %v1238_v6 = vld [vmem:[%s1539_s11 + $0x40] ss:$8 sps:$4 sm:$0xff]  }
  0x53   : > { %923 = vmatprep.subr.bf16.mxu1 %v1248_v2  ;;  %v1239_v7 = vld [vmem:[%s1539_s11 + $0x54] ss:$8 sps:$4 sm:$0xff]   ;;  %v1258_v8 = vld [vmem:[%s1539_s11 + $0x120] ss:$8 sps:$4 sm:$0xff]   ;;  %v1241_v10 = vld [vmem:[%s1539_s11 + $0x50] ss:$8 sps:$4 sm:$0xff]  }
  0x54   : > { %883 = vmatpush1.bf16.msra.mxu0 %v1229_v59  ;;  %v1260_v9 = vld [vmem:[%s1539_s11 + $0x134] ss:$8 sps:$4 sm:$0xff]   ;;  %v1244_v11 = vld [vmem:[%s1539_s11 + $0x64] ss:$8 sps:$4 sm:$0xff]   ;;  %v1264_v12 = vld [vmem:[%s1539_s11 + $0x130] ss:$8 sps:$4 sm:$0xff]  }
  0x55   : > { %884 = vmatprep.subr.bf16.mxu0 %v1230_v60  ;;  %v1266_v13 = vld [vmem:[%s1539_s11 + $0x144] ss:$8 sps:$4 sm:$0xff]   ;;  %v1247_v14 = vld [vmem:[%s1539_s11 + $0x60] ss:$8 sps:$4 sm:$0xff]   ;;  %v1250_v15 = vld [vmem:[%s1539_s11 + $0x74] ss:$8 sps:$4 sm:$0xff]  }
  0x56   : > { %924 = vmatpush1.bf16.msra.mxu1 %v1252_v4  ;;  %v1270_v16 = vld [vmem:[%s1539_s11 + $0x140] ss:$8 sps:$4 sm:$0xff]   ;;  %v1272_v17 = vld [vmem:[%s1539_s11 + $0x154] ss:$8 sps:$4 sm:$0xff]   ;;  %v1253_v18 = vld [vmem:[%s1539_s11 + $0x70] ss:$8 sps:$4 sm:$0xff]  }
  0x57   : > { %925 = vmatprep.subr.bf16.mxu1 %v1254_v5  ;;  %v1256_v19 = vld [vmem:[%s1539_s11 + $0x84] ss:$8 sps:$4 sm:$0xff]   ;;  %v1276_v20 = vld [vmem:[%s1539_s11 + $0x150] ss:$8 sps:$4 sm:$0xff]   ;;  %v1259_v22 = vld [vmem:[%s1539_s11 + $0x80] ss:$8 sps:$4 sm:$0xff]  }
  0x58   : > { %885 = vmatpush1.bf16.msra.mxu0 %v1232_v61  ;;  %v1278_v21 = vld [vmem:[%s1539_s11 + $0x164] ss:$8 sps:$4 sm:$0xff]   ;;  %v1262_v23 = vld [vmem:[%s1539_s11 + $0x94] ss:$8 sps:$4 sm:$0xff]   ;;  %v1282_v24 = vld [vmem:[%s1539_s11 + $0x160] ss:$8 sps:$4 sm:$0xff]  }
  0x59   : > { %886 = vmatprep.subr.bf16.mxu0 %v1233_v62  ;;  %v1284_v25 = vld [vmem:[%s1539_s11 + $0x174] ss:$8 sps:$4 sm:$0xff]   ;;  %v1265_v26 = vld [vmem:[%s1539_s11 + $0x90] ss:$8 sps:$4 sm:$0xff]   ;;  %v1268_v27 = vld [vmem:[%s1539_s11 + $0xa4] ss:$8 sps:$4 sm:$0xff]  }
  0x5a   : > { %926 = vmatpush1.bf16.msra.mxu1 %v1258_v8  ;;  %v1288_v28 = vld [vmem:[%s1539_s11 + $0x170] ss:$8 sps:$4 sm:$0xff]   ;;  %v1290_v29 = vld [vmem:[%s1539_s11 + $0x184] ss:$8 sps:$4 sm:$0xff]   ;;  %v1271_v30 = vld [vmem:[%s1539_s11 + $0xa0] ss:$8 sps:$4 sm:$0xff]  }
  0x5b   : > { %927 = vmatprep.subr.bf16.mxu1 %v1260_v9  ;;  %v1274_v31 = vld [vmem:[%s1539_s11 + $0xb4] ss:$8 sps:$4 sm:$0xff]   ;;  %v1294_v32 = vld [vmem:[%s1539_s11 + $0x180] ss:$8 sps:$4 sm:$0xff]   ;;  %v1277_v34 = vld [vmem:[%s1539_s11 + $0xb0] ss:$8 sps:$4 sm:$0xff]  }
  0x5c   : > { %887 = vmatpush1.bf16.msra.mxu0 %v1235_v0  ;;  %v1296_v33 = vld [vmem:[%s1539_s11 + $0x194] ss:$8 sps:$4 sm:$0xff]   ;;  %v1280_v35 = vld [vmem:[%s1539_s11 + $0xc4] ss:$8 sps:$4 sm:$0xff]   ;;  %v1300_v36 = vld [vmem:[%s1539_s11 + $0x190] ss:$8 sps:$4 sm:$0xff]  }
  0x5d   : > { %888 = vmatprep.subr.bf16.mxu0 %v1236_v3  ;;  %v1283_v37 = vld [vmem:[%s1539_s11 + $0xc0] ss:$8 sps:$4 sm:$0xff]   ;;  %v1286_v39 = vld [vmem:[%s1539_s11 + $0xd4] ss:$8 sps:$4 sm:$0xff]   ;;  %v1289_v40 = vld [vmem:[%s1539_s11 + $0xd0] ss:$8 sps:$4 sm:$0xff]  }
  0x5e   : > { %928 = vmatpush1.bf16.msra.mxu1 %v1264_v12  ;;  %v1292_v41 = vld [vmem:[%s1539_s11 + $0xe4] ss:$8 sps:$4 sm:$0xff]   ;;  %v1295_v42 = vld [vmem:[%s1539_s11 + $0xe0] ss:$8 sps:$4 sm:$0xff]   ;;  %v1298_v43 = vld [vmem:[%s1539_s11 + $0xf4] ss:$8 sps:$4 sm:$0xff]  }
  0x5f   : > { %929 = vmatprep.subr.bf16.mxu1 %v1266_v13  ;;  %v1301_v44 = vld [vmem:[%s1539_s11 + $0xf0] ss:$8 sps:$4 sm:$0xff]   ;;  %s1634_s12 = smov (!%p512_p9, %s1115_s12), 7 }
  0x60   : > { %889 = vmatpush1.bf16.msra.mxu0 %v1238_v6  ;;  %s514_s15 = scalar_lea.vmem %s1624_s2, %s1634_s12  ;;  %s1117_s21 = sshll.u32 %s1634_s12, 2 }
  0x61   : > { %890 = vmatprep.subr.bf16.mxu0 %v1239_v7  ;;  %v591_v54 = vld [vmem:[%s514_s15] sm:$0x3]  ;;  %s524_s17 = scalar_lea.vmem %s1625_s3, %s1117_s21  ;;  %s534_s27 = scalar_lea.vmem %s1626_s4, %s1117_s21 }
  0x62   : > { %930 = vmatpush1.bf16.msra.mxu1 %v1270_v16  ;;  %v596_v53 = vrot.slane %v591_v54, %v595_v52  ;;  %v962_v56 = vld [vmem:[%s524_s17] sm:$0xff]  ;;  %v600_v57 = vrot.slane %v591_v54, %v599_v55 }
  0x63   : > { %931 = vmatprep.subr.bf16.mxu1 %v1272_v17  ;;  %v963_v60 = vunpack.c.l.bf16 %v962_v56  ;;  %v964_v63 = vunpack.c.h.bf16 %v962_v56 }
  0x64   : > { %891 = vmatpush1.bf16.msra.mxu0 %v1241_v10 }
  0x65   : > { %892 = vmatprep.subr.bf16.mxu0 %v1244_v11 }
  0x66   : > { %932 = vmatpush1.bf16.msra.mxu1 %v1276_v20 }
  0x67   : > { %933 = vmatprep.subr.bf16.mxu1 %v1278_v21 }
  0x68   : > { %893 = vmatpush1.bf16.msra.mxu0 %v1247_v14 }
  0x69   : > { %894 = vmatprep.subr.bf16.mxu0 %v1250_v15 }
  0x6a   : > { %934 = vmatpush1.bf16.msra.mxu1 %v1282_v24 }
  0x6b   : > { %935 = vmatprep.subr.bf16.mxu1 %v1284_v25 }
  0x6c   : > { %895 = vmatpush1.bf16.msra.mxu0 %v1253_v18 }
  0x6d   : > { %896 = vmatprep.subr.bf16.mxu0 %v1256_v19 }
  0x6e   : > { %936 = vmatpush1.bf16.msra.mxu1 %v1288_v28 }
  0x6f   : > { %937 = vmatprep.subr.bf16.mxu1 %v1290_v29 }
  0x70   : > { %897 = vmatpush1.bf16.msra.mxu0 %v1259_v22 }
  0x71   : > { %898 = vmatprep.subr.bf16.mxu0 %v1262_v23 }
  0x72   : > { %938 = vmatpush1.bf16.msra.mxu1 %v1294_v32 }
  0x73   : > { %939 = vmatprep.subr.bf16.mxu1 %v1296_v33 }
  0x74   : > { %899 = vmatpush1.bf16.msra.mxu0 %v1265_v26 }
  0x75   : > { %900 = vmatprep.subr.bf16.mxu0 %v1268_v27 }
  0x76   : > { %940 = vmatpush1.bf16.msra.mxu1 %v1300_v36 }
  0x78   : > { %901 = vmatpush1.bf16.msra.mxu0 %v1271_v30 }
  0x79   : > { %902 = vmatprep.subr.bf16.mxu0 %v1274_v31  ;;  %954 = vmatmul.mubr.bf16.vlgmr.msra.gmra.mrb[0].mxu1 %v1122_v38 }
  0x7c   : > { %903 = vmatpush1.bf16.msra.mxu0 %v1277_v34 }
  0x7d   : > { %904 = vmatprep.subr.bf16.mxu0 %v1280_v35 }
  0x80   : > { %905 = vmatpush1.bf16.msra.mxu0 %v1283_v37 }
  0x81   : > { %906 = vmatprep.subr.bf16.mxu0 %v1286_v39 }
  0x84   : > { %907 = vmatpush1.bf16.msra.mxu0 %v1289_v40 }
  0x85   : > { %908 = vmatprep.subr.bf16.mxu0 %v1292_v41 }
  0x88   : > { %909 = vmatpush1.bf16.msra.mxu0 %v1295_v42 }
  0x89   : > { %910 = vmatprep.subr.bf16.mxu0 %v1298_v43 }
  0x8c   : > { %911 = vmatpush1.bf16.msra.mxu0 %v1301_v44 }
  0x8f   : > { %913 = vmatmul.mubr.bf16.vlgmr.msra.gmra.mrb[0].mxu0 %v1120_v45 }
 0x14c   : > { %v955_v46 = vpop.f32.mrb[0].mxu1 }
 0x14d   : > { %v957_v48 = vpop.f32.mrb[1].mxu1 }
 0x14e   : > { %v959_v49 = vpop.f32.mrb[2].mxu1 }
 0x14f   : > { %v960_v50 = vpop.f32.mrb[3].mxu1 }
 0x162   : > { %v914_v58 = vpop.f32.mrb[0].mxu0 }
 0x163   : > { %v915_v59 = vadd.f32 %v914_v58, %v596_v53  ;;  %v916_v61 = vpop.f32.mrb[1].mxu0 }
 0x164   : > { %v917_v62 = vadd.f32 %v916_v61, %v600_v57  ;;  %v918_v0 = vpop.f32.mrb[2].mxu0 }
 0x165   : > { %v956_v1 = vadd.f32 %v955_v46, %v915_v59  ;;  %v919_v2 = vpop.f32.mrb[3].mxu0 }
 0x166   : > { %v958_v3 = vadd.f32 %v957_v48, %v917_v62 }
 0x167   : > { %v965_v4 = vadd.f32 %v963_v60, %v956_v1 }
 0x168   : > { %v966_v5 = vadd.f32 %v964_v63, %v958_v3 }
 0x169   : > { %v967_v6 = vmax.f32 %v965_v4, 0.0 }
 0x16a   : > { %v968_v7 = vmax.f32 %v966_v5, 0.0 }
 0x16c   : > { %v1181_v8 = vpack.c.bf16 %v968_v7, %v967_v6 }
 0x16e   : > { %977 = vst [vmem:[%s534_s27] sm:$0xff] %v1181_v8 }
 0x16f PF: > { %s14_s19 = sadd.s32 1, %s1344_s19   ;;  %s1627_s15 = smov %s1332_s16 }
 0x170   : > { %p11_p10 = scmp.ge.s32.totalorder %s14_s19, 6   ;;  %s1628_s16 = smov %s1406_s23 }
 0x171   : > { %s1629_s17 = smov %s1340_s18  ;;  %s1630_s18 = smov %s1632_s20 }
 0x172   :  { %13 = sbr.rel (!%p11_p10) target bundleno = 3 (0x3), region = 118 }

</bundles_post_ra>
